<compile_context>
chip_gen: v7x
topology: tpu7x:2x2x1
jax: 0.10.0
libtpu: 0.0.40
codegen_flags: <defaults>
</compile_context>

<pallas_src>
import math

import jax
import jax.numpy as jnp
from jax import lax
from jax.experimental import pallas as pl
from jax.experimental.pallas import tpu as pltpu

# ---------------- model hyper-parameters (small, consistent with the module) ---
INPUT_DIM = 16
HIDDEN_DIM = 32
NHEAD = 4
NUM_LAYERS = 2
NUM_CLASSES = 4
DIM_FEEDFORWARD = 2048       # PyTorch TransformerEncoderLayer default
LN_EPS = 1e-5                # PyTorch LayerNorm default eps
OUT_PAD = 128                # lane-dense padded class dimension

N_LSTM_P = 3                 # params per LSTM layer
N_TR_P = 12                  # params per transformer encoder layer

VMEM = pltpu.MemorySpace.VMEM


# ------------------------------ small helpers ---------------------------------
def _mm(a, b):
    """MXU matmul: bf16 operands, f32 accumulation."""
    return jnp.dot(a.astype(jnp.bfloat16), b.astype(jnp.bfloat16),
                   preferred_element_type=jnp.float32)


def _softmax_lastdim(x):
    """Numerically-stable softmax; reciprocal goes to the EUP slot."""
    m = jnp.max(x, axis=-1, keepdims=True)
    e = jnp.exp(x - m)
    return e * pl.reciprocal(jnp.sum(e, axis=-1, keepdims=True), approx=True)


def _layer_norm(x, w, b):
    mean = jnp.mean(x, axis=-1, keepdims=True)
    var = jnp.mean((x - mean) ** 2, axis=-1, keepdims=True)
    return (x - mean) * lax.rsqrt(var + LN_EPS) * w + b


# ------------------------------ LSTM layer ------------------------------------
def _lstm_layer(x_bsd, wih_ref, whh_ref, b_ref):
    """x_bsd: (B, S, Din) f32 value.  wih_ref: (Din, 4H) bf16, whh_ref: (H, 4H)
       bf16, b_ref: (1, 4H) f32 (= b_ih + b_hh).  PyTorch gate order: i, f, g, o."""
    B, S, Din = x_bsd.shape
    H = HIDDEN_DIM

    # Hoisted input projection: one (B*S, Din) x (Din, 4H) matmul + bias.
    gx = _mm(x_bsd.reshape(B * S, Din), wih_ref[...]) + b_ref[...]   # (B*S, 4H)
    gx = gx.reshape(B, S, 4 * H)

    whh = whh_ref[...]                       # hoisted out of the recurrence
    h = jnp.zeros((B, H), jnp.float32)
    c = jnp.zeros((B, H), jnp.float32)
    outs = []
    for t in range(S):                       # static unroll, S = 8
        gates = gx[:, t, :] + jnp.dot(h.astype(jnp.bfloat16), whh,
                                      preferred_element_type=jnp.float32)
        i = jax.nn.sigmoid(gates[:, 0:H])
        f = jax.nn.sigmoid(gates[:, H:2 * H])
        g = jnp.tanh(gates[:, 2 * H:3 * H])
        o = jax.nn.sigmoid(gates[:, 3 * H:4 * H])
        c = f * c + i * g
        h = o * jnp.tanh(c)
        outs.append(h)
    return jnp.stack(outs, axis=1)           # (B, S, H)


# ----------------------- Transformer encoder layer ----------------------------
def _encoder_layer(x_bsh, win_ref, bqkv_ref, wo_ref, bo_ref, n1w_ref, n1b_ref,
                   w1_ref, b1_ref, w2_ref, b2_ref, n2w_ref, n2b_ref):
    """Post-norm (norm_first=False) TransformerEncoderLayer, ReLU activation,
       dropout = identity.  x_bsh: (B, S, H) f32 value."""
    B, S, H = x_bsh.shape
    hd = H // NHEAD
    scale = 1.0 / math.sqrt(hd)

    x2 = x_bsh.reshape(B * S, H)                               # 2-D slab (B*S, H)

    # fused QKV projection: one (B*S, H) x (H, 3H) matmul
    qkv = _mm(x2, win_ref[...]) + bqkv_ref[...]                # (B*S, 3H)
    qkv3 = qkv.reshape(B, S, 3 * H)
    q = qkv3[:, :, 0:H]
    k = qkv3[:, :, H:2 * H]
    v = qkv3[:, :, 2 * H:3 * H]

    # per-head attention; out-projection accumulated per head (no concatenate)
    wo = wo_ref[...]                                           # (H, H) f32
    attn = jnp.zeros((B * S, H), jnp.float32)
    for hix in range(NHEAD):                                   # static unroll
        sl = slice(hix * hd, (hix + 1) * hd)
        qh = q[:, :, sl].astype(jnp.bfloat16)
        kh = k[:, :, sl].astype(jnp.bfloat16)
        vh = v[:, :, sl].astype(jnp.bfloat16)
        scores = jnp.einsum('bqd,bkd->bqk', qh, kh,
                            preferred_element_type=jnp.float32) * scale
        probs = _softmax_lastdim(scores)                       # f32
        ctx = jnp.einsum('bqk,bkd->bqd', probs.astype(jnp.bfloat16), vh,
                         preferred_element_type=jnp.float32)   # (B, S, hd)
        attn = attn + _mm(ctx.reshape(B * S, hd), wo[sl, :])
    attn = attn + bo_ref[...]

    # residual + LayerNorm1 (self-attention block)
    y = _layer_norm(x2 + attn, n1w_ref[...], n1b_ref[...])

    # feed-forward: linear1 -> ReLU -> linear2
    h1 = jnp.maximum(_mm(y, w1_ref[...]) + b1_ref[...], 0.0)   # (B*S, F)
    h2 = _mm(h1, w2_ref[...]) + b2_ref[...]                    # (B*S, H)

    # residual + LayerNorm2
    out = _layer_norm(y + h2, n2w_ref[...], n2b_ref[...])
    return out.reshape(B, S, H)


# ----------------------------- fused kernel -----------------------------------
def fused_forward_kernel(*refs):
    """refs = [x, 2x(LSTM params), 2x(encoder params), fc_w_pad, fc_b_pad, out]."""
    x_ref = refs[0]
    out_ref = refs[-1]
    idx = 1

    h = x_ref[...]                                             # (B, S, INPUT_DIM)
    for _ in range(NUM_LAYERS):
        h = _lstm_layer(h, *refs[idx:idx + N_LSTM_P])          # (B, S, H)
        idx += N_LSTM_P
    for _ in range(NUM_LAYERS):
        h = _encoder_layer(h, *refs[idx:idx + N_TR_P])         # (B, S, H)
        idx += N_TR_P

    fc_w_ref, fc_b_ref = refs[idx], refs[idx + 1]
    last = h[:, h.shape[1] - 1, :]                             # (B, H) last step
    z = _mm(last, fc_w_ref[...]) + fc_b_ref[...]               # (B, OUT_PAD)
    out_ref[...] = jax.nn.sigmoid(z)


def lstm_transformer_forward(x, flat_params):
    """x: (B, S, INPUT_DIM) -> (B, NUM_CLASSES), sigmoid activations."""
    B = x.shape[0]
    n_in = 1 + len(flat_params)
    out_pad = pl.pallas_call(
        fused_forward_kernel,
        out_shape=jax.ShapeDtypeStruct((B, OUT_PAD), jnp.float32),
        in_specs=[pl.BlockSpec(memory_space=VMEM)] * n_in,
        out_specs=pl.BlockSpec(memory_space=VMEM),
    )(x.astype(jnp.float32), *flat_params)
    return out_pad[:, :NUM_CLASSES]


# ----------------------------- parameter init ---------------------------------
def init_params(key):
    keys = iter(jax.random.split(key, 64))
    BF = jnp.bfloat16

    def rnd(shape, dtype=jnp.float32, scale=0.08):
        return (jax.random.normal(next(keys), shape, jnp.float32) * scale).astype(dtype)

    flat = []

    # LSTM: per layer pre-transposed W_ih^T (Din, 4H) bf16, W_hh^T (H, 4H) bf16,
    # combined bias b_ih + b_hh (1, 4H) f32.
    for l in range(NUM_LAYERS):
        din = INPUT_DIM if l == 0 else HIDDEN_DIM
        flat += [rnd((din, 4 * HIDDEN_DIM), BF),
                 rnd((HIDDEN_DIM, 4 * HIDDEN_DIM), BF),
                 rnd((1, 4 * HIDDEN_DIM))]

    # Transformer encoder layers (fused in_proj W^T (H, 3H); weights pre-transposed)
    for l in range(NUM_LAYERS):
        flat += [
            rnd((HIDDEN_DIM, 3 * HIDDEN_DIM), BF),        # in_proj W^T (q|k|v)
            rnd((1, 3 * HIDDEN_DIM)),                     # in_proj bias
            rnd((HIDDEN_DIM, HIDDEN_DIM)),                # out_proj W^T (f32; sliced per head)
            rnd((1, HIDDEN_DIM)),                         # out_proj bias
            jnp.ones((1, HIDDEN_DIM), jnp.float32),       # norm1 weight
            jnp.zeros((1, HIDDEN_DIM), jnp.float32),      # norm1 bias
            rnd((HIDDEN_DIM, DIM_FEEDFORWARD), BF),       # linear1 W^T
            rnd((1, DIM_FEEDFORWARD)),                    # linear1 bias
            rnd((DIM_FEEDFORWARD, HIDDEN_DIM), BF),       # linear2 W^T
            rnd((1, HIDDEN_DIM)),                         # linear2 bias
            jnp.ones((1, HIDDEN_DIM), jnp.float32),       # norm2 weight
            jnp.zeros((1, HIDDEN_DIM), jnp.float32),      # norm2 bias
        ]

    # final fc, class dim zero-padded to OUT_PAD lanes (lane-dense unmasked store)
    fc_w = rnd((HIDDEN_DIM, NUM_CLASSES))
    fc_b = rnd((1, NUM_CLASSES))
    fc_w_pad = jnp.zeros((HIDDEN_DIM, OUT_PAD), jnp.float32)
    fc_w_pad = fc_w_pad.at[:, :NUM_CLASSES].set(fc_w).astype(BF)
    fc_b_pad = jnp.zeros((1, OUT_PAD), jnp.float32).at[:, :NUM_CLASSES].set(fc_b)
    flat += [fc_w_pad, fc_b_pad]
    return tuple(flat)


# --------------------------------- main ----------------------------------------
if __name__ == "__main__":
    key = jax.random.PRNGKey(0)
    pkey, xkey = jax.random.split(key)
    params = init_params(pkey)

    B, S = 2, 8
    x = jax.random.normal(xkey, (B, S, INPUT_DIM), jnp.float32)

    fwd = jax.jit(lstm_transformer_forward)
    out = fwd(x, params)
    jax.block_until_ready(out)

    assert out.shape == (B, NUM_CLASSES), out.shape
    assert bool(jnp.all((out >= 0.0) & (out <= 1.0)))
    assert bool(jnp.all(jnp.isfinite(out)))
    print("KERNEL_OK")
</pallas_src>

<mosaic_0001>
module attributes {stable_mosaic.version = 11 : i64} {
  func.func @fused_forward_kernel(%arg0: memref<2x8x16xf32, #tpu.memory_space<vmem>>, %arg1: memref<16x128xbf16, #tpu.memory_space<vmem>>, %arg2: memref<32x128xbf16, #tpu.memory_space<vmem>>, %arg3: memref<1x128xf32, #tpu.memory_space<vmem>>, %arg4: memref<32x128xbf16, #tpu.memory_space<vmem>>, %arg5: memref<32x128xbf16, #tpu.memory_space<vmem>>, %arg6: memref<1x128xf32, #tpu.memory_space<vmem>>, %arg7: memref<32x96xbf16, #tpu.memory_space<vmem>>, %arg8: memref<1x96xf32, #tpu.memory_space<vmem>>, %arg9: memref<32x32xf32, #tpu.memory_space<vmem>>, %arg10: memref<1x32xf32, #tpu.memory_space<vmem>>, %arg11: memref<1x32xf32, #tpu.memory_space<vmem>>, %arg12: memref<1x32xf32, #tpu.memory_space<vmem>>, %arg13: memref<32x2048xbf16, #tpu.memory_space<vmem>>, %arg14: memref<1x2048xf32, #tpu.memory_space<vmem>>, %arg15: memref<2048x32xbf16, #tpu.memory_space<vmem>>, %arg16: memref<1x32xf32, #tpu.memory_space<vmem>>, %arg17: memref<1x32xf32, #tpu.memory_space<vmem>>, %arg18: memref<1x32xf32, #tpu.memory_space<vmem>>, %arg19: memref<32x96xbf16, #tpu.memory_space<vmem>>, %arg20: memref<1x96xf32, #tpu.memory_space<vmem>>, %arg21: memref<32x32xf32, #tpu.memory_space<vmem>>, %arg22: memref<1x32xf32, #tpu.memory_space<vmem>>, %arg23: memref<1x32xf32, #tpu.memory_space<vmem>>, %arg24: memref<1x32xf32, #tpu.memory_space<vmem>>, %arg25: memref<32x2048xbf16, #tpu.memory_space<vmem>>, %arg26: memref<1x2048xf32, #tpu.memory_space<vmem>>, %arg27: memref<2048x32xbf16, #tpu.memory_space<vmem>>, %arg28: memref<1x32xf32, #tpu.memory_space<vmem>>, %arg29: memref<1x32xf32, #tpu.memory_space<vmem>>, %arg30: memref<1x32xf32, #tpu.memory_space<vmem>>, %arg31: memref<32x128xbf16, #tpu.memory_space<vmem>>, %arg32: memref<1x128xf32, #tpu.memory_space<vmem>>, %arg33: memref<2x128xf32, #tpu.memory_space<vmem>>) attributes {dimension_semantics = [], scalar_prefetch = 0 : i64, scratch_operands = 0 : i64, tpu.core_type = #tpu.core_type<tc>} {
    %c0 = arith.constant 0 : index
    %c0_0 = arith.constant 0 : index
    %c0_1 = arith.constant 0 : index
    %0 = vector.load %arg0[%c0, %c0_0, %c0_1] : memref<2x8x16xf32, #tpu.memory_space<vmem>>, vector<2x8x16xf32>
    %1 = vector.shape_cast %0 : vector<2x8x16xf32> to vector<16x16xf32>
    %c0_2 = arith.constant 0 : index
    %c0_3 = arith.constant 0 : index
    %2 = vector.load %arg1[%c0_2, %c0_3] : memref<16x128xbf16, #tpu.memory_space<vmem>>, vector<16x128xbf16>
    %3 = arith.truncf %1 : vector<16x16xf32> to vector<16x16xbf16>
    %cst = arith.constant dense<0.000000e+00> : vector<16x128xf32>
    %4 = tpu.matmul %3, %2, %cst {dimension_numbers = #tpu.dot_dimension_numbers<[1], [0], [0], [1], [0, 0, 1, 1], [], []>} : vector<16x16xbf16>, vector<16x128xbf16>, vector<16x128xf32> -> vector<16x128xf32>
    %c0_4 = arith.constant 0 : index
    %c0_5 = arith.constant 0 : index
    %5 = vector.load %arg3[%c0_4, %c0_5] : memref<1x128xf32, #tpu.memory_space<vmem>>, vector<1x128xf32>
    %6 = vector.broadcast %5 : vector<1x128xf32> to vector<16x128xf32>
    %7 = arith.addf %4, %6 : vector<16x128xf32>
    %8 = vector.shape_cast %7 : vector<16x128xf32> to vector<2x8x128xf32>
    %c0_6 = arith.constant 0 : index
    %c0_7 = arith.constant 0 : index
    %9 = vector.load %arg2[%c0_6, %c0_7] : memref<32x128xbf16, #tpu.memory_space<vmem>>, vector<32x128xbf16>
    %cst_8 = arith.constant 0.000000e+00 : f32
    %10 = vector.broadcast %cst_8 : f32 to vector<2x32xf32>
    %cst_9 = arith.constant 0.000000e+00 : f32
    %11 = vector.broadcast %cst_9 : f32 to vector<2x32xf32>
    %12 = vector.extract_strided_slice %8 {offsets = [0, 0, 0], sizes = [2, 1, 128], strides = [1, 1, 1]} : vector<2x8x128xf32> to vector<2x1x128xf32>
    %13 = vector.shape_cast %12 : vector<2x1x128xf32> to vector<2x128xf32>
    %14 = arith.truncf %10 : vector<2x32xf32> to vector<2x32xbf16>
    %cst_10 = arith.constant dense<0.000000e+00> : vector<2x128xf32>
    %15 = tpu.matmul %14, %9, %cst_10 {dimension_numbers = #tpu.dot_dimension_numbers<[1], [0], [0], [1], [0, 0, 1, 1], [], []>} : vector<2x32xbf16>, vector<32x128xbf16>, vector<2x128xf32> -> vector<2x128xf32>
    %16 = arith.addf %13, %15 : vector<2x128xf32>
    %17 = vector.extract_strided_slice %16 {offsets = [0, 0], sizes = [2, 32], strides = [1, 1]} : vector<2x128xf32> to vector<2x32xf32>
    %18 = arith.negf %17 : vector<2x32xf32>
    %19 = math.exp %18 : vector<2x32xf32>
    %cst_11 = arith.constant 1.000000e+00 : f32
    %20 = vector.broadcast %cst_11 : f32 to vector<2x32xf32>
    %21 = arith.addf %20, %19 : vector<2x32xf32>
    %22 = arith.divf %20, %21 : vector<2x32xf32>
    %23 = vector.extract_strided_slice %16 {offsets = [0, 32], sizes = [2, 32], strides = [1, 1]} : vector<2x128xf32> to vector<2x32xf32>
    %24 = arith.negf %23 : vector<2x32xf32>
    %25 = math.exp %24 : vector<2x32xf32>
    %cst_12 = arith.constant 1.000000e+00 : f32
    %26 = vector.broadcast %cst_12 : f32 to vector<2x32xf32>
    %27 = arith.addf %26, %25 : vector<2x32xf32>
    %28 = arith.divf %26, %27 : vector<2x32xf32>
    %29 = vector.extract_strided_slice %16 {offsets = [0, 64], sizes = [2, 32], strides = [1, 1]} : vector<2x128xf32> to vector<2x32xf32>
    %30 = math.tanh %29 : vector<2x32xf32>
    %31 = vector.extract_strided_slice %16 {offsets = [0, 96], sizes = [2, 32], strides = [1, 1]} : vector<2x128xf32> to vector<2x32xf32>
    %32 = arith.negf %31 : vector<2x32xf32>
    %33 = math.exp %32 : vector<2x32xf32>
    %cst_13 = arith.constant 1.000000e+00 : f32
    %34 = vector.broadcast %cst_13 : f32 to vector<2x32xf32>
    %35 = arith.addf %34, %33 : vector<2x32xf32>
    %36 = arith.divf %34, %35 : vector<2x32xf32>
    %37 = arith.mulf %28, %11 : vector<2x32xf32>
    %38 = arith.mulf %22, %30 : vector<2x32xf32>
    %39 = arith.addf %37, %38 : vector<2x32xf32>
    %40 = math.tanh %39 : vector<2x32xf32>
    %41 = arith.mulf %36, %40 : vector<2x32xf32>
    %42 = vector.extract_strided_slice %8 {offsets = [0, 1, 0], sizes = [2, 1, 128], strides = [1, 1, 1]} : vector<2x8x128xf32> to vector<2x1x128xf32>
    %43 = vector.shape_cast %42 : vector<2x1x128xf32> to vector<2x128xf32>
    %44 = arith.truncf %41 : vector<2x32xf32> to vector<2x32xbf16>
    %cst_14 = arith.constant dense<0.000000e+00> : vector<2x128xf32>
    %45 = tpu.matmul %44, %9, %cst_14 {dimension_numbers = #tpu.dot_dimension_numbers<[1], [0], [0], [1], [0, 0, 1, 1], [], []>} : vector<2x32xbf16>, vector<32x128xbf16>, vector<2x128xf32> -> vector<2x128xf32>
    %46 = arith.addf %43, %45 : vector<2x128xf32>
    %47 = vector.extract_strided_slice %46 {offsets = [0, 0], sizes = [2, 32], strides = [1, 1]} : vector<2x128xf32> to vector<2x32xf32>
    %48 = arith.negf %47 : vector<2x32xf32>
    %49 = math.exp %48 : vector<2x32xf32>
    %cst_15 = arith.constant 1.000000e+00 : f32
    %50 = vector.broadcast %cst_15 : f32 to vector<2x32xf32>
    %51 = arith.addf %50, %49 : vector<2x32xf32>
    %52 = arith.divf %50, %51 : vector<2x32xf32>
    %53 = vector.extract_strided_slice %46 {offsets = [0, 32], sizes = [2, 32], strides = [1, 1]} : vector<2x128xf32> to vector<2x32xf32>
    %54 = arith.negf %53 : vector<2x32xf32>
    %55 = math.exp %54 : vector<2x32xf32>
    %cst_16 = arith.constant 1.000000e+00 : f32
    %56 = vector.broadcast %cst_16 : f32 to vector<2x32xf32>
    %57 = arith.addf %56, %55 : vector<2x32xf32>
    %58 = arith.divf %56, %57 : vector<2x32xf32>
    %59 = vector.extract_strided_slice %46 {offsets = [0, 64], sizes = [2, 32], strides = [1, 1]} : vector<2x128xf32> to vector<2x32xf32>
    %60 = math.tanh %59 : vector<2x32xf32>
    %61 = vector.extract_strided_slice %46 {offsets = [0, 96], sizes = [2, 32], strides = [1, 1]} : vector<2x128xf32> to vector<2x32xf32>
    %62 = arith.negf %61 : vector<2x32xf32>
    %63 = math.exp %62 : vector<2x32xf32>
    %cst_17 = arith.constant 1.000000e+00 : f32
    %64 = vector.broadcast %cst_17 : f32 to vector<2x32xf32>
    %65 = arith.addf %64, %63 : vector<2x32xf32>
    %66 = arith.divf %64, %65 : vector<2x32xf32>
    %67 = arith.mulf %58, %39 : vector<2x32xf32>
    %68 = arith.mulf %52, %60 : vector<2x32xf32>
    %69 = arith.addf %67, %68 : vector<2x32xf32>
    %70 = math.tanh %69 : vector<2x32xf32>
    %71 = arith.mulf %66, %70 : vector<2x32xf32>
    %72 = vector.extract_strided_slice %8 {offsets = [0, 2, 0], sizes = [2, 1, 128], strides = [1, 1, 1]} : vector<2x8x128xf32> to vector<2x1x128xf32>
    %73 = vector.shape_cast %72 : vector<2x1x128xf32> to vector<2x128xf32>
    %74 = arith.truncf %71 : vector<2x32xf32> to vector<2x32xbf16>
    %cst_18 = arith.constant dense<0.000000e+00> : vector<2x128xf32>
    %75 = tpu.matmul %74, %9, %cst_18 {dimension_numbers = #tpu.dot_dimension_numbers<[1], [0], [0], [1], [0, 0, 1, 1], [], []>} : vector<2x32xbf16>, vector<32x128xbf16>, vector<2x128xf32> -> vector<2x128xf32>
    %76 = arith.addf %73, %75 : vector<2x128xf32>
    %77 = vector.extract_strided_slice %76 {offsets = [0, 0], sizes = [2, 32], strides = [1, 1]} : vector<2x128xf32> to vector<2x32xf32>
    %78 = arith.negf %77 : vector<2x32xf32>
    %79 = math.exp %78 : vector<2x32xf32>
    %cst_19 = arith.constant 1.000000e+00 : f32
    %80 = vector.broadcast %cst_19 : f32 to vector<2x32xf32>
    %81 = arith.addf %80, %79 : vector<2x32xf32>
    %82 = arith.divf %80, %81 : vector<2x32xf32>
    %83 = vector.extract_strided_slice %76 {offsets = [0, 32], sizes = [2, 32], strides = [1, 1]} : vector<2x128xf32> to vector<2x32xf32>
    %84 = arith.negf %83 : vector<2x32xf32>
    %85 = math.exp %84 : vector<2x32xf32>
    %cst_20 = arith.constant 1.000000e+00 : f32
    %86 = vector.broadcast %cst_20 : f32 to vector<2x32xf32>
    %87 = arith.addf %86, %85 : vector<2x32xf32>
    %88 = arith.divf %86, %87 : vector<2x32xf32>
    %89 = vector.extract_strided_slice %76 {offsets = [0, 64], sizes = [2, 32], strides = [1, 1]} : vector<2x128xf32> to vector<2x32xf32>
    %90 = math.tanh %89 : vector<2x32xf32>
    %91 = vector.extract_strided_slice %76 {offsets = [0, 96], sizes = [2, 32], strides = [1, 1]} : vector<2x128xf32> to vector<2x32xf32>
    %92 = arith.negf %91 : vector<2x32xf32>
    %93 = math.exp %92 : vector<2x32xf32>
    %cst_21 = arith.constant 1.000000e+00 : f32
    %94 = vector.broadcast %cst_21 : f32 to vector<2x32xf32>
    %95 = arith.addf %94, %93 : vector<2x32xf32>
    %96 = arith.divf %94, %95 : vector<2x32xf32>
    %97 = arith.mulf %88, %69 : vector<2x32xf32>
    %98 = arith.mulf %82, %90 : vector<2x32xf32>
    %99 = arith.addf %97, %98 : vector<2x32xf32>
    %100 = math.tanh %99 : vector<2x32xf32>
    %101 = arith.mulf %96, %100 : vector<2x32xf32>
    %102 = vector.extract_strided_slice %8 {offsets = [0, 3, 0], sizes = [2, 1, 128], strides = [1, 1, 1]} : vector<2x8x128xf32> to vector<2x1x128xf32>
    %103 = vector.shape_cast %102 : vector<2x1x128xf32> to vector<2x128xf32>
    %104 = arith.truncf %101 : vector<2x32xf32> to vector<2x32xbf16>
    %cst_22 = arith.constant dense<0.000000e+00> : vector<2x128xf32>
    %105 = tpu.matmul %104, %9, %cst_22 {dimension_numbers = #tpu.dot_dimension_numbers<[1], [0], [0], [1], [0, 0, 1, 1], [], []>} : vector<2x32xbf16>, vector<32x128xbf16>, vector<2x128xf32> -> vector<2x128xf32>
    %106 = arith.addf %103, %105 : vector<2x128xf32>
    %107 = vector.extract_strided_slice %106 {offsets = [0, 0], sizes = [2, 32], strides = [1, 1]} : vector<2x128xf32> to vector<2x32xf32>
    %108 = arith.negf %107 : vector<2x32xf32>
    %109 = math.exp %108 : vector<2x32xf32>
    %cst_23 = arith.constant 1.000000e+00 : f32
    %110 = vector.broadcast %cst_23 : f32 to vector<2x32xf32>
    %111 = arith.addf %110, %109 : vector<2x32xf32>
    %112 = arith.divf %110, %111 : vector<2x32xf32>
    %113 = vector.extract_strided_slice %106 {offsets = [0, 32], sizes = [2, 32], strides = [1, 1]} : vector<2x128xf32> to vector<2x32xf32>
    %114 = arith.negf %113 : vector<2x32xf32>
    %115 = math.exp %114 : vector<2x32xf32>
    %cst_24 = arith.constant 1.000000e+00 : f32
    %116 = vector.broadcast %cst_24 : f32 to vector<2x32xf32>
    %117 = arith.addf %116, %115 : vector<2x32xf32>
    %118 = arith.divf %116, %117 : vector<2x32xf32>
    %119 = vector.extract_strided_slice %106 {offsets = [0, 64], sizes = [2, 32], strides = [1, 1]} : vector<2x128xf32> to vector<2x32xf32>
    %120 = math.tanh %119 : vector<2x32xf32>
    %121 = vector.extract_strided_slice %106 {offsets = [0, 96], sizes = [2, 32], strides = [1, 1]} : vector<2x128xf32> to vector<2x32xf32>
    %122 = arith.negf %121 : vector<2x32xf32>
    %123 = math.exp %122 : vector<2x32xf32>
    %cst_25 = arith.constant 1.000000e+00 : f32
    %124 = vector.broadcast %cst_25 : f32 to vector<2x32xf32>
    %125 = arith.addf %124, %123 : vector<2x32xf32>
    %126 = arith.divf %124, %125 : vector<2x32xf32>
    %127 = arith.mulf %118, %99 : vector<2x32xf32>
    %128 = arith.mulf %112, %120 : vector<2x32xf32>
    %129 = arith.addf %127, %128 : vector<2x32xf32>
    %130 = math.tanh %129 : vector<2x32xf32>
    %131 = arith.mulf %126, %130 : vector<2x32xf32>
    %132 = vector.extract_strided_slice %8 {offsets = [0, 4, 0], sizes = [2, 1, 128], strides = [1, 1, 1]} : vector<2x8x128xf32> to vector<2x1x128xf32>
    %133 = vector.shape_cast %132 : vector<2x1x128xf32> to vector<2x128xf32>
    %134 = arith.truncf %131 : vector<2x32xf32> to vector<2x32xbf16>
    %cst_26 = arith.constant dense<0.000000e+00> : vector<2x128xf32>
    %135 = tpu.matmul %134, %9, %cst_26 {dimension_numbers = #tpu.dot_dimension_numbers<[1], [0], [0], [1], [0, 0, 1, 1], [], []>} : vector<2x32xbf16>, vector<32x128xbf16>, vector<2x128xf32> -> vector<2x128xf32>
    %136 = arith.addf %133, %135 : vector<2x128xf32>
    %137 = vector.extract_strided_slice %136 {offsets = [0, 0], sizes = [2, 32], strides = [1, 1]} : vector<2x128xf32> to vector<2x32xf32>
    %138 = arith.negf %137 : vector<2x32xf32>
    %139 = math.exp %138 : vector<2x32xf32>
    %cst_27 = arith.constant 1.000000e+00 : f32
    %140 = vector.broadcast %cst_27 : f32 to vector<2x32xf32>
    %141 = arith.addf %140, %139 : vector<2x32xf32>
    %142 = arith.divf %140, %141 : vector<2x32xf32>
    %143 = vector.extract_strided_slice %136 {offsets = [0, 32], sizes = [2, 32], strides = [1, 1]} : vector<2x128xf32> to vector<2x32xf32>
    %144 = arith.negf %143 : vector<2x32xf32>
    %145 = math.exp %144 : vector<2x32xf32>
    %cst_28 = arith.constant 1.000000e+00 : f32
    %146 = vector.broadcast %cst_28 : f32 to vector<2x32xf32>
    %147 = arith.addf %146, %145 : vector<2x32xf32>
    %148 = arith.divf %146, %147 : vector<2x32xf32>
    %149 = vector.extract_strided_slice %136 {offsets = [0, 64], sizes = [2, 32], strides = [1, 1]} : vector<2x128xf32> to vector<2x32xf32>
    %150 = math.tanh %149 : vector<2x32xf32>
    %151 = vector.extract_strided_slice %136 {offsets = [0, 96], sizes = [2, 32], strides = [1, 1]} : vector<2x128xf32> to vector<2x32xf32>
    %152 = arith.negf %151 : vector<2x32xf32>
    %153 = math.exp %152 : vector<2x32xf32>
    %cst_29 = arith.constant 1.000000e+00 : f32
    %154 = vector.broadcast %cst_29 : f32 to vector<2x32xf32>
    %155 = arith.addf %154, %153 : vector<2x32xf32>
    %156 = arith.divf %154, %155 : vector<2x32xf32>
    %157 = arith.mulf %148, %129 : vector<2x32xf32>
    %158 = arith.mulf %142, %150 : vector<2x32xf32>
    %159 = arith.addf %157, %158 : vector<2x32xf32>
    %160 = math.tanh %159 : vector<2x32xf32>
    %161 = arith.mulf %156, %160 : vector<2x32xf32>
    %162 = vector.extract_strided_slice %8 {offsets = [0, 5, 0], sizes = [2, 1, 128], strides = [1, 1, 1]} : vector<2x8x128xf32> to vector<2x1x128xf32>
    %163 = vector.shape_cast %162 : vector<2x1x128xf32> to vector<2x128xf32>
    %164 = arith.truncf %161 : vector<2x32xf32> to vector<2x32xbf16>
    %cst_30 = arith.constant dense<0.000000e+00> : vector<2x128xf32>
    %165 = tpu.matmul %164, %9, %cst_30 {dimension_numbers = #tpu.dot_dimension_numbers<[1], [0], [0], [1], [0, 0, 1, 1], [], []>} : vector<2x32xbf16>, vector<32x128xbf16>, vector<2x128xf32> -> vector<2x128xf32>
    %166 = arith.addf %163, %165 : vector<2x128xf32>
    %167 = vector.extract_strided_slice %166 {offsets = [0, 0], sizes = [2, 32], strides = [1, 1]} : vector<2x128xf32> to vector<2x32xf32>
    %168 = arith.negf %167 : vector<2x32xf32>
    %169 = math.exp %168 : vector<2x32xf32>
    %cst_31 = arith.constant 1.000000e+00 : f32
    %170 = vector.broadcast %cst_31 : f32 to vector<2x32xf32>
    %171 = arith.addf %170, %169 : vector<2x32xf32>
    %172 = arith.divf %170, %171 : vector<2x32xf32>
    %173 = vector.extract_strided_slice %166 {offsets = [0, 32], sizes = [2, 32], strides = [1, 1]} : vector<2x128xf32> to vector<2x32xf32>
    %174 = arith.negf %173 : vector<2x32xf32>
    %175 = math.exp %174 : vector<2x32xf32>
    %cst_32 = arith.constant 1.000000e+00 : f32
    %176 = vector.broadcast %cst_32 : f32 to vector<2x32xf32>
    %177 = arith.addf %176, %175 : vector<2x32xf32>
    %178 = arith.divf %176, %177 : vector<2x32xf32>
    %179 = vector.extract_strided_slice %166 {offsets = [0, 64], sizes = [2, 32], strides = [1, 1]} : vector<2x128xf32> to vector<2x32xf32>
    %180 = math.tanh %179 : vector<2x32xf32>
    %181 = vector.extract_strided_slice %166 {offsets = [0, 96], sizes = [2, 32], strides = [1, 1]} : vector<2x128xf32> to vector<2x32xf32>
    %182 = arith.negf %181 : vector<2x32xf32>
    %183 = math.exp %182 : vector<2x32xf32>
    %cst_33 = arith.constant 1.000000e+00 : f32
    %184 = vector.broadcast %cst_33 : f32 to vector<2x32xf32>
    %185 = arith.addf %184, %183 : vector<2x32xf32>
    %186 = arith.divf %184, %185 : vector<2x32xf32>
    %187 = arith.mulf %178, %159 : vector<2x32xf32>
    %188 = arith.mulf %172, %180 : vector<2x32xf32>
    %189 = arith.addf %187, %188 : vector<2x32xf32>
    %190 = math.tanh %189 : vector<2x32xf32>
    %191 = arith.mulf %186, %190 : vector<2x32xf32>
    %192 = vector.extract_strided_slice %8 {offsets = [0, 6, 0], sizes = [2, 1, 128], strides = [1, 1, 1]} : vector<2x8x128xf32> to vector<2x1x128xf32>
    %193 = vector.shape_cast %192 : vector<2x1x128xf32> to vector<2x128xf32>
    %194 = arith.truncf %191 : vector<2x32xf32> to vector<2x32xbf16>
    %cst_34 = arith.constant dense<0.000000e+00> : vector<2x128xf32>
    %195 = tpu.matmul %194, %9, %cst_34 {dimension_numbers = #tpu.dot_dimension_numbers<[1], [0], [0], [1], [0, 0, 1, 1], [], []>} : vector<2x32xbf16>, vector<32x128xbf16>, vector<2x128xf32> -> vector<2x128xf32>
    %196 = arith.addf %193, %195 : vector<2x128xf32>
    %197 = vector.extract_strided_slice %196 {offsets = [0, 0], sizes = [2, 32], strides = [1, 1]} : vector<2x128xf32> to vector<2x32xf32>
    %198 = arith.negf %197 : vector<2x32xf32>
    %199 = math.exp %198 : vector<2x32xf32>
    %cst_35 = arith.constant 1.000000e+00 : f32
    %200 = vector.broadcast %cst_35 : f32 to vector<2x32xf32>
    %201 = arith.addf %200, %199 : vector<2x32xf32>
    %202 = arith.divf %200, %201 : vector<2x32xf32>
    %203 = vector.extract_strided_slice %196 {offsets = [0, 32], sizes = [2, 32], strides = [1, 1]} : vector<2x128xf32> to vector<2x32xf32>
    %204 = arith.negf %203 : vector<2x32xf32>
    %205 = math.exp %204 : vector<2x32xf32>
    %cst_36 = arith.constant 1.000000e+00 : f32
    %206 = vector.broadcast %cst_36 : f32 to vector<2x32xf32>
    %207 = arith.addf %206, %205 : vector<2x32xf32>
    %208 = arith.divf %206, %207 : vector<2x32xf32>
    %209 = vector.extract_strided_slice %196 {offsets = [0, 64], sizes = [2, 32], strides = [1, 1]} : vector<2x128xf32> to vector<2x32xf32>
    %210 = math.tanh %209 : vector<2x32xf32>
    %211 = vector.extract_strided_slice %196 {offsets = [0, 96], sizes = [2, 32], strides = [1, 1]} : vector<2x128xf32> to vector<2x32xf32>
    %212 = arith.negf %211 : vector<2x32xf32>
    %213 = math.exp %212 : vector<2x32xf32>
    %cst_37 = arith.constant 1.000000e+00 : f32
    %214 = vector.broadcast %cst_37 : f32 to vector<2x32xf32>
    %215 = arith.addf %214, %213 : vector<2x32xf32>
    %216 = arith.divf %214, %215 : vector<2x32xf32>
    %217 = arith.mulf %208, %189 : vector<2x32xf32>
    %218 = arith.mulf %202, %210 : vector<2x32xf32>
    %219 = arith.addf %217, %218 : vector<2x32xf32>
    %220 = math.tanh %219 : vector<2x32xf32>
    %221 = arith.mulf %216, %220 : vector<2x32xf32>
    %222 = vector.extract_strided_slice %8 {offsets = [0, 7, 0], sizes = [2, 1, 128], strides = [1, 1, 1]} : vector<2x8x128xf32> to vector<2x1x128xf32>
    %223 = vector.shape_cast %222 : vector<2x1x128xf32> to vector<2x128xf32>
    %224 = arith.truncf %221 : vector<2x32xf32> to vector<2x32xbf16>
    %cst_38 = arith.constant dense<0.000000e+00> : vector<2x128xf32>
    %225 = tpu.matmul %224, %9, %cst_38 {dimension_numbers = #tpu.dot_dimension_numbers<[1], [0], [0], [1], [0, 0, 1, 1], [], []>} : vector<2x32xbf16>, vector<32x128xbf16>, vector<2x128xf32> -> vector<2x128xf32>
    %226 = arith.addf %223, %225 : vector<2x128xf32>
    %227 = vector.extract_strided_slice %226 {offsets = [0, 0], sizes = [2, 32], strides = [1, 1]} : vector<2x128xf32> to vector<2x32xf32>
    %228 = arith.negf %227 : vector<2x32xf32>
    %229 = math.exp %228 : vector<2x32xf32>
    %cst_39 = arith.constant 1.000000e+00 : f32
    %230 = vector.broadcast %cst_39 : f32 to vector<2x32xf32>
    %231 = arith.addf %230, %229 : vector<2x32xf32>
    %232 = arith.divf %230, %231 : vector<2x32xf32>
    %233 = vector.extract_strided_slice %226 {offsets = [0, 32], sizes = [2, 32], strides = [1, 1]} : vector<2x128xf32> to vector<2x32xf32>
    %234 = arith.negf %233 : vector<2x32xf32>
    %235 = math.exp %234 : vector<2x32xf32>
    %cst_40 = arith.constant 1.000000e+00 : f32
    %236 = vector.broadcast %cst_40 : f32 to vector<2x32xf32>
    %237 = arith.addf %236, %235 : vector<2x32xf32>
    %238 = arith.divf %236, %237 : vector<2x32xf32>
    %239 = vector.extract_strided_slice %226 {offsets = [0, 64], sizes = [2, 32], strides = [1, 1]} : vector<2x128xf32> to vector<2x32xf32>
    %240 = math.tanh %239 : vector<2x32xf32>
    %241 = vector.extract_strided_slice %226 {offsets = [0, 96], sizes = [2, 32], strides = [1, 1]} : vector<2x128xf32> to vector<2x32xf32>
    %242 = arith.negf %241 : vector<2x32xf32>
    %243 = math.exp %242 : vector<2x32xf32>
    %cst_41 = arith.constant 1.000000e+00 : f32
    %244 = vector.broadcast %cst_41 : f32 to vector<2x32xf32>
    %245 = arith.addf %244, %243 : vector<2x32xf32>
    %246 = arith.divf %244, %245 : vector<2x32xf32>
    %247 = arith.mulf %238, %219 : vector<2x32xf32>
    %248 = arith.mulf %232, %240 : vector<2x32xf32>
    %249 = arith.addf %247, %248 : vector<2x32xf32>
    %250 = math.tanh %249 : vector<2x32xf32>
    %251 = arith.mulf %246, %250 : vector<2x32xf32>
    %252 = vector.shape_cast %41 : vector<2x32xf32> to vector<2x1x32xf32>
    %253 = vector.shape_cast %71 : vector<2x32xf32> to vector<2x1x32xf32>
    %254 = vector.shape_cast %101 : vector<2x32xf32> to vector<2x1x32xf32>
    %255 = vector.shape_cast %131 : vector<2x32xf32> to vector<2x1x32xf32>
    %256 = vector.shape_cast %161 : vector<2x32xf32> to vector<2x1x32xf32>
    %257 = vector.shape_cast %191 : vector<2x32xf32> to vector<2x1x32xf32>
    %258 = vector.shape_cast %221 : vector<2x32xf32> to vector<2x1x32xf32>
    %259 = vector.shape_cast %251 : vector<2x32xf32> to vector<2x1x32xf32>
    %260 = tpu.concatenate %252, %253, %254, %255, %256, %257, %258, %259 in 1 : vector<2x1x32xf32>, vector<2x1x32xf32>, vector<2x1x32xf32>, vector<2x1x32xf32>, vector<2x1x32xf32>, vector<2x1x32xf32>, vector<2x1x32xf32>, vector<2x1x32xf32> -> vector<2x8x32xf32>
    %261 = vector.shape_cast %260 : vector<2x8x32xf32> to vector<16x32xf32>
    %c0_42 = arith.constant 0 : index
    %c0_43 = arith.constant 0 : index
    %262 = vector.load %arg4[%c0_42, %c0_43] : memref<32x128xbf16, #tpu.memory_space<vmem>>, vector<32x128xbf16>
    %263 = arith.truncf %261 : vector<16x32xf32> to vector<16x32xbf16>
    %cst_44 = arith.constant dense<0.000000e+00> : vector<16x128xf32>
    %264 = tpu.matmul %263, %262, %cst_44 {dimension_numbers = #tpu.dot_dimension_numbers<[1], [0], [0], [1], [0, 0, 1, 1], [], []>} : vector<16x32xbf16>, vector<32x128xbf16>, vector<16x128xf32> -> vector<16x128xf32>
    %c0_45 = arith.constant 0 : index
    %c0_46 = arith.constant 0 : index
    %265 = vector.load %arg6[%c0_45, %c0_46] : memref<1x128xf32, #tpu.memory_space<vmem>>, vector<1x128xf32>
    %266 = vector.broadcast %265 : vector<1x128xf32> to vector<16x128xf32>
    %267 = arith.addf %264, %266 : vector<16x128xf32>
    %268 = vector.shape_cast %267 : vector<16x128xf32> to vector<2x8x128xf32>
    %c0_47 = arith.constant 0 : index
    %c0_48 = arith.constant 0 : index
    %269 = vector.load %arg5[%c0_47, %c0_48] : memref<32x128xbf16, #tpu.memory_space<vmem>>, vector<32x128xbf16>
    %cst_49 = arith.constant 0.000000e+00 : f32
    %270 = vector.broadcast %cst_49 : f32 to vector<2x32xf32>
    %cst_50 = arith.constant 0.000000e+00 : f32
    %271 = vector.broadcast %cst_50 : f32 to vector<2x32xf32>
    %272 = vector.extract_strided_slice %268 {offsets = [0, 0, 0], sizes = [2, 1, 128], strides = [1, 1, 1]} : vector<2x8x128xf32> to vector<2x1x128xf32>
    %273 = vector.shape_cast %272 : vector<2x1x128xf32> to vector<2x128xf32>
    %274 = arith.truncf %270 : vector<2x32xf32> to vector<2x32xbf16>
    %cst_51 = arith.constant dense<0.000000e+00> : vector<2x128xf32>
    %275 = tpu.matmul %274, %269, %cst_51 {dimension_numbers = #tpu.dot_dimension_numbers<[1], [0], [0], [1], [0, 0, 1, 1], [], []>} : vector<2x32xbf16>, vector<32x128xbf16>, vector<2x128xf32> -> vector<2x128xf32>
    %276 = arith.addf %273, %275 : vector<2x128xf32>
    %277 = vector.extract_strided_slice %276 {offsets = [0, 0], sizes = [2, 32], strides = [1, 1]} : vector<2x128xf32> to vector<2x32xf32>
    %278 = arith.negf %277 : vector<2x32xf32>
    %279 = math.exp %278 : vector<2x32xf32>
    %cst_52 = arith.constant 1.000000e+00 : f32
    %280 = vector.broadcast %cst_52 : f32 to vector<2x32xf32>
    %281 = arith.addf %280, %279 : vector<2x32xf32>
    %282 = arith.divf %280, %281 : vector<2x32xf32>
    %283 = vector.extract_strided_slice %276 {offsets = [0, 32], sizes = [2, 32], strides = [1, 1]} : vector<2x128xf32> to vector<2x32xf32>
    %284 = arith.negf %283 : vector<2x32xf32>
    %285 = math.exp %284 : vector<2x32xf32>
    %cst_53 = arith.constant 1.000000e+00 : f32
    %286 = vector.broadcast %cst_53 : f32 to vector<2x32xf32>
    %287 = arith.addf %286, %285 : vector<2x32xf32>
    %288 = arith.divf %286, %287 : vector<2x32xf32>
    %289 = vector.extract_strided_slice %276 {offsets = [0, 64], sizes = [2, 32], strides = [1, 1]} : vector<2x128xf32> to vector<2x32xf32>
    %290 = math.tanh %289 : vector<2x32xf32>
    %291 = vector.extract_strided_slice %276 {offsets = [0, 96], sizes = [2, 32], strides = [1, 1]} : vector<2x128xf32> to vector<2x32xf32>
    %292 = arith.negf %291 : vector<2x32xf32>
    %293 = math.exp %292 : vector<2x32xf32>
    %cst_54 = arith.constant 1.000000e+00 : f32
    %294 = vector.broadcast %cst_54 : f32 to vector<2x32xf32>
    %295 = arith.addf %294, %293 : vector<2x32xf32>
    %296 = arith.divf %294, %295 : vector<2x32xf32>
    %297 = arith.mulf %288, %271 : vector<2x32xf32>
    %298 = arith.mulf %282, %290 : vector<2x32xf32>
    %299 = arith.addf %297, %298 : vector<2x32xf32>
    %300 = math.tanh %299 : vector<2x32xf32>
    %301 = arith.mulf %296, %300 : vector<2x32xf32>
    %302 = vector.extract_strided_slice %268 {offsets = [0, 1, 0], sizes = [2, 1, 128], strides = [1, 1, 1]} : vector<2x8x128xf32> to vector<2x1x128xf32>
    %303 = vector.shape_cast %302 : vector<2x1x128xf32> to vector<2x128xf32>
    %304 = arith.truncf %301 : vector<2x32xf32> to vector<2x32xbf16>
    %cst_55 = arith.constant dense<0.000000e+00> : vector<2x128xf32>
    %305 = tpu.matmul %304, %269, %cst_55 {dimension_numbers = #tpu.dot_dimension_numbers<[1], [0], [0], [1], [0, 0, 1, 1], [], []>} : vector<2x32xbf16>, vector<32x128xbf16>, vector<2x128xf32> -> vector<2x128xf32>
    %306 = arith.addf %303, %305 : vector<2x128xf32>
    %307 = vector.extract_strided_slice %306 {offsets = [0, 0], sizes = [2, 32], strides = [1, 1]} : vector<2x128xf32> to vector<2x32xf32>
    %308 = arith.negf %307 : vector<2x32xf32>
    %309 = math.exp %308 : vector<2x32xf32>
    %cst_56 = arith.constant 1.000000e+00 : f32
    %310 = vector.broadcast %cst_56 : f32 to vector<2x32xf32>
    %311 = arith.addf %310, %309 : vector<2x32xf32>
    %312 = arith.divf %310, %311 : vector<2x32xf32>
    %313 = vector.extract_strided_slice %306 {offsets = [0, 32], sizes = [2, 32], strides = [1, 1]} : vector<2x128xf32> to vector<2x32xf32>
    %314 = arith.negf %313 : vector<2x32xf32>
    %315 = math.exp %314 : vector<2x32xf32>
    %cst_57 = arith.constant 1.000000e+00 : f32
    %316 = vector.broadcast %cst_57 : f32 to vector<2x32xf32>
    %317 = arith.addf %316, %315 : vector<2x32xf32>
    %318 = arith.divf %316, %317 : vector<2x32xf32>
    %319 = vector.extract_strided_slice %306 {offsets = [0, 64], sizes = [2, 32], strides = [1, 1]} : vector<2x128xf32> to vector<2x32xf32>
    %320 = math.tanh %319 : vector<2x32xf32>
    %321 = vector.extract_strided_slice %306 {offsets = [0, 96], sizes = [2, 32], strides = [1, 1]} : vector<2x128xf32> to vector<2x32xf32>
    %322 = arith.negf %321 : vector<2x32xf32>
    %323 = math.exp %322 : vector<2x32xf32>
    %cst_58 = arith.constant 1.000000e+00 : f32
    %324 = vector.broadcast %cst_58 : f32 to vector<2x32xf32>
    %325 = arith.addf %324, %323 : vector<2x32xf32>
    %326 = arith.divf %324, %325 : vector<2x32xf32>
    %327 = arith.mulf %318, %299 : vector<2x32xf32>
    %328 = arith.mulf %312, %320 : vector<2x32xf32>
    %329 = arith.addf %327, %328 : vector<2x32xf32>
    %330 = math.tanh %329 : vector<2x32xf32>
    %331 = arith.mulf %326, %330 : vector<2x32xf32>
    %332 = vector.extract_strided_slice %268 {offsets = [0, 2, 0], sizes = [2, 1, 128], strides = [1, 1, 1]} : vector<2x8x128xf32> to vector<2x1x128xf32>
    %333 = vector.shape_cast %332 : vector<2x1x128xf32> to vector<2x128xf32>
    %334 = arith.truncf %331 : vector<2x32xf32> to vector<2x32xbf16>
    %cst_59 = arith.constant dense<0.000000e+00> : vector<2x128xf32>
    %335 = tpu.matmul %334, %269, %cst_59 {dimension_numbers = #tpu.dot_dimension_numbers<[1], [0], [0], [1], [0, 0, 1, 1], [], []>} : vector<2x32xbf16>, vector<32x128xbf16>, vector<2x128xf32> -> vector<2x128xf32>
    %336 = arith.addf %333, %335 : vector<2x128xf32>
    %337 = vector.extract_strided_slice %336 {offsets = [0, 0], sizes = [2, 32], strides = [1, 1]} : vector<2x128xf32> to vector<2x32xf32>
    %338 = arith.negf %337 : vector<2x32xf32>
    %339 = math.exp %338 : vector<2x32xf32>
    %cst_60 = arith.constant 1.000000e+00 : f32
    %340 = vector.broadcast %cst_60 : f32 to vector<2x32xf32>
    %341 = arith.addf %340, %339 : vector<2x32xf32>
    %342 = arith.divf %340, %341 : vector<2x32xf32>
    %343 = vector.extract_strided_slice %336 {offsets = [0, 32], sizes = [2, 32], strides = [1, 1]} : vector<2x128xf32> to vector<2x32xf32>
    %344 = arith.negf %343 : vector<2x32xf32>
    %345 = math.exp %344 : vector<2x32xf32>
    %cst_61 = arith.constant 1.000000e+00 : f32
    %346 = vector.broadcast %cst_61 : f32 to vector<2x32xf32>
    %347 = arith.addf %346, %345 : vector<2x32xf32>
    %348 = arith.divf %346, %347 : vector<2x32xf32>
    %349 = vector.extract_strided_slice %336 {offsets = [0, 64], sizes = [2, 32], strides = [1, 1]} : vector<2x128xf32> to vector<2x32xf32>
    %350 = math.tanh %349 : vector<2x32xf32>
    %351 = vector.extract_strided_slice %336 {offsets = [0, 96], sizes = [2, 32], strides = [1, 1]} : vector<2x128xf32> to vector<2x32xf32>
    %352 = arith.negf %351 : vector<2x32xf32>
    %353 = math.exp %352 : vector<2x32xf32>
    %cst_62 = arith.constant 1.000000e+00 : f32
    %354 = vector.broadcast %cst_62 : f32 to vector<2x32xf32>
    %355 = arith.addf %354, %353 : vector<2x32xf32>
    %356 = arith.divf %354, %355 : vector<2x32xf32>
    %357 = arith.mulf %348, %329 : vector<2x32xf32>
    %358 = arith.mulf %342, %350 : vector<2x32xf32>
    %359 = arith.addf %357, %358 : vector<2x32xf32>
    %360 = math.tanh %359 : vector<2x32xf32>
    %361 = arith.mulf %356, %360 : vector<2x32xf32>
    %362 = vector.extract_strided_slice %268 {offsets = [0, 3, 0], sizes = [2, 1, 128], strides = [1, 1, 1]} : vector<2x8x128xf32> to vector<2x1x128xf32>
    %363 = vector.shape_cast %362 : vector<2x1x128xf32> to vector<2x128xf32>
    %364 = arith.truncf %361 : vector<2x32xf32> to vector<2x32xbf16>
    %cst_63 = arith.constant dense<0.000000e+00> : vector<2x128xf32>
    %365 = tpu.matmul %364, %269, %cst_63 {dimension_numbers = #tpu.dot_dimension_numbers<[1], [0], [0], [1], [0, 0, 1, 1], [], []>} : vector<2x32xbf16>, vector<32x128xbf16>, vector<2x128xf32> -> vector<2x128xf32>
    %366 = arith.addf %363, %365 : vector<2x128xf32>
    %367 = vector.extract_strided_slice %366 {offsets = [0, 0], sizes = [2, 32], strides = [1, 1]} : vector<2x128xf32> to vector<2x32xf32>
    %368 = arith.negf %367 : vector<2x32xf32>
    %369 = math.exp %368 : vector<2x32xf32>
    %cst_64 = arith.constant 1.000000e+00 : f32
    %370 = vector.broadcast %cst_64 : f32 to vector<2x32xf32>
    %371 = arith.addf %370, %369 : vector<2x32xf32>
    %372 = arith.divf %370, %371 : vector<2x32xf32>
    %373 = vector.extract_strided_slice %366 {offsets = [0, 32], sizes = [2, 32], strides = [1, 1]} : vector<2x128xf32> to vector<2x32xf32>
    %374 = arith.negf %373 : vector<2x32xf32>
    %375 = math.exp %374 : vector<2x32xf32>
    %cst_65 = arith.constant 1.000000e+00 : f32
    %376 = vector.broadcast %cst_65 : f32 to vector<2x32xf32>
    %377 = arith.addf %376, %375 : vector<2x32xf32>
    %378 = arith.divf %376, %377 : vector<2x32xf32>
    %379 = vector.extract_strided_slice %366 {offsets = [0, 64], sizes = [2, 32], strides = [1, 1]} : vector<2x128xf32> to vector<2x32xf32>
    %380 = math.tanh %379 : vector<2x32xf32>
    %381 = vector.extract_strided_slice %366 {offsets = [0, 96], sizes = [2, 32], strides = [1, 1]} : vector<2x128xf32> to vector<2x32xf32>
    %382 = arith.negf %381 : vector<2x32xf32>
    %383 = math.exp %382 : vector<2x32xf32>
    %cst_66 = arith.constant 1.000000e+00 : f32
    %384 = vector.broadcast %cst_66 : f32 to vector<2x32xf32>
    %385 = arith.addf %384, %383 : vector<2x32xf32>
    %386 = arith.divf %384, %385 : vector<2x32xf32>
    %387 = arith.mulf %378, %359 : vector<2x32xf32>
    %388 = arith.mulf %372, %380 : vector<2x32xf32>
    %389 = arith.addf %387, %388 : vector<2x32xf32>
    %390 = math.tanh %389 : vector<2x32xf32>
    %391 = arith.mulf %386, %390 : vector<2x32xf32>
    %392 = vector.extract_strided_slice %268 {offsets = [0, 4, 0], sizes = [2, 1, 128], strides = [1, 1, 1]} : vector<2x8x128xf32> to vector<2x1x128xf32>
    %393 = vector.shape_cast %392 : vector<2x1x128xf32> to vector<2x128xf32>
    %394 = arith.truncf %391 : vector<2x32xf32> to vector<2x32xbf16>
    %cst_67 = arith.constant dense<0.000000e+00> : vector<2x128xf32>
    %395 = tpu.matmul %394, %269, %cst_67 {dimension_numbers = #tpu.dot_dimension_numbers<[1], [0], [0], [1], [0, 0, 1, 1], [], []>} : vector<2x32xbf16>, vector<32x128xbf16>, vector<2x128xf32> -> vector<2x128xf32>
    %396 = arith.addf %393, %395 : vector<2x128xf32>
    %397 = vector.extract_strided_slice %396 {offsets = [0, 0], sizes = [2, 32], strides = [1, 1]} : vector<2x128xf32> to vector<2x32xf32>
    %398 = arith.negf %397 : vector<2x32xf32>
    %399 = math.exp %398 : vector<2x32xf32>
    %cst_68 = arith.constant 1.000000e+00 : f32
    %400 = vector.broadcast %cst_68 : f32 to vector<2x32xf32>
    %401 = arith.addf %400, %399 : vector<2x32xf32>
    %402 = arith.divf %400, %401 : vector<2x32xf32>
    %403 = vector.extract_strided_slice %396 {offsets = [0, 32], sizes = [2, 32], strides = [1, 1]} : vector<2x128xf32> to vector<2x32xf32>
    %404 = arith.negf %403 : vector<2x32xf32>
    %405 = math.exp %404 : vector<2x32xf32>
    %cst_69 = arith.constant 1.000000e+00 : f32
    %406 = vector.broadcast %cst_69 : f32 to vector<2x32xf32>
    %407 = arith.addf %406, %405 : vector<2x32xf32>
    %408 = arith.divf %406, %407 : vector<2x32xf32>
    %409 = vector.extract_strided_slice %396 {offsets = [0, 64], sizes = [2, 32], strides = [1, 1]} : vector<2x128xf32> to vector<2x32xf32>
    %410 = math.tanh %409 : vector<2x32xf32>
    %411 = vector.extract_strided_slice %396 {offsets = [0, 96], sizes = [2, 32], strides = [1, 1]} : vector<2x128xf32> to vector<2x32xf32>
    %412 = arith.negf %411 : vector<2x32xf32>
    %413 = math.exp %412 : vector<2x32xf32>
    %cst_70 = arith.constant 1.000000e+00 : f32
    %414 = vector.broadcast %cst_70 : f32 to vector<2x32xf32>
    %415 = arith.addf %414, %413 : vector<2x32xf32>
    %416 = arith.divf %414, %415 : vector<2x32xf32>
    %417 = arith.mulf %408, %389 : vector<2x32xf32>
    %418 = arith.mulf %402, %410 : vector<2x32xf32>
    %419 = arith.addf %417, %418 : vector<2x32xf32>
    %420 = math.tanh %419 : vector<2x32xf32>
    %421 = arith.mulf %416, %420 : vector<2x32xf32>
    %422 = vector.extract_strided_slice %268 {offsets = [0, 5, 0], sizes = [2, 1, 128], strides = [1, 1, 1]} : vector<2x8x128xf32> to vector<2x1x128xf32>
    %423 = vector.shape_cast %422 : vector<2x1x128xf32> to vector<2x128xf32>
    %424 = arith.truncf %421 : vector<2x32xf32> to vector<2x32xbf16>
    %cst_71 = arith.constant dense<0.000000e+00> : vector<2x128xf32>
    %425 = tpu.matmul %424, %269, %cst_71 {dimension_numbers = #tpu.dot_dimension_numbers<[1], [0], [0], [1], [0, 0, 1, 1], [], []>} : vector<2x32xbf16>, vector<32x128xbf16>, vector<2x128xf32> -> vector<2x128xf32>
    %426 = arith.addf %423, %425 : vector<2x128xf32>
    %427 = vector.extract_strided_slice %426 {offsets = [0, 0], sizes = [2, 32], strides = [1, 1]} : vector<2x128xf32> to vector<2x32xf32>
    %428 = arith.negf %427 : vector<2x32xf32>
    %429 = math.exp %428 : vector<2x32xf32>
    %cst_72 = arith.constant 1.000000e+00 : f32
    %430 = vector.broadcast %cst_72 : f32 to vector<2x32xf32>
    %431 = arith.addf %430, %429 : vector<2x32xf32>
    %432 = arith.divf %430, %431 : vector<2x32xf32>
    %433 = vector.extract_strided_slice %426 {offsets = [0, 32], sizes = [2, 32], strides = [1, 1]} : vector<2x128xf32> to vector<2x32xf32>
    %434 = arith.negf %433 : vector<2x32xf32>
    %435 = math.exp %434 : vector<2x32xf32>
    %cst_73 = arith.constant 1.000000e+00 : f32
    %436 = vector.broadcast %cst_73 : f32 to vector<2x32xf32>
    %437 = arith.addf %436, %435 : vector<2x32xf32>
    %438 = arith.divf %436, %437 : vector<2x32xf32>
    %439 = vector.extract_strided_slice %426 {offsets = [0, 64], sizes = [2, 32], strides = [1, 1]} : vector<2x128xf32> to vector<2x32xf32>
    %440 = math.tanh %439 : vector<2x32xf32>
    %441 = vector.extract_strided_slice %426 {offsets = [0, 96], sizes = [2, 32], strides = [1, 1]} : vector<2x128xf32> to vector<2x32xf32>
    %442 = arith.negf %441 : vector<2x32xf32>
    %443 = math.exp %442 : vector<2x32xf32>
    %cst_74 = arith.constant 1.000000e+00 : f32
    %444 = vector.broadcast %cst_74 : f32 to vector<2x32xf32>
    %445 = arith.addf %444, %443 : vector<2x32xf32>
    %446 = arith.divf %444, %445 : vector<2x32xf32>
    %447 = arith.mulf %438, %419 : vector<2x32xf32>
    %448 = arith.mulf %432, %440 : vector<2x32xf32>
    %449 = arith.addf %447, %448 : vector<2x32xf32>
    %450 = math.tanh %449 : vector<2x32xf32>
    %451 = arith.mulf %446, %450 : vector<2x32xf32>
    %452 = vector.extract_strided_slice %268 {offsets = [0, 6, 0], sizes = [2, 1, 128], strides = [1, 1, 1]} : vector<2x8x128xf32> to vector<2x1x128xf32>
    %453 = vector.shape_cast %452 : vector<2x1x128xf32> to vector<2x128xf32>
    %454 = arith.truncf %451 : vector<2x32xf32> to vector<2x32xbf16>
    %cst_75 = arith.constant dense<0.000000e+00> : vector<2x128xf32>
    %455 = tpu.matmul %454, %269, %cst_75 {dimension_numbers = #tpu.dot_dimension_numbers<[1], [0], [0], [1], [0, 0, 1, 1], [], []>} : vector<2x32xbf16>, vector<32x128xbf16>, vector<2x128xf32> -> vector<2x128xf32>
    %456 = arith.addf %453, %455 : vector<2x128xf32>
    %457 = vector.extract_strided_slice %456 {offsets = [0, 0], sizes = [2, 32], strides = [1, 1]} : vector<2x128xf32> to vector<2x32xf32>
    %458 = arith.negf %457 : vector<2x32xf32>
    %459 = math.exp %458 : vector<2x32xf32>
    %cst_76 = arith.constant 1.000000e+00 : f32
    %460 = vector.broadcast %cst_76 : f32 to vector<2x32xf32>
    %461 = arith.addf %460, %459 : vector<2x32xf32>
    %462 = arith.divf %460, %461 : vector<2x32xf32>
    %463 = vector.extract_strided_slice %456 {offsets = [0, 32], sizes = [2, 32], strides = [1, 1]} : vector<2x128xf32> to vector<2x32xf32>
    %464 = arith.negf %463 : vector<2x32xf32>
    %465 = math.exp %464 : vector<2x32xf32>
    %cst_77 = arith.constant 1.000000e+00 : f32
    %466 = vector.broadcast %cst_77 : f32 to vector<2x32xf32>
    %467 = arith.addf %466, %465 : vector<2x32xf32>
    %468 = arith.divf %466, %467 : vector<2x32xf32>
    %469 = vector.extract_strided_slice %456 {offsets = [0, 64], sizes = [2, 32], strides = [1, 1]} : vector<2x128xf32> to vector<2x32xf32>
    %470 = math.tanh %469 : vector<2x32xf32>
    %471 = vector.extract_strided_slice %456 {offsets = [0, 96], sizes = [2, 32], strides = [1, 1]} : vector<2x128xf32> to vector<2x32xf32>
    %472 = arith.negf %471 : vector<2x32xf32>
    %473 = math.exp %472 : vector<2x32xf32>
    %cst_78 = arith.constant 1.000000e+00 : f32
    %474 = vector.broadcast %cst_78 : f32 to vector<2x32xf32>
    %475 = arith.addf %474, %473 : vector<2x32xf32>
    %476 = arith.divf %474, %475 : vector<2x32xf32>
    %477 = arith.mulf %468, %449 : vector<2x32xf32>
    %478 = arith.mulf %462, %470 : vector<2x32xf32>
    %479 = arith.addf %477, %478 : vector<2x32xf32>
    %480 = math.tanh %479 : vector<2x32xf32>
    %481 = arith.mulf %476, %480 : vector<2x32xf32>
    %482 = vector.extract_strided_slice %268 {offsets = [0, 7, 0], sizes = [2, 1, 128], strides = [1, 1, 1]} : vector<2x8x128xf32> to vector<2x1x128xf32>
    %483 = vector.shape_cast %482 : vector<2x1x128xf32> to vector<2x128xf32>
    %484 = arith.truncf %481 : vector<2x32xf32> to vector<2x32xbf16>
    %cst_79 = arith.constant dense<0.000000e+00> : vector<2x128xf32>
    %485 = tpu.matmul %484, %269, %cst_79 {dimension_numbers = #tpu.dot_dimension_numbers<[1], [0], [0], [1], [0, 0, 1, 1], [], []>} : vector<2x32xbf16>, vector<32x128xbf16>, vector<2x128xf32> -> vector<2x128xf32>
    %486 = arith.addf %483, %485 : vector<2x128xf32>
    %487 = vector.extract_strided_slice %486 {offsets = [0, 0], sizes = [2, 32], strides = [1, 1]} : vector<2x128xf32> to vector<2x32xf32>
    %488 = arith.negf %487 : vector<2x32xf32>
    %489 = math.exp %488 : vector<2x32xf32>
    %cst_80 = arith.constant 1.000000e+00 : f32
    %490 = vector.broadcast %cst_80 : f32 to vector<2x32xf32>
    %491 = arith.addf %490, %489 : vector<2x32xf32>
    %492 = arith.divf %490, %491 : vector<2x32xf32>
    %493 = vector.extract_strided_slice %486 {offsets = [0, 32], sizes = [2, 32], strides = [1, 1]} : vector<2x128xf32> to vector<2x32xf32>
    %494 = arith.negf %493 : vector<2x32xf32>
    %495 = math.exp %494 : vector<2x32xf32>
    %cst_81 = arith.constant 1.000000e+00 : f32
    %496 = vector.broadcast %cst_81 : f32 to vector<2x32xf32>
    %497 = arith.addf %496, %495 : vector<2x32xf32>
    %498 = arith.divf %496, %497 : vector<2x32xf32>
    %499 = vector.extract_strided_slice %486 {offsets = [0, 64], sizes = [2, 32], strides = [1, 1]} : vector<2x128xf32> to vector<2x32xf32>
    %500 = math.tanh %499 : vector<2x32xf32>
    %501 = vector.extract_strided_slice %486 {offsets = [0, 96], sizes = [2, 32], strides = [1, 1]} : vector<2x128xf32> to vector<2x32xf32>
    %502 = arith.negf %501 : vector<2x32xf32>
    %503 = math.exp %502 : vector<2x32xf32>
    %cst_82 = arith.constant 1.000000e+00 : f32
    %504 = vector.broadcast %cst_82 : f32 to vector<2x32xf32>
    %505 = arith.addf %504, %503 : vector<2x32xf32>
    %506 = arith.divf %504, %505 : vector<2x32xf32>
    %507 = arith.mulf %498, %479 : vector<2x32xf32>
    %508 = arith.mulf %492, %500 : vector<2x32xf32>
    %509 = arith.addf %507, %508 : vector<2x32xf32>
    %510 = math.tanh %509 : vector<2x32xf32>
    %511 = arith.mulf %506, %510 : vector<2x32xf32>
    %512 = vector.shape_cast %301 : vector<2x32xf32> to vector<2x1x32xf32>
    %513 = vector.shape_cast %331 : vector<2x32xf32> to vector<2x1x32xf32>
    %514 = vector.shape_cast %361 : vector<2x32xf32> to vector<2x1x32xf32>
    %515 = vector.shape_cast %391 : vector<2x32xf32> to vector<2x1x32xf32>
    %516 = vector.shape_cast %421 : vector<2x32xf32> to vector<2x1x32xf32>
    %517 = vector.shape_cast %451 : vector<2x32xf32> to vector<2x1x32xf32>
    %518 = vector.shape_cast %481 : vector<2x32xf32> to vector<2x1x32xf32>
    %519 = vector.shape_cast %511 : vector<2x32xf32> to vector<2x1x32xf32>
    %520 = tpu.concatenate %512, %513, %514, %515, %516, %517, %518, %519 in 1 : vector<2x1x32xf32>, vector<2x1x32xf32>, vector<2x1x32xf32>, vector<2x1x32xf32>, vector<2x1x32xf32>, vector<2x1x32xf32>, vector<2x1x32xf32>, vector<2x1x32xf32> -> vector<2x8x32xf32>
    %521 = vector.shape_cast %520 : vector<2x8x32xf32> to vector<16x32xf32>
    %c0_83 = arith.constant 0 : index
    %c0_84 = arith.constant 0 : index
    %522 = vector.load %arg7[%c0_83, %c0_84] : memref<32x96xbf16, #tpu.memory_space<vmem>>, vector<32x96xbf16>
    %523 = arith.truncf %521 : vector<16x32xf32> to vector<16x32xbf16>
    %cst_85 = arith.constant dense<0.000000e+00> : vector<16x96xf32>
    %524 = tpu.matmul %523, %522, %cst_85 {dimension_numbers = #tpu.dot_dimension_numbers<[1], [0], [0], [1], [0, 0, 1, 1], [], []>} : vector<16x32xbf16>, vector<32x96xbf16>, vector<16x96xf32> -> vector<16x96xf32>
    %c0_86 = arith.constant 0 : index
    %c0_87 = arith.constant 0 : index
    %525 = vector.load %arg8[%c0_86, %c0_87] : memref<1x96xf32, #tpu.memory_space<vmem>>, vector<1x96xf32>
    %526 = vector.broadcast %525 : vector<1x96xf32> to vector<16x96xf32>
    %527 = arith.addf %524, %526 : vector<16x96xf32>
    %528 = vector.shape_cast %527 : vector<16x96xf32> to vector<2x8x96xf32>
    %529 = vector.extract_strided_slice %528 {offsets = [0, 0, 0], sizes = [2, 8, 32], strides = [1, 1, 1]} : vector<2x8x96xf32> to vector<2x8x32xf32>
    %530 = vector.extract_strided_slice %528 {offsets = [0, 0, 32], sizes = [2, 8, 32], strides = [1, 1, 1]} : vector<2x8x96xf32> to vector<2x8x32xf32>
    %531 = vector.extract_strided_slice %528 {offsets = [0, 0, 64], sizes = [2, 8, 32], strides = [1, 1, 1]} : vector<2x8x96xf32> to vector<2x8x32xf32>
    %c0_88 = arith.constant 0 : index
    %c0_89 = arith.constant 0 : index
    %532 = vector.load %arg9[%c0_88, %c0_89] : memref<32x32xf32, #tpu.memory_space<vmem>>, vector<32x32xf32>
    %cst_90 = arith.constant 0.000000e+00 : f32
    %533 = vector.broadcast %cst_90 : f32 to vector<16x32xf32>
    %534 = vector.extract_strided_slice %529 {offsets = [0, 0, 0], sizes = [2, 8, 8], strides = [1, 1, 1]} : vector<2x8x32xf32> to vector<2x8x8xf32>
    %535 = arith.truncf %534 : vector<2x8x8xf32> to vector<2x8x8xbf16>
    %536 = vector.extract_strided_slice %530 {offsets = [0, 0, 0], sizes = [2, 8, 8], strides = [1, 1, 1]} : vector<2x8x32xf32> to vector<2x8x8xf32>
    %537 = arith.truncf %536 : vector<2x8x8xf32> to vector<2x8x8xbf16>
    %538 = vector.extract_strided_slice %531 {offsets = [0, 0, 0], sizes = [2, 8, 8], strides = [1, 1, 1]} : vector<2x8x32xf32> to vector<2x8x8xf32>
    %539 = arith.truncf %538 : vector<2x8x8xf32> to vector<2x8x8xbf16>
    "tpu.trace_start"() <{level = 10 : i32, message = "bqd,bkd->bqk"}> : () -> ()
    %cst_91 = arith.constant dense<0.000000e+00> : vector<2x8x8xf32>
    %540 = tpu.matmul %535, %537, %cst_91 {dimension_numbers = #tpu.dot_dimension_numbers<[2], [2], [1], [1], [0, 0, 0, 1, 1, 1], [0], [0]>} : vector<2x8x8xbf16>, vector<2x8x8xbf16>, vector<2x8x8xf32> -> vector<2x8x8xf32>
    "tpu.trace_stop"() : () -> ()
    %cst_92 = arith.constant 0.353553385 : f32
    %541 = vector.broadcast %cst_92 : f32 to vector<2x8x8xf32>
    %542 = arith.mulf %540, %541 : vector<2x8x8xf32>
    %cst_93 = arith.constant dense<0xFF800000> : vector<2x8xf32>
    %543 = vector.multi_reduction <maximumf>, %542, %cst_93 [2] : vector<2x8x8xf32> to vector<2x8xf32>
    %544 = vector.shape_cast %543 : vector<2x8xf32> to vector<2x8x1xf32>
    %545 = vector.broadcast %544 : vector<2x8x1xf32> to vector<2x8x8xf32>
    %546 = arith.subf %542, %545 : vector<2x8x8xf32>
    %547 = math.exp %546 : vector<2x8x8xf32>
    %cst_94 = arith.constant dense<0.000000e+00> : vector<2x8xf32>
    %548 = vector.multi_reduction <add>, %547, %cst_94 [2] : vector<2x8x8xf32> to vector<2x8xf32>
    %549 = vector.shape_cast %548 : vector<2x8xf32> to vector<2x8x1xf32>
    %550 = tpu.reciprocal %549 {approx = true} : vector<2x8x1xf32> -> vector<2x8x1xf32>
    %551 = vector.broadcast %550 : vector<2x8x1xf32> to vector<2x8x8xf32>
    %552 = arith.mulf %547, %551 : vector<2x8x8xf32>
    %553 = arith.truncf %552 : vector<2x8x8xf32> to vector<2x8x8xbf16>
    "tpu.trace_start"() <{level = 10 : i32, message = "bqk,bkd->bqd"}> : () -> ()
    %cst_95 = arith.constant dense<0.000000e+00> : vector<2x8x8xf32>
    %554 = tpu.matmul %553, %539, %cst_95 {dimension_numbers = #tpu.dot_dimension_numbers<[2], [1], [1], [2], [0, 0, 0, 1, 1, 2], [0], [0]>} : vector<2x8x8xbf16>, vector<2x8x8xbf16>, vector<2x8x8xf32> -> vector<2x8x8xf32>
    "tpu.trace_stop"() : () -> ()
    %555 = vector.shape_cast %554 : vector<2x8x8xf32> to vector<16x8xf32>
    %556 = vector.extract_strided_slice %532 {offsets = [0, 0], sizes = [8, 32], strides = [1, 1]} : vector<32x32xf32> to vector<8x32xf32>
    %557 = arith.truncf %555 : vector<16x8xf32> to vector<16x8xbf16>
    %558 = arith.truncf %556 : vector<8x32xf32> to vector<8x32xbf16>
    %cst_96 = arith.constant dense<0.000000e+00> : vector<16x32xf32>
    %559 = tpu.matmul %557, %558, %cst_96 {dimension_numbers = #tpu.dot_dimension_numbers<[1], [0], [0], [1], [0, 0, 1, 1], [], []>} : vector<16x8xbf16>, vector<8x32xbf16>, vector<16x32xf32> -> vector<16x32xf32>
    %560 = arith.addf %533, %559 : vector<16x32xf32>
    %561 = vector.extract_strided_slice %529 {offsets = [0, 0, 8], sizes = [2, 8, 8], strides = [1, 1, 1]} : vector<2x8x32xf32> to vector<2x8x8xf32>
    %562 = arith.truncf %561 : vector<2x8x8xf32> to vector<2x8x8xbf16>
    %563 = vector.extract_strided_slice %530 {offsets = [0, 0, 8], sizes = [2, 8, 8], strides = [1, 1, 1]} : vector<2x8x32xf32> to vector<2x8x8xf32>
    %564 = arith.truncf %563 : vector<2x8x8xf32> to vector<2x8x8xbf16>
    %565 = vector.extract_strided_slice %531 {offsets = [0, 0, 8], sizes = [2, 8, 8], strides = [1, 1, 1]} : vector<2x8x32xf32> to vector<2x8x8xf32>
    %566 = arith.truncf %565 : vector<2x8x8xf32> to vector<2x8x8xbf16>
    "tpu.trace_start"() <{level = 10 : i32, message = "bqd,bkd->bqk"}> : () -> ()
    %cst_97 = arith.constant dense<0.000000e+00> : vector<2x8x8xf32>
    %567 = tpu.matmul %562, %564, %cst_97 {dimension_numbers = #tpu.dot_dimension_numbers<[2], [2], [1], [1], [0, 0, 0, 1, 1, 1], [0], [0]>} : vector<2x8x8xbf16>, vector<2x8x8xbf16>, vector<2x8x8xf32> -> vector<2x8x8xf32>
    "tpu.trace_stop"() : () -> ()
    %cst_98 = arith.constant 0.353553385 : f32
    %568 = vector.broadcast %cst_98 : f32 to vector<2x8x8xf32>
    %569 = arith.mulf %567, %568 : vector<2x8x8xf32>
    %cst_99 = arith.constant dense<0xFF800000> : vector<2x8xf32>
    %570 = vector.multi_reduction <maximumf>, %569, %cst_99 [2] : vector<2x8x8xf32> to vector<2x8xf32>
    %571 = vector.shape_cast %570 : vector<2x8xf32> to vector<2x8x1xf32>
    %572 = vector.broadcast %571 : vector<2x8x1xf32> to vector<2x8x8xf32>
    %573 = arith.subf %569, %572 : vector<2x8x8xf32>
    %574 = math.exp %573 : vector<2x8x8xf32>
    %cst_100 = arith.constant dense<0.000000e+00> : vector<2x8xf32>
    %575 = vector.multi_reduction <add>, %574, %cst_100 [2] : vector<2x8x8xf32> to vector<2x8xf32>
    %576 = vector.shape_cast %575 : vector<2x8xf32> to vector<2x8x1xf32>
    %577 = tpu.reciprocal %576 {approx = true} : vector<2x8x1xf32> -> vector<2x8x1xf32>
    %578 = vector.broadcast %577 : vector<2x8x1xf32> to vector<2x8x8xf32>
    %579 = arith.mulf %574, %578 : vector<2x8x8xf32>
    %580 = arith.truncf %579 : vector<2x8x8xf32> to vector<2x8x8xbf16>
    "tpu.trace_start"() <{level = 10 : i32, message = "bqk,bkd->bqd"}> : () -> ()
    %cst_101 = arith.constant dense<0.000000e+00> : vector<2x8x8xf32>
    %581 = tpu.matmul %580, %566, %cst_101 {dimension_numbers = #tpu.dot_dimension_numbers<[2], [1], [1], [2], [0, 0, 0, 1, 1, 2], [0], [0]>} : vector<2x8x8xbf16>, vector<2x8x8xbf16>, vector<2x8x8xf32> -> vector<2x8x8xf32>
    "tpu.trace_stop"() : () -> ()
    %582 = vector.shape_cast %581 : vector<2x8x8xf32> to vector<16x8xf32>
    %583 = vector.extract_strided_slice %532 {offsets = [8, 0], sizes = [8, 32], strides = [1, 1]} : vector<32x32xf32> to vector<8x32xf32>
    %584 = arith.truncf %582 : vector<16x8xf32> to vector<16x8xbf16>
    %585 = arith.truncf %583 : vector<8x32xf32> to vector<8x32xbf16>
    %cst_102 = arith.constant dense<0.000000e+00> : vector<16x32xf32>
    %586 = tpu.matmul %584, %585, %cst_102 {dimension_numbers = #tpu.dot_dimension_numbers<[1], [0], [0], [1], [0, 0, 1, 1], [], []>} : vector<16x8xbf16>, vector<8x32xbf16>, vector<16x32xf32> -> vector<16x32xf32>
    %587 = arith.addf %560, %586 : vector<16x32xf32>
    %588 = vector.extract_strided_slice %529 {offsets = [0, 0, 16], sizes = [2, 8, 8], strides = [1, 1, 1]} : vector<2x8x32xf32> to vector<2x8x8xf32>
    %589 = arith.truncf %588 : vector<2x8x8xf32> to vector<2x8x8xbf16>
    %590 = vector.extract_strided_slice %530 {offsets = [0, 0, 16], sizes = [2, 8, 8], strides = [1, 1, 1]} : vector<2x8x32xf32> to vector<2x8x8xf32>
    %591 = arith.truncf %590 : vector<2x8x8xf32> to vector<2x8x8xbf16>
    %592 = vector.extract_strided_slice %531 {offsets = [0, 0, 16], sizes = [2, 8, 8], strides = [1, 1, 1]} : vector<2x8x32xf32> to vector<2x8x8xf32>
    %593 = arith.truncf %592 : vector<2x8x8xf32> to vector<2x8x8xbf16>
    "tpu.trace_start"() <{level = 10 : i32, message = "bqd,bkd->bqk"}> : () -> ()
    %cst_103 = arith.constant dense<0.000000e+00> : vector<2x8x8xf32>
    %594 = tpu.matmul %589, %591, %cst_103 {dimension_numbers = #tpu.dot_dimension_numbers<[2], [2], [1], [1], [0, 0, 0, 1, 1, 1], [0], [0]>} : vector<2x8x8xbf16>, vector<2x8x8xbf16>, vector<2x8x8xf32> -> vector<2x8x8xf32>
    "tpu.trace_stop"() : () -> ()
    %cst_104 = arith.constant 0.353553385 : f32
    %595 = vector.broadcast %cst_104 : f32 to vector<2x8x8xf32>
    %596 = arith.mulf %594, %595 : vector<2x8x8xf32>
    %cst_105 = arith.constant dense<0xFF800000> : vector<2x8xf32>
    %597 = vector.multi_reduction <maximumf>, %596, %cst_105 [2] : vector<2x8x8xf32> to vector<2x8xf32>
    %598 = vector.shape_cast %597 : vector<2x8xf32> to vector<2x8x1xf32>
    %599 = vector.broadcast %598 : vector<2x8x1xf32> to vector<2x8x8xf32>
    %600 = arith.subf %596, %599 : vector<2x8x8xf32>
    %601 = math.exp %600 : vector<2x8x8xf32>
    %cst_106 = arith.constant dense<0.000000e+00> : vector<2x8xf32>
    %602 = vector.multi_reduction <add>, %601, %cst_106 [2] : vector<2x8x8xf32> to vector<2x8xf32>
    %603 = vector.shape_cast %602 : vector<2x8xf32> to vector<2x8x1xf32>
    %604 = tpu.reciprocal %603 {approx = true} : vector<2x8x1xf32> -> vector<2x8x1xf32>
    %605 = vector.broadcast %604 : vector<2x8x1xf32> to vector<2x8x8xf32>
    %606 = arith.mulf %601, %605 : vector<2x8x8xf32>
    %607 = arith.truncf %606 : vector<2x8x8xf32> to vector<2x8x8xbf16>
    "tpu.trace_start"() <{level = 10 : i32, message = "bqk,bkd->bqd"}> : () -> ()
    %cst_107 = arith.constant dense<0.000000e+00> : vector<2x8x8xf32>
    %608 = tpu.matmul %607, %593, %cst_107 {dimension_numbers = #tpu.dot_dimension_numbers<[2], [1], [1], [2], [0, 0, 0, 1, 1, 2], [0], [0]>} : vector<2x8x8xbf16>, vector<2x8x8xbf16>, vector<2x8x8xf32> -> vector<2x8x8xf32>
    "tpu.trace_stop"() : () -> ()
    %609 = vector.shape_cast %608 : vector<2x8x8xf32> to vector<16x8xf32>
    %610 = vector.extract_strided_slice %532 {offsets = [16, 0], sizes = [8, 32], strides = [1, 1]} : vector<32x32xf32> to vector<8x32xf32>
    %611 = arith.truncf %609 : vector<16x8xf32> to vector<16x8xbf16>
    %612 = arith.truncf %610 : vector<8x32xf32> to vector<8x32xbf16>
    %cst_108 = arith.constant dense<0.000000e+00> : vector<16x32xf32>
    %613 = tpu.matmul %611, %612, %cst_108 {dimension_numbers = #tpu.dot_dimension_numbers<[1], [0], [0], [1], [0, 0, 1, 1], [], []>} : vector<16x8xbf16>, vector<8x32xbf16>, vector<16x32xf32> -> vector<16x32xf32>
    %614 = arith.addf %587, %613 : vector<16x32xf32>
    %615 = vector.extract_strided_slice %529 {offsets = [0, 0, 24], sizes = [2, 8, 8], strides = [1, 1, 1]} : vector<2x8x32xf32> to vector<2x8x8xf32>
    %616 = arith.truncf %615 : vector<2x8x8xf32> to vector<2x8x8xbf16>
    %617 = vector.extract_strided_slice %530 {offsets = [0, 0, 24], sizes = [2, 8, 8], strides = [1, 1, 1]} : vector<2x8x32xf32> to vector<2x8x8xf32>
    %618 = arith.truncf %617 : vector<2x8x8xf32> to vector<2x8x8xbf16>
    %619 = vector.extract_strided_slice %531 {offsets = [0, 0, 24], sizes = [2, 8, 8], strides = [1, 1, 1]} : vector<2x8x32xf32> to vector<2x8x8xf32>
    %620 = arith.truncf %619 : vector<2x8x8xf32> to vector<2x8x8xbf16>
    "tpu.trace_start"() <{level = 10 : i32, message = "bqd,bkd->bqk"}> : () -> ()
    %cst_109 = arith.constant dense<0.000000e+00> : vector<2x8x8xf32>
    %621 = tpu.matmul %616, %618, %cst_109 {dimension_numbers = #tpu.dot_dimension_numbers<[2], [2], [1], [1], [0, 0, 0, 1, 1, 1], [0], [0]>} : vector<2x8x8xbf16>, vector<2x8x8xbf16>, vector<2x8x8xf32> -> vector<2x8x8xf32>
    "tpu.trace_stop"() : () -> ()
    %cst_110 = arith.constant 0.353553385 : f32
    %622 = vector.broadcast %cst_110 : f32 to vector<2x8x8xf32>
    %623 = arith.mulf %621, %622 : vector<2x8x8xf32>
    %cst_111 = arith.constant dense<0xFF800000> : vector<2x8xf32>
    %624 = vector.multi_reduction <maximumf>, %623, %cst_111 [2] : vector<2x8x8xf32> to vector<2x8xf32>
    %625 = vector.shape_cast %624 : vector<2x8xf32> to vector<2x8x1xf32>
    %626 = vector.broadcast %625 : vector<2x8x1xf32> to vector<2x8x8xf32>
    %627 = arith.subf %623, %626 : vector<2x8x8xf32>
    %628 = math.exp %627 : vector<2x8x8xf32>
    %cst_112 = arith.constant dense<0.000000e+00> : vector<2x8xf32>
    %629 = vector.multi_reduction <add>, %628, %cst_112 [2] : vector<2x8x8xf32> to vector<2x8xf32>
    %630 = vector.shape_cast %629 : vector<2x8xf32> to vector<2x8x1xf32>
    %631 = tpu.reciprocal %630 {approx = true} : vector<2x8x1xf32> -> vector<2x8x1xf32>
    %632 = vector.broadcast %631 : vector<2x8x1xf32> to vector<2x8x8xf32>
    %633 = arith.mulf %628, %632 : vector<2x8x8xf32>
    %634 = arith.truncf %633 : vector<2x8x8xf32> to vector<2x8x8xbf16>
    "tpu.trace_start"() <{level = 10 : i32, message = "bqk,bkd->bqd"}> : () -> ()
    %cst_113 = arith.constant dense<0.000000e+00> : vector<2x8x8xf32>
    %635 = tpu.matmul %634, %620, %cst_113 {dimension_numbers = #tpu.dot_dimension_numbers<[2], [1], [1], [2], [0, 0, 0, 1, 1, 2], [0], [0]>} : vector<2x8x8xbf16>, vector<2x8x8xbf16>, vector<2x8x8xf32> -> vector<2x8x8xf32>
    "tpu.trace_stop"() : () -> ()
    %636 = vector.shape_cast %635 : vector<2x8x8xf32> to vector<16x8xf32>
    %637 = vector.extract_strided_slice %532 {offsets = [24, 0], sizes = [8, 32], strides = [1, 1]} : vector<32x32xf32> to vector<8x32xf32>
    %638 = arith.truncf %636 : vector<16x8xf32> to vector<16x8xbf16>
    %639 = arith.truncf %637 : vector<8x32xf32> to vector<8x32xbf16>
    %cst_114 = arith.constant dense<0.000000e+00> : vector<16x32xf32>
    %640 = tpu.matmul %638, %639, %cst_114 {dimension_numbers = #tpu.dot_dimension_numbers<[1], [0], [0], [1], [0, 0, 1, 1], [], []>} : vector<16x8xbf16>, vector<8x32xbf16>, vector<16x32xf32> -> vector<16x32xf32>
    %641 = arith.addf %614, %640 : vector<16x32xf32>
    %c0_115 = arith.constant 0 : index
    %c0_116 = arith.constant 0 : index
    %642 = vector.load %arg10[%c0_115, %c0_116] : memref<1x32xf32, #tpu.memory_space<vmem>>, vector<1x32xf32>
    %643 = vector.broadcast %642 : vector<1x32xf32> to vector<16x32xf32>
    %644 = arith.addf %641, %643 : vector<16x32xf32>
    %645 = arith.addf %521, %644 : vector<16x32xf32>
    %c0_117 = arith.constant 0 : index
    %c0_118 = arith.constant 0 : index
    %646 = vector.load %arg11[%c0_117, %c0_118] : memref<1x32xf32, #tpu.memory_space<vmem>>, vector<1x32xf32>
    %c0_119 = arith.constant 0 : index
    %c0_120 = arith.constant 0 : index
    %647 = vector.load %arg12[%c0_119, %c0_120] : memref<1x32xf32, #tpu.memory_space<vmem>>, vector<1x32xf32>
    %cst_121 = arith.constant dense<0.000000e+00> : vector<16xf32>
    %648 = vector.multi_reduction <add>, %645, %cst_121 [1] : vector<16x32xf32> to vector<16xf32>
    %649 = vector.shape_cast %648 : vector<16xf32> to vector<16x1xf32>
    %cst_122 = arith.constant 3.200000e+01 : f32
    %650 = vector.broadcast %cst_122 : f32 to vector<16x1xf32>
    %651 = arith.divf %649, %650 : vector<16x1xf32>
    %652 = vector.broadcast %651 : vector<16x1xf32> to vector<16x32xf32>
    %653 = arith.subf %645, %652 : vector<16x32xf32>
    %654 = arith.mulf %653, %653 : vector<16x32xf32>
    %cst_123 = arith.constant dense<0.000000e+00> : vector<16xf32>
    %655 = vector.multi_reduction <add>, %654, %cst_123 [1] : vector<16x32xf32> to vector<16xf32>
    %656 = vector.shape_cast %655 : vector<16xf32> to vector<16x1xf32>
    %cst_124 = arith.constant 3.200000e+01 : f32
    %657 = vector.broadcast %cst_124 : f32 to vector<16x1xf32>
    %658 = arith.divf %656, %657 : vector<16x1xf32>
    %659 = vector.broadcast %651 : vector<16x1xf32> to vector<16x32xf32>
    %660 = arith.subf %645, %659 : vector<16x32xf32>
    %cst_125 = arith.constant 9.99999974E-6 : f32
    %661 = vector.broadcast %cst_125 : f32 to vector<16x1xf32>
    %662 = arith.addf %658, %661 : vector<16x1xf32>
    %663 = math.rsqrt %662 : vector<16x1xf32>
    %664 = vector.broadcast %663 : vector<16x1xf32> to vector<16x32xf32>
    %665 = arith.mulf %660, %664 : vector<16x32xf32>
    %666 = vector.broadcast %646 : vector<1x32xf32> to vector<16x32xf32>
    %667 = arith.mulf %665, %666 : vector<16x32xf32>
    %668 = vector.broadcast %647 : vector<1x32xf32> to vector<16x32xf32>
    %669 = arith.addf %667, %668 : vector<16x32xf32>
    %c0_126 = arith.constant 0 : index
    %c0_127 = arith.constant 0 : index
    %670 = vector.load %arg13[%c0_126, %c0_127] : memref<32x2048xbf16, #tpu.memory_space<vmem>>, vector<32x2048xbf16>
    %671 = arith.truncf %669 : vector<16x32xf32> to vector<16x32xbf16>
    %cst_128 = arith.constant dense<0.000000e+00> : vector<16x2048xf32>
    %672 = tpu.matmul %671, %670, %cst_128 {dimension_numbers = #tpu.dot_dimension_numbers<[1], [0], [0], [1], [0, 0, 1, 1], [], []>} : vector<16x32xbf16>, vector<32x2048xbf16>, vector<16x2048xf32> -> vector<16x2048xf32>
    %c0_129 = arith.constant 0 : index
    %c0_130 = arith.constant 0 : index
    %673 = vector.load %arg14[%c0_129, %c0_130] : memref<1x2048xf32, #tpu.memory_space<vmem>>, vector<1x2048xf32>
    %674 = vector.broadcast %673 : vector<1x2048xf32> to vector<16x2048xf32>
    %675 = arith.addf %672, %674 : vector<16x2048xf32>
    %cst_131 = arith.constant 0.000000e+00 : f32
    %676 = vector.broadcast %cst_131 : f32 to vector<16x2048xf32>
    %677 = arith.maximumf %675, %676 : vector<16x2048xf32>
    %c0_132 = arith.constant 0 : index
    %c0_133 = arith.constant 0 : index
    %678 = vector.load %arg15[%c0_132, %c0_133] : memref<2048x32xbf16, #tpu.memory_space<vmem>>, vector<2048x32xbf16>
    %679 = arith.truncf %677 : vector<16x2048xf32> to vector<16x2048xbf16>
    %cst_134 = arith.constant dense<0.000000e+00> : vector<16x32xf32>
    %680 = tpu.matmul %679, %678, %cst_134 {dimension_numbers = #tpu.dot_dimension_numbers<[1], [0], [0], [1], [0, 0, 1, 1], [], []>} : vector<16x2048xbf16>, vector<2048x32xbf16>, vector<16x32xf32> -> vector<16x32xf32>
    %c0_135 = arith.constant 0 : index
    %c0_136 = arith.constant 0 : index
    %681 = vector.load %arg16[%c0_135, %c0_136] : memref<1x32xf32, #tpu.memory_space<vmem>>, vector<1x32xf32>
    %682 = vector.broadcast %681 : vector<1x32xf32> to vector<16x32xf32>
    %683 = arith.addf %680, %682 : vector<16x32xf32>
    %684 = arith.addf %669, %683 : vector<16x32xf32>
    %c0_137 = arith.constant 0 : index
    %c0_138 = arith.constant 0 : index
    %685 = vector.load %arg17[%c0_137, %c0_138] : memref<1x32xf32, #tpu.memory_space<vmem>>, vector<1x32xf32>
    %c0_139 = arith.constant 0 : index
    %c0_140 = arith.constant 0 : index
    %686 = vector.load %arg18[%c0_139, %c0_140] : memref<1x32xf32, #tpu.memory_space<vmem>>, vector<1x32xf32>
    %cst_141 = arith.constant dense<0.000000e+00> : vector<16xf32>
    %687 = vector.multi_reduction <add>, %684, %cst_141 [1] : vector<16x32xf32> to vector<16xf32>
    %688 = vector.shape_cast %687 : vector<16xf32> to vector<16x1xf32>
    %cst_142 = arith.constant 3.200000e+01 : f32
    %689 = vector.broadcast %cst_142 : f32 to vector<16x1xf32>
    %690 = arith.divf %688, %689 : vector<16x1xf32>
    %691 = vector.broadcast %690 : vector<16x1xf32> to vector<16x32xf32>
    %692 = arith.subf %684, %691 : vector<16x32xf32>
    %693 = arith.mulf %692, %692 : vector<16x32xf32>
    %cst_143 = arith.constant dense<0.000000e+00> : vector<16xf32>
    %694 = vector.multi_reduction <add>, %693, %cst_143 [1] : vector<16x32xf32> to vector<16xf32>
    %695 = vector.shape_cast %694 : vector<16xf32> to vector<16x1xf32>
    %cst_144 = arith.constant 3.200000e+01 : f32
    %696 = vector.broadcast %cst_144 : f32 to vector<16x1xf32>
    %697 = arith.divf %695, %696 : vector<16x1xf32>
    %698 = vector.broadcast %690 : vector<16x1xf32> to vector<16x32xf32>
    %699 = arith.subf %684, %698 : vector<16x32xf32>
    %cst_145 = arith.constant 9.99999974E-6 : f32
    %700 = vector.broadcast %cst_145 : f32 to vector<16x1xf32>
    %701 = arith.addf %697, %700 : vector<16x1xf32>
    %702 = math.rsqrt %701 : vector<16x1xf32>
    %703 = vector.broadcast %702 : vector<16x1xf32> to vector<16x32xf32>
    %704 = arith.mulf %699, %703 : vector<16x32xf32>
    %705 = vector.broadcast %685 : vector<1x32xf32> to vector<16x32xf32>
    %706 = arith.mulf %704, %705 : vector<16x32xf32>
    %707 = vector.broadcast %686 : vector<1x32xf32> to vector<16x32xf32>
    %708 = arith.addf %706, %707 : vector<16x32xf32>
    %709 = vector.shape_cast %708 : vector<16x32xf32> to vector<2x8x32xf32>
    %710 = vector.shape_cast %709 : vector<2x8x32xf32> to vector<16x32xf32>
    %c0_146 = arith.constant 0 : index
    %c0_147 = arith.constant 0 : index
    %711 = vector.load %arg19[%c0_146, %c0_147] : memref<32x96xbf16, #tpu.memory_space<vmem>>, vector<32x96xbf16>
    %712 = arith.truncf %710 : vector<16x32xf32> to vector<16x32xbf16>
    %cst_148 = arith.constant dense<0.000000e+00> : vector<16x96xf32>
    %713 = tpu.matmul %712, %711, %cst_148 {dimension_numbers = #tpu.dot_dimension_numbers<[1], [0], [0], [1], [0, 0, 1, 1], [], []>} : vector<16x32xbf16>, vector<32x96xbf16>, vector<16x96xf32> -> vector<16x96xf32>
    %c0_149 = arith.constant 0 : index
    %c0_150 = arith.constant 0 : index
    %714 = vector.load %arg20[%c0_149, %c0_150] : memref<1x96xf32, #tpu.memory_space<vmem>>, vector<1x96xf32>
    %715 = vector.broadcast %714 : vector<1x96xf32> to vector<16x96xf32>
    %716 = arith.addf %713, %715 : vector<16x96xf32>
    %717 = vector.shape_cast %716 : vector<16x96xf32> to vector<2x8x96xf32>
    %718 = vector.extract_strided_slice %717 {offsets = [0, 0, 0], sizes = [2, 8, 32], strides = [1, 1, 1]} : vector<2x8x96xf32> to vector<2x8x32xf32>
    %719 = vector.extract_strided_slice %717 {offsets = [0, 0, 32], sizes = [2, 8, 32], strides = [1, 1, 1]} : vector<2x8x96xf32> to vector<2x8x32xf32>
    %720 = vector.extract_strided_slice %717 {offsets = [0, 0, 64], sizes = [2, 8, 32], strides = [1, 1, 1]} : vector<2x8x96xf32> to vector<2x8x32xf32>
    %c0_151 = arith.constant 0 : index
    %c0_152 = arith.constant 0 : index
    %721 = vector.load %arg21[%c0_151, %c0_152] : memref<32x32xf32, #tpu.memory_space<vmem>>, vector<32x32xf32>
    %cst_153 = arith.constant 0.000000e+00 : f32
    %722 = vector.broadcast %cst_153 : f32 to vector<16x32xf32>
    %723 = vector.extract_strided_slice %718 {offsets = [0, 0, 0], sizes = [2, 8, 8], strides = [1, 1, 1]} : vector<2x8x32xf32> to vector<2x8x8xf32>
    %724 = arith.truncf %723 : vector<2x8x8xf32> to vector<2x8x8xbf16>
    %725 = vector.extract_strided_slice %719 {offsets = [0, 0, 0], sizes = [2, 8, 8], strides = [1, 1, 1]} : vector<2x8x32xf32> to vector<2x8x8xf32>
    %726 = arith.truncf %725 : vector<2x8x8xf32> to vector<2x8x8xbf16>
    %727 = vector.extract_strided_slice %720 {offsets = [0, 0, 0], sizes = [2, 8, 8], strides = [1, 1, 1]} : vector<2x8x32xf32> to vector<2x8x8xf32>
    %728 = arith.truncf %727 : vector<2x8x8xf32> to vector<2x8x8xbf16>
    "tpu.trace_start"() <{level = 10 : i32, message = "bqd,bkd->bqk"}> : () -> ()
    %cst_154 = arith.constant dense<0.000000e+00> : vector<2x8x8xf32>
    %729 = tpu.matmul %724, %726, %cst_154 {dimension_numbers = #tpu.dot_dimension_numbers<[2], [2], [1], [1], [0, 0, 0, 1, 1, 1], [0], [0]>} : vector<2x8x8xbf16>, vector<2x8x8xbf16>, vector<2x8x8xf32> -> vector<2x8x8xf32>
    "tpu.trace_stop"() : () -> ()
    %cst_155 = arith.constant 0.353553385 : f32
    %730 = vector.broadcast %cst_155 : f32 to vector<2x8x8xf32>
    %731 = arith.mulf %729, %730 : vector<2x8x8xf32>
    %cst_156 = arith.constant dense<0xFF800000> : vector<2x8xf32>
    %732 = vector.multi_reduction <maximumf>, %731, %cst_156 [2] : vector<2x8x8xf32> to vector<2x8xf32>
    %733 = vector.shape_cast %732 : vector<2x8xf32> to vector<2x8x1xf32>
    %734 = vector.broadcast %733 : vector<2x8x1xf32> to vector<2x8x8xf32>
    %735 = arith.subf %731, %734 : vector<2x8x8xf32>
    %736 = math.exp %735 : vector<2x8x8xf32>
    %cst_157 = arith.constant dense<0.000000e+00> : vector<2x8xf32>
    %737 = vector.multi_reduction <add>, %736, %cst_157 [2] : vector<2x8x8xf32> to vector<2x8xf32>
    %738 = vector.shape_cast %737 : vector<2x8xf32> to vector<2x8x1xf32>
    %739 = tpu.reciprocal %738 {approx = true} : vector<2x8x1xf32> -> vector<2x8x1xf32>
    %740 = vector.broadcast %739 : vector<2x8x1xf32> to vector<2x8x8xf32>
    %741 = arith.mulf %736, %740 : vector<2x8x8xf32>
    %742 = arith.truncf %741 : vector<2x8x8xf32> to vector<2x8x8xbf16>
    "tpu.trace_start"() <{level = 10 : i32, message = "bqk,bkd->bqd"}> : () -> ()
    %cst_158 = arith.constant dense<0.000000e+00> : vector<2x8x8xf32>
    %743 = tpu.matmul %742, %728, %cst_158 {dimension_numbers = #tpu.dot_dimension_numbers<[2], [1], [1], [2], [0, 0, 0, 1, 1, 2], [0], [0]>} : vector<2x8x8xbf16>, vector<2x8x8xbf16>, vector<2x8x8xf32> -> vector<2x8x8xf32>
    "tpu.trace_stop"() : () -> ()
    %744 = vector.shape_cast %743 : vector<2x8x8xf32> to vector<16x8xf32>
    %745 = vector.extract_strided_slice %721 {offsets = [0, 0], sizes = [8, 32], strides = [1, 1]} : vector<32x32xf32> to vector<8x32xf32>
    %746 = arith.truncf %744 : vector<16x8xf32> to vector<16x8xbf16>
    %747 = arith.truncf %745 : vector<8x32xf32> to vector<8x32xbf16>
    %cst_159 = arith.constant dense<0.000000e+00> : vector<16x32xf32>
    %748 = tpu.matmul %746, %747, %cst_159 {dimension_numbers = #tpu.dot_dimension_numbers<[1], [0], [0], [1], [0, 0, 1, 1], [], []>} : vector<16x8xbf16>, vector<8x32xbf16>, vector<16x32xf32> -> vector<16x32xf32>
    %749 = arith.addf %722, %748 : vector<16x32xf32>
    %750 = vector.extract_strided_slice %718 {offsets = [0, 0, 8], sizes = [2, 8, 8], strides = [1, 1, 1]} : vector<2x8x32xf32> to vector<2x8x8xf32>
    %751 = arith.truncf %750 : vector<2x8x8xf32> to vector<2x8x8xbf16>
    %752 = vector.extract_strided_slice %719 {offsets = [0, 0, 8], sizes = [2, 8, 8], strides = [1, 1, 1]} : vector<2x8x32xf32> to vector<2x8x8xf32>
    %753 = arith.truncf %752 : vector<2x8x8xf32> to vector<2x8x8xbf16>
    %754 = vector.extract_strided_slice %720 {offsets = [0, 0, 8], sizes = [2, 8, 8], strides = [1, 1, 1]} : vector<2x8x32xf32> to vector<2x8x8xf32>
    %755 = arith.truncf %754 : vector<2x8x8xf32> to vector<2x8x8xbf16>
    "tpu.trace_start"() <{level = 10 : i32, message = "bqd,bkd->bqk"}> : () -> ()
    %cst_160 = arith.constant dense<0.000000e+00> : vector<2x8x8xf32>
    %756 = tpu.matmul %751, %753, %cst_160 {dimension_numbers = #tpu.dot_dimension_numbers<[2], [2], [1], [1], [0, 0, 0, 1, 1, 1], [0], [0]>} : vector<2x8x8xbf16>, vector<2x8x8xbf16>, vector<2x8x8xf32> -> vector<2x8x8xf32>
    "tpu.trace_stop"() : () -> ()
    %cst_161 = arith.constant 0.353553385 : f32
    %757 = vector.broadcast %cst_161 : f32 to vector<2x8x8xf32>
    %758 = arith.mulf %756, %757 : vector<2x8x8xf32>
    %cst_162 = arith.constant dense<0xFF800000> : vector<2x8xf32>
    %759 = vector.multi_reduction <maximumf>, %758, %cst_162 [2] : vector<2x8x8xf32> to vector<2x8xf32>
    %760 = vector.shape_cast %759 : vector<2x8xf32> to vector<2x8x1xf32>
    %761 = vector.broadcast %760 : vector<2x8x1xf32> to vector<2x8x8xf32>
    %762 = arith.subf %758, %761 : vector<2x8x8xf32>
    %763 = math.exp %762 : vector<2x8x8xf32>
    %cst_163 = arith.constant dense<0.000000e+00> : vector<2x8xf32>
    %764 = vector.multi_reduction <add>, %763, %cst_163 [2] : vector<2x8x8xf32> to vector<2x8xf32>
    %765 = vector.shape_cast %764 : vector<2x8xf32> to vector<2x8x1xf32>
    %766 = tpu.reciprocal %765 {approx = true} : vector<2x8x1xf32> -> vector<2x8x1xf32>
    %767 = vector.broadcast %766 : vector<2x8x1xf32> to vector<2x8x8xf32>
    %768 = arith.mulf %763, %767 : vector<2x8x8xf32>
    %769 = arith.truncf %768 : vector<2x8x8xf32> to vector<2x8x8xbf16>
    "tpu.trace_start"() <{level = 10 : i32, message = "bqk,bkd->bqd"}> : () -> ()
    %cst_164 = arith.constant dense<0.000000e+00> : vector<2x8x8xf32>
    %770 = tpu.matmul %769, %755, %cst_164 {dimension_numbers = #tpu.dot_dimension_numbers<[2], [1], [1], [2], [0, 0, 0, 1, 1, 2], [0], [0]>} : vector<2x8x8xbf16>, vector<2x8x8xbf16>, vector<2x8x8xf32> -> vector<2x8x8xf32>
    "tpu.trace_stop"() : () -> ()
    %771 = vector.shape_cast %770 : vector<2x8x8xf32> to vector<16x8xf32>
    %772 = vector.extract_strided_slice %721 {offsets = [8, 0], sizes = [8, 32], strides = [1, 1]} : vector<32x32xf32> to vector<8x32xf32>
    %773 = arith.truncf %771 : vector<16x8xf32> to vector<16x8xbf16>
    %774 = arith.truncf %772 : vector<8x32xf32> to vector<8x32xbf16>
    %cst_165 = arith.constant dense<0.000000e+00> : vector<16x32xf32>
    %775 = tpu.matmul %773, %774, %cst_165 {dimension_numbers = #tpu.dot_dimension_numbers<[1], [0], [0], [1], [0, 0, 1, 1], [], []>} : vector<16x8xbf16>, vector<8x32xbf16>, vector<16x32xf32> -> vector<16x32xf32>
    %776 = arith.addf %749, %775 : vector<16x32xf32>
    %777 = vector.extract_strided_slice %718 {offsets = [0, 0, 16], sizes = [2, 8, 8], strides = [1, 1, 1]} : vector<2x8x32xf32> to vector<2x8x8xf32>
    %778 = arith.truncf %777 : vector<2x8x8xf32> to vector<2x8x8xbf16>
    %779 = vector.extract_strided_slice %719 {offsets = [0, 0, 16], sizes = [2, 8, 8], strides = [1, 1, 1]} : vector<2x8x32xf32> to vector<2x8x8xf32>
    %780 = arith.truncf %779 : vector<2x8x8xf32> to vector<2x8x8xbf16>
    %781 = vector.extract_strided_slice %720 {offsets = [0, 0, 16], sizes = [2, 8, 8], strides = [1, 1, 1]} : vector<2x8x32xf32> to vector<2x8x8xf32>
    %782 = arith.truncf %781 : vector<2x8x8xf32> to vector<2x8x8xbf16>
    "tpu.trace_start"() <{level = 10 : i32, message = "bqd,bkd->bqk"}> : () -> ()
    %cst_166 = arith.constant dense<0.000000e+00> : vector<2x8x8xf32>
    %783 = tpu.matmul %778, %780, %cst_166 {dimension_numbers = #tpu.dot_dimension_numbers<[2], [2], [1], [1], [0, 0, 0, 1, 1, 1], [0], [0]>} : vector<2x8x8xbf16>, vector<2x8x8xbf16>, vector<2x8x8xf32> -> vector<2x8x8xf32>
    "tpu.trace_stop"() : () -> ()
    %cst_167 = arith.constant 0.353553385 : f32
    %784 = vector.broadcast %cst_167 : f32 to vector<2x8x8xf32>
    %785 = arith.mulf %783, %784 : vector<2x8x8xf32>
    %cst_168 = arith.constant dense<0xFF800000> : vector<2x8xf32>
    %786 = vector.multi_reduction <maximumf>, %785, %cst_168 [2] : vector<2x8x8xf32> to vector<2x8xf32>
    %787 = vector.shape_cast %786 : vector<2x8xf32> to vector<2x8x1xf32>
    %788 = vector.broadcast %787 : vector<2x8x1xf32> to vector<2x8x8xf32>
    %789 = arith.subf %785, %788 : vector<2x8x8xf32>
    %790 = math.exp %789 : vector<2x8x8xf32>
    %cst_169 = arith.constant dense<0.000000e+00> : vector<2x8xf32>
    %791 = vector.multi_reduction <add>, %790, %cst_169 [2] : vector<2x8x8xf32> to vector<2x8xf32>
    %792 = vector.shape_cast %791 : vector<2x8xf32> to vector<2x8x1xf32>
    %793 = tpu.reciprocal %792 {approx = true} : vector<2x8x1xf32> -> vector<2x8x1xf32>
    %794 = vector.broadcast %793 : vector<2x8x1xf32> to vector<2x8x8xf32>
    %795 = arith.mulf %790, %794 : vector<2x8x8xf32>
    %796 = arith.truncf %795 : vector<2x8x8xf32> to vector<2x8x8xbf16>
    "tpu.trace_start"() <{level = 10 : i32, message = "bqk,bkd->bqd"}> : () -> ()
    %cst_170 = arith.constant dense<0.000000e+00> : vector<2x8x8xf32>
    %797 = tpu.matmul %796, %782, %cst_170 {dimension_numbers = #tpu.dot_dimension_numbers<[2], [1], [1], [2], [0, 0, 0, 1, 1, 2], [0], [0]>} : vector<2x8x8xbf16>, vector<2x8x8xbf16>, vector<2x8x8xf32> -> vector<2x8x8xf32>
    "tpu.trace_stop"() : () -> ()
    %798 = vector.shape_cast %797 : vector<2x8x8xf32> to vector<16x8xf32>
    %799 = vector.extract_strided_slice %721 {offsets = [16, 0], sizes = [8, 32], strides = [1, 1]} : vector<32x32xf32> to vector<8x32xf32>
    %800 = arith.truncf %798 : vector<16x8xf32> to vector<16x8xbf16>
    %801 = arith.truncf %799 : vector<8x32xf32> to vector<8x32xbf16>
    %cst_171 = arith.constant dense<0.000000e+00> : vector<16x32xf32>
    %802 = tpu.matmul %800, %801, %cst_171 {dimension_numbers = #tpu.dot_dimension_numbers<[1], [0], [0], [1], [0, 0, 1, 1], [], []>} : vector<16x8xbf16>, vector<8x32xbf16>, vector<16x32xf32> -> vector<16x32xf32>
    %803 = arith.addf %776, %802 : vector<16x32xf32>
    %804 = vector.extract_strided_slice %718 {offsets = [0, 0, 24], sizes = [2, 8, 8], strides = [1, 1, 1]} : vector<2x8x32xf32> to vector<2x8x8xf32>
    %805 = arith.truncf %804 : vector<2x8x8xf32> to vector<2x8x8xbf16>
    %806 = vector.extract_strided_slice %719 {offsets = [0, 0, 24], sizes = [2, 8, 8], strides = [1, 1, 1]} : vector<2x8x32xf32> to vector<2x8x8xf32>
    %807 = arith.truncf %806 : vector<2x8x8xf32> to vector<2x8x8xbf16>
    %808 = vector.extract_strided_slice %720 {offsets = [0, 0, 24], sizes = [2, 8, 8], strides = [1, 1, 1]} : vector<2x8x32xf32> to vector<2x8x8xf32>
    %809 = arith.truncf %808 : vector<2x8x8xf32> to vector<2x8x8xbf16>
    "tpu.trace_start"() <{level = 10 : i32, message = "bqd,bkd->bqk"}> : () -> ()
    %cst_172 = arith.constant dense<0.000000e+00> : vector<2x8x8xf32>
    %810 = tpu.matmul %805, %807, %cst_172 {dimension_numbers = #tpu.dot_dimension_numbers<[2], [2], [1], [1], [0, 0, 0, 1, 1, 1], [0], [0]>} : vector<2x8x8xbf16>, vector<2x8x8xbf16>, vector<2x8x8xf32> -> vector<2x8x8xf32>
    "tpu.trace_stop"() : () -> ()
    %cst_173 = arith.constant 0.353553385 : f32
    %811 = vector.broadcast %cst_173 : f32 to vector<2x8x8xf32>
    %812 = arith.mulf %810, %811 : vector<2x8x8xf32>
    %cst_174 = arith.constant dense<0xFF800000> : vector<2x8xf32>
    %813 = vector.multi_reduction <maximumf>, %812, %cst_174 [2] : vector<2x8x8xf32> to vector<2x8xf32>
    %814 = vector.shape_cast %813 : vector<2x8xf32> to vector<2x8x1xf32>
    %815 = vector.broadcast %814 : vector<2x8x1xf32> to vector<2x8x8xf32>
    %816 = arith.subf %812, %815 : vector<2x8x8xf32>
    %817 = math.exp %816 : vector<2x8x8xf32>
    %cst_175 = arith.constant dense<0.000000e+00> : vector<2x8xf32>
    %818 = vector.multi_reduction <add>, %817, %cst_175 [2] : vector<2x8x8xf32> to vector<2x8xf32>
    %819 = vector.shape_cast %818 : vector<2x8xf32> to vector<2x8x1xf32>
    %820 = tpu.reciprocal %819 {approx = true} : vector<2x8x1xf32> -> vector<2x8x1xf32>
    %821 = vector.broadcast %820 : vector<2x8x1xf32> to vector<2x8x8xf32>
    %822 = arith.mulf %817, %821 : vector<2x8x8xf32>
    %823 = arith.truncf %822 : vector<2x8x8xf32> to vector<2x8x8xbf16>
    "tpu.trace_start"() <{level = 10 : i32, message = "bqk,bkd->bqd"}> : () -> ()
    %cst_176 = arith.constant dense<0.000000e+00> : vector<2x8x8xf32>
    %824 = tpu.matmul %823, %809, %cst_176 {dimension_numbers = #tpu.dot_dimension_numbers<[2], [1], [1], [2], [0, 0, 0, 1, 1, 2], [0], [0]>} : vector<2x8x8xbf16>, vector<2x8x8xbf16>, vector<2x8x8xf32> -> vector<2x8x8xf32>
    "tpu.trace_stop"() : () -> ()
    %825 = vector.shape_cast %824 : vector<2x8x8xf32> to vector<16x8xf32>
    %826 = vector.extract_strided_slice %721 {offsets = [24, 0], sizes = [8, 32], strides = [1, 1]} : vector<32x32xf32> to vector<8x32xf32>
    %827 = arith.truncf %825 : vector<16x8xf32> to vector<16x8xbf16>
    %828 = arith.truncf %826 : vector<8x32xf32> to vector<8x32xbf16>
    %cst_177 = arith.constant dense<0.000000e+00> : vector<16x32xf32>
    %829 = tpu.matmul %827, %828, %cst_177 {dimension_numbers = #tpu.dot_dimension_numbers<[1], [0], [0], [1], [0, 0, 1, 1], [], []>} : vector<16x8xbf16>, vector<8x32xbf16>, vector<16x32xf32> -> vector<16x32xf32>
    %830 = arith.addf %803, %829 : vector<16x32xf32>
    %c0_178 = arith.constant 0 : index
    %c0_179 = arith.constant 0 : index
    %831 = vector.load %arg22[%c0_178, %c0_179] : memref<1x32xf32, #tpu.memory_space<vmem>>, vector<1x32xf32>
    %832 = vector.broadcast %831 : vector<1x32xf32> to vector<16x32xf32>
    %833 = arith.addf %830, %832 : vector<16x32xf32>
    %834 = arith.addf %710, %833 : vector<16x32xf32>
    %c0_180 = arith.constant 0 : index
    %c0_181 = arith.constant 0 : index
    %835 = vector.load %arg23[%c0_180, %c0_181] : memref<1x32xf32, #tpu.memory_space<vmem>>, vector<1x32xf32>
    %c0_182 = arith.constant 0 : index
    %c0_183 = arith.constant 0 : index
    %836 = vector.load %arg24[%c0_182, %c0_183] : memref<1x32xf32, #tpu.memory_space<vmem>>, vector<1x32xf32>
    %cst_184 = arith.constant dense<0.000000e+00> : vector<16xf32>
    %837 = vector.multi_reduction <add>, %834, %cst_184 [1] : vector<16x32xf32> to vector<16xf32>
    %838 = vector.shape_cast %837 : vector<16xf32> to vector<16x1xf32>
    %cst_185 = arith.constant 3.200000e+01 : f32
    %839 = vector.broadcast %cst_185 : f32 to vector<16x1xf32>
    %840 = arith.divf %838, %839 : vector<16x1xf32>
    %841 = vector.broadcast %840 : vector<16x1xf32> to vector<16x32xf32>
    %842 = arith.subf %834, %841 : vector<16x32xf32>
    %843 = arith.mulf %842, %842 : vector<16x32xf32>
    %cst_186 = arith.constant dense<0.000000e+00> : vector<16xf32>
    %844 = vector.multi_reduction <add>, %843, %cst_186 [1] : vector<16x32xf32> to vector<16xf32>
    %845 = vector.shape_cast %844 : vector<16xf32> to vector<16x1xf32>
    %cst_187 = arith.constant 3.200000e+01 : f32
    %846 = vector.broadcast %cst_187 : f32 to vector<16x1xf32>
    %847 = arith.divf %845, %846 : vector<16x1xf32>
    %848 = vector.broadcast %840 : vector<16x1xf32> to vector<16x32xf32>
    %849 = arith.subf %834, %848 : vector<16x32xf32>
    %cst_188 = arith.constant 9.99999974E-6 : f32
    %850 = vector.broadcast %cst_188 : f32 to vector<16x1xf32>
    %851 = arith.addf %847, %850 : vector<16x1xf32>
    %852 = math.rsqrt %851 : vector<16x1xf32>
    %853 = vector.broadcast %852 : vector<16x1xf32> to vector<16x32xf32>
    %854 = arith.mulf %849, %853 : vector<16x32xf32>
    %855 = vector.broadcast %835 : vector<1x32xf32> to vector<16x32xf32>
    %856 = arith.mulf %854, %855 : vector<16x32xf32>
    %857 = vector.broadcast %836 : vector<1x32xf32> to vector<16x32xf32>
    %858 = arith.addf %856, %857 : vector<16x32xf32>
    %c0_189 = arith.constant 0 : index
    %c0_190 = arith.constant 0 : index
    %859 = vector.load %arg25[%c0_189, %c0_190] : memref<32x2048xbf16, #tpu.memory_space<vmem>>, vector<32x2048xbf16>
    %860 = arith.truncf %858 : vector<16x32xf32> to vector<16x32xbf16>
    %cst_191 = arith.constant dense<0.000000e+00> : vector<16x2048xf32>
    %861 = tpu.matmul %860, %859, %cst_191 {dimension_numbers = #tpu.dot_dimension_numbers<[1], [0], [0], [1], [0, 0, 1, 1], [], []>} : vector<16x32xbf16>, vector<32x2048xbf16>, vector<16x2048xf32> -> vector<16x2048xf32>
    %c0_192 = arith.constant 0 : index
    %c0_193 = arith.constant 0 : index
    %862 = vector.load %arg26[%c0_192, %c0_193] : memref<1x2048xf32, #tpu.memory_space<vmem>>, vector<1x2048xf32>
    %863 = vector.broadcast %862 : vector<1x2048xf32> to vector<16x2048xf32>
    %864 = arith.addf %861, %863 : vector<16x2048xf32>
    %cst_194 = arith.constant 0.000000e+00 : f32
    %865 = vector.broadcast %cst_194 : f32 to vector<16x2048xf32>
    %866 = arith.maximumf %864, %865 : vector<16x2048xf32>
    %c0_195 = arith.constant 0 : index
    %c0_196 = arith.constant 0 : index
    %867 = vector.load %arg27[%c0_195, %c0_196] : memref<2048x32xbf16, #tpu.memory_space<vmem>>, vector<2048x32xbf16>
    %868 = arith.truncf %866 : vector<16x2048xf32> to vector<16x2048xbf16>
    %cst_197 = arith.constant dense<0.000000e+00> : vector<16x32xf32>
    %869 = tpu.matmul %868, %867, %cst_197 {dimension_numbers = #tpu.dot_dimension_numbers<[1], [0], [0], [1], [0, 0, 1, 1], [], []>} : vector<16x2048xbf16>, vector<2048x32xbf16>, vector<16x32xf32> -> vector<16x32xf32>
    %c0_198 = arith.constant 0 : index
    %c0_199 = arith.constant 0 : index
    %870 = vector.load %arg28[%c0_198, %c0_199] : memref<1x32xf32, #tpu.memory_space<vmem>>, vector<1x32xf32>
    %871 = vector.broadcast %870 : vector<1x32xf32> to vector<16x32xf32>
    %872 = arith.addf %869, %871 : vector<16x32xf32>
    %873 = arith.addf %858, %872 : vector<16x32xf32>
    %c0_200 = arith.constant 0 : index
    %c0_201 = arith.constant 0 : index
    %874 = vector.load %arg29[%c0_200, %c0_201] : memref<1x32xf32, #tpu.memory_space<vmem>>, vector<1x32xf32>
    %c0_202 = arith.constant 0 : index
    %c0_203 = arith.constant 0 : index
    %875 = vector.load %arg30[%c0_202, %c0_203] : memref<1x32xf32, #tpu.memory_space<vmem>>, vector<1x32xf32>
    %cst_204 = arith.constant dense<0.000000e+00> : vector<16xf32>
    %876 = vector.multi_reduction <add>, %873, %cst_204 [1] : vector<16x32xf32> to vector<16xf32>
    %877 = vector.shape_cast %876 : vector<16xf32> to vector<16x1xf32>
    %cst_205 = arith.constant 3.200000e+01 : f32
    %878 = vector.broadcast %cst_205 : f32 to vector<16x1xf32>
    %879 = arith.divf %877, %878 : vector<16x1xf32>
    %880 = vector.broadcast %879 : vector<16x1xf32> to vector<16x32xf32>
    %881 = arith.subf %873, %880 : vector<16x32xf32>
    %882 = arith.mulf %881, %881 : vector<16x32xf32>
    %cst_206 = arith.constant dense<0.000000e+00> : vector<16xf32>
    %883 = vector.multi_reduction <add>, %882, %cst_206 [1] : vector<16x32xf32> to vector<16xf32>
    %884 = vector.shape_cast %883 : vector<16xf32> to vector<16x1xf32>
    %cst_207 = arith.constant 3.200000e+01 : f32
    %885 = vector.broadcast %cst_207 : f32 to vector<16x1xf32>
    %886 = arith.divf %884, %885 : vector<16x1xf32>
    %887 = vector.broadcast %879 : vector<16x1xf32> to vector<16x32xf32>
    %888 = arith.subf %873, %887 : vector<16x32xf32>
    %cst_208 = arith.constant 9.99999974E-6 : f32
    %889 = vector.broadcast %cst_208 : f32 to vector<16x1xf32>
    %890 = arith.addf %886, %889 : vector<16x1xf32>
    %891 = math.rsqrt %890 : vector<16x1xf32>
    %892 = vector.broadcast %891 : vector<16x1xf32> to vector<16x32xf32>
    %893 = arith.mulf %888, %892 : vector<16x32xf32>
    %894 = vector.broadcast %874 : vector<1x32xf32> to vector<16x32xf32>
    %895 = arith.mulf %893, %894 : vector<16x32xf32>
    %896 = vector.broadcast %875 : vector<1x32xf32> to vector<16x32xf32>
    %897 = arith.addf %895, %896 : vector<16x32xf32>
    %898 = vector.shape_cast %897 : vector<16x32xf32> to vector<2x8x32xf32>
    %899 = vector.extract_strided_slice %898 {offsets = [0, 7, 0], sizes = [2, 1, 32], strides = [1, 1, 1]} : vector<2x8x32xf32> to vector<2x1x32xf32>
    %900 = vector.shape_cast %899 : vector<2x1x32xf32> to vector<2x32xf32>
    %c0_209 = arith.constant 0 : index
    %c0_210 = arith.constant 0 : index
    %901 = vector.load %arg31[%c0_209, %c0_210] : memref<32x128xbf16, #tpu.memory_space<vmem>>, vector<32x128xbf16>
    %902 = arith.truncf %900 : vector<2x32xf32> to vector<2x32xbf16>
    %cst_211 = arith.constant dense<0.000000e+00> : vector<2x128xf32>
    %903 = tpu.matmul %902, %901, %cst_211 {dimension_numbers = #tpu.dot_dimension_numbers<[1], [0], [0], [1], [0, 0, 1, 1], [], []>} : vector<2x32xbf16>, vector<32x128xbf16>, vector<2x128xf32> -> vector<2x128xf32>
    %c0_212 = arith.constant 0 : index
    %c0_213 = arith.constant 0 : index
    %904 = vector.load %arg32[%c0_212, %c0_213] : memref<1x128xf32, #tpu.memory_space<vmem>>, vector<1x128xf32>
    %905 = vector.broadcast %904 : vector<1x128xf32> to vector<2x128xf32>
    %906 = arith.addf %903, %905 : vector<2x128xf32>
    %907 = arith.negf %906 : vector<2x128xf32>
    %908 = math.exp %907 : vector<2x128xf32>
    %cst_214 = arith.constant 1.000000e+00 : f32
    %909 = vector.broadcast %cst_214 : f32 to vector<2x128xf32>
    %910 = arith.addf %909, %908 : vector<2x128xf32>
    %911 = arith.divf %909, %910 : vector<2x128xf32>
    %c0_215 = arith.constant 0 : index
    %c0_216 = arith.constant 0 : index
    %912 = vector.load %arg33[%c0_215, %c0_216] : memref<2x128xf32, #tpu.memory_space<vmem>>, vector<2x128xf32>
    tpu.vector_store %arg33[%c0_215, %c0_216], %911 {strides = array<i32>} : memref<2x128xf32, #tpu.memory_space<vmem>>, vector<2x128xf32>,
    return
  }
}

</mosaic_0001>

<bundles_post_ra>
// kernel: lstm_transformer_forward.1
= control target key start
LH: loop header
LB: loop body
LE: loop exit
PB: predicated region body
PF: predicated region fallthrough
CT: control target
= control target key end

     0   :  { %s11036_s6 = smov 1   ;;  %s11037_s10 = smov 2   ;;  %s12756_s0 = inlined_call_operand.smem [shape: u32[34], index: -1, kind: input, shape index: {}] }
   0x1   :  { %s11093_s5 = sld [smem:[%s12756_s0]]   ;;  %s11038_s14 = smov 3  }
   0x2   :  { %s11098_s9 = sld [smem:[%s12756_s0 + %s11036_s6]]   ;;  %s11039_s18 = smov 4  }
   0x3   :  { %s11103_s13 = sld [smem:[%s12756_s0 + %s11037_s10]]   ;;  %s11040_s22 = smov 5  }
   0x4   :  { %s11108_s17 = sld [smem:[%s12756_s0 + %s11038_s14]]   ;;  %s11041_s26 = smov 6  }
   0x5   :  { %s11113_s21 = sld [smem:[%s12756_s0 + %s11039_s18]]   ;;  %s11042_s30 = smov 7  }
   0x6   :  { %s11118_s25 = sld [smem:[%s12756_s0 + %s11040_s22]]   ;;  %s11043_s4 = smov 8  }
   0x7   :  { %s11123_s29 = sld [smem:[%s12756_s0 + %s11041_s26]]   ;;  %s11044_s10 = smov 9  }
   0x8   :  { %s11128_s3 = sld [smem:[%s12756_s0 + %s11042_s30]]   ;;  %s11045_s15 = smov 10  }
   0x9   :  { %s11133_s8 = sld [smem:[%s12756_s0 + %s11043_s4]]   ;;  %s11046_s20 = smov 11  }
   0xa   :  { %s11138_s14 = sld [smem:[%s12756_s0 + %s11044_s10]]   ;;  %s11047_s26 = smov 12  }
   0xb   :  { %s11143_s19 = sld [smem:[%s12756_s0 + %s11045_s15]]   ;;  %s11048_s1 = smov 13  }
   0xc   :  { %s11148_s24 = sld [smem:[%s12756_s0 + %s11046_s20]]   ;;  %s11049_s7 = smov 14  }
   0xd   :  { %s11153_s30 = sld [smem:[%s12756_s0 + %s11047_s26]]   ;;  %s11050_s15 = smov 15  }
   0xe   :  { %s11158_s6 = sld [smem:[%s12756_s0 + %s11048_s1]]   ;;  %s11051_s22 = smov 16  }
   0xf   :  { %s11163_s12 = sld [smem:[%s12756_s0 + %s11049_s7]]   ;;  %s11052_s28 = smov 17  }
  0x10   :  { %s11168_s20 = sld [smem:[%s12756_s0 + %s11050_s15]]   ;;  %s11053_s7 = smov 18  }
  0x11   :  { %s11173_s27 = sld [smem:[%s12756_s0 + %s11051_s22]]   ;;  %s11054_s15 = smov 19  }
  0x12   :  { %s11178_s4 = sld [smem:[%s12756_s0 + %s11052_s28]]   ;;  %s11055_s22 = smov 20  }
  0x13   :  { %s11056_s28 = smov 21  }
  0x15   :  { %12764 = sst [smem:[#allocation5_spill]] %s11163_s12 }
  0x16   :  { %12765 = sst [smem:[#allocation6_spill]] %s11168_s20 }
  0x17   :  { %12766 = sst [smem:[#allocation7_spill]] %s11173_s27 }
  0x18   :  { %12767 = sst [smem:[#allocation8_spill]] %s11178_s4 }
  0x19   :  { %s11183_s12 = sld [smem:[%s12756_s0 + %s11053_s7]]   ;;  %s11057_s7 = smov 22  }
  0x1a   :  { %s11188_s20 = sld [smem:[%s12756_s0 + %s11054_s15]]   ;;  %s11058_s15 = smov 23  }
  0x1b   :  { %s11193_s27 = sld [smem:[%s12756_s0 + %s11055_s22]]   ;;  %s11059_s22 = smov 24  }
  0x1c   :  { %s11198_s4 = sld [smem:[%s12756_s0 + %s11056_s28]]   ;;  %s11060_s28 = smov 25  }
  0x1f   :  { %12768 = sst [smem:[#allocation9_spill]] %s11183_s12 }
  0x20   :  { %12769 = sst [smem:[#allocation10_spill]] %s11188_s20 }
  0x21   :  { %12770 = sst [smem:[#allocation11_spill]] %s11193_s27 }
  0x22   :  { %12771 = sst [smem:[#allocation12_spill]] %s11198_s4 }
  0x23   :  { %s11203_s12 = sld [smem:[%s12756_s0 + %s11057_s7]]   ;;  %s11061_s7 = smov 26  }
  0x24   :  { %s11208_s20 = sld [smem:[%s12756_s0 + %s11058_s15]]   ;;  %s11062_s15 = smov 27  }
  0x25   :  { %s11213_s27 = sld [smem:[%s12756_s0 + %s11059_s22]]   ;;  %s11063_s22 = smov 28  }
  0x26   :  { %s11218_s4 = sld [smem:[%s12756_s0 + %s11060_s28]]   ;;  %s11064_s28 = smov 29  }
  0x29   :  { %12772 = sst [smem:[#allocation13_spill]] %s11203_s12 }
  0x2a   :  { %12773 = sst [smem:[#allocation14_spill]] %s11208_s20 }
  0x2b   :  { %12774 = sst [smem:[#allocation15_spill]] %s11213_s27 }
  0x2c   :  { %12775 = sst [smem:[#allocation16_spill]] %s11218_s4 }
  0x2d   :  { %s11223_s12 = sld [smem:[%s12756_s0 + %s11061_s7]]   ;;  %s11065_s7 = smov 30  }
  0x2e   :  { %s11228_s20 = sld [smem:[%s12756_s0 + %s11062_s15]]   ;;  %s11066_s15 = smov 31  }
  0x2f   :  { %s11233_s27 = sld [smem:[%s12756_s0 + %s11063_s22]]   ;;  %s11067_s22 = smov 32  }
  0x30   :  { %s11238_s4 = sld [smem:[%s12756_s0 + %s11064_s28]]   ;;  %s11068_s28 = smov 33  }
  0x33   :  { %12776 = sst [smem:[#allocation17_spill]] %s11223_s12 }
  0x34   :  { %12777 = sst [smem:[#allocation18_spill]] %s11228_s20 }
  0x35   :  { %12778 = sst [smem:[#allocation19_spill]] %s11233_s27 }
  0x36   :  { %12779 = sst [smem:[#allocation20_spill]] %s11238_s4 }
  0x37   :  { %s11243_s12 = sld [smem:[%s12756_s0 + %s11065_s7]]  }
  0x38   :  { %s11248_s20 = sld [smem:[%s12756_s0 + %s11066_s15]]  }
  0x39   :  { %s11253_s27 = sld [smem:[%s12756_s0 + %s11067_s22]]  }
  0x3a   :  { %s11258_s4 = sld [smem:[%s12756_s0 + %s11068_s28]]  }
  0x3b   :  { %v10401_v0 = vld [vmem:[%s11098_s9] sm:$0xff]   ;;  %v11069_v1 = vmov 0.0   ;;  %vm11070_vm0 = vmmov 0   ;;  %v141_v4 = vld [vmem:[%s11093_s5 + $0x8] sm:$0xff]  ;;  %vm158_vm1 = vcmask 130048   ;;  %v11071_v7 = vmov 0  }
  0x3c   :  { %9946 = vmatprep.subr.bf16.mxu0 %v11069_v1  ;;  %9952 = vmatprep.subr.bf16.mxu1 %v11069_v1  ;;  %v10402_v2 = vld [vmem:[%s11103_s13] sm:$0xff]   ;;  %v10403_v6 = vld [vmem:[%s11103_s13 + $0x8] sm:$0xff]  }
  0x3d   :  { %9947 = vmatpush3.bf16.msra.mxu0 %v10401_v0  ;;  %9948 = vmatprep.mubr.msk.bf16.mxu0 %vm11070_vm0, %v11069_v1  ;;  %v140_v3 = vld [vmem:[%s11093_s5] sm:$0xff] }
  0x3e   :  { %9953 = vmatpush3.bf16.msra.mxu1 %v10402_v2  ;;  %v144_v5 = vpack.c.bf16 %v141_v4, %v140_v3  ;;  %9956 = vmatprep.mubr.msk.bf16.mxu1 %vm11070_vm0, %v11069_v1 }
  0x3f   :  { %9954 = vmatprep.subr.bf16.mxu1 %v11069_v1  ;;  %9960 = vmatprep.subr.bf16.mxu0 %v11069_v1 }
  0x40   :  { %9949 = vmatmul.mubr.msk.bf16.vlgmr.msra.gmra.mrb[0].mxu0 %vm158_vm1, %v144_v5 }
  0x41   :  { %9961 = vmatpush3.bf16.msra.mxu0 %v10402_v2  ;;  %9964 = vmatprep.mubr.msk.bf16.mxu0 %vm11070_vm0, %v11069_v1 }
  0x42   :  { %9955 = vmatpush3.bf16.msra.mxu1 %v10403_v6  ;;  %9962 = vmatprep.subr.bf16.mxu0 %v11069_v1 }
  0x43   :  { %9968 = vmatprep.subr.bf16.mxu1 %v11069_v1 }
  0x45   :  { %9957 = vmatmul.mubr.bf16.vlgmr.msra.gmra.mrb[0].mxu1 %v11071_v7  ;;  %9963 = vmatpush3.bf16.msra.mxu0 %v10403_v6 }
  0x46   :  { %9969 = vmatpush3.bf16.msra.mxu1 %v10402_v2  ;;  %9972 = vmatprep.mubr.msk.bf16.mxu1 %vm11070_vm0, %v11069_v1 }
  0x47   :  { %9970 = vmatprep.subr.bf16.mxu1 %v11069_v1  ;;  %9976 = vmatprep.subr.bf16.mxu0 %v11069_v1 }
  0x4a   :  { %9971 = vmatpush3.bf16.msra.mxu1 %v10403_v6 }
  0x4b   :  { %9984 = vmatprep.subr.bf16.mxu1 %v11069_v1 }
  0x4c   :  { %72 = vsyncpa [#allocation3], 0  ;;  %v8994_v11 = vld [vmem:[%s11108_s17] ss:$0 sm:$0xff]  ;;  %s11072_s0 = smov 64   ;;  %s11073_s5 = smov 32  }
  0x4d   :  { %vm324_vm2 = vcmask 1041409   ;;  %vm219_vm3 = vcmask 261120   ;;  %v11314_v56 = vld [vmem:[%s11103_s13] sm:$0xff]   ;;  %v11321_v57 = vld [vmem:[%s11103_s13 + $0x8] sm:$0xff]   ;;  %vm1127_vm4 = vcmask 1040384   ;;  %vm1130_vm5 = vcmask 1041408  }
  0x4e   :  { %vm1133_vm6 = vcmask 1042432   ;;  %vm1136_vm7 = vcmask 1043456   ;;  %vm1139_vm8 = vcmask 1044480   ;;  %vm1142_vm9 = vcmask 1045504   ;;  %s11074_s9 = smov 96   ;;  %s11075_s13 = smov 88  }
  0x4f   :  { %vm1145_vm10 = vcmask 1046528   ;;  %vm2232_vm11 = vcmask 64512   ;;  %s11076_s17 = smov 120   ;;  %s11082_s7 = smov 104  }
  0x50   :  { %s11083_s10 = smov 40   ;;  %s12785_s11 = sld [smem:[#allocation10_spill]] }
  0x51   :  { %s12786_s15 = sld [smem:[#allocation11_spill]]  ;;  %s12787_s16 = sld [smem:[#allocation12_spill]] }
  0x52   :  { %s12788_s18 = sld [smem:[#allocation13_spill]]  ;;  %s12789_s22 = sld [smem:[#allocation15_spill]] }
  0x53   :  { %s12790_s23 = sld [smem:[#allocation14_spill]]  ;;  %s12791_s26 = sld [smem:[#allocation16_spill]] }
  0x54   :  { %s12792_s28 = sld [smem:[#allocation18_spill]]  ;;  %s12793_s1 = sld [smem:[#allocation17_spill]] }
  0x55   :  { %s12794_s2 = sld [smem:[#allocation19_spill]] }
 0x113   :  { %v196_v8 = vpop.f32.mrb[0].mxu0 }
 0x114   :  { %v9950_v9 = vpop.f32.mrb[1].mxu0  ;;  %v11286_v17 = vadd.f32 %v8994_v11, %v196_v8 }
 0x115   :  { %v199_v10 = vpop.f32.mrb[2].mxu0 }
 0x116   :  { %v9951_v12 = vpop.f32.mrb[3].mxu0  ;;  %v11284_v14 = vadd.f32 %v8994_v11, %v199_v10 }
 0x118   :  { %v257_v13 = vpop.f32.mrb[0].mxu1 }
 0x119   :  { %v264_v15 = vrot.slane %v257_v13, 1  ;;  %v9958_v16 = vpop.f32.mrb[1].mxu1  ;;  %v267_v21 = vadd.f32 %v257_v13, %v11286_v17 }
 0x11a   :  { %v260_v18 = vpop.f32.mrb[2].mxu1 }
 0x11b   :  { %v268_v19 = vadd.f32 %v264_v15, %v11284_v14  ;;  %v9959_v20 = vpop.f32.mrb[3].mxu1  ;;  %v8999_v25 = vmul.f32 -1.442695, %v267_v21 }
 0x11d   :  { %10670 = vtanh.f32 %v268_v19  ;;  %v9000_v24 = vmul.f32 -1.442695, %v268_v19 }
 0x11e   :  { %10672 = vtanh.f32 %v267_v21 }
 0x11f   :  { %10674 = vpow2.f32 %v9000_v24 }
 0x120   :  { %10676 = vpow2.f32 %v8999_v25 }
 0x127   :  { %v10671_v22 = vpop.eup %10670 }
 0x128   :  { %289 = vrot.lane.b32.xlu0 %v10671_v22, %s11072_s0  ;;  %v10673_v23 = vpop.eup %10672 }
 0x129   :  { %v10675_v26 = vpop.eup %10674 }
 0x12a   :  { %v276_v27 = vadd.f32 1.0, %v10675_v26  ;;  %v10677_v28 = vpop.eup %10676 }
 0x12b   :  { %v275_v29 = vadd.f32 1.0, %v10677_v28 }
 0x12c   :  { %287 = vrot.lane.b32.xlu0 %v10673_v23, %s11072_s0  ;;  %10678 = vrcp.f32 %v276_v27 }
 0x12d   :  { %10680 = vrcp.f32 %v275_v29 }
 0x136   :  { %v10679_v30 = vpop.eup %10678 }
 0x137   :  { %v10681_v33 = vpop.eup %10680  ;;  %v284_v36 = vmul.f32 0.0, %v10679_v30 }
 0x138   :  { %v283_v39 = vmul.f32 0.0, %v10681_v33 }
 0x19a   :  { %v290_v31 = vpop.permute.xlu0 %289 }
 0x19b   :  { %v294_v32 = vmul.f32 %v10679_v30, %v290_v31 }
 0x19d   :  { %299 = vrot.lane.b32.xlu1 %v294_v32, %s11073_s5 }
 0x19e   :  { %v288_v34 = vpop.permute.xlu0 %287 }
 0x19f   :  { %v293_v35 = vmul.f32 %v10681_v33, %v288_v34 }
 0x1a1   :  { %297 = vrot.lane.b32.xlu1 %v293_v35, %s11073_s5 }
 0x20f   :  { %v300_v37 = vpop.permute.xlu1 %299 }
 0x210   :  { %v11294_v38 = vadd.f32 %v300_v37, %v284_v36 }
 0x212   :  { %10682 = vtanh.f32 %v11294_v38  ;;  %v395_v19 = vrot.slane %v11294_v38, 7 }
 0x213   :  { %v298_v40 = vpop.permute.xlu1 %297 }
 0x214   :  { %v11297_v41 = vadd.f32 %v298_v40, %v283_v39 }
 0x216   :  { %10684 = vtanh.f32 %v11297_v41  ;;  %v394_v21 = vrot.slane %v11297_v41, 7 }
 0x21c   :  { %v10683_v42 = vpop.eup %10682 }
 0x21d   :  { %311 = vrot.lane.b32.xlu0 %v10683_v42, %s11072_s0 }
 0x220   :  { %v10685_v43 = vpop.eup %10684 }
 0x221   :  { %309 = vrot.lane.b32.xlu1 %v10685_v43, %s11072_s0 }
 0x28f   :  { %v312_v44 = vpop.permute.xlu0 %311 }
 0x290   :  { %v11302_v45 = vmul.f32 %v10679_v30, %v312_v44 }
 0x292   :  { %v318_v46 = vpack.c.bf16 %v11302_v45, %v11302_v45 }
 0x293   :  { %v310_v47 = vpop.permute.xlu1 %309 }
 0x294   :  { %v322_v48 = vunpack.c.l.b16 %v318_v46  ;;  %v11306_v49 = vmul.f32 %v10681_v33, %v310_v47 }
 0x296   :  { %v317_v50 = vpack.c.bf16 %v11306_v49, %v11306_v49  ;;  %v323_v51 = vrot.slane %v322_v48, 7 }
 0x298   :  { %v321_v52 = vunpack.c.l.b16 %v317_v50 }
 0x29a   :  { %v325_v53 = vsel %vm324_vm2, %v323_v51, %v321_v52 }
 0x29b   :  { %v326_v54 = vpack.c.b16 %v325_v53, %v325_v53 }
 0x29d   :  { %327 = vrot.lane.b32.xlu0 %v326_v54, %s11073_s5 }
 0x30f   :  { %v328_v55 = vpop.permute.xlu0 %327 }
 0x310   :  { %9965 = vmatmul.mubr.msk.bf16.vlgmr.msra.gmra.mrb[4].mxu0 %vm219_vm3, %v328_v55 }
 0x311   :  { %9977 = vmatpush3.bf16.msra.mxu0 %v11314_v56  ;;  %9980 = vmatprep.mubr.msk.bf16.mxu0 %vm11070_vm0, %v11069_v1 }
 0x312   :  { %9978 = vmatprep.subr.bf16.mxu0 %v11069_v1 }
 0x315   :  { %9979 = vmatpush3.bf16.msra.mxu0 %v11321_v57 }
 0x316   :  { %9992 = vmatprep.subr.bf16.mxu0 %v11069_v1 }
 0x3e3   :  { %v366_v58 = vpop.f32.mrb[4].mxu0 }
 0x3e4   :  { %v373_v59 = vrot.slane %v366_v58, 7  ;;  %v377_v60 = vadd.f32 %v366_v58, %v11284_v14  ;;  %v9966_v61 = vpop.f32.mrb[5].mxu0 }
 0x3e5   :  { %v369_v62 = vpop.f32.mrb[6].mxu0 }
 0x3e6   :  { %v376_v63 = vadd.f32 %v373_v59, %v11286_v17  ;;  %10686 = vtanh.f32 %v377_v60  ;;  %v9967_v0 = vpop.f32.mrb[7].mxu0  ;;  %v9003_v4 = vmul.f32 -1.442695, %v377_v60 }
 0x3e8   :  { %10688 = vtanh.f32 %v376_v63  ;;  %v9002_v5 = vmul.f32 -1.442695, %v376_v63 }
 0x3e9   :  { %10690 = vpow2.f32 %v9003_v4 }
 0x3ea   :  { %10692 = vpow2.f32 %v9002_v5 }
 0x3f0   :  { %v10687_v2 = vpop.eup %10686 }
 0x3f1   :  { %404 = vrot.lane.b32.xlu0 %v10687_v2, %s11072_s0 }
 0x3f2   :  { %v10689_v3 = vpop.eup %10688 }
 0x3f3   :  { %402 = vrot.lane.b32.xlu1 %v10689_v3, %s11072_s0  ;;  %v10691_v6 = vpop.eup %10690 }
 0x3f4   :  { %v10693_v8 = vpop.eup %10692  ;;  %v385_v9 = vadd.f32 1.0, %v10691_v6 }
 0x3f5   :  { %v384_v10 = vadd.f32 1.0, %v10693_v8 }
 0x3f6   :  { %10694 = vrcp.f32 %v385_v9 }
 0x3f7   :  { %10696 = vrcp.f32 %v384_v10 }
 0x400   :  { %v10695_v11 = vpop.eup %10694 }
 0x401   :  { %v10697_v15 = vpop.eup %10696  ;;  %v399_v20 = vmul.f32 %v10695_v11, %v395_v19 }
 0x402   :  { %v398_v24 = vmul.f32 %v10697_v15, %v394_v21 }
 0x463   :  { %v405_v12 = vpop.permute.xlu0 %404 }
 0x464   :  { %v409_v13 = vmul.f32 %v10695_v11, %v405_v12 }
 0x465   :  { %v403_v16 = vpop.permute.xlu1 %402 }
 0x466   :  { %414 = vrot.lane.b32.xlu0 %v409_v13, %s11073_s5  ;;  %v408_v18 = vmul.f32 %v10697_v15, %v403_v16 }
 0x468   :  { %412 = vrot.lane.b32.xlu1 %v408_v18, %s11073_s5 }
 0x4d8   :  { %v415_v22 = vpop.permute.xlu0 %414 }
 0x4d9   :  { %v11333_v23 = vadd.f32 %v415_v22, %v399_v20 }
 0x4da   :  { %v413_v25 = vpop.permute.xlu1 %412 }
 0x4db   :  { %10698 = vtanh.f32 %v11333_v23  ;;  %v418_v26 = vadd.f32 %v413_v25, %v398_v24  ;;  %v510_v5 = vrot.slane %v11333_v23, 7 }
 0x4dd   :  { %10700 = vtanh.f32 %v418_v26  ;;  %v509_v4 = vrot.slane %v418_v26, 7 }
 0x4e5   :  { %v10699_v27 = vpop.eup %10698 }
 0x4e6   :  { %426 = vrot.lane.b32.xlu0 %v10699_v27, %s11072_s0 }
 0x4e7   :  { %v10701_v28 = vpop.eup %10700 }
 0x4e8   :  { %424 = vrot.lane.b32.xlu1 %v10701_v28, %s11072_s0 }
 0x558   :  { %v427_v29 = vpop.permute.xlu0 %426 }
 0x559   :  { %v11338_v30 = vmul.f32 %v10695_v11, %v427_v29 }
 0x55a   :  { %v425_v31 = vpop.permute.xlu1 %424 }
 0x55b   :  { %v11340_v32 = vmul.f32 %v10697_v15, %v425_v31  ;;  %v433_v33 = vpack.c.bf16 %v11338_v30, %v11338_v30  ;;  %v1129_v22 = vsel %vm1127_vm4, %v11302_v45, %v11338_v30 }
 0x55d   :  { %v432_v34 = vpack.c.bf16 %v11340_v32, %v11340_v32  ;;  %v437_v36 = vunpack.c.l.b16 %v433_v33  ;;  %v1128_v20 = vsel %vm1127_vm4, %v11306_v49, %v11340_v32 }
 0x55f   :  { %v436_v35 = vunpack.c.l.b16 %v432_v34 }
 0x561   :  { %v438_v37 = vrot.slane %v436_v35, 1 }
 0x563   :  { %v439_v38 = vsel %vm324_vm2, %v437_v36, %v438_v37 }
 0x564   :  { %v440_v39 = vpack.c.b16 %v439_v38, %v439_v38 }
 0x566   :  { %441 = vrot.lane.b32.xlu1 %v440_v39, %s11073_s5 }
 0x5d8   :  { %v442_v40 = vpop.permute.xlu1 %441 }
 0x5d9   :  { %9973 = vmatmul.mubr.msk.bf16.vlgmr.msra.gmra.mrb[4].mxu1 %vm219_vm3, %v442_v40 }
 0x5da   :  { %9985 = vmatpush3.bf16.msra.mxu1 %v11314_v56  ;;  %9988 = vmatprep.mubr.msk.bf16.mxu1 %vm11070_vm0, %v11069_v1 }
 0x5db   :  { %9986 = vmatprep.subr.bf16.mxu1 %v11069_v1 }
 0x5de   :  { %9987 = vmatpush3.bf16.msra.mxu1 %v11321_v57 }
 0x5df   :  { %10000 = vmatprep.subr.bf16.mxu1 %v11069_v1 }
 0x6ac   :  { %v480_v41 = vpop.f32.mrb[4].mxu1 }
 0x6ad   :  { %v487_v42 = vrot.slane %v480_v41, 6  ;;  %v488_v43 = vrot.slane %v480_v41, 7  ;;  %v9974_v44 = vpop.f32.mrb[5].mxu1 }
 0x6ae   :  { %v483_v46 = vpop.f32.mrb[6].mxu1 }
 0x6af   :  { %v491_v47 = vadd.f32 %v487_v42, %v11286_v17  ;;  %v492_v48 = vadd.f32 %v488_v43, %v11284_v14  ;;  %v9975_v50 = vpop.f32.mrb[7].mxu1 }
 0x6b1   :  { %10702 = vtanh.f32 %v491_v47  ;;  %v9005_v53 = vmul.f32 -1.442695, %v491_v47  ;;  %v9006_v54 = vmul.f32 -1.442695, %v492_v48 }
 0x6b2   :  { %10704 = vtanh.f32 %v492_v48 }
 0x6b3   :  { %10706 = vpow2.f32 %v9005_v53 }
 0x6b4   :  { %10708 = vpow2.f32 %v9006_v54 }
 0x6bb   :  { %v10703_v51 = vpop.eup %10702 }
 0x6bc   :  { %v10705_v52 = vpop.eup %10704  ;;  %517 = vrot.lane.b32.xlu0 %v10703_v51, %s11072_s0 }
 0x6bd   :  { %519 = vrot.lane.b32.xlu1 %v10705_v52, %s11072_s0  ;;  %v10707_v55 = vpop.eup %10706 }
 0x6be   :  { %v10709_v58 = vpop.eup %10708  ;;  %v499_v59 = vadd.f32 1.0, %v10707_v55 }
 0x6bf   :  { %v500_v60 = vadd.f32 1.0, %v10709_v58 }
 0x6c0   :  { %10710 = vrcp.f32 %v499_v59 }
 0x6c1   :  { %10712 = vrcp.f32 %v500_v60 }
 0x6ca   :  { %v10711_v61 = vpop.eup %10710 }
 0x6cb   :  { %v10713_v63 = vpop.eup %10712  ;;  %v513_v6 = vmul.f32 %v10711_v61, %v509_v4 }
 0x6cc   :  { %v514_v8 = vmul.f32 %v10713_v63, %v510_v5 }
 0x72e   :  { %v518_v62 = vpop.permute.xlu0 %517 }
 0x72f   :  { %v520_v0 = vpop.permute.xlu1 %519  ;;  %v523_v2 = vmul.f32 %v10711_v61, %v518_v62 }
 0x730   :  { %v524_v3 = vmul.f32 %v10713_v63, %v520_v0 }
 0x731   :  { %527 = vrot.lane.b32.xlu0 %v523_v2, %s11073_s5 }
 0x732   :  { %529 = vrot.lane.b32.xlu1 %v524_v3, %s11073_s5 }
 0x7a3   :  { %v528_v9 = vpop.permute.xlu0 %527 }
 0x7a4   :  { %v530_v10 = vpop.permute.xlu1 %529  ;;  %v11362_v11 = vadd.f32 %v528_v9, %v513_v6 }
 0x7a5   :  { %v11364_v12 = vadd.f32 %v530_v10, %v514_v8 }
 0x7a6   :  { %10714 = vtanh.f32 %v11362_v11  ;;  %v625_v58 = vrot.slane %v11362_v11, 7 }
 0x7a7   :  { %10716 = vtanh.f32 %v11364_v12  ;;  %v626_v59 = vrot.slane %v11364_v12, 7 }
 0x7b0   :  { %v10715_v13 = vpop.eup %10714 }
 0x7b1   :  { %v10717_v15 = vpop.eup %10716  ;;  %539 = vrot.lane.b32.xlu0 %v10715_v13, %s11072_s0 }
 0x7b2   :  { %541 = vrot.lane.b32.xlu1 %v10717_v15, %s11072_s0 }
 0x823   :  { %v540_v16 = vpop.permute.xlu0 %539 }
 0x824   :  { %v542_v18 = vpop.permute.xlu1 %541  ;;  %v545_v19 = vmul.f32 %v10711_v61, %v540_v16 }
 0x825   :  { %v546_v21 = vmul.f32 %v10713_v63, %v542_v18 }
 0x826   :  { %v547_v23 = vpack.c.bf16 %v545_v19, %v545_v19  ;;  %v11377_v24 = vsel %vm1130_vm5, %v1128_v20, %v545_v19 }
 0x827   :  { %v548_v25 = vpack.c.bf16 %v546_v21, %v546_v21  ;;  %v11380_v26 = vsel %vm1130_vm5, %v1129_v22, %v546_v21 }
 0x828   :  { %v551_v27 = vunpack.c.l.b16 %v547_v23 }
 0x829   :  { %v552_v28 = vunpack.c.l.b16 %v548_v25 }
 0x82a   :  { %v553_v29 = vrot.slane %v551_v27, 2 }
 0x82b   :  { %v554_v31 = vrot.slane %v552_v28, 1 }
 0x82d   :  { %v555_v33 = vsel %vm324_vm2, %v554_v31, %v553_v29 }
 0x82e   :  { %v556_v49 = vpack.c.b16 %v555_v33, %v555_v33 }
 0x830   :  { %557 = vrot.lane.b32.xlu0 %v556_v49, %s11073_s5 }
 0x8a2   :  { %v558_v32 = vpop.permute.xlu0 %557 }
 0x8a3   :  { %9981 = vmatmul.mubr.msk.bf16.vlgmr.msra.gmra.mrb[8].mxu0 %vm219_vm3, %v558_v32 }
 0x8a4   :  { %9993 = vmatpush3.bf16.msra.mxu0 %v11314_v56  ;;  %9996 = vmatprep.mubr.msk.bf16.mxu0 %vm11070_vm0, %v11069_v1 }
 0x8a5   :  { %9994 = vmatprep.subr.bf16.mxu0 %v11069_v1 }
 0x8a8   :  { %9995 = vmatpush3.bf16.msra.mxu0 %v11321_v57 }
 0x8a9   :  { %10008 = vmatprep.subr.bf16.mxu0 %v11069_v1 }
 0x976   :  { %v596_v45 = vpop.f32.mrb[8].mxu0 }
 0x977   :  { %v603_v30 = vrot.slane %v596_v45, 5  ;;  %v604_v34 = vrot.slane %v596_v45, 6  ;;  %v9982_v35 = vpop.f32.mrb[9].mxu0 }
 0x978   :  { %v599_v36 = vpop.f32.mrb[10].mxu0 }
 0x979   :  { %v607_v37 = vadd.f32 %v603_v30, %v11286_v17  ;;  %v608_v38 = vadd.f32 %v604_v34, %v11284_v14  ;;  %v9983_v39 = vpop.f32.mrb[11].mxu0 }
 0x97b   :  { %10718 = vtanh.f32 %v607_v37  ;;  %v9008_v42 = vmul.f32 -1.442695, %v607_v37  ;;  %v9009_v43 = vmul.f32 -1.442695, %v608_v38 }
 0x97c   :  { %10720 = vtanh.f32 %v608_v38 }
 0x97d   :  { %10722 = vpow2.f32 %v9008_v42 }
 0x97e   :  { %10724 = vpow2.f32 %v9009_v43 }
 0x985   :  { %v10719_v40 = vpop.eup %10718 }
 0x986   :  { %v10721_v41 = vpop.eup %10720  ;;  %633 = vrot.lane.b32.xlu1 %v10719_v40, %s11072_s0 }
 0x987   :  { %635 = vrot.lane.b32.xlu0 %v10721_v41, %s11072_s0  ;;  %v10723_v44 = vpop.eup %10722 }
 0x988   :  { %v10725_v46 = vpop.eup %10724  ;;  %v615_v47 = vadd.f32 1.0, %v10723_v44 }
 0x989   :  { %v616_v48 = vadd.f32 1.0, %v10725_v46 }
 0x98a   :  { %10726 = vrcp.f32 %v615_v47 }
 0x98b   :  { %10728 = vrcp.f32 %v616_v48 }
 0x994   :  { %v10727_v50 = vpop.eup %10726 }
 0x995   :  { %v10729_v52 = vpop.eup %10728  ;;  %v629_v60 = vmul.f32 %v10727_v50, %v625_v58 }
 0x996   :  { %v630_v61 = vmul.f32 %v10729_v52, %v626_v59 }
 0x9f8   :  { %v634_v51 = vpop.permute.xlu1 %633 }
 0x9f9   :  { %v636_v53 = vpop.permute.xlu0 %635  ;;  %v639_v54 = vmul.f32 %v10727_v50, %v634_v51 }
 0x9fa   :  { %v640_v55 = vmul.f32 %v10729_v52, %v636_v53 }
 0x9fb   :  { %643 = vrot.lane.b32.xlu1 %v639_v54, %s11073_s5 }
 0x9fc   :  { %645 = vrot.lane.b32.xlu0 %v640_v55, %s11073_s5 }
 0xa6d   :  { %v644_v62 = vpop.permute.xlu1 %643 }
 0xa6e   :  { %v646_v63 = vpop.permute.xlu0 %645  ;;  %v11399_v0 = vadd.f32 %v644_v62, %v629_v60 }
 0xa6f   :  { %v11401_v2 = vadd.f32 %v646_v63, %v630_v61 }
 0xa70   :  { %10730 = vtanh.f32 %v11399_v0  ;;  %v741_v43 = vrot.slane %v11399_v0, 7 }
 0xa71   :  { %10732 = vtanh.f32 %v11401_v2  ;;  %v742_v44 = vrot.slane %v11401_v2, 7 }
 0xa7a   :  { %v10731_v3 = vpop.eup %10730 }
 0xa7b   :  { %v10733_v4 = vpop.eup %10732  ;;  %655 = vrot.lane.b32.xlu1 %v10731_v3, %s11072_s0 }
 0xa7c   :  { %657 = vrot.lane.b32.xlu0 %v10733_v4, %s11072_s0 }
 0xaed   :  { %v656_v5 = vpop.permute.xlu1 %655 }
 0xaee   :  { %v658_v6 = vpop.permute.xlu0 %657  ;;  %v661_v8 = vmul.f32 %v10727_v50, %v656_v5 }
 0xaef   :  { %v662_v9 = vmul.f32 %v10729_v52, %v658_v6 }
 0xaf0   :  { %v663_v10 = vpack.c.bf16 %v661_v8, %v661_v8  ;;  %v11409_v11 = vsel %vm1133_vm6, %v11377_v24, %v661_v8 }
 0xaf1   :  { %v664_v12 = vpack.c.bf16 %v662_v9, %v662_v9  ;;  %v11413_v13 = vsel %vm1133_vm6, %v11380_v26, %v662_v9 }
 0xaf2   :  { %v667_v15 = vunpack.c.l.b16 %v663_v10 }
 0xaf3   :  { %v668_v16 = vunpack.c.l.b16 %v664_v12 }
 0xaf4   :  { %v669_v18 = vrot.slane %v667_v15, 3 }
 0xaf5   :  { %v670_v19 = vrot.slane %v668_v16, 2 }
 0xaf7   :  { %v671_v20 = vsel %vm324_vm2, %v670_v19, %v669_v18 }
 0xaf8   :  { %v672_v21 = vpack.c.b16 %v671_v20, %v671_v20 }
 0xafa   :  { %673 = vrot.lane.b32.xlu1 %v672_v21, %s11073_s5 }
 0xb6c   :  { %v674_v22 = vpop.permute.xlu1 %673 }
 0xb6d   :  { %9989 = vmatmul.mubr.msk.bf16.vlgmr.msra.gmra.mrb[8].mxu1 %vm219_vm3, %v674_v22 }
 0xb6e   :  { %10001 = vmatpush3.bf16.msra.mxu1 %v11314_v56  ;;  %10004 = vmatprep.mubr.msk.bf16.mxu1 %vm11070_vm0, %v11069_v1 }
 0xb6f   :  { %10002 = vmatprep.subr.bf16.mxu1 %v11069_v1 }
 0xb72   :  { %10003 = vmatpush3.bf16.msra.mxu1 %v11321_v57 }
 0xb73   :  { %10016 = vmatprep.subr.bf16.mxu1 %v11069_v1 }
 0xc40   :  { %v712_v23 = vpop.f32.mrb[8].mxu1 }
 0xc41   :  { %v719_v24 = vrot.slane %v712_v23, 4  ;;  %v720_v25 = vrot.slane %v712_v23, 5  ;;  %v9990_v26 = vpop.f32.mrb[9].mxu1 }
 0xc42   :  { %v715_v27 = vpop.f32.mrb[10].mxu1 }
 0xc43   :  { %v723_v28 = vadd.f32 %v719_v24, %v11286_v17  ;;  %v724_v29 = vadd.f32 %v720_v25, %v11284_v14  ;;  %v9991_v31 = vpop.f32.mrb[11].mxu1 }
 0xc45   :  { %10734 = vtanh.f32 %v723_v28  ;;  %v9011_v32 = vmul.f32 -1.442695, %v723_v28  ;;  %v9012_v45 = vmul.f32 -1.442695, %v724_v29 }
 0xc46   :  { %10736 = vtanh.f32 %v724_v29 }
 0xc47   :  { %10738 = vpow2.f32 %v9011_v32 }
 0xc48   :  { %10740 = vpow2.f32 %v9012_v45 }
 0xc4f   :  { %v10735_v33 = vpop.eup %10734 }
 0xc50   :  { %v10737_v49 = vpop.eup %10736  ;;  %749 = vrot.lane.b32.xlu0 %v10735_v33, %s11072_s0 }
 0xc51   :  { %751 = vrot.lane.b32.xlu1 %v10737_v49, %s11072_s0  ;;  %v10739_v30 = vpop.eup %10738 }
 0xc52   :  { %v10741_v34 = vpop.eup %10740  ;;  %v731_v35 = vadd.f32 1.0, %v10739_v30 }
 0xc53   :  { %v732_v36 = vadd.f32 1.0, %v10741_v34 }
 0xc54   :  { %10742 = vrcp.f32 %v731_v35 }
 0xc55   :  { %10744 = vrcp.f32 %v732_v36 }
 0xc5e   :  { %v10743_v37 = vpop.eup %10742 }
 0xc5f   :  { %v10745_v39 = vpop.eup %10744  ;;  %v745_v46 = vmul.f32 %v10743_v37, %v741_v43 }
 0xc60   :  { %v746_v47 = vmul.f32 %v10745_v39, %v742_v44 }
 0xcc2   :  { %v750_v38 = vpop.permute.xlu0 %749 }
 0xcc3   :  { %v752_v40 = vpop.permute.xlu1 %751  ;;  %v755_v41 = vmul.f32 %v10743_v37, %v750_v38 }
 0xcc4   :  { %v756_v42 = vmul.f32 %v10745_v39, %v752_v40 }
 0xcc5   :  { %759 = vrot.lane.b32.xlu0 %v755_v41, %s11073_s5 }
 0xcc6   :  { %761 = vrot.lane.b32.xlu1 %v756_v42, %s11073_s5 }
 0xd37   :  { %v760_v48 = vpop.permute.xlu0 %759 }
 0xd38   :  { %v762_v50 = vpop.permute.xlu1 %761  ;;  %v11432_v51 = vadd.f32 %v760_v48, %v745_v46 }
 0xd39   :  { %v11434_v52 = vadd.f32 %v762_v50, %v746_v47 }
 0xd3a   :  { %10746 = vtanh.f32 %v11432_v51  ;;  %v857_v49 = vrot.slane %v11432_v51, 7 }
 0xd3b   :  { %10748 = vtanh.f32 %v11434_v52  ;;  %v858_v32 = vrot.slane %v11434_v52, 7 }
 0xd44   :  { %v10747_v53 = vpop.eup %10746 }
 0xd45   :  { %v10749_v54 = vpop.eup %10748  ;;  %771 = vrot.lane.b32.xlu0 %v10747_v53, %s11072_s0 }
 0xd46   :  { %773 = vrot.lane.b32.xlu1 %v10749_v54, %s11072_s0 }
 0xdb7   :  { %v772_v55 = vpop.permute.xlu0 %771 }
 0xdb8   :  { %v774_v58 = vpop.permute.xlu1 %773  ;;  %v777_v59 = vmul.f32 %v10743_v37, %v772_v55 }
 0xdb9   :  { %v778_v60 = vmul.f32 %v10745_v39, %v774_v58 }
 0xdba   :  { %v779_v61 = vpack.c.bf16 %v777_v59, %v777_v59  ;;  %v11442_v62 = vsel %vm1136_vm7, %v11409_v11, %v777_v59 }
 0xdbb   :  { %v780_v63 = vpack.c.bf16 %v778_v60, %v778_v60  ;;  %v11446_v0 = vsel %vm1136_vm7, %v11413_v13, %v778_v60 }
 0xdbc   :  { %v783_v2 = vunpack.c.l.b16 %v779_v61 }
 0xdbd   :  { %v784_v3 = vunpack.c.l.b16 %v780_v63 }
 0xdbe   :  { %v785_v4 = vrot.slane %v783_v2, 4 }
 0xdbf   :  { %v786_v5 = vrot.slane %v784_v3, 3 }
 0xdc1   :  { %v787_v6 = vsel %vm324_vm2, %v786_v5, %v785_v4 }
 0xdc2   :  { %v788_v8 = vpack.c.b16 %v787_v6, %v787_v6 }
 0xdc4   :  { %789 = vrot.lane.b32.xlu0 %v788_v8, %s11073_s5 }
 0xe36   :  { %v790_v9 = vpop.permute.xlu0 %789 }
 0xe37   :  { %9997 = vmatmul.mubr.msk.bf16.vlgmr.msra.gmra.mrb[12].mxu0 %vm219_vm3, %v790_v9 }
 0xe38   :  { %10009 = vmatpush3.bf16.msra.mxu0 %v11314_v56  ;;  %10012 = vmatprep.mubr.msk.bf16.mxu0 %vm11070_vm0, %v11069_v1 }
 0xe39   :  { %10010 = vmatprep.subr.bf16.mxu0 %v11069_v1 }
 0xe3c   :  { %10011 = vmatpush3.bf16.msra.mxu0 %v11321_v57 }
 0xe3d   :  { %10024 = vmatprep.subr.bf16.mxu0 %v11069_v1 }
 0xf0a   :  { %v828_v10 = vpop.f32.mrb[12].mxu0 }
 0xf0b   :  { %v835_v11 = vrot.slane %v828_v10, 3  ;;  %v836_v12 = vrot.slane %v828_v10, 4  ;;  %v9998_v13 = vpop.f32.mrb[13].mxu0 }
 0xf0c   :  { %v831_v15 = vpop.f32.mrb[14].mxu0 }
 0xf0d   :  { %v839_v16 = vadd.f32 %v835_v11, %v11286_v17  ;;  %v840_v18 = vadd.f32 %v836_v12, %v11284_v14  ;;  %v9999_v19 = vpop.f32.mrb[15].mxu0 }
 0xf0f   :  { %10750 = vtanh.f32 %v839_v16  ;;  %v9014_v57 = vmul.f32 -1.442695, %v839_v16  ;;  %v9015_v21 = vmul.f32 -1.442695, %v840_v18 }
 0xf10   :  { %10752 = vtanh.f32 %v840_v18 }
 0xf11   :  { %10754 = vpow2.f32 %v9014_v57 }
 0xf12   :  { %10756 = vpow2.f32 %v9015_v21 }
 0xf19   :  { %v10751_v56 = vpop.eup %10750 }
 0xf1a   :  { %v10753_v20 = vpop.eup %10752  ;;  %865 = vrot.lane.b32.xlu1 %v10751_v56, %s11072_s0 }
 0xf1b   :  { %867 = vrot.lane.b32.xlu0 %v10753_v20, %s11072_s0  ;;  %v10755_v22 = vpop.eup %10754 }
 0xf1c   :  { %v10757_v23 = vpop.eup %10756  ;;  %v847_v24 = vadd.f32 1.0, %v10755_v22 }
 0xf1d   :  { %v848_v25 = vadd.f32 1.0, %v10757_v23 }
 0xf1e   :  { %10758 = vrcp.f32 %v847_v24 }
 0xf1f   :  { %10760 = vrcp.f32 %v848_v25 }
 0xf28   :  { %v10759_v26 = vpop.eup %10758 }
 0xf29   :  { %v10761_v28 = vpop.eup %10760  ;;  %v861_v45 = vmul.f32 %v10759_v26, %v857_v49 }
 0xf2a   :  { %v862_v30 = vmul.f32 %v10761_v28, %v858_v32 }
 0xf8c   :  { %v866_v27 = vpop.permute.xlu1 %865 }
 0xf8d   :  { %v868_v29 = vpop.permute.xlu0 %867  ;;  %v871_v31 = vmul.f32 %v10759_v26, %v866_v27 }
 0xf8e   :  { %v872_v33 = vmul.f32 %v10761_v28, %v868_v29 }
 0xf8f   :  { %875 = vrot.lane.b32.xlu1 %v871_v31, %s11073_s5 }
 0xf90   :  { %877 = vrot.lane.b32.xlu0 %v872_v33, %s11073_s5 }
0x1001   :  { %v876_v34 = vpop.permute.xlu1 %875 }
0x1002   :  { %v878_v35 = vpop.permute.xlu0 %877  ;;  %v881_v36 = vadd.f32 %v876_v34, %v861_v45 }
0x1003   :  { %v882_v37 = vadd.f32 %v878_v35, %v862_v30 }
0x1004   :  { %10762 = vtanh.f32 %v881_v36  ;;  %v973_v20 = vrot.slane %v881_v36, 7 }
0x1005   :  { %10764 = vtanh.f32 %v882_v37  ;;  %v974_v57 = vrot.slane %v882_v37, 7 }
0x100e   :  { %v10763_v38 = vpop.eup %10762 }
0x100f   :  { %v10765_v39 = vpop.eup %10764  ;;  %887 = vrot.lane.b32.xlu1 %v10763_v38, %s11072_s0 }
0x1010   :  { %889 = vrot.lane.b32.xlu0 %v10765_v39, %s11072_s0 }
0x1081   :  { %v888_v40 = vpop.permute.xlu1 %887 }
0x1082   :  { %v890_v41 = vpop.permute.xlu0 %889  ;;  %v893_v42 = vmul.f32 %v10759_v26, %v888_v40 }
0x1083   :  { %v894_v43 = vmul.f32 %v10761_v28, %v890_v41 }
0x1084   :  { %v895_v44 = vpack.c.bf16 %v893_v42, %v893_v42  ;;  %v11469_v46 = vsel %vm1139_vm8, %v11442_v62, %v893_v42 }
0x1085   :  { %v896_v47 = vpack.c.bf16 %v894_v43, %v894_v43  ;;  %v11473_v48 = vsel %vm1139_vm8, %v11446_v0, %v894_v43 }
0x1086   :  { %v899_v50 = vunpack.c.l.b16 %v895_v44 }
0x1087   :  { %v900_v51 = vunpack.c.l.b16 %v896_v47 }
0x1088   :  { %v901_v52 = vrot.slane %v899_v50, 5 }
0x1089   :  { %v902_v53 = vrot.slane %v900_v51, 4 }
0x108b   :  { %v903_v54 = vsel %vm324_vm2, %v902_v53, %v901_v52 }
0x108c   :  { %v904_v55 = vpack.c.b16 %v903_v54, %v903_v54 }
0x108e   :  { %905 = vrot.lane.b32.xlu1 %v904_v55, %s11073_s5 }
0x1100   :  { %v906_v58 = vpop.permute.xlu1 %905 }
0x1101   :  { %10005 = vmatmul.mubr.msk.bf16.vlgmr.msra.gmra.mrb[12].mxu1 %vm219_vm3, %v906_v58 }
0x1102   :  { %10020 = vmatprep.mubr.msk.bf16.mxu1 %vm11070_vm0, %v11069_v1 }
0x11d4   :  { %v944_v59 = vpop.f32.mrb[12].mxu1 }
0x11d5   :  { %v951_v60 = vrot.slane %v944_v59, 2  ;;  %v952_v61 = vrot.slane %v944_v59, 3  ;;  %v10006_v62 = vpop.f32.mrb[13].mxu1 }
0x11d6   :  { %v947_v63 = vpop.f32.mrb[14].mxu1 }
0x11d7   :  { %v955_v0 = vadd.f32 %v951_v60, %v11286_v17  ;;  %v956_v2 = vadd.f32 %v952_v61, %v11284_v14  ;;  %v10007_v3 = vpop.f32.mrb[15].mxu1 }
0x11d9   :  { %10766 = vtanh.f32 %v955_v0  ;;  %v9017_v6 = vmul.f32 -1.442695, %v955_v0  ;;  %v9018_v8 = vmul.f32 -1.442695, %v956_v2 }
0x11da   :  { %10768 = vtanh.f32 %v956_v2 }
0x11db   :  { %10770 = vpow2.f32 %v9017_v6 }
0x11dc   :  { %10772 = vpow2.f32 %v9018_v8 }
0x11e3   :  { %v10767_v4 = vpop.eup %10766 }
0x11e4   :  { %v10769_v5 = vpop.eup %10768  ;;  %981 = vrot.lane.b32.xlu0 %v10767_v4, %s11072_s0 }
0x11e5   :  { %983 = vrot.lane.b32.xlu1 %v10769_v5, %s11072_s0  ;;  %v10771_v9 = vpop.eup %10770 }
0x11e6   :  { %v10773_v10 = vpop.eup %10772  ;;  %v963_v11 = vadd.f32 1.0, %v10771_v9 }
0x11e7   :  { %v964_v12 = vadd.f32 1.0, %v10773_v10 }
0x11e8   :  { %10774 = vrcp.f32 %v963_v11 }
0x11e9   :  { %10776 = vrcp.f32 %v964_v12  ;;  %v11508_v12 = vld [vmem:[%s11118_s25] sm:$0xff]  }
0x11f2   :  { %v10775_v13 = vpop.eup %10774 }
0x11f3   :  { %v10777_v16 = vpop.eup %10776  ;;  %v977_v21 = vmul.f32 %v10775_v13, %v973_v20 }
0x11f4   :  { %v978_v22 = vmul.f32 %v10777_v16, %v974_v57 }
0x1256   :  { %v982_v15 = vpop.permute.xlu0 %981 }
0x1257   :  { %v984_v18 = vpop.permute.xlu1 %983  ;;  %v987_v19 = vmul.f32 %v10775_v13, %v982_v15  ;;  %v11513_v15 = vld [vmem:[%s11118_s25 + $0x8] sm:$0xff]   ;;  %s11078_s25 = smov 80  }
0x1258   :  { %v988_v56 = vmul.f32 %v10777_v16, %v984_v18 }
0x1259   :  { %991 = vrot.lane.b32.xlu0 %v987_v19, %s11073_s5 }
0x125a   :  { %993 = vrot.lane.b32.xlu1 %v988_v56, %s11073_s5 }
0x12cb   :  { %v992_v23 = vpop.permute.xlu0 %991 }
0x12cc   :  { %v994_v24 = vpop.permute.xlu1 %993  ;;  %v997_v25 = vadd.f32 %v992_v23, %v977_v21 }
0x12cd   :  { %v998_v26 = vadd.f32 %v994_v24, %v978_v22 }
0x12ce   :  { %10778 = vtanh.f32 %v997_v25  ;;  %v1089_v3 = vrot.slane %v997_v25, 7 }
0x12cf   :  { %10780 = vtanh.f32 %v998_v26  ;;  %v1090_v4 = vrot.slane %v998_v26, 7 }
0x12d8   :  { %v10779_v27 = vpop.eup %10778 }
0x12d9   :  { %v10781_v28 = vpop.eup %10780  ;;  %1003 = vrot.lane.b32.xlu0 %v10779_v27, %s11072_s0 }
0x12da   :  { %1005 = vrot.lane.b32.xlu1 %v10781_v28, %s11072_s0 }
0x134b   :  { %v1004_v29 = vpop.permute.xlu0 %1003 }
0x134c   :  { %v1006_v31 = vpop.permute.xlu1 %1005  ;;  %v1009_v33 = vmul.f32 %v10775_v13, %v1004_v29  ;;  %v10405_v13 = vld [vmem:[%s11113_s21] sm:$0xff]  }
0x134d   :  { %v1010_v49 = vmul.f32 %v10777_v16, %v1006_v31  ;;  %10017 = vmatpush3.bf16.msra.mxu1 %v10405_v13  ;;  %v10407_v16 = vld [vmem:[%s11113_s21 + $0x8] sm:$0xff]   ;;  %v9022_v31 = vld [vmem:[%s11123_s29] ss:$0 sm:$0xff]  ;;  %s11077_s21 = smov 56   ;;  %s11079_s29 = smov 112  }
0x134e   :  { %v1011_v32 = vpack.c.bf16 %v1009_v33, %v1009_v33  ;;  %v11490_v45 = vsel %vm1142_vm9, %v11469_v46, %v1009_v33  ;;  %10018 = vmatprep.subr.bf16.mxu1 %v11069_v1 }
0x134f   :  { %v1012_v30 = vpack.c.bf16 %v1010_v49, %v1010_v49  ;;  %v11494_v34 = vsel %vm1142_vm9, %v11473_v48, %v1010_v49 }
0x1350   :  { %v1015_v35 = vunpack.c.l.b16 %v1011_v32 }
0x1351   :  { %v1016_v36 = vunpack.c.l.b16 %v1012_v30  ;;  %10019 = vmatpush3.bf16.msra.mxu1 %v10407_v16 }
0x1352   :  { %v1017_v37 = vrot.slane %v1015_v35, 6  ;;  %10032 = vmatprep.subr.bf16.mxu1 %v11069_v1 }
0x1353   :  { %v1018_v38 = vrot.slane %v1016_v36, 5 }
0x1355   :  { %v1019_v39 = vsel %vm324_vm2, %v1018_v38, %v1017_v37 }
0x1356   :  { %v1020_v40 = vpack.c.b16 %v1019_v39, %v1019_v39 }
0x1358   :  { %1021 = vrot.lane.b32.xlu0 %v1020_v40, %s11073_s5 }
0x13ca   :  { %v1022_v41 = vpop.permute.xlu0 %1021 }
0x13cb   :  { %10013 = vmatmul.mubr.msk.bf16.vlgmr.msra.gmra.mrb[16].mxu0 %vm219_vm3, %v1022_v41 }
0x13cc   :  { %10028 = vmatprep.mubr.msk.bf16.mxu0 %vm11070_vm0, %v11069_v1  ;;  %10025 = vmatpush3.bf16.msra.mxu0 %v11508_v12 }
0x13cd   :  { %10026 = vmatprep.subr.bf16.mxu0 %v11069_v1 }
0x13d0   :  { %10027 = vmatpush3.bf16.msra.mxu0 %v11513_v15 }
0x13d1   :  { %10040 = vmatprep.subr.bf16.mxu0 %v11069_v1 }
0x13d3   :  { %10029 = vmatmul.mubr.bf16.vlgmr.msra.gmra.mrb[20].mxu0 %v11071_v7 }
0x13d4   :  { %10041 = vmatpush3.bf16.msra.mxu0 %v11508_v12  ;;  %10044 = vmatprep.mubr.msk.bf16.mxu0 %vm11070_vm0, %v11069_v1 }
0x13d5   :  { %10042 = vmatprep.subr.bf16.mxu0 %v11069_v1 }
0x13d8   :  { %10043 = vmatpush3.bf16.msra.mxu0 %v11513_v15 }
0x13d9   :  { %10056 = vmatprep.subr.bf16.mxu0 %v11069_v1 }
0x149e   :  { %v1060_v42 = vpop.f32.mrb[16].mxu0 }
0x149f   :  { %v1067_v43 = vrot.slane %v1060_v42, 1  ;;  %v1068_v44 = vrot.slane %v1060_v42, 2  ;;  %v10014_v46 = vpop.f32.mrb[17].mxu0 }
0x14a0   :  { %v1063_v47 = vpop.f32.mrb[18].mxu0 }
0x14a1   :  { %v1071_v48 = vadd.f32 %v1067_v43, %v11286_v17  ;;  %v1072_v50 = vadd.f32 %v1068_v44, %v11284_v14  ;;  %v10015_v51 = vpop.f32.mrb[19].mxu0 }
0x14a3   :  { %10782 = vtanh.f32 %v1071_v48  ;;  %v9020_v54 = vmul.f32 -1.442695, %v1071_v48  ;;  %v9021_v55 = vmul.f32 -1.442695, %v1072_v50 }
0x14a4   :  { %10784 = vtanh.f32 %v1072_v50 }
0x14a5   :  { %10786 = vpow2.f32 %v9020_v54 }
0x14a6   :  { %10788 = vpow2.f32 %v9021_v55  ;;  %v1269_v25 = vpop.f32.mrb[20].mxu0 }
0x14a7   :  { %v10030_v26 = vpop.f32.mrb[21].mxu0  ;;  %v1276_v49 = vrot.slane %v1269_v25, 1 }
0x14a8   :  { %v1272_v27 = vpop.f32.mrb[22].mxu0 }
0x14a9   :  { %v10031_v28 = vpop.f32.mrb[23].mxu0 }
0x14ad   :  { %v10783_v52 = vpop.eup %10782 }
0x14ae   :  { %v10785_v53 = vpop.eup %10784  ;;  %1097 = vrot.lane.b32.xlu1 %v10783_v52, %s11072_s0 }
0x14af   :  { %1099 = vrot.lane.b32.xlu0 %v10785_v53, %s11072_s0  ;;  %v10787_v58 = vpop.eup %10786 }
0x14b0   :  { %v10789_v59 = vpop.eup %10788  ;;  %v1079_v60 = vadd.f32 1.0, %v10787_v58 }
0x14b1   :  { %v1080_v61 = vadd.f32 1.0, %v10789_v59 }
0x14b2   :  { %10790 = vrcp.f32 %v1079_v60 }
0x14b3   :  { %10792 = vrcp.f32 %v1080_v61 }
0x14bc   :  { %v10791_v14 = vpop.eup %10790 }
0x14bd   :  { %v10793_v62 = vpop.eup %10792  ;;  %v1093_v5 = vmul.f32 %v10791_v14, %v1089_v3 }
0x14be   :  { %v1094_v6 = vmul.f32 %v10793_v62, %v1090_v4 }
0x1520   :  { %v1098_v17 = vpop.permute.xlu1 %1097 }
0x1521   :  { %v1100_v63 = vpop.permute.xlu0 %1099  ;;  %v1103_v0 = vmul.f32 %v10791_v14, %v1098_v17 }
0x1522   :  { %v1104_v2 = vmul.f32 %v10793_v62, %v1100_v63 }
0x1523   :  { %1107 = vrot.lane.b32.xlu1 %v1103_v0, %s11073_s5 }
0x1524   :  { %1109 = vrot.lane.b32.xlu0 %v1104_v2, %s11073_s5 }
0x1595   :  { %v1108_v8 = vpop.permute.xlu1 %1107 }
0x1596   :  { %v1110_v9 = vpop.permute.xlu0 %1109  ;;  %v1113_v10 = vadd.f32 %v1108_v8, %v1093_v5 }
0x1597   :  { %v1114_v11 = vadd.f32 %v1110_v9, %v1094_v6 }
0x1598   :  { %10794 = vtanh.f32 %v1113_v10 }
0x1599   :  { %10796 = vtanh.f32 %v1114_v11 }
0x15a2   :  { %v10795_v18 = vpop.eup %10794 }
0x15a3   :  { %v10797_v19 = vpop.eup %10796  ;;  %1119 = vrot.lane.b32.xlu1 %v10795_v18, %s11072_s0 }
0x15a4   :  { %1121 = vrot.lane.b32.xlu0 %v10797_v19, %s11072_s0 }
0x1615   :  { %v1120_v56 = vpop.permute.xlu1 %1119 }
0x1616   :  { %v1122_v20 = vpop.permute.xlu0 %1121  ;;  %v1125_v57 = vmul.f32 %v10791_v14, %v1120_v56 }
0x1617   :  { %v1126_v21 = vmul.f32 %v10793_v62, %v1122_v20 }
0x1618   :  { %v1146_v22 = vsel %vm1145_vm10, %v11490_v45, %v1125_v57 }
0x1619   :  { %v1147_v23 = vsel %vm1145_vm10, %v11494_v34, %v1126_v21 }
0x161a   :  { %v1152_v24 = vpack.c.bf16 %v1147_v23, %v1146_v22 }
0x161c   :  { %1161 = vrot.lane.b32.xlu1 %v1152_v24, %s11073_s5 }
0x168e   :  { %v1162_v29 = vpop.permute.xlu1 %1161 }
0x168f   :  { %10021 = vmatmul.mubr.msk.bf16.vlgmr.msra.gmra.mrb[16].mxu1 %vm219_vm3, %v1162_v29 }
0x1690   :  { %10033 = vmatpush3.bf16.msra.mxu1 %v11508_v12  ;;  %10036 = vmatprep.mubr.msk.bf16.mxu1 %vm11070_vm0, %v11069_v1 }
0x1691   :  { %10034 = vmatprep.subr.bf16.mxu1 %v11069_v1 }
0x1694   :  { %10035 = vmatpush3.bf16.msra.mxu1 %v11513_v15 }
0x1695   :  { %10048 = vmatprep.subr.bf16.mxu1 %v11069_v1 }
0x1762   :  { %v1212_v33 = vpop.f32.mrb[16].mxu1 }
0x1763   :  { %v11543_v32 = vadd.f32 %v9022_v31, %v1212_v33  ;;  %v10022_v45 = vpop.f32.mrb[17].mxu1 }
0x1764   :  { %v1215_v30 = vpop.f32.mrb[18].mxu1 }
0x1765   :  { %v11545_v34 = vadd.f32 %v9022_v31, %v1215_v30  ;;  %v10023_v35 = vpop.f32.mrb[19].mxu1  ;;  %v1279_v36 = vadd.f32 %v1269_v25, %v11543_v32 }
0x1767   :  { %10798 = vtanh.f32 %v1279_v36  ;;  %v1280_v37 = vadd.f32 %v1276_v49, %v11545_v34  ;;  %v9028_v40 = vmul.f32 -1.442695, %v1279_v36 }
0x1769   :  { %10800 = vtanh.f32 %v1280_v37  ;;  %v9029_v41 = vmul.f32 -1.442695, %v1280_v37 }
0x176a   :  { %10802 = vpow2.f32 %v9028_v40 }
0x176b   :  { %10804 = vpow2.f32 %v9029_v41 }
0x1771   :  { %v10799_v38 = vpop.eup %10798 }
0x1772   :  { %1299 = vrot.lane.b32.xlu1 %v10799_v38, %s11072_s0 }
0x1773   :  { %v10801_v39 = vpop.eup %10800 }
0x1774   :  { %1301 = vrot.lane.b32.xlu0 %v10801_v39, %s11072_s0  ;;  %v10803_v42 = vpop.eup %10802 }
0x1775   :  { %v10805_v43 = vpop.eup %10804  ;;  %v1287_v44 = vadd.f32 1.0, %v10803_v42 }
0x1776   :  { %v1288_v46 = vadd.f32 1.0, %v10805_v43 }
0x1777   :  { %10806 = vrcp.f32 %v1287_v44 }
0x1778   :  { %10808 = vrcp.f32 %v1288_v46 }
0x1781   :  { %v10807_v47 = vpop.eup %10806 }
0x1782   :  { %v10809_v51 = vpop.eup %10808  ;;  %v1295_v54 = vmul.f32 0.0, %v10807_v47 }
0x1783   :  { %v1296_v59 = vmul.f32 0.0, %v10809_v51 }
0x17e4   :  { %v1300_v48 = vpop.permute.xlu1 %1299 }
0x17e5   :  { %v1305_v50 = vmul.f32 %v10807_v47, %v1300_v48 }
0x17e6   :  { %v1302_v52 = vpop.permute.xlu0 %1301 }
0x17e7   :  { %1309 = vrot.lane.b32.xlu1 %v1305_v50, %s11073_s5  ;;  %v1306_v53 = vmul.f32 %v10809_v51, %v1302_v52 }
0x17e9   :  { %1311 = vrot.lane.b32.xlu0 %v1306_v53, %s11073_s5 }
0x1859   :  { %v1310_v55 = vpop.permute.xlu1 %1309 }
0x185a   :  { %v11553_v58 = vadd.f32 %v1310_v55, %v1295_v54 }
0x185b   :  { %v1312_v60 = vpop.permute.xlu0 %1311 }
0x185c   :  { %10810 = vtanh.f32 %v11553_v58  ;;  %v1316_v61 = vadd.f32 %v1312_v60, %v1296_v59  ;;  %v1405_v37 = vrot.slane %v11553_v58, 7 }
0x185e   :  { %10812 = vtanh.f32 %v1316_v61  ;;  %v1406_v35 = vrot.slane %v1316_v61, 7 }
0x1866   :  { %v10811_v14 = vpop.eup %10810 }
0x1867   :  { %1321 = vrot.lane.b32.xlu1 %v10811_v14, %s11072_s0 }
0x1868   :  { %v10813_v17 = vpop.eup %10812 }
0x1869   :  { %1323 = vrot.lane.b32.xlu0 %v10813_v17, %s11072_s0 }
0x18d9   :  { %v1322_v62 = vpop.permute.xlu1 %1321 }
0x18da   :  { %v11558_v63 = vmul.f32 %v10807_v47, %v1322_v62 }
0x18db   :  { %v1324_v0 = vpop.permute.xlu0 %1323 }
0x18dc   :  { %v11560_v2 = vmul.f32 %v10809_v51, %v1324_v0  ;;  %v1329_v3 = vpack.c.bf16 %v11558_v63, %v11558_v63 }
0x18de   :  { %v1330_v4 = vpack.c.bf16 %v11560_v2, %v11560_v2  ;;  %v1333_v6 = vunpack.c.l.b16 %v1329_v3 }
0x18e0   :  { %v1334_v5 = vunpack.c.l.b16 %v1330_v4 }
0x18e2   :  { %v1335_v8 = vrot.slane %v1334_v5, 7 }
0x18e4   :  { %v1336_v9 = vsel %vm324_vm2, %v1335_v8, %v1333_v6 }
0x18e5   :  { %v1337_v10 = vpack.c.b16 %v1336_v9, %v1336_v9 }
0x18e7   :  { %1338 = vrot.lane.b32.xlu0 %v1337_v10, %s11073_s5 }
0x1959   :  { %v1339_v11 = vpop.permute.xlu0 %1338 }
0x195a   :  { %10037 = vmatmul.mubr.msk.bf16.vlgmr.msra.gmra.mrb[20].mxu1 %vm219_vm3, %v1339_v11 }
0x195b   :  { %10049 = vmatpush3.bf16.msra.mxu1 %v11508_v12  ;;  %10052 = vmatprep.mubr.msk.bf16.mxu1 %vm11070_vm0, %v11069_v1 }
0x195c   :  { %10050 = vmatprep.subr.bf16.mxu1 %v11069_v1 }
0x195f   :  { %10051 = vmatpush3.bf16.msra.mxu1 %v11513_v15 }
0x1960   :  { %10064 = vmatprep.subr.bf16.mxu1 %v11069_v1 }
0x1a2d   :  { %v1377_v13 = vpop.f32.mrb[20].mxu1 }
0x1a2e   :  { %v1384_v16 = vrot.slane %v1377_v13, 7  ;;  %v1388_v18 = vadd.f32 %v1377_v13, %v11545_v34  ;;  %v10038_v19 = vpop.f32.mrb[21].mxu1 }
0x1a2f   :  { %v1380_v56 = vpop.f32.mrb[22].mxu1 }
0x1a30   :  { %v1387_v20 = vadd.f32 %v1384_v16, %v11543_v32  ;;  %10814 = vtanh.f32 %v1388_v18  ;;  %v10039_v57 = vpop.f32.mrb[23].mxu1  ;;  %v9032_v23 = vmul.f32 -1.442695, %v1388_v18 }
0x1a32   :  { %10816 = vtanh.f32 %v1387_v20  ;;  %v9031_v24 = vmul.f32 -1.442695, %v1387_v20 }
0x1a33   :  { %10818 = vpow2.f32 %v9032_v23 }
0x1a34   :  { %10820 = vpow2.f32 %v9031_v24 }
0x1a3a   :  { %v10815_v21 = vpop.eup %10814 }
0x1a3b   :  { %1415 = vrot.lane.b32.xlu0 %v10815_v21, %s11072_s0 }
0x1a3c   :  { %v10817_v22 = vpop.eup %10816 }
0x1a3d   :  { %1413 = vrot.lane.b32.xlu1 %v10817_v22, %s11072_s0  ;;  %v10819_v25 = vpop.eup %10818 }
0x1a3e   :  { %v10821_v26 = vpop.eup %10820  ;;  %v1396_v27 = vadd.f32 1.0, %v10819_v25 }
0x1a3f   :  { %v1395_v28 = vadd.f32 1.0, %v10821_v26 }
0x1a40   :  { %10822 = vrcp.f32 %v1396_v27 }
0x1a41   :  { %10824 = vrcp.f32 %v1395_v28 }
0x1a4a   :  { %v10823_v29 = vpop.eup %10822 }
0x1a4b   :  { %v10825_v49 = vpop.eup %10824  ;;  %v1410_v36 = vmul.f32 %v10823_v29, %v1406_v35 }
0x1a4c   :  { %v1409_v40 = vmul.f32 %v10825_v49, %v1405_v37 }
0x1aad   :  { %v1416_v31 = vpop.permute.xlu0 %1415 }
0x1aae   :  { %v1420_v33 = vmul.f32 %v10823_v29, %v1416_v31 }
0x1aaf   :  { %v1414_v45 = vpop.permute.xlu1 %1413 }
0x1ab0   :  { %1425 = vrot.lane.b32.xlu0 %v1420_v33, %s11073_s5  ;;  %v1419_v30 = vmul.f32 %v10825_v49, %v1414_v45 }
0x1ab2   :  { %1423 = vrot.lane.b32.xlu1 %v1419_v30, %s11073_s5 }
0x1b22   :  { %v1426_v38 = vpop.permute.xlu0 %1425 }
0x1b23   :  { %v11582_v39 = vadd.f32 %v1426_v38, %v1410_v36 }
0x1b24   :  { %v1424_v41 = vpop.permute.xlu1 %1423 }
0x1b25   :  { %10826 = vtanh.f32 %v11582_v39  ;;  %v1429_v42 = vadd.f32 %v1424_v41, %v1409_v40  ;;  %v1521_v24 = vrot.slane %v11582_v39, 7 }
0x1b27   :  { %10828 = vtanh.f32 %v1429_v42  ;;  %v1520_v23 = vrot.slane %v1429_v42, 7 }
0x1b2f   :  { %v10827_v43 = vpop.eup %10826 }
0x1b30   :  { %1437 = vrot.lane.b32.xlu0 %v10827_v43, %s11072_s0 }
0x1b31   :  { %v10829_v44 = vpop.eup %10828 }
0x1b32   :  { %1435 = vrot.lane.b32.xlu1 %v10829_v44, %s11072_s0 }
0x1ba2   :  { %v1438_v46 = vpop.permute.xlu0 %1437 }
0x1ba3   :  { %v11587_v47 = vmul.f32 %v10823_v29, %v1438_v46 }
0x1ba4   :  { %v1436_v48 = vpop.permute.xlu1 %1435 }
0x1ba5   :  { %v11589_v50 = vmul.f32 %v10825_v49, %v1436_v48  ;;  %v1444_v51 = vpack.c.bf16 %v11587_v47, %v11587_v47  ;;  %v2139_v38 = vsel %vm1127_vm4, %v11560_v2, %v11587_v47 }
0x1ba7   :  { %v1443_v52 = vpack.c.bf16 %v11589_v50, %v11589_v50  ;;  %v1448_v54 = vunpack.c.l.b16 %v1444_v51  ;;  %v2138_v36 = vsel %vm1127_vm4, %v11558_v63, %v11589_v50 }
0x1ba9   :  { %v1447_v53 = vunpack.c.l.b16 %v1443_v52 }
0x1bab   :  { %v1449_v55 = vrot.slane %v1447_v53, 1 }
0x1bad   :  { %v1450_v58 = vsel %vm324_vm2, %v1448_v54, %v1449_v55 }
0x1bae   :  { %v1451_v59 = vpack.c.b16 %v1450_v58, %v1450_v58 }
0x1bb0   :  { %1452 = vrot.lane.b32.xlu1 %v1451_v59, %s11073_s5 }
0x1c22   :  { %v1453_v60 = vpop.permute.xlu1 %1452 }
0x1c23   :  { %10045 = vmatmul.mubr.msk.bf16.vlgmr.msra.gmra.mrb[24].mxu0 %vm219_vm3, %v1453_v60 }
0x1c24   :  { %10057 = vmatpush3.bf16.msra.mxu0 %v11508_v12  ;;  %10060 = vmatprep.mubr.msk.bf16.mxu0 %vm11070_vm0, %v11069_v1 }
0x1c25   :  { %10058 = vmatprep.subr.bf16.mxu0 %v11069_v1 }
0x1c28   :  { %10059 = vmatpush3.bf16.msra.mxu0 %v11513_v15 }
0x1c29   :  { %10072 = vmatprep.subr.bf16.mxu0 %v11069_v1 }
0x1cf6   :  { %v1491_v61 = vpop.f32.mrb[24].mxu0 }
0x1cf7   :  { %v1498_v14 = vrot.slane %v1491_v61, 6  ;;  %v1499_v17 = vrot.slane %v1491_v61, 7  ;;  %v10046_v62 = vpop.f32.mrb[25].mxu0 }
0x1cf8   :  { %v1494_v0 = vpop.f32.mrb[26].mxu0 }
0x1cf9   :  { %v1502_v3 = vadd.f32 %v1498_v14, %v11543_v32  ;;  %v1503_v4 = vadd.f32 %v1499_v17, %v11545_v34  ;;  %v10047_v5 = vpop.f32.mrb[27].mxu0 }
0x1cfb   :  { %10830 = vtanh.f32 %v1502_v3  ;;  %v9034_v9 = vmul.f32 -1.442695, %v1502_v3  ;;  %v9035_v10 = vmul.f32 -1.442695, %v1503_v4 }
0x1cfc   :  { %10832 = vtanh.f32 %v1503_v4 }
0x1cfd   :  { %10834 = vpow2.f32 %v9034_v9 }
0x1cfe   :  { %10836 = vpow2.f32 %v9035_v10 }
0x1d05   :  { %v10831_v6 = vpop.eup %10830 }
0x1d06   :  { %v10833_v8 = vpop.eup %10832  ;;  %1528 = vrot.lane.b32.xlu0 %v10831_v6, %s11072_s0 }
0x1d07   :  { %1530 = vrot.lane.b32.xlu1 %v10833_v8, %s11072_s0  ;;  %v10835_v11 = vpop.eup %10834 }
0x1d08   :  { %v10837_v13 = vpop.eup %10836  ;;  %v1510_v16 = vadd.f32 1.0, %v10835_v11 }
0x1d09   :  { %v1511_v18 = vadd.f32 1.0, %v10837_v13 }
0x1d0a   :  { %10838 = vrcp.f32 %v1510_v16 }
0x1d0b   :  { %10840 = vrcp.f32 %v1511_v18 }
0x1d14   :  { %v10839_v19 = vpop.eup %10838 }
0x1d15   :  { %v10841_v20 = vpop.eup %10840  ;;  %v1524_v25 = vmul.f32 %v10839_v19, %v1520_v23 }
0x1d16   :  { %v1525_v26 = vmul.f32 %v10841_v20, %v1521_v24 }
0x1d78   :  { %v1529_v56 = vpop.permute.xlu0 %1528 }
0x1d79   :  { %v1531_v57 = vpop.permute.xlu1 %1530  ;;  %v1534_v21 = vmul.f32 %v10839_v19, %v1529_v56 }
0x1d7a   :  { %v1535_v22 = vmul.f32 %v10841_v20, %v1531_v57 }
0x1d7b   :  { %1538 = vrot.lane.b32.xlu0 %v1534_v21, %s11073_s5 }
0x1d7c   :  { %1540 = vrot.lane.b32.xlu1 %v1535_v22, %s11073_s5 }
0x1ded   :  { %v1539_v27 = vpop.permute.xlu0 %1538 }
0x1dee   :  { %v1541_v28 = vpop.permute.xlu1 %1540  ;;  %v11611_v29 = vadd.f32 %v1539_v27, %v1524_v25 }
0x1def   :  { %v11613_v31 = vadd.f32 %v1541_v28, %v1525_v26 }
0x1df0   :  { %10842 = vtanh.f32 %v11611_v29  ;;  %v1636_v13 = vrot.slane %v11611_v29, 7 }
0x1df1   :  { %10844 = vtanh.f32 %v11613_v31  ;;  %v1637_v16 = vrot.slane %v11613_v31, 7 }
0x1dfa   :  { %v10843_v33 = vpop.eup %10842 }
0x1dfb   :  { %v10845_v49 = vpop.eup %10844  ;;  %1550 = vrot.lane.b32.xlu0 %v10843_v33, %s11072_s0 }
0x1dfc   :  { %1552 = vrot.lane.b32.xlu1 %v10845_v49, %s11072_s0 }
0x1e6d   :  { %v1551_v45 = vpop.permute.xlu0 %1550 }
0x1e6e   :  { %v1553_v30 = vpop.permute.xlu1 %1552  ;;  %v1556_v35 = vmul.f32 %v10839_v19, %v1551_v45 }
0x1e6f   :  { %v1557_v37 = vmul.f32 %v10841_v20, %v1553_v30 }
0x1e70   :  { %v1558_v39 = vpack.c.bf16 %v1556_v35, %v1556_v35  ;;  %v11626_v40 = vsel %vm1130_vm5, %v2138_v36, %v1556_v35 }
0x1e71   :  { %v1559_v41 = vpack.c.bf16 %v1557_v37, %v1557_v37  ;;  %v11629_v42 = vsel %vm1130_vm5, %v2139_v38, %v1557_v37 }
0x1e72   :  { %v1562_v43 = vunpack.c.l.b16 %v1558_v39 }
0x1e73   :  { %v1563_v44 = vunpack.c.l.b16 %v1559_v41 }
0x1e74   :  { %v1564_v46 = vrot.slane %v1562_v43, 2 }
0x1e75   :  { %v1565_v48 = vrot.slane %v1563_v44, 1 }
0x1e77   :  { %v1566_v51 = vsel %vm324_vm2, %v1565_v48, %v1564_v46 }
0x1e78   :  { %v1567_v63 = vpack.c.b16 %v1566_v51, %v1566_v51 }
0x1e7a   :  { %1568 = vrot.lane.b32.xlu0 %v1567_v63, %s11073_s5 }
0x1eec   :  { %v1569_v50 = vpop.permute.xlu0 %1568 }
0x1eed   :  { %10053 = vmatmul.mubr.msk.bf16.vlgmr.msra.gmra.mrb[24].mxu1 %vm219_vm3, %v1569_v50 }
0x1eee   :  { %10065 = vmatpush3.bf16.msra.mxu1 %v11508_v12  ;;  %10068 = vmatprep.mubr.msk.bf16.mxu1 %vm11070_vm0, %v11069_v1 }
0x1eef   :  { %10066 = vmatprep.subr.bf16.mxu1 %v11069_v1 }
0x1ef2   :  { %10067 = vmatpush3.bf16.msra.mxu1 %v11513_v15 }
0x1ef3   :  { %10080 = vmatprep.subr.bf16.mxu1 %v11069_v1 }
0x1fc0   :  { %v1607_v2 = vpop.f32.mrb[24].mxu1 }
0x1fc1   :  { %v1614_v47 = vrot.slane %v1607_v2, 5  ;;  %v1615_v52 = vrot.slane %v1607_v2, 6  ;;  %v10054_v53 = vpop.f32.mrb[25].mxu1 }
0x1fc2   :  { %v1610_v54 = vpop.f32.mrb[26].mxu1 }
0x1fc3   :  { %v1618_v55 = vadd.f32 %v1614_v47, %v11543_v32  ;;  %v1619_v58 = vadd.f32 %v1615_v52, %v11545_v34  ;;  %v10055_v59 = vpop.f32.mrb[27].mxu1 }
0x1fc5   :  { %10846 = vtanh.f32 %v1618_v55  ;;  %v9037_v14 = vmul.f32 -1.442695, %v1618_v55  ;;  %v9038_v17 = vmul.f32 -1.442695, %v1619_v58 }
0x1fc6   :  { %10848 = vtanh.f32 %v1619_v58 }
0x1fc7   :  { %10850 = vpow2.f32 %v9037_v14 }
0x1fc8   :  { %10852 = vpow2.f32 %v9038_v17 }
0x1fcf   :  { %v10847_v60 = vpop.eup %10846 }
0x1fd0   :  { %v10849_v61 = vpop.eup %10848  ;;  %1644 = vrot.lane.b32.xlu1 %v10847_v60, %s11072_s0 }
0x1fd1   :  { %1646 = vrot.lane.b32.xlu0 %v10849_v61, %s11072_s0  ;;  %v10851_v62 = vpop.eup %10850 }
0x1fd2   :  { %v10853_v0 = vpop.eup %10852  ;;  %v1626_v3 = vadd.f32 1.0, %v10851_v62 }
0x1fd3   :  { %v1627_v4 = vadd.f32 1.0, %v10853_v0 }
0x1fd4   :  { %10854 = vrcp.f32 %v1626_v3 }
0x1fd5   :  { %10856 = vrcp.f32 %v1627_v4 }
0x1fde   :  { %v10855_v5 = vpop.eup %10854 }
0x1fdf   :  { %v10857_v8 = vpop.eup %10856  ;;  %v1640_v18 = vmul.f32 %v10855_v5, %v1636_v13 }
0x1fe0   :  { %v1641_v19 = vmul.f32 %v10857_v8, %v1637_v16 }
0x2042   :  { %v1645_v6 = vpop.permute.xlu1 %1644 }
0x2043   :  { %v1647_v9 = vpop.permute.xlu0 %1646  ;;  %v1650_v10 = vmul.f32 %v10855_v5, %v1645_v6 }
0x2044   :  { %v1651_v11 = vmul.f32 %v10857_v8, %v1647_v9 }
0x2045   :  { %1654 = vrot.lane.b32.xlu1 %v1650_v10, %s11073_s5 }
0x2046   :  { %1656 = vrot.lane.b32.xlu0 %v1651_v11, %s11073_s5 }
0x20b7   :  { %v1655_v56 = vpop.permute.xlu1 %1654 }
0x20b8   :  { %v1657_v20 = vpop.permute.xlu0 %1656  ;;  %v11648_v57 = vadd.f32 %v1655_v56, %v1640_v18 }
0x20b9   :  { %v11650_v21 = vadd.f32 %v1657_v20, %v1641_v19 }
0x20ba   :  { %10858 = vtanh.f32 %v11648_v57  ;;  %v1752_v17 = vrot.slane %v11648_v57, 7 }
0x20bb   :  { %10860 = vtanh.f32 %v11650_v21  ;;  %v1753_v62 = vrot.slane %v11650_v21, 7 }
0x20c4   :  { %v10859_v22 = vpop.eup %10858 }
0x20c5   :  { %v10861_v23 = vpop.eup %10860  ;;  %1666 = vrot.lane.b32.xlu1 %v10859_v22, %s11072_s0 }
0x20c6   :  { %1668 = vrot.lane.b32.xlu0 %v10861_v23, %s11072_s0 }
0x2137   :  { %v1667_v24 = vpop.permute.xlu1 %1666 }
0x2138   :  { %v1669_v25 = vpop.permute.xlu0 %1668  ;;  %v1672_v26 = vmul.f32 %v10855_v5, %v1667_v24 }
0x2139   :  { %v1673_v27 = vmul.f32 %v10857_v8, %v1669_v25 }
0x213a   :  { %v1674_v28 = vpack.c.bf16 %v1672_v26, %v1672_v26  ;;  %v11658_v29 = vsel %vm1133_vm6, %v11626_v40, %v1672_v26 }
0x213b   :  { %v1675_v31 = vpack.c.bf16 %v1673_v27, %v1673_v27  ;;  %v11662_v33 = vsel %vm1133_vm6, %v11629_v42, %v1673_v27 }
0x213c   :  { %v1678_v49 = vunpack.c.l.b16 %v1674_v28 }
0x213d   :  { %v1679_v45 = vunpack.c.l.b16 %v1675_v31 }
0x213e   :  { %v1680_v30 = vrot.slane %v1678_v49, 3 }
0x213f   :  { %v1681_v35 = vrot.slane %v1679_v45, 2 }
0x2141   :  { %v1682_v36 = vsel %vm324_vm2, %v1681_v35, %v1680_v30 }
0x2142   :  { %v1683_v37 = vpack.c.b16 %v1682_v36, %v1682_v36 }
0x2144   :  { %1684 = vrot.lane.b32.xlu1 %v1683_v37, %s11073_s5 }
0x21b6   :  { %v1685_v38 = vpop.permute.xlu1 %1684 }
0x21b7   :  { %10061 = vmatmul.mubr.msk.bf16.vlgmr.msra.gmra.mrb[28].mxu0 %vm219_vm3, %v1685_v38 }
0x21b8   :  { %10073 = vmatpush3.bf16.msra.mxu0 %v11508_v12  ;;  %10076 = vmatprep.mubr.msk.bf16.mxu0 %vm11070_vm0, %v11069_v1 }
0x21b9   :  { %10074 = vmatprep.subr.bf16.mxu0 %v11069_v1 }
0x21bc   :  { %10075 = vmatpush3.bf16.msra.mxu0 %v11513_v15 }
0x21bd   :  { %10088 = vmatprep.subr.bf16.mxu0 %v11069_v1 }
0x228a   :  { %v1723_v39 = vpop.f32.mrb[28].mxu0 }
0x228b   :  { %v1730_v40 = vrot.slane %v1723_v39, 4  ;;  %v1731_v41 = vrot.slane %v1723_v39, 5  ;;  %v10062_v42 = vpop.f32.mrb[29].mxu0 }
0x228c   :  { %v1726_v43 = vpop.f32.mrb[30].mxu0 }
0x228d   :  { %v1734_v44 = vadd.f32 %v1730_v40, %v11543_v32  ;;  %v1735_v46 = vadd.f32 %v1731_v41, %v11545_v34  ;;  %v10063_v48 = vpop.f32.mrb[31].mxu0 }
0x228f   :  { %10862 = vtanh.f32 %v1734_v44  ;;  %v9040_v50 = vmul.f32 -1.442695, %v1734_v44  ;;  %v9041_v2 = vmul.f32 -1.442695, %v1735_v46 }
0x2290   :  { %10864 = vtanh.f32 %v1735_v46 }
0x2291   :  { %10866 = vpow2.f32 %v9040_v50 }
0x2292   :  { %10868 = vpow2.f32 %v9041_v2 }
0x2299   :  { %v10863_v51 = vpop.eup %10862 }
0x229a   :  { %v10865_v63 = vpop.eup %10864  ;;  %1760 = vrot.lane.b32.xlu0 %v10863_v51, %s11072_s0 }
0x229b   :  { %1762 = vrot.lane.b32.xlu1 %v10865_v63, %s11072_s0  ;;  %v10867_v47 = vpop.eup %10866 }
0x229c   :  { %v10869_v52 = vpop.eup %10868  ;;  %v1742_v53 = vadd.f32 1.0, %v10867_v47 }
0x229d   :  { %v1743_v54 = vadd.f32 1.0, %v10869_v52 }
0x229e   :  { %10870 = vrcp.f32 %v1742_v53 }
0x229f   :  { %10872 = vrcp.f32 %v1743_v54 }
0x22a8   :  { %v10871_v55 = vpop.eup %10870 }
0x22a9   :  { %v10873_v59 = vpop.eup %10872  ;;  %v1756_v0 = vmul.f32 %v10871_v55, %v1752_v17 }
0x22aa   :  { %v1757_v3 = vmul.f32 %v10873_v59, %v1753_v62 }
0x230c   :  { %v1761_v58 = vpop.permute.xlu0 %1760 }
0x230d   :  { %v1763_v60 = vpop.permute.xlu1 %1762  ;;  %v1766_v61 = vmul.f32 %v10871_v55, %v1761_v58 }
0x230e   :  { %v1767_v14 = vmul.f32 %v10873_v59, %v1763_v60 }
0x230f   :  { %1770 = vrot.lane.b32.xlu0 %v1766_v61, %s11073_s5 }
0x2310   :  { %1772 = vrot.lane.b32.xlu1 %v1767_v14, %s11073_s5 }
0x2381   :  { %v1771_v4 = vpop.permute.xlu0 %1770 }
0x2382   :  { %v1773_v5 = vpop.permute.xlu1 %1772  ;;  %v11681_v6 = vadd.f32 %v1771_v4, %v1756_v0 }
0x2383   :  { %v11683_v8 = vadd.f32 %v1773_v5, %v1757_v3 }
0x2384   :  { %10874 = vtanh.f32 %v11681_v6  ;;  %v1868_v63 = vrot.slane %v11681_v6, 7 }
0x2385   :  { %10876 = vtanh.f32 %v11683_v8  ;;  %v1869_v50 = vrot.slane %v11683_v8, 7 }
0x238e   :  { %v10875_v9 = vpop.eup %10874 }
0x238f   :  { %v10877_v10 = vpop.eup %10876  ;;  %1782 = vrot.lane.b32.xlu0 %v10875_v9, %s11072_s0 }
0x2390   :  { %1784 = vrot.lane.b32.xlu1 %v10877_v10, %s11072_s0 }
0x2401   :  { %v1783_v11 = vpop.permute.xlu0 %1782 }
0x2402   :  { %v1785_v13 = vpop.permute.xlu1 %1784  ;;  %v1788_v16 = vmul.f32 %v10871_v55, %v1783_v11 }
0x2403   :  { %v1789_v18 = vmul.f32 %v10873_v59, %v1785_v13 }
0x2404   :  { %v1790_v19 = vpack.c.bf16 %v1788_v16, %v1788_v16  ;;  %v11691_v56 = vsel %vm1136_vm7, %v11658_v29, %v1788_v16 }
0x2405   :  { %v1791_v20 = vpack.c.bf16 %v1789_v18, %v1789_v18  ;;  %v11695_v57 = vsel %vm1136_vm7, %v11662_v33, %v1789_v18 }
0x2406   :  { %v1794_v21 = vunpack.c.l.b16 %v1790_v19 }
0x2407   :  { %v1795_v22 = vunpack.c.l.b16 %v1791_v20 }
0x2408   :  { %v1796_v23 = vrot.slane %v1794_v21, 4 }
0x2409   :  { %v1797_v24 = vrot.slane %v1795_v22, 3 }
0x240b   :  { %v1798_v25 = vsel %vm324_vm2, %v1797_v24, %v1796_v23 }
0x240c   :  { %v1799_v26 = vpack.c.b16 %v1798_v25, %v1798_v25 }
0x240e   :  { %1800 = vrot.lane.b32.xlu0 %v1799_v26, %s11073_s5 }
0x2480   :  { %v1801_v27 = vpop.permute.xlu0 %1800 }
0x2481   :  { %10069 = vmatmul.mubr.msk.bf16.vlgmr.msra.gmra.mrb[28].mxu1 %vm219_vm3, %v1801_v27 }
0x2482   :  { %10081 = vmatpush3.bf16.msra.mxu1 %v11508_v12  ;;  %10084 = vmatprep.mubr.msk.bf16.mxu1 %vm11070_vm0, %v11069_v1 }
0x2483   :  { %10082 = vmatprep.subr.bf16.mxu1 %v11069_v1 }
0x2486   :  { %10083 = vmatpush3.bf16.msra.mxu1 %v11513_v15 }
0x2487   :  { %10096 = vmatprep.subr.bf16.mxu1 %v11069_v1 }
0x2554   :  { %v1839_v28 = vpop.f32.mrb[28].mxu1 }
0x2555   :  { %v1846_v29 = vrot.slane %v1839_v28, 3  ;;  %v1847_v31 = vrot.slane %v1839_v28, 4  ;;  %v10070_v33 = vpop.f32.mrb[29].mxu1 }
0x2556   :  { %v1842_v49 = vpop.f32.mrb[30].mxu1 }
0x2557   :  { %v1850_v45 = vadd.f32 %v1846_v29, %v11543_v32  ;;  %v1851_v30 = vadd.f32 %v1847_v31, %v11545_v34  ;;  %v10071_v35 = vpop.f32.mrb[31].mxu1 }
0x2559   :  { %10878 = vtanh.f32 %v1850_v45  ;;  %v9043_v15 = vmul.f32 -1.442695, %v1850_v45  ;;  %v9044_v37 = vmul.f32 -1.442695, %v1851_v30 }
0x255a   :  { %10880 = vtanh.f32 %v1851_v30 }
0x255b   :  { %10882 = vpow2.f32 %v9043_v15 }
0x255c   :  { %10884 = vpow2.f32 %v9044_v37 }
0x2563   :  { %v10879_v12 = vpop.eup %10878 }
0x2564   :  { %v10881_v36 = vpop.eup %10880  ;;  %1876 = vrot.lane.b32.xlu1 %v10879_v12, %s11072_s0 }
0x2565   :  { %1878 = vrot.lane.b32.xlu0 %v10881_v36, %s11072_s0  ;;  %v10883_v38 = vpop.eup %10882 }
0x2566   :  { %v10885_v39 = vpop.eup %10884  ;;  %v1858_v40 = vadd.f32 1.0, %v10883_v38 }
0x2567   :  { %v1859_v41 = vadd.f32 1.0, %v10885_v39 }
0x2568   :  { %10886 = vrcp.f32 %v1858_v40 }
0x2569   :  { %10888 = vrcp.f32 %v1859_v41 }
0x2572   :  { %v10887_v42 = vpop.eup %10886 }
0x2573   :  { %v10889_v44 = vpop.eup %10888  ;;  %v1872_v2 = vmul.f32 %v10887_v42, %v1868_v63 }
0x2574   :  { %v1873_v47 = vmul.f32 %v10889_v44, %v1869_v50 }
0x25d6   :  { %v1877_v43 = vpop.permute.xlu1 %1876 }
0x25d7   :  { %v1879_v46 = vpop.permute.xlu0 %1878  ;;  %v1882_v48 = vmul.f32 %v10887_v42, %v1877_v43 }
0x25d8   :  { %v1883_v51 = vmul.f32 %v10889_v44, %v1879_v46 }
0x25d9   :  { %1886 = vrot.lane.b32.xlu1 %v1882_v48, %s11073_s5 }
0x25da   :  { %1888 = vrot.lane.b32.xlu0 %v1883_v51, %s11073_s5 }
0x264b   :  { %v1887_v52 = vpop.permute.xlu1 %1886 }
0x264c   :  { %v1889_v53 = vpop.permute.xlu0 %1888  ;;  %v1892_v54 = vadd.f32 %v1887_v52, %v1872_v2 }
0x264d   :  { %v1893_v55 = vadd.f32 %v1889_v53, %v1873_v47 }
0x264e   :  { %10890 = vtanh.f32 %v1892_v54  ;;  %v1984_v36 = vrot.slane %v1892_v54, 7 }
0x264f   :  { %10892 = vtanh.f32 %v1893_v55  ;;  %v1985_v15 = vrot.slane %v1893_v55, 7 }
0x2658   :  { %v10891_v58 = vpop.eup %10890 }
0x2659   :  { %v10893_v59 = vpop.eup %10892  ;;  %1898 = vrot.lane.b32.xlu1 %v10891_v58, %s11072_s0 }
0x265a   :  { %1900 = vrot.lane.b32.xlu0 %v10893_v59, %s11072_s0 }
0x26cb   :  { %v1899_v60 = vpop.permute.xlu1 %1898 }
0x26cc   :  { %v1901_v61 = vpop.permute.xlu0 %1900  ;;  %v1904_v14 = vmul.f32 %v10887_v42, %v1899_v60 }
0x26cd   :  { %v1905_v17 = vmul.f32 %v10889_v44, %v1901_v61 }
0x26ce   :  { %v1906_v62 = vpack.c.bf16 %v1904_v14, %v1904_v14  ;;  %v11718_v0 = vsel %vm1139_vm8, %v11691_v56, %v1904_v14 }
0x26cf   :  { %v1907_v3 = vpack.c.bf16 %v1905_v17, %v1905_v17  ;;  %v11722_v4 = vsel %vm1139_vm8, %v11695_v57, %v1905_v17 }
0x26d0   :  { %v1910_v5 = vunpack.c.l.b16 %v1906_v62 }
0x26d1   :  { %v1911_v6 = vunpack.c.l.b16 %v1907_v3 }
0x26d2   :  { %v1912_v8 = vrot.slane %v1910_v5, 5 }
0x26d3   :  { %v1913_v9 = vrot.slane %v1911_v6, 4 }
0x26d5   :  { %v1914_v10 = vsel %vm324_vm2, %v1913_v9, %v1912_v8 }
0x26d6   :  { %v1915_v11 = vpack.c.b16 %v1914_v10, %v1914_v10 }
0x26d8   :  { %1916 = vrot.lane.b32.xlu1 %v1915_v11, %s11073_s5 }
0x274a   :  { %v1917_v13 = vpop.permute.xlu1 %1916 }
0x274b   :  { %10077 = vmatmul.mubr.msk.bf16.vlgmr.msra.gmra.mrb[32].mxu0 %vm219_vm3, %v1917_v13 }
0x274c   :  { %10092 = vmatprep.mubr.msk.bf16.mxu0 %vm11070_vm0, %v11069_v1 }
0x281e   :  { %v1955_v16 = vpop.f32.mrb[32].mxu0 }
0x281f   :  { %v1962_v18 = vrot.slane %v1955_v16, 2  ;;  %v1963_v19 = vrot.slane %v1955_v16, 3  ;;  %v10078_v56 = vpop.f32.mrb[33].mxu0 }
0x2820   :  { %v1958_v20 = vpop.f32.mrb[34].mxu0 }
0x2821   :  { %v1966_v57 = vadd.f32 %v1962_v18, %v11543_v32  ;;  %v1967_v21 = vadd.f32 %v1963_v19, %v11545_v34  ;;  %v10079_v22 = vpop.f32.mrb[35].mxu0 }
0x2823   :  { %10894 = vtanh.f32 %v1966_v57  ;;  %v9046_v25 = vmul.f32 -1.442695, %v1966_v57  ;;  %v9047_v26 = vmul.f32 -1.442695, %v1967_v21 }
0x2824   :  { %10896 = vtanh.f32 %v1967_v21 }
0x2825   :  { %10898 = vpow2.f32 %v9046_v25 }
0x2826   :  { %10900 = vpow2.f32 %v9047_v26 }
0x282d   :  { %v10895_v23 = vpop.eup %10894 }
0x282e   :  { %v10897_v24 = vpop.eup %10896  ;;  %1992 = vrot.lane.b32.xlu0 %v10895_v23, %s11072_s0 }
0x282f   :  { %1994 = vrot.lane.b32.xlu1 %v10897_v24, %s11072_s0  ;;  %v10899_v27 = vpop.eup %10898 }
0x2830   :  { %v10901_v28 = vpop.eup %10900  ;;  %v1974_v29 = vadd.f32 1.0, %v10899_v27 }
0x2831   :  { %v1975_v31 = vadd.f32 1.0, %v10901_v28 }
0x2832   :  { %10902 = vrcp.f32 %v1974_v29 }
0x2833   :  { %10904 = vrcp.f32 %v1975_v31  ;;  %v10408_v31 = vld [vmem:[%s11128_s3] sm:$0xff]  }
0x2834   :  { %10089 = vmatpush3.bf16.msra.mxu0 %v10408_v31 }
0x2835   :  { %10090 = vmatprep.subr.bf16.mxu0 %v11069_v1 }
0x283c   :  { %v10903_v33 = vpop.eup %10902 }
0x283d   :  { %v10905_v45 = vpop.eup %10904  ;;  %v1988_v37 = vmul.f32 %v10903_v33, %v1984_v36 }
0x283e   :  { %v1989_v38 = vmul.f32 %v10905_v45, %v1985_v15 }
0x28a0   :  { %v1993_v49 = vpop.permute.xlu0 %1992 }
0x28a1   :  { %v1995_v30 = vpop.permute.xlu1 %1994  ;;  %v1998_v35 = vmul.f32 %v10903_v33, %v1993_v49 }
0x28a2   :  { %v1999_v12 = vmul.f32 %v10905_v45, %v1995_v30 }
0x28a3   :  { %2002 = vrot.lane.b32.xlu0 %v1998_v35, %s11073_s5 }
0x28a4   :  { %2004 = vrot.lane.b32.xlu1 %v1999_v12, %s11073_s5 }
0x2915   :  { %v2003_v39 = vpop.permute.xlu0 %2002 }
0x2916   :  { %v2005_v40 = vpop.permute.xlu1 %2004  ;;  %v2008_v41 = vadd.f32 %v2003_v39, %v1988_v37 }
0x2917   :  { %v2009_v42 = vadd.f32 %v2005_v40, %v1989_v38  ;;  %v9051_v40 = vld [vmem:[%s11133_s8] ss:$0 sm:$0xff]  ;;  %s11081_s8 = smov 72  }
0x2918   :  { %10906 = vtanh.f32 %v2008_v41  ;;  %v2100_v22 = vrot.slane %v2008_v41, 7 }
0x2919   :  { %10908 = vtanh.f32 %v2009_v42  ;;  %v2101_v23 = vrot.slane %v2009_v42, 7 }
0x2922   :  { %v10907_v43 = vpop.eup %10906 }
0x2923   :  { %v10909_v44 = vpop.eup %10908  ;;  %2014 = vrot.lane.b32.xlu0 %v10907_v43, %s11072_s0 }
0x2924   :  { %2016 = vrot.lane.b32.xlu1 %v10909_v44, %s11072_s0 }
0x2995   :  { %v2015_v46 = vpop.permute.xlu0 %2014 }
0x2996   :  { %v2017_v48 = vpop.permute.xlu1 %2016  ;;  %v2020_v51 = vmul.f32 %v10903_v33, %v2015_v46  ;;  %v10409_v33 = vld [vmem:[%s11128_s3 + $0x8] sm:$0xff]   ;;  %s11080_s3 = smov 48  }
0x2997   :  { %v2021_v63 = vmul.f32 %v10905_v45, %v2017_v48  ;;  %10091 = vmatpush3.bf16.msra.mxu0 %v10409_v33 }
0x2998   :  { %v2022_v50 = vpack.c.bf16 %v2020_v51, %v2020_v51  ;;  %v11739_v2 = vsel %vm1142_vm9, %v11718_v0, %v2020_v51  ;;  %10102 = vmatprep.subr.bf16.mxu0 %v11069_v1 }
0x2999   :  { %v2023_v47 = vpack.c.bf16 %v2021_v63, %v2021_v63  ;;  %v11743_v52 = vsel %vm1142_vm9, %v11722_v4, %v2021_v63 }
0x299a   :  { %v2026_v53 = vunpack.c.l.b16 %v2022_v50 }
0x299b   :  { %v2027_v54 = vunpack.c.l.b16 %v2023_v47 }
0x299c   :  { %v2028_v55 = vrot.slane %v2026_v53, 6 }
0x299d   :  { %v2029_v58 = vrot.slane %v2027_v54, 5 }
0x299f   :  { %v2030_v59 = vsel %vm324_vm2, %v2029_v58, %v2028_v55 }
0x29a0   :  { %v2031_v60 = vpack.c.b16 %v2030_v59, %v2030_v59 }
0x29a2   :  { %2032 = vrot.lane.b32.xlu0 %v2031_v60, %s11073_s5 }
0x2a14   :  { %v2033_v61 = vpop.permute.xlu0 %2032 }
0x2a15   :  { %10085 = vmatmul.mubr.msk.bf16.vlgmr.msra.gmra.mrb[32].mxu1 %vm219_vm3, %v2033_v61 }
0x2a16   :  { %10098 = vmatprep.mubr.msk.bf16.mxu1 %vm11070_vm0, %v11069_v1 }
0x2ae8   :  { %v2071_v14 = vpop.f32.mrb[32].mxu1 }
0x2ae9   :  { %v2078_v17 = vrot.slane %v2071_v14, 1  ;;  %v2079_v62 = vrot.slane %v2071_v14, 2  ;;  %v10086_v0 = vpop.f32.mrb[33].mxu1 }
0x2aea   :  { %v2074_v3 = vpop.f32.mrb[34].mxu1 }
0x2aeb   :  { %v2082_v4 = vadd.f32 %v2078_v17, %v11543_v32  ;;  %v2083_v5 = vadd.f32 %v2079_v62, %v11545_v34  ;;  %v10087_v6 = vpop.f32.mrb[35].mxu1 }
0x2aed   :  { %10910 = vtanh.f32 %v2082_v4  ;;  %v9049_v10 = vmul.f32 -1.442695, %v2082_v4  ;;  %v9050_v11 = vmul.f32 -1.442695, %v2083_v5 }
0x2aee   :  { %10912 = vtanh.f32 %v2083_v5 }
0x2aef   :  { %10914 = vpow2.f32 %v9049_v10 }
0x2af0   :  { %10916 = vpow2.f32 %v9050_v11 }
0x2af7   :  { %v10911_v8 = vpop.eup %10910 }
0x2af8   :  { %v10913_v9 = vpop.eup %10912  ;;  %2108 = vrot.lane.b32.xlu1 %v10911_v8, %s11072_s0 }
0x2af9   :  { %2110 = vrot.lane.b32.xlu0 %v10913_v9, %s11072_s0  ;;  %v10915_v13 = vpop.eup %10914 }
0x2afa   :  { %v10917_v16 = vpop.eup %10916  ;;  %v2090_v18 = vadd.f32 1.0, %v10915_v13 }
0x2afb   :  { %v2091_v19 = vadd.f32 1.0, %v10917_v16 }
0x2afc   :  { %10918 = vrcp.f32 %v2090_v18 }
0x2afd   :  { %10920 = vrcp.f32 %v2091_v19 }
0x2b06   :  { %v10919_v32 = vpop.eup %10918 }
0x2b07   :  { %v10921_v56 = vpop.eup %10920  ;;  %v2104_v24 = vmul.f32 %v10919_v32, %v2100_v22 }
0x2b08   :  { %v2105_v25 = vmul.f32 %v10921_v56, %v2101_v23 }
0x2b6a   :  { %v2109_v34 = vpop.permute.xlu1 %2108 }
0x2b6b   :  { %v2111_v20 = vpop.permute.xlu0 %2110  ;;  %v2114_v57 = vmul.f32 %v10919_v32, %v2109_v34 }
0x2b6c   :  { %v2115_v21 = vmul.f32 %v10921_v56, %v2111_v20 }
0x2b6d   :  { %2118 = vrot.lane.b32.xlu1 %v2114_v57, %s11073_s5 }
0x2b6e   :  { %2120 = vrot.lane.b32.xlu0 %v2115_v21, %s11073_s5 }
0x2bdf   :  { %v2119_v26 = vpop.permute.xlu1 %2118 }
0x2be0   :  { %v2121_v27 = vpop.permute.xlu0 %2120  ;;  %v2124_v28 = vadd.f32 %v2119_v26, %v2104_v24 }
0x2be1   :  { %v2125_v29 = vadd.f32 %v2121_v27, %v2105_v25 }
0x2be2   :  { %10922 = vtanh.f32 %v2124_v28 }
0x2be3   :  { %10924 = vtanh.f32 %v2125_v29 }
0x2bec   :  { %v10923_v49 = vpop.eup %10922 }
0x2bed   :  { %v10925_v45 = vpop.eup %10924  ;;  %2130 = vrot.lane.b32.xlu1 %v10923_v49, %s11072_s0 }
0x2bee   :  { %2132 = vrot.lane.b32.xlu0 %v10925_v45, %s11072_s0 }
0x2c5f   :  { %v2131_v30 = vpop.permute.xlu1 %2130 }
0x2c60   :  { %v2133_v35 = vpop.permute.xlu0 %2132  ;;  %v2136_v12 = vmul.f32 %v10919_v32, %v2131_v30 }
0x2c61   :  { %v2137_v36 = vmul.f32 %v10921_v56, %v2133_v35 }
0x2c62   :  { %v11764_v15 = vsel %vm1145_vm10, %v11739_v2, %v2136_v12 }
0x2c63   :  { %v11768_v37 = vsel %vm1145_vm10, %v11743_v52, %v2137_v36 }
0x2c64   :  { %v2156_v38 = vpack.c.bf16 %v11768_v37, %v11764_v15 }
0x2c66   :  { %2165 = vrot.lane.b32.xlu1 %v2156_v38, %s11073_s5 }
0x2cd8   :  { %v2166_v39 = vpop.permute.xlu1 %2165 }
0x2cd9   :  { %10093 = vmatmul.mubr.msk.bf16.vlgmr.msra.gmra.mrb[36].mxu0 %vm219_vm3, %v2166_v39 }
0x2cda   :  { %10104 = vmatprep.mubr.msk.bf16.mxu0 %vm11070_vm0, %v11069_v1 }
0x2dac   :  { %v2216_v41 = vpop.f32.mrb[36].mxu0 }
0x2dad   :  { %v2217_v42 = vadd.f32 %v9051_v40, %v2216_v41  ;;  %v10094_v43 = vpop.f32.mrb[37].mxu0 }
0x2dae   :  { %v2219_v44 = vpop.f32.mrb[38].mxu0 }
0x2daf   :  { %v11777_v46 = vpack.c.bf16 %v2217_v42, %v2217_v42  ;;  %v2220_v48 = vadd.f32 %v9051_v40, %v2219_v44  ;;  %v10095_v51 = vpop.f32.mrb[39].mxu0 }
0x2db1   :  { %v11779_v63 = vpack.c.bf16 %v2220_v48, %v2220_v48  ;;  %2230 = vrot.lane.b32.xlu0 %v11777_v46, %s11074_s9 }
0x2db3   :  { %2280 = vrot.lane.b32.xlu1 %v11779_v63, %s11074_s9 }
0x2e23   :  { %v2231_v50 = vpop.permute.xlu0 %2230 }
0x2e24   :  { %v2237_v2 = vsel %vm2232_vm11, %v2231_v50, 0 }
0x2e25   :  { %10097 = vmatpush3.bf16.xpose.msra.mxu1 %v2237_v2  ;;  %v2281_v47 = vpop.permute.xlu1 %2280 }
0x2e26   :  { %v2286_v52 = vsel %vm2232_vm11, %v2281_v47, 0  ;;  %10108 = vmatprep.subr.bf16.mxu1 %v11069_v1 }
0x2e27   :  { %10103 = vmatpush3.bf16.xpose.msra.mxu0 %v2286_v52 }
0x2e28   :  { %10114 = vmatprep.subr.bf16.mxu0 %v11069_v1 }
0x2e2c   :  { %10099 = vmatmul.mubr.msk.bf16.vlgmr.msra.gmra.mrb[36].mxu1 %vm2232_vm11, %v11777_v46 }
0x2e2d   :  { %10110 = vmatprep.mubr.msk.bf16.mxu1 %vm11070_vm0, %v11069_v1 }
0x2e2e   :  { %10105 = vmatmul.mubr.msk.bf16.vlgmr.msra.gmra.mrb[40].mxu0 %vm2232_vm11, %v11779_v63 }
0x2e2f   :  { %10116 = vmatprep.mubr.msk.bf16.mxu0 %vm11070_vm0, %v11069_v1 }
0x2eff   :  { %v2273_v53 = vpop.f32.mrb[36].mxu1 }
0x2f00   :  { %v2328_v54 = vmul.f32 0.35355338, %v2273_v53  ;;  %v10100_v55 = vpop.f32.mrb[37].mxu1 }
0x2f01   :  { %v2276_v58 = vpop.f32.mrb[38].mxu1  ;;  %v2322_v59 = vpop.f32.mrb[40].mxu0 }
0x2f02   :  { %v2329_v60 = vmul.f32 0.35355338, %v2322_v59  ;;  %v10101_v61 = vpop.f32.mrb[39].mxu1  ;;  %v10106_v14 = vpop.f32.mrb[41].mxu0  ;;  %v2330_v17 = vsel %vm2232_vm11, %v2328_v54, -inf }
0x2f03   :  { %2331 = vmax.xlane.f32.xlu0 %v2330_v17  ;;  %v2325_v62 = vpop.f32.mrb[42].mxu0 }
0x2f04   :  { %v10107_v0 = vpop.f32.mrb[43].mxu0  ;;  %v2333_v3 = vsel %vm2232_vm11, %v2329_v60, -inf }
0x2f05   :  { %2334 = vmax.xlane.f32.xlu1 %v2333_v3 }
0x2f16   :  { %2354 = vrot.lane.b32.xlu1 %v11777_v46, %s11072_s0 }
0x2f1a   :  { %2454 = vrot.lane.b32.xlu1 %v11777_v46, %s11075_s13 }
0x2f1e   :  { %2504 = vrot.lane.b32.xlu1 %v11779_v63, %s11075_s13 }
0x2f22   :  { %2502 = vrot.lane.b32.xlu1 %v11779_v63, %s11076_s17 }
0x2f90   :  { %v2332_v4 = vpop.xlane.xlu0 %2331 }
0x2f91   :  { %v2336_v5 = vsub.f32 %v2328_v54, %v2332_v4 }
0x2f92   :  { %v2335_v6 = vpop.xlane.xlu1 %2334 }
0x2f93   :  { %v2338_v8 = vmul.f32 1.442695, %v2336_v5  ;;  %v2337_v9 = vsub.f32 %v2329_v60, %v2335_v6 }
0x2f95   :  { %10926 = vpow2.f32 %v2338_v8  ;;  %v2340_v10 = vmul.f32 1.442695, %v2337_v9 }
0x2f96   :  { %v2355_v11 = vpop.permute.xlu1 %2354 }
0x2f97   :  { %10928 = vpow2.f32 %v2340_v10  ;;  %v2360_v13 = vsel %vm1136_vm7, %v2355_v11, 0  ;;  %v2224_v10 = vld [vmem:[%s11138_s14 + $0x8] sm:$0xff] }
0x2f98   :  { %10109 = vmatpush3.bf16.msra.mxu1 %v2360_v13 }
0x2f99   :  { %10120 = vmatprep.subr.bf16.mxu1 %v11069_v1 }
0x2f9a   :  { %v2455_v22 = vpop.permute.xlu1 %2454 }
0x2f9b   :  { %v2460_v26 = vsel %vm2232_vm11, %v2455_v22, 0 }
0x2f9e   :  { %v2505_v28 = vpop.permute.xlu1 %2504 }
0x2f9f   :  { %v10927_v16 = vpop.eup %10926  ;;  %v2510_v31 = vsel %vm2232_vm11, %v2505_v28, 0 }
0x2fa0   :  { %v2342_v18 = vsel %vm2232_vm11, %v10927_v16, 0.0 }
0x2fa1   :  { %v10929_v19 = vpop.eup %10928  ;;  %2343 = vadd.xlane.f32.xlu0 %v2342_v18 }
0x2fa2   :  { %v2345_v32 = vsel %vm2232_vm11, %v10929_v19, 0.0  ;;  %v2503_v49 = vpop.permute.xlu1 %2502 }
0x2fa5   :  { %2346 = vadd.xlane.f32.xlu0 %v2345_v32 }
0x2fbb   :  { %2402 = vrot.lane.b32.xlu0 %v11779_v63, %s11072_s0 }
0x2fbf   :  { %2452 = vrot.lane.b32.xlu0 %v11777_v46, %s11076_s17 }
0x302e   :  { %v2344_v34 = vpop.xlane.xlu0 %2343 }
0x302f   :  { %10930 = vrcp.f32 %v2344_v34 }
0x3032   :  { %v2347_v56 = vpop.xlane.xlu0 %2346 }
0x3033   :  { %10932 = vrcp.f32 %v2347_v56 }
0x3036   :  { %v2403_v20 = vpop.permute.xlu0 %2402 }
0x3037   :  { %v2408_v57 = vsel %vm1136_vm7, %v2403_v20, 0 }
0x3038   :  { %10115 = vmatpush3.bf16.msra.mxu0 %v2408_v57 }
0x3039   :  { %v10931_v21 = vpop.eup %10930  ;;  %10126 = vmatprep.subr.bf16.mxu0 %v11069_v1 }
0x303a   :  { %v2350_v23 = vmul.f32 %v10931_v21, %v10927_v16  ;;  %v2453_v33 = vpop.permute.xlu0 %2452  ;;  %v2675_v16 = vpack.c.bf16 %v2224_v10, %v2224_v10 }
0x303c   :  { %v2352_v24 = vpack.c.bf16 %v2350_v23, %v2350_v23  ;;  %v2680_v20 = vsel %vm1136_vm7, %v2675_v16, 0 }
0x303d   :  { %v10933_v25 = vpop.eup %10932 }
0x303e   :  { %10111 = vmatmul.mubr.msk.bf16.vlgmr.msra.gmra.mrb[40].mxu1 %vm2232_vm11, %v2352_v24  ;;  %v2351_v27 = vmul.f32 %v10933_v25, %v10929_v19  ;;  %v2223_v19 = vld [vmem:[%s11138_s14] sm:$0xff] }
0x303f   :  { %10121 = vmatpush3.bf16.xpose.msra.mxu1 %v2460_v26  ;;  %10122 = vmatprep.mubr.msk.bf16.mxu1 %vm11070_vm0, %v11069_v1  ;;  %v2451_v56 = vpack.c.bf16 %v2223_v19, %v2223_v19 }
0x3040   :  { %v2353_v29 = vpack.c.bf16 %v2351_v27, %v2351_v27  ;;  %10132 = vmatprep.subr.bf16.mxu1 %v11069_v1 }
0x3041   :  { %v2727_v23 = vsel %vm1136_vm7, %v2451_v56, 0 }
0x3042   :  { %10117 = vmatmul.mubr.msk.bf16.vlgmr.msra.gmra.mrb[44].mxu0 %vm2232_vm11, %v2353_v29 }
0x3043   :  { %10127 = vmatpush3.bf16.xpose.msra.mxu0 %v2510_v31  ;;  %10128 = vmatprep.mubr.msk.bf16.mxu0 %vm11070_vm0, %v11069_v1 }
0x3044   :  { %10138 = vmatprep.subr.bf16.mxu0 %v11069_v1 }
0x3046   :  { %10123 = vmatmul.mubr.msk.bf16.vlgmr.msra.gmra.mrb[44].mxu1 %vm2232_vm11, %v2453_v33 }
0x3047   :  { %10134 = vmatprep.mubr.msk.bf16.mxu1 %vm11070_vm0, %v11069_v1 }
0x304a   :  { %10129 = vmatmul.mubr.msk.bf16.vlgmr.msra.gmra.mrb[48].mxu0 %vm2232_vm11, %v2503_v49 }
0x304b   :  { %10140 = vmatprep.mubr.msk.bf16.mxu0 %vm11070_vm0, %v11069_v1 }
0x3111   :  { %v11833_v45 = vpop.f32.mrb[40].mxu1 }
0x3112   :  { %v10112_v30 = vpop.f32.mrb[41].mxu1 }
0x3113   :  { %v2399_v35 = vpop.f32.mrb[42].mxu1 }
0x3114   :  { %v10113_v12 = vpop.f32.mrb[43].mxu1 }
0x3115   :  { %v11835_v36 = vpop.f32.mrb[44].mxu0 }
0x3116   :  { %v2450_v38 = vpack.c.bf16 %v11835_v36, %v11833_v45  ;;  %v10118_v39 = vpop.f32.mrb[45].mxu0 }
0x3117   :  { %v2447_v40 = vpop.f32.mrb[46].mxu0 }
0x3118   :  { %v10119_v41 = vpop.f32.mrb[47].mxu0 }
0x3119   :  { %v2496_v42 = vpop.f32.mrb[44].mxu1 }
0x311a   :  { %v2552_v43 = vmul.f32 0.35355338, %v2496_v42  ;;  %v10124_v44 = vpop.f32.mrb[45].mxu1 }
0x311b   :  { %v2499_v48 = vpop.f32.mrb[46].mxu1 }
0x311c   :  { %v10125_v51 = vpop.f32.mrb[47].mxu1  ;;  %v2554_v50 = vsel %vm2232_vm11, %v2552_v43, -inf }
0x311d   :  { %2555 = vmax.xlane.f32.xlu0 %v2554_v50  ;;  %v2546_v2 = vpop.f32.mrb[48].mxu0 }
0x311e   :  { %v2553_v47 = vmul.f32 0.35355338, %v2546_v2  ;;  %v10130_v52 = vpop.f32.mrb[49].mxu0 }
0x311f   :  { %v2549_v53 = vpop.f32.mrb[50].mxu0 }
0x3120   :  { %v10131_v54 = vpop.f32.mrb[51].mxu0  ;;  %v2557_v55 = vsel %vm2232_vm11, %v2553_v47, -inf }
0x3121   :  { %2558 = vmax.xlane.f32.xlu1 %v2557_v55 }
0x3132   :  { %2578 = vrot.lane.b32.xlu1 %v11777_v46, %s11077_s21 }
0x3136   :  { %2772 = vrot.lane.b32.xlu1 %v11777_v46, %s11078_s25 }
0x313a   :  { %2822 = vrot.lane.b32.xlu1 %v11779_v63, %s11078_s25 }
0x313e   :  { %2820 = vrot.lane.b32.xlu1 %v11779_v63, %s11079_s29 }
0x31aa   :  { %v2556_v58 = vpop.xlane.xlu0 %2555 }
0x31ab   :  { %v2560_v59 = vsub.f32 %v2552_v43, %v2556_v58 }
0x31ad   :  { %v2562_v60 = vmul.f32 1.442695, %v2560_v59 }
0x31ae   :  { %v2559_v61 = vpop.xlane.xlu1 %2558 }
0x31af   :  { %10934 = vpow2.f32 %v2562_v60  ;;  %v2561_v14 = vsub.f32 %v2553_v47, %v2559_v61 }
0x31b1   :  { %v2564_v17 = vmul.f32 1.442695, %v2561_v14 }
0x31b2   :  { %v2579_v62 = vpop.permute.xlu1 %2578 }
0x31b3   :  { %10936 = vpow2.f32 %v2564_v17  ;;  %v2584_v0 = vsel %vm1136_vm7, %v2579_v62, 0 }
0x31b4   :  { %10133 = vmatpush3.bf16.msra.mxu1 %v2584_v0 }
0x31b5   :  { %10144 = vmatprep.subr.bf16.mxu1 %v11069_v1 }
0x31b6   :  { %v2773_v24 = vpop.permute.xlu1 %2772 }
0x31b7   :  { %v2778_v12 = vsel %vm2232_vm11, %v2773_v24, 0 }
0x31b9   :  { %v10935_v3 = vpop.eup %10934 }
0x31ba   :  { %v2566_v4 = vsel %vm2232_vm11, %v10935_v3, 0.0  ;;  %v2823_v25 = vpop.permute.xlu1 %2822 }
0x31bb   :  { %2567 = vadd.xlane.f32.xlu0 %v2566_v4  ;;  %v2828_v26 = vsel %vm2232_vm11, %v2823_v25, 0 }
0x31bd   :  { %v10937_v5 = vpop.eup %10936 }
0x31be   :  { %v2569_v6 = vsel %vm2232_vm11, %v10937_v5, 0.0  ;;  %v2821_v27 = vpop.permute.xlu1 %2820 }
0x31bf   :  { %2570 = vadd.xlane.f32.xlu0 %v2569_v6 }
0x31d5   :  { %2626 = vrot.lane.b32.xlu0 %v11779_v63, %s11077_s21 }
0x31d9   :  { %2770 = vrot.lane.b32.xlu0 %v11777_v46, %s11079_s29 }
0x3248   :  { %v2568_v8 = vpop.xlane.xlu0 %2567 }
0x3249   :  { %10938 = vrcp.f32 %v2568_v8 }
0x324c   :  { %v2571_v9 = vpop.xlane.xlu0 %2570 }
0x324d   :  { %10940 = vrcp.f32 %v2571_v9 }
0x3250   :  { %v2627_v11 = vpop.permute.xlu0 %2626 }
0x3251   :  { %v2632_v13 = vsel %vm1136_vm7, %v2627_v11, 0 }
0x3252   :  { %10139 = vmatpush3.bf16.msra.mxu0 %v2632_v13 }
0x3253   :  { %v10939_v18 = vpop.eup %10938  ;;  %10150 = vmatprep.subr.bf16.mxu0 %v11069_v1 }
0x3254   :  { %v2574_v32 = vmul.f32 %v10939_v18, %v10935_v3  ;;  %v2771_v40 = vpop.permute.xlu0 %2770 }
0x3256   :  { %v2576_v34 = vpack.c.bf16 %v2574_v32, %v2574_v32 }
0x3257   :  { %v10941_v57 = vpop.eup %10940 }
0x3258   :  { %10135 = vmatmul.mubr.msk.bf16.vlgmr.msra.gmra.mrb[48].mxu1 %vm2232_vm11, %v2576_v34  ;;  %v2575_v21 = vmul.f32 %v10941_v57, %v10937_v5 }
0x3259   :  { %10145 = vmatpush3.bf16.msra.mxu1 %v2680_v20  ;;  %10146 = vmatprep.mubr.msk.bf16.mxu1 %vm11070_vm0, %v11069_v1 }
0x325a   :  { %v2577_v22 = vpack.c.bf16 %v2575_v21, %v2575_v21  ;;  %10156 = vmatprep.subr.bf16.mxu1 %v11069_v1 }
0x325c   :  { %10141 = vmatmul.mubr.msk.bf16.vlgmr.msra.gmra.mrb[52].mxu0 %vm2232_vm11, %v2577_v22 }
0x325d   :  { %10151 = vmatpush3.bf16.msra.mxu0 %v2727_v23  ;;  %10152 = vmatprep.mubr.msk.bf16.mxu0 %vm11070_vm0, %v11069_v1 }
0x325e   :  { %10162 = vmatprep.subr.bf16.mxu0 %v11069_v1 }
0x3264   :  { %10153 = vmatmul.mubr.msk.bf16.vlgmr.msra.gmra.mrb[56].mxu0 %vm2232_vm11, %v2450_v38 }
0x3265   :  { %10164 = vmatprep.mubr.msk.bf16.mxu0 %vm11070_vm0, %v11069_v1 }
0x3266   :  { %10163 = vmatpush3.bf16.xpose.msra.mxu0 %v2828_v26 }
0x3267   :  { %10174 = vmatprep.subr.bf16.mxu0 %v11069_v1 }
0x326d   :  { %10165 = vmatmul.mubr.msk.bf16.vlgmr.msra.gmra.mrb[60].mxu0 %vm2232_vm11, %v2821_v27 }
0x326e   :  { %10176 = vmatprep.mubr.msk.bf16.mxu0 %vm11070_vm0, %v11069_v1 }
0x332b   :  { %v2620_v28 = vpop.f32.mrb[48].mxu1 }
0x332c   :  { %v10136_v29 = vpop.f32.mrb[49].mxu1 }
0x332d   :  { %v2623_v31 = vpop.f32.mrb[50].mxu1 }
0x332e   :  { %v10137_v33 = vpop.f32.mrb[51].mxu1 }
0x332f   :  { %v2668_v49 = vpop.f32.mrb[52].mxu0 }
0x3330   :  { %v2674_v45 = vpack.c.bf16 %v2668_v49, %v2620_v28  ;;  %v10142_v30 = vpop.f32.mrb[53].mxu0  ;;  %v2225_v28 = vld [vmem:[%s11138_s14 + $0x10] sm:$0xff] }
0x3331   :  { %v2671_v35 = vpop.f32.mrb[54].mxu0  ;;  %v2993_v29 = vpack.c.bf16 %v2225_v28, %v2225_v28 }
0x3332   :  { %v10143_v36 = vpop.f32.mrb[55].mxu0  ;;  %10147 = vmatmul.mubr.msk.bf16.vlgmr.msra.gmra.mrb[52].mxu1 %vm2232_vm11, %v2674_v45 }
0x3333   :  { %10157 = vmatpush3.bf16.xpose.msra.mxu1 %v2778_v12  ;;  %10158 = vmatprep.mubr.msk.bf16.mxu1 %vm11070_vm0, %v11069_v1  ;;  %v2998_v31 = vsel %vm1136_vm7, %v2993_v29, 0 }
0x3334   :  { %10168 = vmatprep.subr.bf16.mxu1 %v11069_v1 }
0x3337   :  { %v2763_v38 = vpop.f32.mrb[56].mxu0 }
0x3338   :  { %v10154_v39 = vpop.f32.mrb[57].mxu0 }
0x3339   :  { %v2766_v41 = vpop.f32.mrb[58].mxu0 }
0x333a   :  { %v10155_v42 = vpop.f32.mrb[59].mxu0  ;;  %10159 = vmatmul.mubr.msk.bf16.vlgmr.msra.gmra.mrb[56].mxu1 %vm2232_vm11, %v2771_v40 }
0x333b   :  { %10170 = vmatprep.mubr.msk.bf16.mxu1 %vm11070_vm0, %v11069_v1 }
0x3340   :  { %v2864_v43 = vpop.f32.mrb[60].mxu0 }
0x3341   :  { %v2871_v44 = vmul.f32 0.35355338, %v2864_v43  ;;  %v10166_v48 = vpop.f32.mrb[61].mxu0 }
0x3342   :  { %v2867_v51 = vpop.f32.mrb[62].mxu0 }
0x3343   :  { %v10167_v50 = vpop.f32.mrb[63].mxu0  ;;  %v2875_v2 = vsel %vm2232_vm11, %v2871_v44, -inf }
0x3344   :  { %2876 = vmax.xlane.f32.xlu1 %v2875_v2 }
0x3355   :  { %2896 = vrot.lane.b32.xlu1 %v11777_v46, %s11080_s3 }
0x3359   :  { %3045 = vrot.lane.b32.xlu1 %v11777_v46, %s11081_s8 }
0x335d   :  { %3095 = vrot.lane.b32.xlu1 %v11779_v63, %s11081_s8 }
0x3361   :  { %3093 = vrot.lane.b32.xlu1 %v11779_v63, %s11082_s7 }
0x33d1   :  { %v2877_v47 = vpop.xlane.xlu1 %2876 }
0x33d2   :  { %v2879_v54 = vsub.f32 %v2871_v44, %v2877_v47 }
0x33d4   :  { %v2882_v55 = vmul.f32 1.442695, %v2879_v54 }
0x33d5   :  { %v2897_v52 = vpop.permute.xlu1 %2896 }
0x33d6   :  { %v2902_v53 = vsel %vm1136_vm7, %v2897_v52, 0  ;;  %10942 = vpow2.f32 %v2882_v55 }
0x33d7   :  { %10169 = vmatpush3.bf16.msra.mxu1 %v2902_v53 }
0x33d8   :  { %10180 = vmatprep.subr.bf16.mxu1 %v11069_v1 }
0x33d9   :  { %v3046_v23 = vpop.permute.xlu1 %3045 }
0x33da   :  { %v3051_v25 = vsel %vm2232_vm11, %v3046_v23, 0 }
0x33dd   :  { %v3096_v35 = vpop.permute.xlu1 %3095 }
0x33de   :  { %v3101_v40 = vsel %vm2232_vm11, %v3096_v35, 0 }
0x33e0   :  { %v10943_v8 = vpop.eup %10942 }
0x33e1   :  { %v2887_v9 = vsel %vm2232_vm11, %v10943_v8, 0.0  ;;  %v3094_v2 = vpop.permute.xlu1 %3093 }
0x3405   :  { %v2716_v58 = vpop.f32.mrb[52].mxu1 }
0x3406   :  { %v11901_v59 = vadd.f32 %v2763_v38, %v2716_v58  ;;  %v10148_v60 = vpop.f32.mrb[53].mxu1 }
0x3407   :  { %v2719_v61 = vpop.f32.mrb[54].mxu1 }
0x3408   :  { %v11903_v14 = vadd.f32 %v2766_v41, %v2719_v61  ;;  %v10149_v17 = vpop.f32.mrb[55].mxu1 }
0x340d   :  { %v2814_v62 = vpop.f32.mrb[56].mxu1 }
0x340e   :  { %v2870_v0 = vmul.f32 0.35355338, %v2814_v62  ;;  %v10160_v3 = vpop.f32.mrb[57].mxu1 }
0x340f   :  { %v2817_v4 = vpop.f32.mrb[58].mxu1 }
0x3410   :  { %v10161_v5 = vpop.f32.mrb[59].mxu1  ;;  %v2872_v6 = vsel %vm2232_vm11, %v2870_v0, -inf }
0x3411   :  { %2873 = vmax.xlane.f32.xlu0 %v2872_v6 }
0x3415   :  { %2888 = vadd.xlane.f32.xlu0 %v2887_v9 }
0x349e   :  { %v2874_v10 = vpop.xlane.xlu0 %2873 }
0x349f   :  { %v2878_v11 = vsub.f32 %v2870_v0, %v2874_v10 }
0x34a1   :  { %v2880_v13 = vmul.f32 1.442695, %v2878_v11 }
0x34a2   :  { %v2889_v19 = vpop.xlane.xlu0 %2888 }
0x34a3   :  { %10944 = vpow2.f32 %v2880_v13 }
0x34a4   :  { %10946 = vrcp.f32 %v2889_v19 }
0x34ad   :  { %v10945_v16 = vpop.eup %10944 }
0x34ae   :  { %v2884_v18 = vsel %vm2232_vm11, %v10945_v16, 0.0  ;;  %v10947_v32 = vpop.eup %10946 }
0x34af   :  { %2885 = vadd.xlane.f32.xlu0 %v2884_v18  ;;  %v2893_v56 = vmul.f32 %v10947_v32, %v10943_v8 }
0x34b1   :  { %v2895_v21 = vpack.c.bf16 %v2893_v56, %v2893_v56  ;;  %v2226_v56 = vld [vmem:[%s11138_s14 + $0x18] sm:$0xff]  ;;  %s12780_s14 = sld [smem:[#allocation6_spill]] }
0x34c5   :  { %2944 = vrot.lane.b32.xlu0 %v11779_v63, %s11080_s3 }
0x34c9   :  { %3043 = vrot.lane.b32.xlu0 %v11777_v46, %s11082_s7 }
0x353c   :  { %v2886_v34 = vpop.xlane.xlu0 %2885 }
0x353d   :  { %10948 = vrcp.f32 %v2886_v34 }
0x3540   :  { %v2945_v20 = vpop.permute.xlu0 %2944 }
0x3541   :  { %v2950_v57 = vsel %vm1136_vm7, %v2945_v20, 0  ;;  %v3266_v20 = vpack.c.bf16 %v2226_v56, %v2226_v56 }
0x3542   :  { %10175 = vmatpush3.bf16.msra.mxu0 %v2950_v57 }
0x3543   :  { %10186 = vmatprep.subr.bf16.mxu0 %v11069_v1  ;;  %v3271_v57 = vsel %vm1136_vm7, %v3266_v20, 0 }
0x3544   :  { %v3044_v27 = vpop.permute.xlu0 %3043 }
0x3545   :  { %10177 = vmatmul.mubr.msk.bf16.vlgmr.msra.gmra.mrb[64].mxu0 %vm2232_vm11, %v2895_v21 }
0x3546   :  { %10188 = vmatprep.mubr.msk.bf16.mxu0 %vm11070_vm0, %v11069_v1 }
0x3547   :  { %v10949_v22 = vpop.eup %10948 }
0x3548   :  { %v2892_v24 = vmul.f32 %v10949_v22, %v10945_v16 }
0x354a   :  { %v2894_v26 = vpack.c.bf16 %v2892_v24, %v2892_v24 }
0x354b   :  { %10187 = vmatpush3.bf16.xpose.msra.mxu0 %v3051_v25 }
0x354c   :  { %10171 = vmatmul.mubr.msk.bf16.vlgmr.msra.gmra.mrb[60].mxu1 %vm2232_vm11, %v2894_v26  ;;  %10198 = vmatprep.subr.bf16.mxu0 %v11069_v1 }
0x354d   :  { %10182 = vmatprep.mubr.msk.bf16.mxu1 %vm11070_vm0, %v11069_v1  ;;  %10181 = vmatpush3.bf16.msra.mxu1 %v2998_v31 }
0x354e   :  { %10192 = vmatprep.subr.bf16.mxu1 %v11069_v1 }
0x3552   :  { %10189 = vmatmul.mubr.msk.bf16.vlgmr.msra.gmra.mrb[68].mxu0 %vm2232_vm11, %v3044_v27 }
0x3553   :  { %10200 = vmatprep.mubr.msk.bf16.mxu0 %vm11070_vm0, %v11069_v1 }
0x3618   :  { %v2986_v33 = vpop.f32.mrb[64].mxu0 }
0x3619   :  { %v10178_v49 = vpop.f32.mrb[65].mxu0 }
0x361a   :  { %v2989_v45 = vpop.f32.mrb[66].mxu0 }
0x361b   :  { %v10179_v30 = vpop.f32.mrb[67].mxu0 }
0x361f   :  { %v2938_v12 = vpop.f32.mrb[60].mxu1 }
0x3620   :  { %v2992_v36 = vpack.c.bf16 %v2986_v33, %v2938_v12  ;;  %v10172_v38 = vpop.f32.mrb[61].mxu1  ;;  %v9075_v12 = vld [vmem:[%s11143_s19] ss:$0 sm:$0xff]  ;;  %s12781_s19 = sld [smem:[#allocation5_spill]] }
0x3621   :  { %v2941_v39 = vpop.f32.mrb[62].mxu1 }
0x3622   :  { %v10173_v41 = vpop.f32.mrb[63].mxu1  ;;  %10183 = vmatmul.mubr.msk.bf16.vlgmr.msra.gmra.mrb[64].mxu1 %vm2232_vm11, %v2992_v36 }
0x3623   :  { %10193 = vmatpush3.bf16.xpose.msra.mxu1 %v3101_v40  ;;  %10194 = vmatprep.mubr.msk.bf16.mxu1 %vm11070_vm0, %v11069_v1 }
0x3624   :  { %10204 = vmatprep.subr.bf16.mxu1 %v11069_v1 }
0x3625   :  { %v3087_v42 = vpop.f32.mrb[68].mxu0 }
0x3626   :  { %v3143_v43 = vmul.f32 0.35355338, %v3087_v42  ;;  %v10190_v44 = vpop.f32.mrb[69].mxu0 }
0x3627   :  { %v3090_v48 = vpop.f32.mrb[70].mxu0 }
0x3628   :  { %v10191_v51 = vpop.f32.mrb[71].mxu0  ;;  %v3145_v50 = vsel %vm2232_vm11, %v3143_v43, -inf }
0x3629   :  { %3146 = vmax.xlane.f32.xlu0 %v3145_v50 }
0x362a   :  { %10195 = vmatmul.mubr.msk.bf16.vlgmr.msra.gmra.mrb[68].mxu1 %vm2232_vm11, %v3094_v2 }
0x362b   :  { %10206 = vmatprep.mubr.msk.bf16.mxu1 %vm11070_vm0, %v11069_v1 }
0x36b6   :  { %v3147_v47 = vpop.xlane.xlu0 %3146 }
0x36b7   :  { %v3151_v52 = vsub.f32 %v3143_v43, %v3147_v47 }
0x36b9   :  { %v3153_v53 = vmul.f32 1.442695, %v3151_v52 }
0x36bb   :  { %10950 = vpow2.f32 %v3153_v53 }
0x36c5   :  { %v10951_v54 = vpop.eup %10950 }
0x36c6   :  { %v3157_v55 = vsel %vm2232_vm11, %v10951_v54, 0.0 }
0x36c7   :  { %3158 = vadd.xlane.f32.xlu0 %v3157_v55 }
0x36f5   :  { %v3034_v58 = vpop.f32.mrb[64].mxu1 }
0x36f6   :  { %v3041_v60 = vadd.f32 %v3034_v58, %v11901_v59  ;;  %v10184_v61 = vpop.f32.mrb[65].mxu1 }
0x36f7   :  { %v3037_v17 = vpop.f32.mrb[66].mxu1 }
0x36f8   :  { %v3042_v62 = vadd.f32 %v3037_v17, %v11903_v14  ;;  %v10185_v0 = vpop.f32.mrb[67].mxu1 }
0x36fd   :  { %v3137_v3 = vpop.f32.mrb[68].mxu1 }
0x36fe   :  { %v3144_v4 = vmul.f32 0.35355338, %v3137_v3  ;;  %v10196_v5 = vpop.f32.mrb[69].mxu1 }
0x36ff   :  { %v3140_v6 = vpop.f32.mrb[70].mxu1  ;;  %v9077_v5 = vld [vmem:[%s11153_s30] ss:$0 sm:$0xff]  ;;  %s12783_s30 = sld [smem:[#allocation9_spill]] }
0x3700   :  { %v10197_v8 = vpop.f32.mrb[71].mxu1  ;;  %v3148_v9 = vsel %vm2232_vm11, %v3144_v4, -inf  ;;  %v9076_v6 = vld [vmem:[%s11148_s24] ss:$0 sm:$0xff]  ;;  %s12782_s24 = sld [smem:[#allocation7_spill]] }
0x3701   :  { %3149 = vmax.xlane.f32.xlu1 %v3148_v9  ;;  %v3400_v8 = vld [vmem:[%s11158_s6] sm:$0xff] }
0x3702   :  { %v3408_v9 = vld [vmem:[%s11158_s6 + $0x40] sm:$0xff] }
0x3712   :  { %3169 = vrot.lane.b32.xlu1 %v11777_v46, %s11083_s10 }
0x3754   :  { %v3159_v10 = vpop.xlane.xlu0 %3158 }
0x3755   :  { %10952 = vrcp.f32 %v3159_v10  ;;  %v3401_v10 = vld [vmem:[%s11158_s6 + $0x8] sm:$0xff] }
0x375f   :  { %v10953_v59 = vpop.eup %10952 }
0x3760   :  { %v3165_v14 = vmul.f32 %v10953_v59, %v10951_v54  ;;  %v9078_v59 = vcombine.low %v3400_v8, %v3408_v9 }
0x3762   :  { %v3167_v32 = vpack.c.bf16 %v3165_v14, %v3165_v14  ;;  %v3416_v14 = vld [vmem:[%s11158_s6 + $0x80] sm:$0xff] }
0x378e   :  { %v3150_v11 = vpop.xlane.xlu1 %3149 }
0x378f   :  { %v3152_v13 = vsub.f32 %v3144_v4, %v3150_v11  ;;  %v9079_v11 = vcombine.high %v3400_v8, %v3408_v9 }
0x3791   :  { %v3155_v16 = vmul.f32 1.442695, %v3152_v13  ;;  %v3409_v13 = vld [vmem:[%s11158_s6 + $0x48] sm:$0xff] }
0x3792   :  { %v3170_v18 = vpop.permute.xlu1 %3169 }
0x3793   :  { %10954 = vpow2.f32 %v3155_v16  ;;  %v3175_v19 = vsel %vm1136_vm7, %v3170_v18, 0  ;;  %v3424_v16 = vld [vmem:[%s11158_s6 + $0xc0] sm:$0xff]  ;;  %v9080_v18 = vcombine.low %v3401_v10, %v3409_v13 }
0x3794   :  { %10199 = vmatpush3.bf16.msra.mxu0 %v3175_v19  ;;  %v9081_v19 = vcombine.high %v3401_v10, %v3409_v13  ;;  %v9094_v20 = vcombine.low %v3416_v14, %v3424_v16  ;;  %v3406_v10 = vld [vmem:[%s11158_s6 + $0x30] sm:$0xff]  ;;  %v3415_v13 = vld [vmem:[%s11158_s6 + $0x78] sm:$0xff] }
0x3795   :  { %10210 = vmatprep.subr.bf16.mxu0 %v11069_v1 }
0x3797   :  { %10201 = vmatmul.mubr.msk.bf16.vlgmr.msra.gmra.mrb[72].mxu0 %vm2232_vm11, %v3167_v32  ;;  %v9095_v32 = vcombine.high %v3416_v14, %v3424_v16 }
0x3798   :  { %10212 = vmatprep.mubr.msk.bf16.mxu0 %vm11070_vm0, %v11069_v1  ;;  %10211 = vmatpush3.bf16.msra.mxu0 %v3271_v57 }
0x3799   :  { %3726 = vmatprep.subr.bf16.mxu0 %v9081_v19 }
0x379d   :  { %v10955_v46 = vpop.eup %10954 }
0x379e   :  { %v3160_v34 = vsel %vm2232_vm11, %v10955_v46, 0.0 }
0x379f   :  { %3161 = vadd.xlane.f32.xlu0 %v3160_v34  ;;  %v3425_v34 = vld [vmem:[%s11158_s6 + $0xc8] sm:$0xff] }
0x37b5   :  { %3217 = vrot.lane.b32.xlu0 %v11779_v63, %s11083_s10 }
0x382c   :  { %v3162_v21 = vpop.xlane.xlu0 %3161 }
0x382d   :  { %10956 = vrcp.f32 %v3162_v21 }
0x3830   :  { %v3218_v22 = vpop.permute.xlu0 %3217 }
0x3831   :  { %v3223_v23 = vsel %vm1136_vm7, %v3218_v22, 0 }
0x3832   :  { %10205 = vmatpush3.bf16.msra.mxu1 %v3223_v23 }
0x3833   :  { %3683 = vmatprep.subr.bf16.mxu1 %v9079_v11  ;;  %v3407_v11 = vld [vmem:[%s11158_s6 + $0x38] sm:$0xff] }
0x3834   :  { %v9093_v19 = vcombine.high %v3407_v11, %v3415_v13 }
0x3837   :  { %v10957_v24 = vpop.eup %10956 }
0x3838   :  { %v3166_v25 = vmul.f32 %v10957_v24, %v10955_v46  ;;  %v3417_v46 = vld [vmem:[%s11158_s6 + $0x88] sm:$0xff] }
0x3839   :  { %v9097_v56 = vcombine.high %v3417_v46, %v3425_v34  ;;  %v9096_v57 = vcombine.low %v3417_v46, %v3425_v34  ;;  %v3430_v46 = vld [vmem:[%s11158_s6 + $0xf0] sm:$0xff]  ;;  %v3423_v34 = vld [vmem:[%s11158_s6 + $0xb8] sm:$0xff] }
0x383a   :  { %v3168_v26 = vpack.c.bf16 %v3166_v25, %v3166_v25 }
0x383c   :  { %10207 = vmatmul.mubr.msk.bf16.vlgmr.msra.gmra.mrb[72].mxu1 %vm2232_vm11, %v3168_v26 }
0x383d   :  { %3715 = vmatprep.mubr.bf16.mxu1 %v11071_v7  ;;  %3684 = vmatpush1.bf16.msra.mxu1 %v9078_v59  ;;  %v3414_v59 = vld [vmem:[%s11158_s6 + $0x70] sm:$0xff] }
0x383e   :  { %3685 = vmatprep.subr.bf16.mxu1 %v9095_v32  ;;  %v3422_v32 = vld [vmem:[%s11158_s6 + $0xb0] sm:$0xff] }
0x3841   :  { %3686 = vmatpush1.bf16.msra.mxu1 %v9094_v20  ;;  %v9090_v20 = vcombine.low %v3406_v10, %v3414_v59 }
0x386a   :  { %v3211_v63 = vpop.f32.mrb[72].mxu0 }
0x386b   :  { %v10202_v27 = vpop.f32.mrb[73].mxu0 }
0x386c   :  { %v3214_v28 = vpop.f32.mrb[74].mxu0  ;;  %v3410_v27 = vld [vmem:[%s11158_s6 + $0x50] sm:$0xff] }
0x386d   :  { %v10203_v29 = vpop.f32.mrb[75].mxu0  ;;  %v3403_v28 = vld [vmem:[%s11158_s6 + $0x18] sm:$0xff] }
0x390f   :  { %v3259_v31 = vpop.f32.mrb[72].mxu1 }
0x3910   :  { %v3265_v33 = vpack.c.bf16 %v3259_v31, %v3211_v63  ;;  %v10208_v49 = vpop.f32.mrb[73].mxu1  ;;  %v3402_v63 = vld [vmem:[%s11158_s6 + $0x10] sm:$0xff]  ;;  %v3411_v31 = vld [vmem:[%s11158_s6 + $0x58] sm:$0xff] }
0x3911   :  { %v3262_v45 = vpop.f32.mrb[74].mxu1  ;;  %v9083_v29 = vcombine.high %v3402_v63, %v3410_v27  ;;  %v9082_v49 = vcombine.low %v3402_v63, %v3410_v27  ;;  %v10412_v63 = vld [vmem:[%s12780_s14] sm:$0xff]  }
0x3912   :  { %v10209_v30 = vpop.f32.mrb[75].mxu1  ;;  %10213 = vmatmul.mubr.msk.bf16.vlgmr.msra.gmra.mrb[76].mxu0 %vm2232_vm11, %v3265_v33  ;;  %v9084_v45 = vcombine.low %v3403_v28, %v3411_v31  ;;  %v10413_v27 = vld [vmem:[%s12780_s14 + $0x80] sm:$0xff]  }
0x3913   :  { %3758 = vmatprep.mubr.bf16.mxu0 %v11071_v7  ;;  %3727 = vmatpush1.bf16.msra.mxu0 %v9080_v18  ;;  %v9085_v30 = vcombine.high %v3403_v28, %v3411_v31  ;;  %v9091_v18 = vcombine.high %v3406_v10, %v3414_v59  ;;  %v10414_v28 = vld [vmem:[%s12780_s14 + $0x48] sm:$0xff]  }
0x3914   :  { %3728 = vmatprep.subr.bf16.mxu0 %v9097_v56  ;;  %3769 = vmatprep.subr.bf16.mxu1 %v9083_v29  ;;  %v3431_v56 = vld [vmem:[%s11158_s6 + $0xf8] sm:$0xff]  ;;  %v10415_v29 = vld [vmem:[%s12780_s14 + $0xc8] sm:$0xff]  }
0x3915   :  { %v10416_v31 = vld [vmem:[%s12780_s14 + $0x8] sm:$0xff]  }
0x3917   :  { %3729 = vmatpush1.bf16.msra.mxu0 %v9096_v57  ;;  %v9092_v57 = vcombine.low %v3407_v11, %v3415_v13 }
0x3918   :  { %3812 = vmatprep.subr.bf16.mxu0 %v9085_v30  ;;  %v10420_v30 = vld [vmem:[%s12780_s14 + $0x10] sm:$0xff]  }
0x39e5   :  { %v3307_v35 = vpop.f32.mrb[76].mxu0 }
0x39e6   :  { %v3314_v36 = vadd.f32 %v3307_v35, %v3041_v60  ;;  %v10214_v38 = vpop.f32.mrb[77].mxu0 }
0x39e7   :  { %v3310_v39 = vpop.f32.mrb[78].mxu0 }
0x39e8   :  { %v3323_v40 = vadd.f32 %v9075_v12, %v3314_v36  ;;  %v3315_v41 = vadd.f32 %v3310_v39, %v3042_v62  ;;  %v10215_v42 = vpop.f32.mrb[79].mxu0 }
0x39ea   :  { %3327 = vrot.lane.b32.xlu1 %v3323_v40, %s11074_s9  ;;  %v3324_v43 = vadd.f32 %v9075_v12, %v3315_v41 }
0x39ee   :  { %3329 = vrot.lane.b32.xlu1 %v3324_v43, %s11074_s9 }
0x3a5c   :  { %v3328_v44 = vpop.permute.xlu1 %3327 }
0x3a5d   :  { %v3333_v48 = vadd.f32 %v3328_v44, %v11764_v15 }
0x3a5f   :  { %3339 = vrot.lane.b32.xlu0 %v3333_v48, %s11073_s5 }
0x3a60   :  { %v3330_v51 = vpop.permute.xlu1 %3329 }
0x3a61   :  { %v3334_v50 = vadd.f32 %v3330_v51, %v11768_v37  ;;  %v3426_v51 = vld [vmem:[%s11158_s6 + $0xd0] sm:$0xff] }
0x3a63   :  { %3341 = vrot.lane.b32.xlu1 %v3334_v50, %s11073_s5 }
0x3ad1   :  { %v3340_v2 = vpop.permute.xlu0 %3339 }
0x3ad2   :  { %v3345_v47 = vsel %vm219_vm3, %v3340_v2, 0.0  ;;  %v3427_v2 = vld [vmem:[%s11158_s6 + $0xd8] sm:$0xff] }
0x3ad3   :  { %3346 = vadd.xlane.f32.xlu0 %v3345_v47 }
0x3ad5   :  { %v3342_v52 = vpop.permute.xlu1 %3341 }
0x3ad6   :  { %v3348_v53 = vsel %vm219_vm3, %v3342_v52, 0.0 }
0x3ad7   :  { %3349 = vadd.xlane.f32.xlu1 %v3348_v53  ;;  %v3404_v53 = vld [vmem:[%s11158_s6 + $0x20] sm:$0xff] }
0x3b60   :  { %v3347_v54 = vpop.xlane.xlu0 %3346 }
0x3b61   :  { %v3352_v55 = vmul.f32 0.03125, %v3347_v54 }
0x3b63   :  { %v3354_v15 = vsub.f32 %v3333_v48, %v3352_v55  ;;  %v3418_v48 = vld [vmem:[%s11158_s6 + $0x90] sm:$0xff]  ;;  %v3412_v55 = vld [vmem:[%s11158_s6 + $0x60] sm:$0xff] }
0x3b64   :  { %v3350_v58 = vpop.xlane.xlu1 %3349  ;;  %v9099_v47 = vcombine.high %v3418_v48, %v3426_v51 }
0x3b65   :  { %v3356_v60 = vmul.f32 %v3354_v15, %v3354_v15  ;;  %v3353_v61 = vmul.f32 0.03125, %v3350_v58  ;;  %v3413_v58 = vld [vmem:[%s11158_s6 + $0x68] sm:$0xff] }
0x3b67   :  { %v3355_v37 = vsub.f32 %v3334_v50, %v3353_v61  ;;  %3360 = vrot.lane.b32.xlu0 %v3356_v60, %s11073_s5  ;;  %v3419_v50 = vld [vmem:[%s11158_s6 + $0x98] sm:$0xff]  ;;  %v9098_v60 = vcombine.low %v3418_v48, %v3426_v51  ;;  %v10429_v48 = vld [vmem:[%s12780_s14 + $0xa0] sm:$0xff]   ;;  %v10430_v51 = vld [vmem:[%s12780_s14 + $0x68] sm:$0xff]  }
0x3b68   :  { %v9101_v52 = vcombine.high %v3419_v50, %v3427_v2  ;;  %v9100_v61 = vcombine.low %v3419_v50, %v3427_v2  ;;  %v10431_v50 = vld [vmem:[%s12780_s14 + $0xe8] sm:$0xff]  }
0x3b69   :  { %v3357_v17 = vmul.f32 %v3355_v37, %v3355_v37  ;;  %v10432_v2 = vld [vmem:[%s12780_s14 + $0x28] sm:$0xff]  }
0x3b6b   :  { %3362 = vrot.lane.b32.xlu1 %v3357_v17, %s11073_s5 }
0x3bd9   :  { %v3361_v62 = vpop.permute.xlu0 %3360 }
0x3bda   :  { %v3366_v0 = vsel %vm219_vm3, %v3361_v62, 0.0  ;;  %v3420_v62 = vld [vmem:[%s11158_s6 + $0xa0] sm:$0xff] }
0x3bdb   :  { %3367 = vadd.xlane.f32.xlu0 %v3366_v0  ;;  %v3428_v0 = vld [vmem:[%s11158_s6 + $0xe0] sm:$0xff] }
0x3bdc   :  { %v9103_v8 = vcombine.high %v3420_v62, %v3428_v0  ;;  %v9102_v14 = vcombine.low %v3420_v62, %v3428_v0  ;;  %v3437_v62 = vlaneseq }
0x3bdd   :  { %v3363_v3 = vpop.permute.xlu1 %3362 }
0x3bde   :  { %v3369_v4 = vsel %vm219_vm3, %v3363_v3, 0.0  ;;  %v3421_v3 = vld [vmem:[%s11158_s6 + $0xa8] sm:$0xff]  ;;  %v3438_v0 = vshrl.u32 %v3437_v62, 7 }
0x3bdf   :  { %3370 = vadd.xlane.f32.xlu1 %v3369_v4  ;;  %v3429_v4 = vld [vmem:[%s11158_s6 + $0xe8] sm:$0xff] }
0x3be0   :  { %v9105_v9 = vcombine.high %v3421_v3, %v3429_v4  ;;  %v9104_v16 = vcombine.low %v3421_v3, %v3429_v4  ;;  %v12072_v3 = vsub.s32 0, %v3438_v0  ;;  %v12074_v4 = vsub.s32 2, %v3438_v0 }
0x3be1   :  { %v12085_v13 = vsub.s32 4, %v3438_v0 }
0x3bf0   :  { %3395 = vrot.lane.b32.xlu1 %v9077_v5, %s11074_s9  ;;  %v9086_v5 = vcombine.low %v3404_v53, %v3412_v55 }
0x3bf1   :  { %3385 = vrot.lane.b32.xlu0 %v9076_v6, %s11074_s9 }
0x3c68   :  { %v3368_v21 = vpop.xlane.xlu0 %3367 }
0x3c69   :  { %v3372_v22 = vmul.f32 0.03125, %v3368_v21  ;;  %v9107_v21 = vcombine.high %v3422_v32, %v3430_v46 }
0x3c6b   :  { %v3374_v23 = vadd.f32 1e-05, %v3372_v22  ;;  %v9109_v22 = vcombine.high %v3423_v34, %v3431_v56 }
0x3c6c   :  { %v3371_v24 = vpop.xlane.xlu1 %3370  ;;  %v3386_v12 = vpop.permute.xlu0 %3385 }
0x3c6d   :  { %10958 = vrsqrt.f32 %v3374_v23  ;;  %v3373_v25 = vmul.f32 0.03125, %v3371_v24  ;;  %v9106_v23 = vcombine.low %v3422_v32, %v3430_v46  ;;  %v9108_v24 = vcombine.low %v3423_v34, %v3431_v56 }
0x3c6e   :  { %v12091_v32 = vsub.s32 7, %v3438_v0 }
0x3c6f   :  { %v3375_v26 = vadd.f32 1e-05, %v3373_v25  ;;  %v10410_v25 = vld [vmem:[%s12780_s14 + $0x40] sm:$0xff]  }
0x3c70   :  { %v3396_v40 = vpop.permute.xlu1 %3395 }
0x3c71   :  { %10960 = vrsqrt.f32 %v3375_v26  ;;  %v10411_v26 = vld [vmem:[%s12780_s14 + $0xc0] sm:$0xff]  }
0x3c77   :  { %v10959_v33 = vpop.eup %10958 }
0x3c78   :  { %v3378_v35 = vmul.f32 %v10959_v33, %v3354_v15  ;;  %v3405_v15 = vld [vmem:[%s11158_s6 + $0x28] sm:$0xff]  ;;  %s12784_s6 = sld [smem:[#allocation8_spill]] }
0x3c79   :  { %v9089_v17 = vcombine.high %v3405_v15, %v3413_v58  ;;  %v9088_v6 = vcombine.low %v3405_v15, %v3413_v58  ;;  %v10417_v33 = vld [vmem:[%s12780_s14 + $0x88] sm:$0xff]   ;;  %v10438_v15 = vld [vmem:[%s12780_s14 + $0x78] sm:$0xff]  }
0x3c7a   :  { %v3388_v39 = vmul.f32 %v3386_v12, %v3378_v35  ;;  %v10421_v35 = vld [vmem:[%s12780_s14 + $0x90] sm:$0xff]   ;;  %v10439_v58 = vld [vmem:[%s12780_s14 + $0xf8] sm:$0xff]  }
0x3c7b   :  { %v10961_v36 = vpop.eup %10960 }
0x3c7c   :  { %v3379_v38 = vmul.f32 %v10961_v36, %v3355_v37  ;;  %v11987_v42 = vadd.f32 %v3396_v40, %v3388_v39  ;;  %v9087_v37 = vcombine.high %v3404_v53, %v3412_v55  ;;  %v10423_v36 = vld [vmem:[%s12780_s14 + $0xd8] sm:$0xff]   ;;  %v10435_v53 = vld [vmem:[%s12780_s14 + $0xf0] sm:$0xff]  }
0x3c7d   :  { %v10425_v39 = vld [vmem:[%s12780_s14 + $0x98] sm:$0xff]   ;;  %v10437_v55 = vld [vmem:[%s12780_s14 + $0xb0] sm:$0xff]  }
0x3c7e   :  { %v3389_v41 = vmul.f32 %v3386_v12, %v3379_v38  ;;  %v10422_v12 = vld [vmem:[%s12780_s14 + $0x58] sm:$0xff]  }
0x3c7f   :  { %v10424_v38 = vld [vmem:[%s12780_s14 + $0x18] sm:$0xff]  }
0x3c80   :  { %v11989_v43 = vadd.f32 %v3396_v40, %v3389_v41  ;;  %v10426_v40 = vld [vmem:[%s12780_s14 + $0x60] sm:$0xff]  }
0x3c81   :  { %v10427_v41 = vld [vmem:[%s12780_s14 + $0xe0] sm:$0xff]  }
0x3c82   :  { %v3432_v44 = vpack.c.bf16 %v11989_v43, %v11987_v42 }
0x3c84   :  { %3518 = vrot.lane.b32.xlu0 %v3432_v44, %s11073_s5  ;;  %v10428_v44 = vld [vmem:[%s12780_s14 + $0x20] sm:$0xff]  }
0x3cf6   :  { %v11999_v54 = vpop.permute.xlu0 %3518 }
0x3cf7   :  { %9110 = vmatmul.mubr.msk.bf16.vlgmr.msra.gmra.mrb[76].mxu1 %vm219_vm3, %v11999_v54  ;;  %9111 = vmatmul.mubr.msk.bf16.vlgmr.msra.gmra.mrb[80].mxu0 %vm219_vm3, %v11999_v54 }
0x3cf8   :  { %3770 = vmatpush1.bf16.msra.mxu1 %v9082_v49  ;;  %3813 = vmatpush1.bf16.msra.mxu0 %v9084_v45  ;;  %v10418_v49 = vld [vmem:[%s12780_s14 + $0x50] sm:$0xff]  }
0x3cf9   :  { %3771 = vmatprep.subr.bf16.mxu1 %v9099_v47  ;;  %3814 = vmatprep.subr.bf16.mxu0 %v9101_v52  ;;  %v10419_v45 = vld [vmem:[%s12780_s14 + $0xd0] sm:$0xff]   ;;  %v10433_v47 = vld [vmem:[%s12780_s14 + $0xa8] sm:$0xff]  }
0x3cfa   :  { %3801 = vmatprep.mubr.bf16.mxu1 %v11071_v7  ;;  %3844 = vmatprep.mubr.bf16.mxu0 %v11071_v7  ;;  %v10434_v52 = vld [vmem:[%s12780_s14 + $0x70] sm:$0xff]  }
0x3cfc   :  { %3772 = vmatpush1.bf16.msra.mxu1 %v9098_v60  ;;  %3815 = vmatpush1.bf16.msra.mxu0 %v9100_v61  ;;  %v10440_v60 = vld [vmem:[%s12780_s14 + $0x38] sm:$0xff]  }
0x3cfd   :  { %3855 = vmatprep.subr.bf16.mxu1 %v9087_v37  ;;  %3898 = vmatprep.subr.bf16.mxu0 %v9089_v17  ;;  %v10441_v61 = vld [vmem:[%s12780_s14 + $0xb8] sm:$0xff]   ;;  %v10442_v37 = vld [vmem:[%s12780_s14 + $0x140] sm:$0xff]  }
0x3cfe   :  { %v10443_v17 = vld [vmem:[%s12780_s14 + $0x1c0] sm:$0xff]  }
0x3cff   :  { %9112 = vmatmul.mubr.msk.bf16.vlgmr.msra.gmra.mrb[80].mxu1 %vm219_vm3, %v11999_v54  ;;  %9113 = vmatmul.mubr.msk.bf16.vlgmr.msra.gmra.mrb[84].mxu0 %vm219_vm3, %v11999_v54 }
0x3d00   :  { %3856 = vmatpush1.bf16.msra.mxu1 %v9086_v5  ;;  %3899 = vmatpush1.bf16.msra.mxu0 %v9088_v6  ;;  %v3433_v5 = vld [vmem:[%s12781_s19] sm:$0xff]  ;;  %v12077_v6 = vsub.s32 1, %v3438_v0 }
0x3d01   :  { %3857 = vmatprep.subr.bf16.mxu1 %v9103_v8  ;;  %3900 = vmatprep.subr.bf16.mxu0 %v9105_v9  ;;  %v12079_v8 = vsub.s32 3, %v3438_v0  ;;  %v3440_v9 = vrot.slane %v3433_v5, %v12072_v3  ;;  %v3448_v10 = vrot.slane %v3433_v5, %v12074_v4 }
0x3d02   :  { %3887 = vmatprep.mubr.bf16.mxu1 %v11071_v7  ;;  %3930 = vmatprep.mubr.bf16.mxu0 %v11071_v7  ;;  %v3444_v59 = vrot.slane %v3433_v5, %v12077_v6 }
0x3d03   :  { %v3452_v11 = vrot.slane %v3433_v5, %v12079_v8 }
0x3d04   :  { %3858 = vmatpush1.bf16.msra.mxu1 %v9102_v14  ;;  %3901 = vmatpush1.bf16.msra.mxu0 %v9104_v16  ;;  %v12087_v14 = vsub.s32 6, %v3438_v0 }
0x3d05   :  { %3941 = vmatprep.subr.bf16.mxu1 %v9091_v18  ;;  %3984 = vmatprep.subr.bf16.mxu0 %v9093_v19  ;;  %v12089_v19 = vsub.s32 5, %v3438_v0 }
0x3d07   :  { %9114 = vmatmul.mubr.msk.bf16.vlgmr.msra.gmra.mrb[84].mxu1 %vm219_vm3, %v11999_v54  ;;  %9115 = vmatmul.mubr.msk.bf16.vlgmr.msra.gmra.mrb[88].mxu0 %vm219_vm3, %v11999_v54 }
0x3d08   :  { %3942 = vmatpush1.bf16.msra.mxu1 %v9090_v20  ;;  %3985 = vmatpush1.bf16.msra.mxu0 %v9092_v57 }
0x3d09   :  { %3943 = vmatprep.subr.bf16.mxu1 %v9107_v21  ;;  %3986 = vmatprep.subr.bf16.mxu0 %v9109_v22 }
0x3d0a   :  { %3973 = vmatprep.mubr.bf16.mxu1 %v11071_v7  ;;  %4016 = vmatprep.mubr.bf16.mxu0 %v11071_v7 }
0x3d0c   :  { %3944 = vmatpush1.bf16.msra.mxu1 %v9106_v23  ;;  %3987 = vmatpush1.bf16.msra.mxu0 %v9108_v24 }
0x3d0d   :  { %9548 = vmatprep.subr.bf16.mxu1 %v10410_v25  ;;  %9570 = vmatprep.subr.bf16.mxu0 %v10411_v26 }
0x3d0f   :  { %9116 = vmatmul.mubr.msk.bf16.vlgmr.msra.gmra.mrb[88].mxu1 %vm219_vm3, %v11999_v54  ;;  %9117 = vmatmul.mubr.msk.bf16.vlgmr.msra.gmra.mrb[92].mxu0 %vm219_vm3, %v11999_v54  ;;  %v10436_v54 = vld [vmem:[%s12780_s14 + $0x30] sm:$0xff]  }
0x3d10   :  { %9549 = vmatpush3.bf16.msra.mxu1 %v10412_v63  ;;  %9571 = vmatpush3.bf16.msra.mxu0 %v10413_v27  ;;  %v3456_v27 = vrot.slane %v3433_v5, %v12085_v13 }
0x3d11   :  { %9550 = vmatprep.subr.bf16.mxu1 %v10414_v28  ;;  %9572 = vmatprep.subr.bf16.mxu0 %v10415_v29  ;;  %v3464_v28 = vrot.slane %v3433_v5, %v12087_v14 }
0x3d14   :  { %9551 = vmatpush3.bf16.msra.mxu1 %v10416_v31  ;;  %9573 = vmatpush3.bf16.msra.mxu0 %v10417_v33  ;;  %v3460_v33 = vrot.slane %v3433_v5, %v12089_v19 }
0x3d15   :  { %9552 = vmatprep.subr.bf16.mxu1 %v10418_v49  ;;  %9574 = vmatprep.subr.bf16.mxu0 %v10419_v45  ;;  %v3468_v49 = vrot.slane %v3433_v5, %v12091_v32 }
0x3d18   :  { %9553 = vmatpush3.bf16.msra.mxu1 %v10420_v30  ;;  %9575 = vmatpush3.bf16.msra.mxu0 %v10421_v35 }
0x3d19   :  { %9554 = vmatprep.subr.bf16.mxu1 %v10422_v12  ;;  %9576 = vmatprep.subr.bf16.mxu0 %v10423_v36 }
0x3d1c   :  { %9555 = vmatpush3.bf16.msra.mxu1 %v10424_v38  ;;  %9577 = vmatpush3.bf16.msra.mxu0 %v10425_v39 }
0x3d1d   :  { %9556 = vmatprep.subr.bf16.mxu1 %v10426_v40  ;;  %9578 = vmatprep.subr.bf16.mxu0 %v10427_v41  ;;  %v12098_v41 = vld [vmem:[%s12781_s19 + $0x8] sm:$0xff] }
0x3d20   :  { %9557 = vmatpush3.bf16.msra.mxu1 %v10428_v44  ;;  %9579 = vmatpush3.bf16.msra.mxu0 %v10429_v48 }
0x3d21   :  { %9558 = vmatprep.subr.bf16.mxu1 %v10430_v51  ;;  %9580 = vmatprep.subr.bf16.mxu0 %v10431_v50 }
0x3d24   :  { %9559 = vmatpush3.bf16.msra.mxu1 %v10432_v2  ;;  %9581 = vmatpush3.bf16.msra.mxu0 %v10433_v47 }
0x3d25   :  { %9560 = vmatprep.subr.bf16.mxu1 %v10434_v52  ;;  %9582 = vmatprep.subr.bf16.mxu0 %v10435_v53  ;;  %v10444_v52 = vld [vmem:[%s12780_s14 + $0x100] sm:$0xff]  }
0x3d26   :  { %v10445_v53 = vld [vmem:[%s12780_s14 + $0x180] sm:$0xff]  }
0x3d28   :  { %9561 = vmatpush3.bf16.msra.mxu1 %v10436_v54  ;;  %9583 = vmatpush3.bf16.msra.mxu0 %v10437_v55 }
0x3d29   :  { %9562 = vmatprep.subr.bf16.mxu1 %v10438_v15  ;;  %9584 = vmatprep.subr.bf16.mxu0 %v10439_v58 }
0x3d2c   :  { %9563 = vmatpush3.bf16.msra.mxu1 %v10440_v60  ;;  %9585 = vmatpush3.bf16.msra.mxu0 %v10441_v61  ;;  %v10446_v60 = vld [vmem:[%s12780_s14 + $0x148] sm:$0xff]  }
0x3d2d   :  { %9592 = vmatprep.subr.bf16.mxu1 %v10442_v37  ;;  %9614 = vmatprep.subr.bf16.mxu0 %v10443_v17  ;;  %v10447_v61 = vld [vmem:[%s12780_s14 + $0x1c8] sm:$0xff]   ;;  %v3472_v37 = vrot.slane %v12098_v41, %v12072_v3 }
0x3dca   :  { %v3717_v16 = vpop.f32.mrb[76].mxu1  ;;  %v3760_v18 = vpop.f32.mrb[80].mxu0 }
0x3dcb   :  { %v3718_v46 = vadd.f32 %v3717_v16, %v3440_v9  ;;  %v3761_v34 = vadd.f32 %v3760_v18, %v3448_v10  ;;  %v3719_v56 = vpop.f32.mrb[77].mxu1  ;;  %v3762_v20 = vpop.f32.mrb[81].mxu0  ;;  %v3476_v18 = vrot.slane %v12098_v41, %v12077_v6 }
0x3dcc   :  { %v3720_v57 = vadd.f32 %v3719_v56, %v3444_v59  ;;  %v3763_v21 = vadd.f32 %v3762_v20, %v3452_v11  ;;  %v3721_v22 = vpop.f32.mrb[78].mxu1  ;;  %v3764_v23 = vpop.f32.mrb[82].mxu0  ;;  %v10448_v56 = vld [vmem:[%s12780_s14 + $0x108] sm:$0xff]  }
0x3dcd   :  { %v3722_v24 = vadd.f32 %v3721_v22, %v3440_v9  ;;  %v3765_v25 = vadd.f32 %v3764_v23, %v3448_v10  ;;  %v3723_v26 = vpop.f32.mrb[79].mxu1  ;;  %v3766_v63 = vpop.f32.mrb[83].mxu0  ;;  %v4027_v45 = vmax.f32 %v3718_v46, 0.0  ;;  %v4029_v30 = vmax.f32 %v3761_v34, 0.0  ;;  %v10449_v20 = vld [vmem:[%s12780_s14 + $0x188] sm:$0xff]  }
0x3dce   :  { %v3724_v29 = vadd.f32 %v3723_v26, %v3444_v59  ;;  %v3767_v31 = vadd.f32 %v3766_v63, %v3452_v11  ;;  %v4028_v36 = vmax.f32 %v3720_v57, 0.0  ;;  %v4030_v38 = vmax.f32 %v3763_v21, 0.0  ;;  %v10451_v26 = vld [vmem:[%s12780_s14 + $0x1d0] sm:$0xff]  }
0x3dcf   :  { %v4043_v35 = vmax.f32 %v3722_v24, 0.0  ;;  %v4045_v12 = vmax.f32 %v3765_v25, 0.0  ;;  %v3480_v9 = vrot.slane %v12098_v41, %v12074_v4  ;;  %v3484_v57 = vrot.slane %v12098_v41, %v12079_v8  ;;  %v10450_v25 = vld [vmem:[%s12780_s14 + $0x150] sm:$0xff]  }
0x3dd0   :  { %v4044_v39 = vmax.f32 %v3724_v29, 0.0  ;;  %v4046_v40 = vmax.f32 %v3767_v31, 0.0 }
0x3dd1   :  { %v4315_v44 = vpack.c.bf16 %v4043_v35, %v4027_v45  ;;  %v4317_v48 = vpack.c.bf16 %v4045_v12, %v4029_v30  ;;  %v10452_v12 = vld [vmem:[%s12780_s14 + $0x110] sm:$0xff]  }
0x3dd2   :  { %v4316_v51 = vpack.c.bf16 %v4044_v39, %v4028_v36  ;;  %v4318_v50 = vpack.c.bf16 %v4046_v40, %v4030_v38  ;;  %v3803_v2 = vpop.f32.mrb[80].mxu1  ;;  %v3846_v47 = vpop.f32.mrb[84].mxu0  ;;  %v10453_v36 = vld [vmem:[%s12780_s14 + $0x190] sm:$0xff]  }
0x3dd3   :  { %v3804_v54 = vadd.f32 %v3803_v2, %v3456_v27  ;;  %v3847_v55 = vadd.f32 %v3846_v47, %v3464_v28  ;;  %v3805_v15 = vpop.f32.mrb[81].mxu1  ;;  %v3848_v58 = vpop.f32.mrb[85].mxu0 }
0x3dd4   :  { %v3806_v17 = vadd.f32 %v3805_v15, %v3460_v33  ;;  %v3849_v62 = vadd.f32 %v3848_v58, %v3468_v49  ;;  %v3807_v0 = vpop.f32.mrb[82].mxu1  ;;  %v3850_v5 = vpop.f32.mrb[86].mxu0  ;;  %5138 = vmatprep.mubr.bf16.mxu1 %v4316_v51  ;;  %5179 = vmatprep.mubr.bf16.mxu0 %v4318_v50  ;;  %v10455_v51 = vld [vmem:[%s12780_s14 + $0x1d8] sm:$0xff]  }
0x3dd5   :  { %v3808_v10 = vadd.f32 %v3807_v0, %v3456_v27  ;;  %v3851_v59 = vadd.f32 %v3850_v5, %v3464_v28  ;;  %v3809_v11 = vpop.f32.mrb[83].mxu1  ;;  %v3852_v16 = vpop.f32.mrb[87].mxu0  ;;  %5139 = vmatmul.mubr.bf16.vlgmr.msra.gmra.mrb[92].mxu1 %v4315_v44  ;;  %5180 = vmatmul.mubr.bf16.vlgmr.msra.gmra.mrb[96].mxu0 %v4317_v48  ;;  %v4031_v21 = vmax.f32 %v3804_v54, 0.0  ;;  %v4033_v22 = vmax.f32 %v3847_v55, 0.0  ;;  %v10454_v48 = vld [vmem:[%s12780_s14 + $0x158] sm:$0xff]  }
0x3dd6   :  { %v3810_v46 = vadd.f32 %v3809_v11, %v3460_v33  ;;  %v3853_v34 = vadd.f32 %v3852_v16, %v3468_v49  ;;  %9593 = vmatpush3.bf16.msra.mxu1 %v10444_v52  ;;  %9615 = vmatpush3.bf16.msra.mxu0 %v10445_v53  ;;  %v4032_v63 = vmax.f32 %v3806_v17, 0.0  ;;  %v4034_v27 = vmax.f32 %v3849_v62, 0.0  ;;  %v10456_v0 = vld [vmem:[%s12780_s14 + $0x118] sm:$0xff]   ;;  %v10458_v16 = vld [vmem:[%s12780_s14 + $0x160] sm:$0xff]  }
0x3dd7   :  { %v4047_v23 = vmax.f32 %v3808_v10, 0.0  ;;  %v4049_v24 = vmax.f32 %v3851_v59, 0.0  ;;  %9594 = vmatprep.subr.bf16.mxu1 %v10446_v60  ;;  %9616 = vmatprep.subr.bf16.mxu0 %v10447_v61  ;;  %v3488_v53 = vrot.slane %v12098_v41, %v12085_v13  ;;  %v3496_v60 = vrot.slane %v12098_v41, %v12087_v14  ;;  %v10457_v5 = vld [vmem:[%s12780_s14 + $0x198] sm:$0xff]  }
0x3dd8   :  { %v4048_v28 = vmax.f32 %v3810_v46, 0.0  ;;  %v4050_v29 = vmax.f32 %v3853_v34, 0.0  ;;  %v3492_v61 = vrot.slane %v12098_v41, %v12089_v19  ;;  %v10459_v46 = vld [vmem:[%s12780_s14 + $0x1e0] sm:$0xff]  }
0x3dd9   :  { %v12116_v31 = vpack.c.bf16 %v4047_v23, %v4031_v21  ;;  %v12118_v33 = vpack.c.bf16 %v4049_v24, %v4033_v22 }
0x3dda   :  { %v4320_v49 = vpack.c.bf16 %v4048_v28, %v4032_v63  ;;  %v4322_v45 = vpack.c.bf16 %v4050_v29, %v4034_v27  ;;  %9595 = vmatpush3.bf16.msra.mxu1 %v10448_v56  ;;  %9617 = vmatpush3.bf16.msra.mxu0 %v10449_v20  ;;  %v3889_v30 = vpop.f32.mrb[84].mxu1  ;;  %v3932_v35 = vpop.f32.mrb[88].mxu0 }
0x3ddb   :  { %v3890_v38 = vadd.f32 %v3889_v30, %v3472_v37  ;;  %v3933_v39 = vadd.f32 %v3932_v35, %v3480_v9  ;;  %v3891_v40 = vpop.f32.mrb[85].mxu1  ;;  %v3934_v44 = vpop.f32.mrb[89].mxu0  ;;  %9596 = vmatprep.subr.bf16.mxu1 %v10450_v25  ;;  %9618 = vmatprep.subr.bf16.mxu0 %v10451_v26  ;;  %v10460_v25 = vld [vmem:[%s12780_s14 + $0x120] sm:$0xff]  }
0x3ddc   :  { %v3892_v50 = vadd.f32 %v3891_v40, %v3476_v18  ;;  %v3935_v2 = vadd.f32 %v3934_v44, %v3484_v57  ;;  %v3893_v47 = vpop.f32.mrb[86].mxu1  ;;  %v3936_v52 = vpop.f32.mrb[90].mxu0  ;;  %5220 = vmatprep.mubr.bf16.mxu1 %v4320_v49  ;;  %5261 = vmatprep.mubr.bf16.mxu0 %v4322_v45  ;;  %v10461_v26 = vld [vmem:[%s12780_s14 + $0x1a0] sm:$0xff]   ;;  %v10462_v49 = vld [vmem:[%s12780_s14 + $0x168] sm:$0xff]  }
0x3ddd   :  { %v3894_v54 = vadd.f32 %v3893_v47, %v3472_v37  ;;  %v3937_v55 = vadd.f32 %v3936_v52, %v3480_v9  ;;  %v3895_v15 = vpop.f32.mrb[87].mxu1  ;;  %v3938_v58 = vpop.f32.mrb[91].mxu0  ;;  %v3500_v37 = vrot.slane %v12098_v41, %v12091_v32  ;;  %v4035_v9 = vmax.f32 %v3890_v38, 0.0  ;;  %v10463_v45 = vld [vmem:[%s12780_s14 + $0x1e8] sm:$0xff]  }
0x3dde   :  { %v3896_v17 = vadd.f32 %v3895_v15, %v3476_v18  ;;  %v3939_v62 = vadd.f32 %v3938_v58, %v3484_v57  ;;  %9597 = vmatpush3.bf16.msra.mxu1 %v10452_v12  ;;  %9619 = vmatpush3.bf16.msra.mxu0 %v10453_v36  ;;  %v4037_v10 = vmax.f32 %v3933_v39, 0.0  ;;  %v4036_v34 = vmax.f32 %v3892_v50, 0.0  ;;  %v10464_v50 = vld [vmem:[%s12780_s14 + $0x128] sm:$0xff]   ;;  %v10467_v15 = vld [vmem:[%s12780_s14 + $0x1f0] sm:$0xff]  }
0x3ddf   :  { %v4051_v59 = vmax.f32 %v3894_v54, 0.0  ;;  %v4053_v11 = vmax.f32 %v3937_v55, 0.0  ;;  %9598 = vmatprep.subr.bf16.mxu1 %v10454_v48  ;;  %9620 = vmatprep.subr.bf16.mxu0 %v10455_v51  ;;  %v4038_v18 = vmax.f32 %v3935_v2, 0.0  ;;  %v10465_v2 = vld [vmem:[%s12780_s14 + $0x1a8] sm:$0xff]  }
0x3de0   :  { %v4052_v56 = vmax.f32 %v3896_v17, 0.0  ;;  %v4054_v20 = vmax.f32 %v3939_v62, 0.0 }
0x3de1   :  { %v12136_v57 = vpack.c.bf16 %v4051_v59, %v4035_v9  ;;  %v12138_v21 = vpack.c.bf16 %v4053_v11, %v4037_v10  ;;  %v10468_v9 = vld [vmem:[%s12780_s14 + $0x130] sm:$0xff]   ;;  %v10470_v59 = vld [vmem:[%s12780_s14 + $0x178] sm:$0xff]  }
0x3de2   :  { %v12140_v41 = vpack.c.bf16 %v4052_v56, %v4036_v34  ;;  %v12142_v22 = vpack.c.bf16 %v4054_v20, %v4038_v18  ;;  %9599 = vmatpush3.bf16.msra.mxu1 %v10456_v0  ;;  %9621 = vmatpush3.bf16.msra.mxu0 %v10457_v5  ;;  %v3975_v23 = vpop.f32.mrb[88].mxu1  ;;  %v4018_v24 = vpop.f32.mrb[92].mxu0  ;;  %v10469_v10 = vld [vmem:[%s12780_s14 + $0x1b0] sm:$0xff]   ;;  %v10471_v11 = vld [vmem:[%s12780_s14 + $0x1f8] sm:$0xff]   ;;  %v10474_v34 = vld [vmem:[%s12780_s14 + $0x240] sm:$0xff]  }
0x3de3   :  { %v3976_v63 = vadd.f32 %v3975_v23, %v3488_v53  ;;  %v4019_v27 = vadd.f32 %v4018_v24, %v3496_v60  ;;  %v3977_v28 = vpop.f32.mrb[89].mxu1  ;;  %v4020_v29 = vpop.f32.mrb[93].mxu0  ;;  %9600 = vmatprep.subr.bf16.mxu1 %v10458_v16  ;;  %9622 = vmatprep.subr.bf16.mxu0 %v10459_v46  ;;  %v10472_v16 = vld [vmem:[%s12780_s14 + $0x138] sm:$0xff]   ;;  %v10475_v18 = vld [vmem:[%s12780_s14 + $0x2c0] sm:$0xff]   ;;  %v10478_v23 = vld [vmem:[%s12780_s14 + $0x248] sm:$0xff]  }
0x3de4   :  { %v3978_v30 = vadd.f32 %v3977_v28, %v3492_v61  ;;  %v4021_v35 = vadd.f32 %v4020_v29, %v3500_v37  ;;  %v3979_v12 = vpop.f32.mrb[90].mxu1  ;;  %v4022_v36 = vpop.f32.mrb[94].mxu0  ;;  %v10473_v46 = vld [vmem:[%s12780_s14 + $0x1b8] sm:$0xff]   ;;  %v10476_v56 = vld [vmem:[%s12780_s14 + $0x200] sm:$0xff]   ;;  %v10479_v24 = vld [vmem:[%s12780_s14 + $0x2c8] sm:$0xff]  }
0x3de5   :  { %v3980_v38 = vadd.f32 %v3979_v12, %v3488_v53  ;;  %v4023_v39 = vadd.f32 %v4022_v36, %v3496_v60  ;;  %v3981_v40 = vpop.f32.mrb[91].mxu1  ;;  %v4024_v44 = vpop.f32.mrb[95].mxu0  ;;  %v4039_v47 = vmax.f32 %v3976_v63, 0.0  ;;  %v4041_v52 = vmax.f32 %v4019_v27, 0.0  ;;  %v10466_v53 = vld [vmem:[%s12780_s14 + $0x170] sm:$0xff]   ;;  %v10477_v20 = vld [vmem:[%s12780_s14 + $0x280] sm:$0xff]  }
0x3de6   :  { %v3982_v48 = vadd.f32 %v3981_v40, %v3492_v61  ;;  %v4025_v51 = vadd.f32 %v4024_v44, %v3500_v37  ;;  %9601 = vmatpush3.bf16.msra.mxu1 %v10460_v25  ;;  %9623 = vmatpush3.bf16.msra.mxu0 %v10461_v26  ;;  %v4040_v58 = vmax.f32 %v3978_v30, 0.0  ;;  %v4042_v60 = vmax.f32 %v4021_v35, 0.0  ;;  %v10480_v25 = vld [vmem:[%s12780_s14 + $0x208] sm:$0xff]   ;;  %v10482_v63 = vld [vmem:[%s12780_s14 + $0x250] sm:$0xff]   ;;  %v10486_v27 = vld [vmem:[%s12780_s14 + $0x258] sm:$0xff]  }
0x3de7   :  { %v4055_v54 = vmax.f32 %v3980_v38, 0.0  ;;  %v4057_v55 = vmax.f32 %v4023_v39, 0.0  ;;  %9602 = vmatprep.subr.bf16.mxu1 %v10462_v49  ;;  %9624 = vmatprep.subr.bf16.mxu0 %v10463_v45  ;;  %v10481_v26 = vld [vmem:[%s12780_s14 + $0x288] sm:$0xff]   ;;  %v10487_v28 = vld [vmem:[%s12780_s14 + $0x2d8] sm:$0xff]   ;;  %v10490_v49 = vld [vmem:[%s12780_s14 + $0x260] sm:$0xff]  }
0x3de8   :  { %v4056_v61 = vmax.f32 %v3982_v48, 0.0  ;;  %v4058_v17 = vmax.f32 %v4025_v51, 0.0  ;;  %v10489_v29 = vld [vmem:[%s12780_s14 + $0x298] sm:$0xff]   ;;  %v10491_v45 = vld [vmem:[%s12780_s14 + $0x2e0] sm:$0xff]   ;;  %v10494_v12 = vld [vmem:[%s12780_s14 + $0x268] sm:$0xff]  }
0x3de9   :  { %v12152_v62 = vpack.c.bf16 %v4055_v54, %v4039_v47  ;;  %v12154_v0 = vpack.c.bf16 %v4057_v55, %v4041_v52  ;;  %v10492_v30 = vld [vmem:[%s12780_s14 + $0x220] sm:$0xff]   ;;  %v10495_v36 = vld [vmem:[%s12780_s14 + $0x2e8] sm:$0xff]   ;;  %v10498_v40 = vld [vmem:[%s12780_s14 + $0x270] sm:$0xff]  }
0x3dea   :  { %v12156_v5 = vpack.c.bf16 %v4056_v61, %v4040_v58  ;;  %v12158_v37 = vpack.c.bf16 %v4058_v17, %v4042_v60  ;;  %9603 = vmatpush3.bf16.msra.mxu1 %v10464_v50  ;;  %9625 = vmatpush3.bf16.msra.mxu0 %v10465_v2  ;;  %v10493_v35 = vld [vmem:[%s12780_s14 + $0x2a0] sm:$0xff]   ;;  %v10496_v38 = vld [vmem:[%s12780_s14 + $0x228] sm:$0xff]   ;;  %v10499_v44 = vld [vmem:[%s12780_s14 + $0x2f0] sm:$0xff]  }
0x3deb   :  { %9604 = vmatprep.subr.bf16.mxu1 %v10466_v53  ;;  %9626 = vmatprep.subr.bf16.mxu0 %v10467_v15  ;;  %v10497_v39 = vld [vmem:[%s12780_s14 + $0x2a8] sm:$0xff]   ;;  %v10500_v48 = vld [vmem:[%s12780_s14 + $0x230] sm:$0xff]   ;;  %v10502_v50 = vld [vmem:[%s12780_s14 + $0x278] sm:$0xff]  }
0x3dec   :  { %v10501_v51 = vld [vmem:[%s12780_s14 + $0x2b0] sm:$0xff]   ;;  %v10503_v2 = vld [vmem:[%s12780_s14 + $0x2f8] sm:$0xff]   ;;  %v10506_v54 = vld [vmem:[%s12780_s14 + $0x340] sm:$0xff]  }
0x3ded   :  { %v10504_v47 = vld [vmem:[%s12780_s14 + $0x238] sm:$0xff]   ;;  %v10507_v55 = vld [vmem:[%s12780_s14 + $0x3c0] sm:$0xff]   ;;  %v10510_v58 = vld [vmem:[%s12780_s14 + $0x348] sm:$0xff]  }
0x3dee   :  { %9605 = vmatpush3.bf16.msra.mxu1 %v10468_v9  ;;  %9627 = vmatpush3.bf16.msra.mxu0 %v10469_v10  ;;  %v10505_v52 = vld [vmem:[%s12780_s14 + $0x2b8] sm:$0xff]   ;;  %v10508_v53 = vld [vmem:[%s12780_s14 + $0x300] sm:$0xff]   ;;  %v10511_v60 = vld [vmem:[%s12780_s14 + $0x3c8] sm:$0xff]  }
0x3def   :  { %9606 = vmatprep.subr.bf16.mxu1 %v10470_v59  ;;  %9628 = vmatprep.subr.bf16.mxu0 %v10471_v11  ;;  %v10509_v15 = vld [vmem:[%s12780_s14 + $0x380] sm:$0xff]   ;;  %v10512_v61 = vld [vmem:[%s12780_s14 + $0x308] sm:$0xff]   ;;  %v10514_v9 = vld [vmem:[%s12780_s14 + $0x350] sm:$0xff]  }
0x3df0   :  { %v10513_v17 = vld [vmem:[%s12780_s14 + $0x388] sm:$0xff]   ;;  %v10517_v10 = vld [vmem:[%s12780_s14 + $0x390] sm:$0xff]   ;;  %v10519_v59 = vld [vmem:[%s12780_s14 + $0x3d8] sm:$0xff]  }
0x3df1   :  { %v10521_v11 = vld [vmem:[%s12780_s14 + $0x398] sm:$0xff]  }
0x3df2   :  { %9607 = vmatpush3.bf16.msra.mxu1 %v10472_v16  ;;  %9629 = vmatpush3.bf16.msra.mxu0 %v10473_v46  ;;  %v10522_v16 = vld [vmem:[%s12780_s14 + $0x360] sm:$0xff]  }
0x3df3   :  { %9636 = vmatprep.subr.bf16.mxu1 %v10474_v34  ;;  %9658 = vmatprep.subr.bf16.mxu0 %v10475_v18  ;;  %v10523_v46 = vld [vmem:[%s12780_s14 + $0x3e0] sm:$0xff]  }
0x3df4   :  { %v10524_v34 = vld [vmem:[%s12780_s14 + $0x320] sm:$0xff]  }
0x3df5   :  { %5221 = vmatmul.mubr.bf16.vlgmr.msra.gmra.mrb[96].mxu1 %v12116_v31  ;;  %5262 = vmatmul.mubr.bf16.vlgmr.msra.gmra.mrb[100].mxu0 %v12118_v33  ;;  %v10483_v31 = vld [vmem:[%s12780_s14 + $0x2d0] sm:$0xff]   ;;  %v10525_v18 = vld [vmem:[%s12780_s14 + $0x3a0] sm:$0xff]  }
0x3df6   :  { %9637 = vmatpush3.bf16.msra.mxu1 %v10476_v56  ;;  %5302 = vmatprep.mubr.bf16.mxu1 %v12140_v41  ;;  %v10484_v33 = vld [vmem:[%s12780_s14 + $0x210] sm:$0xff]   ;;  %v10526_v56 = vld [vmem:[%s12780_s14 + $0x368] sm:$0xff]  }
0x3df7   :  { %9659 = vmatpush3.bf16.msra.mxu0 %v10477_v20  ;;  %5343 = vmatprep.mubr.bf16.mxu0 %v12142_v22  ;;  %v10485_v41 = vld [vmem:[%s12780_s14 + $0x290] sm:$0xff]   ;;  %v10488_v22 = vld [vmem:[%s12780_s14 + $0x218] sm:$0xff]   ;;  %v10527_v20 = vld [vmem:[%s12780_s14 + $0x3e8] sm:$0xff]  }
0x3df8   :  { %9638 = vmatprep.subr.bf16.mxu1 %v10478_v23  ;;  %9660 = vmatprep.subr.bf16.mxu0 %v10479_v24  ;;  %v10528_v23 = vld [vmem:[%s12780_s14 + $0x328] sm:$0xff]  }
0x3df9   :  { %v10529_v24 = vld [vmem:[%s12780_s14 + $0x3a8] sm:$0xff]  }
0x3dfa   :  { %9639 = vmatpush3.bf16.msra.mxu1 %v10480_v25  ;;  %v10530_v25 = vld [vmem:[%s12780_s14 + $0x370] sm:$0xff]  }
0x3dfb   :  { %9661 = vmatpush3.bf16.msra.mxu0 %v10481_v26  ;;  %9640 = vmatprep.subr.bf16.mxu1 %v10482_v63  ;;  %v10531_v26 = vld [vmem:[%s12780_s14 + $0x3f0] sm:$0xff]  }
0x3dfc   :  { %9662 = vmatprep.subr.bf16.mxu0 %v10483_v31  ;;  %v10532_v63 = vld [vmem:[%s12780_s14 + $0x330] sm:$0xff]  }
0x3dfd   :  { %v10533_v31 = vld [vmem:[%s12780_s14 + $0x3b0] sm:$0xff]  }
0x3dfe   :  { %9641 = vmatpush3.bf16.msra.mxu1 %v10484_v33  ;;  %v10534_v33 = vld [vmem:[%s12780_s14 + $0x378] sm:$0xff]  }
0x3dff   :  { %9663 = vmatpush3.bf16.msra.mxu0 %v10485_v41  ;;  %9642 = vmatprep.subr.bf16.mxu1 %v10486_v27  ;;  %v10535_v41 = vld [vmem:[%s12780_s14 + $0x3f8] sm:$0xff]  }
0x3e00   :  { %9664 = vmatprep.subr.bf16.mxu0 %v10487_v28  ;;  %v10536_v27 = vld [vmem:[%s12780_s14 + $0x338] sm:$0xff]  }
0x3e01   :  { %v10537_v28 = vld [vmem:[%s12780_s14 + $0x3b8] sm:$0xff]  }
0x3e02   :  { %9643 = vmatpush3.bf16.msra.mxu1 %v10488_v22 }
0x3e03   :  { %9665 = vmatpush3.bf16.msra.mxu0 %v10489_v29  ;;  %9644 = vmatprep.subr.bf16.mxu1 %v10490_v49  ;;  %v9118_v49 = vld [vmem:[%s12782_s24] ss:$0 sm:$0xff] }
0x3e04   :  { %9666 = vmatprep.subr.bf16.mxu0 %v10491_v45 }
0x3e06   :  { %9645 = vmatpush3.bf16.msra.mxu1 %v10492_v30 }
0x3e07   :  { %9667 = vmatpush3.bf16.msra.mxu0 %v10493_v35  ;;  %9646 = vmatprep.subr.bf16.mxu1 %v10494_v12 }
0x3e08   :  { %9668 = vmatprep.subr.bf16.mxu0 %v10495_v36 }
0x3e0a   :  { %9647 = vmatpush3.bf16.msra.mxu1 %v10496_v38 }
0x3e0b   :  { %9669 = vmatpush3.bf16.msra.mxu0 %v10497_v39  ;;  %9648 = vmatprep.subr.bf16.mxu1 %v10498_v40 }
0x3e0c   :  { %9670 = vmatprep.subr.bf16.mxu0 %v10499_v44 }
0x3e0e   :  { %9649 = vmatpush3.bf16.msra.mxu1 %v10500_v48 }
0x3e0f   :  { %9671 = vmatpush3.bf16.msra.mxu0 %v10501_v51  ;;  %9650 = vmatprep.subr.bf16.mxu1 %v10502_v50 }
0x3e10   :  { %9672 = vmatprep.subr.bf16.mxu0 %v10503_v2 }
0x3e12   :  { %9651 = vmatpush3.bf16.msra.mxu1 %v10504_v47 }
0x3e13   :  { %9673 = vmatpush3.bf16.msra.mxu0 %v10505_v52  ;;  %9680 = vmatprep.subr.bf16.mxu1 %v10506_v54 }
0x3e14   :  { %9702 = vmatprep.subr.bf16.mxu0 %v10507_v55 }
0x3e15   :  { %5303 = vmatmul.mubr.bf16.vlgmr.msra.gmra.mrb[100].mxu1 %v12136_v57  ;;  %v10515_v57 = vld [vmem:[%s12780_s14 + $0x3d0] sm:$0xff]  }
0x3e16   :  { %5344 = vmatmul.mubr.bf16.vlgmr.msra.gmra.mrb[104].mxu0 %v12138_v21  ;;  %9681 = vmatpush3.bf16.msra.mxu1 %v10508_v53  ;;  %v10516_v21 = vld [vmem:[%s12780_s14 + $0x310] sm:$0xff]  }
0x3e17   :  { %5384 = vmatprep.mubr.bf16.mxu1 %v12156_v5  ;;  %9703 = vmatpush3.bf16.msra.mxu0 %v10509_v15  ;;  %v10518_v5 = vld [vmem:[%s12780_s14 + $0x358] sm:$0xff]  }
0x3e18   :  { %5425 = vmatprep.mubr.bf16.mxu0 %v12158_v37  ;;  %9682 = vmatprep.subr.bf16.mxu1 %v10510_v58  ;;  %v10520_v37 = vld [vmem:[%s12780_s14 + $0x318] sm:$0xff]  }
0x3e19   :  { %9704 = vmatprep.subr.bf16.mxu0 %v10511_v60 }
0x3e1a   :  { %9683 = vmatpush3.bf16.msra.mxu1 %v10512_v61 }
0x3e1b   :  { %9705 = vmatpush3.bf16.msra.mxu0 %v10513_v17  ;;  %9684 = vmatprep.subr.bf16.mxu1 %v10514_v9 }
0x3e1c   :  { %9706 = vmatprep.subr.bf16.mxu0 %v10515_v57 }
0x3e1e   :  { %9685 = vmatpush3.bf16.msra.mxu1 %v10516_v21 }
0x3e1f   :  { %9707 = vmatpush3.bf16.msra.mxu0 %v10517_v10  ;;  %9686 = vmatprep.subr.bf16.mxu1 %v10518_v5 }
0x3e20   :  { %9708 = vmatprep.subr.bf16.mxu0 %v10519_v59 }
0x3e22   :  { %9687 = vmatpush3.bf16.msra.mxu1 %v10520_v37 }
0x3e23   :  { %9709 = vmatpush3.bf16.msra.mxu0 %v10521_v11  ;;  %9688 = vmatprep.subr.bf16.mxu1 %v10522_v16 }
0x3e24   :  { %9710 = vmatprep.subr.bf16.mxu0 %v10523_v46 }
0x3e26   :  { %9689 = vmatpush3.bf16.msra.mxu1 %v10524_v34 }
0x3e27   :  { %9711 = vmatpush3.bf16.msra.mxu0 %v10525_v18  ;;  %9690 = vmatprep.subr.bf16.mxu1 %v10526_v56 }
0x3e28   :  { %9712 = vmatprep.subr.bf16.mxu0 %v10527_v20 }
0x3e2a   :  { %9691 = vmatpush3.bf16.msra.mxu1 %v10528_v23 }
0x3e2b   :  { %9713 = vmatpush3.bf16.msra.mxu0 %v10529_v24  ;;  %9692 = vmatprep.subr.bf16.mxu1 %v10530_v25 }
0x3e2c   :  { %9714 = vmatprep.subr.bf16.mxu0 %v10531_v26 }
0x3e2e   :  { %9693 = vmatpush3.bf16.msra.mxu1 %v10532_v63 }
0x3e2f   :  { %9715 = vmatpush3.bf16.msra.mxu0 %v10533_v31  ;;  %9694 = vmatprep.subr.bf16.mxu1 %v10534_v33 }
0x3e30   :  { %9716 = vmatprep.subr.bf16.mxu0 %v10535_v41 }
0x3e32   :  { %9695 = vmatpush3.bf16.msra.mxu1 %v10536_v27 }
0x3e33   :  { %9717 = vmatpush3.bf16.msra.mxu0 %v10537_v28  ;;  %10216 = vmatprep.subr.bf16.mxu1 %v11069_v1 }
0x3e34   :  { %10224 = vmatprep.subr.bf16.mxu0 %v11069_v1 }
0x3e35   :  { %5385 = vmatmul.mubr.bf16.vlgmr.msra.gmra.mrb[104].mxu1 %v12152_v62 }
0x3e36   :  { %5426 = vmatmul.mubr.bf16.vlgmr.msra.gmra.mrb[108].mxu0 %v12154_v0  ;;  %10220 = vmatprep.mubr.msk.bf16.mxu1 %vm11070_vm0, %v11069_v1 }
0x3e37   :  { %10226 = vmatprep.mubr.msk.bf16.mxu0 %vm11070_vm0, %v11069_v1 }
0x3ea8   :  { %v9564_v22 = vpop.f32.mrb[92].mxu1  ;;  %v9586_v29 = vpop.f32.mrb[96].mxu0 }
0x3ea9   :  { %v9565_v45 = vpop.f32.mrb[93].mxu1  ;;  %v9587_v30 = vpop.f32.mrb[97].mxu0 }
0x3eaa   :  { %v9566_v35 = vadd.f32 %v9565_v45, %v9564_v22  ;;  %v9588_v12 = vadd.f32 %v9587_v30, %v9586_v29  ;;  %v9567_v36 = vpop.f32.mrb[94].mxu1  ;;  %v9589_v38 = vpop.f32.mrb[98].mxu0 }
0x3eab   :  { %v9568_v39 = vpop.f32.mrb[95].mxu1  ;;  %v9590_v40 = vpop.f32.mrb[99].mxu0 }
0x3eac   :  { %v5141_v62 = vadd.f32 %v9566_v35, %v9118_v49  ;;  %v9569_v44 = vadd.f32 %v9568_v39, %v9567_v36  ;;  %v9591_v0 = vadd.f32 %v9590_v40, %v9589_v38 }
0x3eae   :  { %v5182_v48 = vadd.f32 %v9588_v12, %v5141_v62  ;;  %v5144_v51 = vadd.f32 %v9569_v44, %v9118_v49 }
0x3eb0   :  { %v5185_v50 = vadd.f32 %v9591_v0, %v5144_v51 }
0x3ec8   :  { %v9608_v2 = vpop.f32.mrb[96].mxu1  ;;  %v9630_v47 = vpop.f32.mrb[100].mxu0 }
0x3ec9   :  { %v9609_v52 = vpop.f32.mrb[97].mxu1  ;;  %v9631_v54 = vpop.f32.mrb[101].mxu0 }
0x3eca   :  { %v9610_v55 = vadd.f32 %v9609_v52, %v9608_v2  ;;  %v9632_v53 = vadd.f32 %v9631_v54, %v9630_v47  ;;  %v9611_v15 = vpop.f32.mrb[98].mxu1  ;;  %v9633_v58 = vpop.f32.mrb[102].mxu0 }
0x3ecb   :  { %v9612_v60 = vpop.f32.mrb[99].mxu1  ;;  %v9634_v61 = vpop.f32.mrb[103].mxu0 }
0x3ecc   :  { %v5223_v17 = vadd.f32 %v9610_v55, %v5182_v48  ;;  %v9613_v9 = vadd.f32 %v9612_v60, %v9611_v15  ;;  %v9635_v57 = vadd.f32 %v9634_v61, %v9633_v58 }
0x3ece   :  { %v5264_v21 = vadd.f32 %v9632_v53, %v5223_v17  ;;  %v5226_v10 = vadd.f32 %v9613_v9, %v5185_v50 }
0x3ed0   :  { %v5267_v5 = vadd.f32 %v9635_v57, %v5226_v10  ;;  %v9248_v10 = vld [vmem:[%s12783_s30] ss:$0 sm:$0xff] }
0x3ee8   :  { %v9652_v59 = vpop.f32.mrb[100].mxu1 }
0x3ee9   :  { %v9674_v37 = vpop.f32.mrb[104].mxu0  ;;  %v9653_v11 = vpop.f32.mrb[101].mxu1 }
0x3eea   :  { %v9654_v16 = vadd.f32 %v9653_v11, %v9652_v59  ;;  %v9675_v46 = vpop.f32.mrb[105].mxu0  ;;  %v9655_v34 = vpop.f32.mrb[102].mxu1  ;;  %v10538_v59 = vld [vmem:[%s12785_s11] sm:$0xff]  }
0x3eeb   :  { %v9676_v18 = vadd.f32 %v9675_v46, %v9674_v37  ;;  %v9677_v56 = vpop.f32.mrb[106].mxu0  ;;  %v9656_v20 = vpop.f32.mrb[103].mxu1  ;;  %10217 = vmatpush3.bf16.msra.mxu1 %v10538_v59  ;;  %v10539_v37 = vld [vmem:[%s12785_s11 + $0x8] sm:$0xff]  }
0x3eec   :  { %v5305_v23 = vadd.f32 %v9654_v16, %v5264_v21  ;;  %v9657_v24 = vadd.f32 %v9656_v20, %v9655_v34  ;;  %v9678_v25 = vpop.f32.mrb[107].mxu0  ;;  %10218 = vmatprep.subr.bf16.mxu1 %v11069_v1 }
0x3eed   :  { %v9679_v26 = vadd.f32 %v9678_v25, %v9677_v56 }
0x3eee   :  { %v5346_v63 = vadd.f32 %v9676_v18, %v5305_v23  ;;  %v5308_v31 = vadd.f32 %v9657_v24, %v5267_v5  ;;  %v9247_v5 = vld [vmem:[%s12784_s6] ss:$0 sm:$0xff] }
0x3eef   :  { %10219 = vmatpush3.bf16.msra.mxu1 %v10539_v37 }
0x3ef0   :  { %v5349_v33 = vadd.f32 %v9679_v26, %v5308_v31  ;;  %10230 = vmatprep.subr.bf16.mxu1 %v11069_v1 }
0x3f08   :  { %v9696_v41 = vpop.f32.mrb[104].mxu1 }
0x3f09   :  { %v9718_v27 = vpop.f32.mrb[108].mxu0  ;;  %v9697_v28 = vpop.f32.mrb[105].mxu1 }
0x3f0a   :  { %v9698_v22 = vadd.f32 %v9697_v28, %v9696_v41  ;;  %v9719_v29 = vpop.f32.mrb[109].mxu0  ;;  %v9699_v49 = vpop.f32.mrb[106].mxu1 }
0x3f0b   :  { %v9720_v45 = vadd.f32 %v9719_v29, %v9718_v27  ;;  %v9721_v30 = vpop.f32.mrb[110].mxu0  ;;  %v9700_v35 = vpop.f32.mrb[107].mxu1  ;;  %v9249_v29 = vld [vmem:[%s12786_s15] ss:$0 sm:$0xff] }
0x3f0c   :  { %v5387_v12 = vadd.f32 %v9698_v22, %v5346_v63  ;;  %v9701_v36 = vadd.f32 %v9700_v35, %v9699_v49  ;;  %v9722_v38 = vpop.f32.mrb[111].mxu0 }
0x3f0d   :  { %v9723_v39 = vadd.f32 %v9722_v38, %v9721_v30 }
0x3f0e   :  { %v5428_v40 = vadd.f32 %v9720_v45, %v5387_v12  ;;  %v5390_v62 = vadd.f32 %v9701_v36, %v5349_v33 }
0x3f10   :  { %v5431_v44 = vadd.f32 %v9723_v39, %v5390_v62  ;;  %5436 = vrot.lane.b32.xlu1 %v5428_v40, %s11074_s9 }
0x3f12   :  { %5438 = vrot.lane.b32.xlu0 %v5431_v44, %s11074_s9 }
0x3f82   :  { %v5437_v0 = vpop.permute.xlu1 %5436 }
0x3f83   :  { %v5442_v48 = vadd.f32 %v5437_v0, %v11987_v42 }
0x3f84   :  { %v5439_v51 = vpop.permute.xlu0 %5438 }
0x3f85   :  { %v5443_v50 = vadd.f32 %v5439_v51, %v11989_v43  ;;  %5448 = vrot.lane.b32.xlu1 %v5442_v48, %s11073_s5 }
0x3f87   :  { %5450 = vrot.lane.b32.xlu0 %v5443_v50, %s11073_s5 }
0x3ff7   :  { %v5449_v2 = vpop.permute.xlu1 %5448 }
0x3ff8   :  { %v5454_v47 = vsel %vm219_vm3, %v5449_v2, 0.0 }
0x3ff9   :  { %v5451_v52 = vpop.permute.xlu0 %5450  ;;  %5455 = vadd.xlane.f32.xlu1 %v5454_v47 }
0x3ffa   :  { %v5457_v54 = vsel %vm219_vm3, %v5451_v52, 0.0 }
0x3ffb   :  { %5458 = vadd.xlane.f32.xlu0 %v5457_v54 }
0x4086   :  { %v5456_v55 = vpop.xlane.xlu1 %5455 }
0x4087   :  { %v5460_v53 = vmul.f32 0.03125, %v5456_v55 }
0x4088   :  { %v5459_v15 = vpop.xlane.xlu0 %5458 }
0x4089   :  { %v5462_v42 = vsub.f32 %v5442_v48, %v5460_v53  ;;  %v5461_v58 = vmul.f32 0.03125, %v5459_v15 }
0x408b   :  { %v5464_v43 = vmul.f32 %v5462_v42, %v5462_v42  ;;  %v5463_v60 = vsub.f32 %v5443_v50, %v5461_v58 }
0x408d   :  { %v5465_v61 = vmul.f32 %v5463_v60, %v5463_v60  ;;  %5468 = vrot.lane.b32.xlu0 %v5464_v43, %s11073_s5 }
0x408f   :  { %5470 = vrot.lane.b32.xlu1 %v5465_v61, %s11073_s5 }
0x40ff   :  { %v5469_v17 = vpop.permute.xlu0 %5468 }
0x4100   :  { %v5474_v9 = vsel %vm219_vm3, %v5469_v17, 0.0 }
0x4101   :  { %5475 = vadd.xlane.f32.xlu1 %v5474_v9  ;;  %v5471_v57 = vpop.permute.xlu1 %5470 }
0x4102   :  { %v5477_v21 = vsel %vm219_vm3, %v5471_v57, 0.0 }
0x4103   :  { %5478 = vadd.xlane.f32.xlu0 %v5477_v21 }
0x4112   :  { %5503 = vrot.lane.b32.xlu1 %v9248_v10, %s11074_s9 }
0x4119   :  { %5493 = vrot.lane.b32.xlu0 %v9247_v5, %s11074_s9 }
0x418e   :  { %v5476_v11 = vpop.xlane.xlu1 %5475 }
0x418f   :  { %v5480_v16 = vmul.f32 0.03125, %v5476_v11 }
0x4190   :  { %v5479_v46 = vpop.xlane.xlu0 %5478 }
0x4191   :  { %v5482_v34 = vadd.f32 1e-05, %v5480_v16  ;;  %v5481_v18 = vmul.f32 0.03125, %v5479_v46 }
0x4192   :  { %v5504_v31 = vpop.permute.xlu1 %5503 }
0x4193   :  { %10962 = vrsqrt.f32 %v5482_v34  ;;  %v5483_v56 = vadd.f32 1e-05, %v5481_v18 }
0x4194   :  { %v5494_v23 = vpop.permute.xlu0 %5493 }
0x4195   :  { %10964 = vrsqrt.f32 %v5483_v56 }
0x419d   :  { %v10963_v20 = vpop.eup %10962 }
0x419e   :  { %v5486_v24 = vmul.f32 %v10963_v20, %v5462_v42 }
0x419f   :  { %v10965_v25 = vpop.eup %10964 }
0x41a0   :  { %v5487_v26 = vmul.f32 %v10965_v25, %v5463_v60  ;;  %v5496_v63 = vmul.f32 %v5494_v23, %v5486_v24 }
0x41a2   :  { %v5497_v33 = vmul.f32 %v5494_v23, %v5487_v26  ;;  %v12267_v41 = vadd.f32 %v5504_v31, %v5496_v63 }
0x41a4   :  { %v12269_v27 = vadd.f32 %v5504_v31, %v5497_v33 }
0x41a6   :  { %v5512_v28 = vpack.c.bf16 %v12269_v27, %v12267_v41 }
0x41a8   :  { %5521 = vrot.lane.b32.xlu1 %v5512_v28, %s11073_s5 }
0x421a   :  { %v5522_v22 = vpop.permute.xlu1 %5521 }
0x421b   :  { %10221 = vmatmul.mubr.msk.bf16.vlgmr.msra.gmra.mrb[108].mxu1 %vm219_vm3, %v5522_v22 }
0x421c   :  { %10232 = vmatprep.mubr.msk.bf16.mxu1 %vm11070_vm0, %v11069_v1 }
0x42ee   :  { %v5572_v49 = vpop.f32.mrb[108].mxu1 }
0x42ef   :  { %v5573_v45 = vadd.f32 %v9249_v29, %v5572_v49  ;;  %v10222_v30 = vpop.f32.mrb[109].mxu1 }
0x42f0   :  { %v5575_v35 = vpop.f32.mrb[110].mxu1 }
0x42f1   :  { %v12278_v12 = vpack.c.bf16 %v5573_v45, %v5573_v45  ;;  %v5576_v36 = vadd.f32 %v9249_v29, %v5575_v35  ;;  %v10223_v38 = vpop.f32.mrb[111].mxu1 }
0x42f3   :  { %v12280_v39 = vpack.c.bf16 %v5576_v36, %v5576_v36  ;;  %5586 = vrot.lane.b32.xlu0 %v12278_v12, %s11074_s9 }
0x42f5   :  { %5635 = vrot.lane.b32.xlu1 %v12280_v39, %s11074_s9 }
0x4365   :  { %v5587_v40 = vpop.permute.xlu0 %5586 }
0x4366   :  { %v5592_v62 = vsel %vm2232_vm11, %v5587_v40, 0 }
0x4367   :  { %10225 = vmatpush3.bf16.xpose.msra.mxu0 %v5592_v62  ;;  %v5636_v44 = vpop.permute.xlu1 %5635 }
0x4368   :  { %v5641_v0 = vsel %vm2232_vm11, %v5636_v44, 0  ;;  %10236 = vmatprep.subr.bf16.mxu0 %v11069_v1 }
0x4369   :  { %10231 = vmatpush3.bf16.xpose.msra.mxu1 %v5641_v0 }
0x436a   :  { %10242 = vmatprep.subr.bf16.mxu1 %v11069_v1 }
0x436e   :  { %10227 = vmatmul.mubr.msk.bf16.vlgmr.msra.gmra.mrb[112].mxu0 %vm2232_vm11, %v12278_v12 }
0x436f   :  { %10238 = vmatprep.mubr.msk.bf16.mxu0 %vm11070_vm0, %v11069_v1 }
0x4370   :  { %10233 = vmatmul.mubr.msk.bf16.vlgmr.msra.gmra.mrb[112].mxu1 %vm2232_vm11, %v12280_v39 }
0x4371   :  { %10244 = vmatprep.mubr.msk.bf16.mxu1 %vm11070_vm0, %v11069_v1 }
0x4441   :  { %v5628_v48 = vpop.f32.mrb[112].mxu0 }
0x4442   :  { %v5683_v51 = vmul.f32 0.35355338, %v5628_v48  ;;  %v10228_v50 = vpop.f32.mrb[113].mxu0 }
0x4443   :  { %v5631_v2 = vpop.f32.mrb[114].mxu0  ;;  %v5677_v47 = vpop.f32.mrb[112].mxu1 }
0x4444   :  { %v5684_v52 = vmul.f32 0.35355338, %v5677_v47  ;;  %v10229_v54 = vpop.f32.mrb[115].mxu0  ;;  %v10234_v55 = vpop.f32.mrb[113].mxu1  ;;  %v5685_v53 = vsel %vm2232_vm11, %v5683_v51, -inf }
0x4445   :  { %5686 = vmax.xlane.f32.xlu0 %v5685_v53  ;;  %v5680_v15 = vpop.f32.mrb[114].mxu1 }
0x4446   :  { %v10235_v42 = vpop.f32.mrb[115].mxu1  ;;  %v5688_v58 = vsel %vm2232_vm11, %v5684_v52, -inf }
0x4447   :  { %5689 = vmax.xlane.f32.xlu1 %v5688_v58 }
0x4458   :  { %5709 = vrot.lane.b32.xlu1 %v12278_v12, %s11072_s0 }
0x445c   :  { %5809 = vrot.lane.b32.xlu1 %v12278_v12, %s11075_s13 }
0x4460   :  { %5859 = vrot.lane.b32.xlu1 %v12280_v39, %s11075_s13 }
0x4464   :  { %5857 = vrot.lane.b32.xlu1 %v12280_v39, %s11076_s17 }
0x44d2   :  { %v5687_v43 = vpop.xlane.xlu0 %5686 }
0x44d3   :  { %v5691_v60 = vsub.f32 %v5683_v51, %v5687_v43 }
0x44d4   :  { %v5690_v61 = vpop.xlane.xlu1 %5689 }
0x44d5   :  { %v5693_v17 = vmul.f32 1.442695, %v5691_v60  ;;  %v5692_v9 = vsub.f32 %v5684_v52, %v5690_v61 }
0x44d7   :  { %10966 = vpow2.f32 %v5693_v17  ;;  %v5695_v57 = vmul.f32 1.442695, %v5692_v9 }
0x44d8   :  { %v5710_v21 = vpop.permute.xlu1 %5709 }
0x44d9   :  { %10968 = vpow2.f32 %v5695_v57  ;;  %v5715_v10 = vsel %vm1136_vm7, %v5710_v21, 0 }
0x44da   :  { %10237 = vmatpush3.bf16.msra.mxu0 %v5715_v10 }
0x44db   :  { %10248 = vmatprep.subr.bf16.mxu0 %v11069_v1 }
0x44dc   :  { %v5810_v20 = vpop.permute.xlu1 %5809 }
0x44dd   :  { %v5815_v26 = vsel %vm2232_vm11, %v5810_v20, 0 }
0x44e0   :  { %v5860_v31 = vpop.permute.xlu1 %5859 }
0x44e1   :  { %v10967_v5 = vpop.eup %10966  ;;  %v5865_v28 = vsel %vm2232_vm11, %v5860_v31, 0 }
0x44e2   :  { %v5697_v59 = vsel %vm2232_vm11, %v10967_v5, 0.0 }
0x44e3   :  { %v10969_v37 = vpop.eup %10968  ;;  %5698 = vadd.xlane.f32.xlu0 %v5697_v59 }
0x44e4   :  { %v5700_v11 = vsel %vm2232_vm11, %v10969_v37, 0.0  ;;  %v5858_v29 = vpop.permute.xlu1 %5857 }
0x44e7   :  { %5701 = vadd.xlane.f32.xlu0 %v5700_v11 }
0x44fd   :  { %5757 = vrot.lane.b32.xlu0 %v12280_v39, %s11072_s0  ;;  %s12795_s0 = sld [smem:[#allocation20_spill]] }
0x4501   :  { %5807 = vrot.lane.b32.xlu0 %v12278_v12, %s11076_s17 }
0x4570   :  { %v5699_v16 = vpop.xlane.xlu0 %5698 }
0x4571   :  { %10970 = vrcp.f32 %v5699_v16 }
0x4574   :  { %v5702_v46 = vpop.xlane.xlu0 %5701 }
0x4575   :  { %10972 = vrcp.f32 %v5702_v46  ;;  %v5580_v46 = vld [vmem:[%s12787_s16 + $0x8] sm:$0xff] }
0x4578   :  { %v5758_v34 = vpop.permute.xlu0 %5757 }
0x4579   :  { %v5763_v18 = vsel %vm1136_vm7, %v5758_v34, 0 }
0x457a   :  { %10243 = vmatpush3.bf16.msra.mxu1 %v5763_v18 }
0x457b   :  { %v10971_v56 = vpop.eup %10970  ;;  %10254 = vmatprep.subr.bf16.mxu1 %v11069_v1 }
0x457c   :  { %v5705_v23 = vmul.f32 %v10971_v56, %v10967_v5  ;;  %v5808_v22 = vpop.permute.xlu0 %5807  ;;  %v6030_v56 = vpack.c.bf16 %v5580_v46, %v5580_v46 }
0x457e   :  { %v5707_v24 = vpack.c.bf16 %v5705_v23, %v5705_v23  ;;  %v5579_v23 = vld [vmem:[%s12787_s16] sm:$0xff] }
0x457f   :  { %v10973_v25 = vpop.eup %10972 }
0x4580   :  { %v5706_v63 = vmul.f32 %v10973_v25, %v10969_v37  ;;  %10239 = vmatmul.mubr.msk.bf16.vlgmr.msra.gmra.mrb[116].mxu0 %vm2232_vm11, %v5707_v24 }
0x4581   :  { %10249 = vmatpush3.bf16.xpose.msra.mxu0 %v5815_v26  ;;  %10250 = vmatprep.mubr.msk.bf16.mxu0 %vm11070_vm0, %v11069_v1  ;;  %v5806_v26 = vpack.c.bf16 %v5579_v23, %v5579_v23 }
0x4582   :  { %v5708_v33 = vpack.c.bf16 %v5706_v63, %v5706_v63  ;;  %10260 = vmatprep.subr.bf16.mxu0 %v11069_v1  ;;  %v6035_v63 = vsel %vm1136_vm7, %v6030_v56, 0 }
0x4584   :  { %10245 = vmatmul.mubr.msk.bf16.vlgmr.msra.gmra.mrb[116].mxu1 %vm2232_vm11, %v5708_v33 }
0x4585   :  { %10255 = vmatpush3.bf16.xpose.msra.mxu1 %v5865_v28  ;;  %10256 = vmatprep.mubr.msk.bf16.mxu1 %vm11070_vm0, %v11069_v1 }
0x4586   :  { %10266 = vmatprep.subr.bf16.mxu1 %v11069_v1 }
0x4588   :  { %10251 = vmatmul.mubr.msk.bf16.vlgmr.msra.gmra.mrb[120].mxu0 %vm2232_vm11, %v5808_v22  ;;  %v6082_v22 = vsel %vm1136_vm7, %v5806_v26, 0 }
0x4589   :  { %10262 = vmatprep.mubr.msk.bf16.mxu0 %vm11070_vm0, %v11069_v1 }
0x458c   :  { %10257 = vmatmul.mubr.msk.bf16.vlgmr.msra.gmra.mrb[120].mxu1 %vm2232_vm11, %v5858_v29 }
0x458d   :  { %10268 = vmatprep.mubr.msk.bf16.mxu1 %vm11070_vm0, %v11069_v1 }
0x4653   :  { %v12334_v49 = vpop.f32.mrb[116].mxu0 }
0x4654   :  { %v10240_v45 = vpop.f32.mrb[117].mxu0 }
0x4655   :  { %v5754_v30 = vpop.f32.mrb[118].mxu0 }
0x4656   :  { %v10241_v35 = vpop.f32.mrb[119].mxu0 }
0x4657   :  { %v12336_v36 = vpop.f32.mrb[116].mxu1 }
0x4658   :  { %v5805_v38 = vpack.c.bf16 %v12336_v36, %v12334_v49  ;;  %v10246_v40 = vpop.f32.mrb[117].mxu1 }
0x4659   :  { %v5802_v62 = vpop.f32.mrb[118].mxu1 }
0x465a   :  { %v10247_v44 = vpop.f32.mrb[119].mxu1 }
0x465b   :  { %v5851_v0 = vpop.f32.mrb[120].mxu0 }
0x465c   :  { %v5907_v48 = vmul.f32 0.35355338, %v5851_v0  ;;  %v10252_v51 = vpop.f32.mrb[121].mxu0 }
0x465d   :  { %v5854_v50 = vpop.f32.mrb[122].mxu0 }
0x465e   :  { %v10253_v2 = vpop.f32.mrb[123].mxu0  ;;  %v5909_v47 = vsel %vm2232_vm11, %v5907_v48, -inf }
0x465f   :  { %5910 = vmax.xlane.f32.xlu0 %v5909_v47  ;;  %v5901_v52 = vpop.f32.mrb[120].mxu1 }
0x4660   :  { %v5908_v54 = vmul.f32 0.35355338, %v5901_v52  ;;  %v10258_v55 = vpop.f32.mrb[121].mxu1 }
0x4661   :  { %v5904_v53 = vpop.f32.mrb[122].mxu1 }
0x4662   :  { %v10259_v15 = vpop.f32.mrb[123].mxu1  ;;  %v5912_v42 = vsel %vm2232_vm11, %v5908_v54, -inf }
0x4663   :  { %5913 = vmax.xlane.f32.xlu1 %v5912_v42 }
0x4674   :  { %5933 = vrot.lane.b32.xlu1 %v12278_v12, %s11077_s21 }
0x4678   :  { %6127 = vrot.lane.b32.xlu1 %v12278_v12, %s11078_s25 }
0x467c   :  { %6177 = vrot.lane.b32.xlu1 %v12280_v39, %s11078_s25 }
0x4680   :  { %6175 = vrot.lane.b32.xlu1 %v12280_v39, %s11079_s29 }
0x46ec   :  { %v5911_v58 = vpop.xlane.xlu0 %5910 }
0x46ed   :  { %v5915_v43 = vsub.f32 %v5907_v48, %v5911_v58 }
0x46ef   :  { %v5917_v60 = vmul.f32 1.442695, %v5915_v43 }
0x46f0   :  { %v5914_v61 = vpop.xlane.xlu1 %5913 }
0x46f1   :  { %10974 = vpow2.f32 %v5917_v60  ;;  %v5916_v17 = vsub.f32 %v5908_v54, %v5914_v61 }
0x46f3   :  { %v5919_v9 = vmul.f32 1.442695, %v5916_v17 }
0x46f4   :  { %v5934_v57 = vpop.permute.xlu1 %5933 }
0x46f5   :  { %10976 = vpow2.f32 %v5919_v9  ;;  %v5939_v21 = vsel %vm1136_vm7, %v5934_v57, 0 }
0x46f6   :  { %10261 = vmatpush3.bf16.msra.mxu0 %v5939_v21 }
0x46f7   :  { %10272 = vmatprep.subr.bf16.mxu0 %v11069_v1 }
0x46f8   :  { %v6128_v29 = vpop.permute.xlu1 %6127 }
0x46f9   :  { %v6133_v51 = vsel %vm2232_vm11, %v6128_v29, 0 }
0x46fb   :  { %v10975_v10 = vpop.eup %10974 }
0x46fc   :  { %v5921_v5 = vsel %vm2232_vm11, %v10975_v10, 0.0  ;;  %v6178_v45 = vpop.permute.xlu1 %6177 }
0x46fd   :  { %5922 = vadd.xlane.f32.xlu0 %v5921_v5  ;;  %v6183_v30 = vsel %vm2232_vm11, %v6178_v45, 0 }
0x46ff   :  { %v10977_v59 = vpop.eup %10976 }
0x4700   :  { %v5924_v37 = vsel %vm2232_vm11, %v10977_v59, 0.0  ;;  %v6176_v35 = vpop.permute.xlu1 %6175 }
0x4701   :  { %5925 = vadd.xlane.f32.xlu0 %v5924_v37 }
0x4717   :  { %5981 = vrot.lane.b32.xlu0 %v12280_v39, %s11077_s21 }
0x471b   :  { %6125 = vrot.lane.b32.xlu0 %v12278_v12, %s11079_s29 }
0x478a   :  { %v5923_v11 = vpop.xlane.xlu0 %5922 }
0x478b   :  { %10978 = vrcp.f32 %v5923_v11 }
0x478e   :  { %v5926_v16 = vpop.xlane.xlu0 %5925 }
0x478f   :  { %10980 = vrcp.f32 %v5926_v16 }
0x4792   :  { %v5982_v34 = vpop.permute.xlu0 %5981 }
0x4793   :  { %v5987_v18 = vsel %vm1136_vm7, %v5982_v34, 0 }
0x4794   :  { %10267 = vmatpush3.bf16.msra.mxu1 %v5987_v18 }
0x4795   :  { %v10979_v20 = vpop.eup %10978  ;;  %10278 = vmatprep.subr.bf16.mxu1 %v11069_v1 }
0x4796   :  { %v5929_v24 = vmul.f32 %v10979_v20, %v10975_v10  ;;  %v6126_v52 = vpop.permute.xlu0 %6125 }
0x4798   :  { %v5931_v25 = vpack.c.bf16 %v5929_v24, %v5929_v24 }
0x4799   :  { %v10981_v31 = vpop.eup %10980 }
0x479a   :  { %v5930_v33 = vmul.f32 %v10981_v31, %v10977_v59  ;;  %10263 = vmatmul.mubr.msk.bf16.vlgmr.msra.gmra.mrb[124].mxu0 %vm2232_vm11, %v5931_v25 }
0x479b   :  { %10273 = vmatpush3.bf16.msra.mxu0 %v6035_v63  ;;  %10274 = vmatprep.mubr.msk.bf16.mxu0 %vm11070_vm0, %v11069_v1 }
0x479c   :  { %v5932_v28 = vpack.c.bf16 %v5930_v33, %v5930_v33  ;;  %10284 = vmatprep.subr.bf16.mxu0 %v11069_v1 }
0x479e   :  { %10269 = vmatmul.mubr.msk.bf16.vlgmr.msra.gmra.mrb[124].mxu1 %vm2232_vm11, %v5932_v28 }
0x479f   :  { %10279 = vmatpush3.bf16.msra.mxu1 %v6082_v22  ;;  %10280 = vmatprep.mubr.msk.bf16.mxu1 %vm11070_vm0, %v11069_v1 }
0x47a0   :  { %10290 = vmatprep.subr.bf16.mxu1 %v11069_v1 }
0x47a6   :  { %10281 = vmatmul.mubr.msk.bf16.vlgmr.msra.gmra.mrb[128].mxu1 %vm2232_vm11, %v5805_v38 }
0x47a7   :  { %10292 = vmatprep.mubr.msk.bf16.mxu1 %vm11070_vm0, %v11069_v1 }
0x47a8   :  { %10291 = vmatpush3.bf16.xpose.msra.mxu1 %v6183_v30 }
0x47a9   :  { %10302 = vmatprep.subr.bf16.mxu1 %v11069_v1 }
0x47af   :  { %10293 = vmatmul.mubr.msk.bf16.vlgmr.msra.gmra.mrb[132].mxu1 %vm2232_vm11, %v6176_v35 }
0x47b0   :  { %10304 = vmatprep.mubr.msk.bf16.mxu1 %vm11070_vm0, %v11069_v1 }
0x486d   :  { %v5975_v40 = vpop.f32.mrb[124].mxu0 }
0x486e   :  { %v10264_v62 = vpop.f32.mrb[125].mxu0 }
0x486f   :  { %v5978_v44 = vpop.f32.mrb[126].mxu0 }
0x4870   :  { %v10265_v49 = vpop.f32.mrb[127].mxu0 }
0x4871   :  { %v6023_v36 = vpop.f32.mrb[124].mxu1 }
0x4872   :  { %v6029_v38 = vpack.c.bf16 %v6023_v36, %v5975_v40  ;;  %v10270_v0 = vpop.f32.mrb[125].mxu1 }
0x4873   :  { %v6026_v48 = vpop.f32.mrb[126].mxu1 }
0x4874   :  { %v10271_v50 = vpop.f32.mrb[127].mxu1  ;;  %10275 = vmatmul.mubr.msk.bf16.vlgmr.msra.gmra.mrb[128].mxu0 %vm2232_vm11, %v6029_v38 }
0x4875   :  { %10285 = vmatpush3.bf16.xpose.msra.mxu0 %v6133_v51  ;;  %10286 = vmatprep.mubr.msk.bf16.mxu0 %vm11070_vm0, %v11069_v1  ;;  %v5581_v51 = vld [vmem:[%s12787_s16 + $0x10] sm:$0xff] }
0x4876   :  { %10296 = vmatprep.subr.bf16.mxu0 %v11069_v1  ;;  %v6348_v50 = vpack.c.bf16 %v5581_v51, %v5581_v51 }
0x4879   :  { %v6118_v2 = vpop.f32.mrb[128].mxu1 }
0x487a   :  { %v10282_v47 = vpop.f32.mrb[129].mxu1 }
0x487b   :  { %v6121_v54 = vpop.f32.mrb[130].mxu1 }
0x487c   :  { %v10283_v55 = vpop.f32.mrb[131].mxu1  ;;  %10287 = vmatmul.mubr.msk.bf16.vlgmr.msra.gmra.mrb[132].mxu0 %vm2232_vm11, %v6126_v52 }
0x487d   :  { %10298 = vmatprep.mubr.msk.bf16.mxu0 %vm11070_vm0, %v11069_v1 }
0x4882   :  { %v6219_v53 = vpop.f32.mrb[132].mxu1 }
0x4883   :  { %v6226_v15 = vmul.f32 0.35355338, %v6219_v53  ;;  %v10294_v42 = vpop.f32.mrb[133].mxu1 }
0x4884   :  { %v6222_v58 = vpop.f32.mrb[134].mxu1 }
0x4885   :  { %v10295_v43 = vpop.f32.mrb[135].mxu1  ;;  %v6230_v60 = vsel %vm2232_vm11, %v6226_v15, -inf }
0x4886   :  { %6231 = vmax.xlane.f32.xlu1 %v6230_v60 }
0x4897   :  { %6251 = vrot.lane.b32.xlu1 %v12278_v12, %s11080_s3 }
0x489b   :  { %6400 = vrot.lane.b32.xlu1 %v12278_v12, %s11081_s8 }
0x489f   :  { %6450 = vrot.lane.b32.xlu1 %v12280_v39, %s11081_s8 }
0x48a3   :  { %6448 = vrot.lane.b32.xlu1 %v12280_v39, %s11082_s7 }
0x4913   :  { %v6232_v61 = vpop.xlane.xlu1 %6231 }
0x4914   :  { %v6234_v57 = vsub.f32 %v6226_v15, %v6232_v61 }
0x4916   :  { %v6237_v21 = vmul.f32 1.442695, %v6234_v57 }
0x4917   :  { %v6252_v17 = vpop.permute.xlu1 %6251 }
0x4918   :  { %v6257_v9 = vsel %vm1136_vm7, %v6252_v17, 0  ;;  %10982 = vpow2.f32 %v6237_v21 }
0x4919   :  { %10297 = vmatpush3.bf16.msra.mxu0 %v6257_v9 }
0x491a   :  { %10308 = vmatprep.subr.bf16.mxu0 %v11069_v1 }
0x491b   :  { %v6401_v49 = vpop.permute.xlu1 %6400 }
0x491c   :  { %v6406_v38 = vsel %vm2232_vm11, %v6401_v49, 0 }
0x491f   :  { %v6451_v53 = vpop.permute.xlu1 %6450 }
0x4920   :  { %v6456_v60 = vsel %vm2232_vm11, %v6451_v53, 0 }
0x4922   :  { %v10983_v24 = vpop.eup %10982 }
0x4923   :  { %v6242_v25 = vsel %vm2232_vm11, %v10983_v24, 0.0 }
0x4947   :  { %v6071_v10 = vpop.f32.mrb[128].mxu0 }
0x4948   :  { %v12402_v5 = vadd.f32 %v6118_v2, %v6071_v10  ;;  %v10276_v59 = vpop.f32.mrb[129].mxu0  ;;  %v6353_v2 = vsel %vm1136_vm7, %v6348_v50, 0 }
0x4949   :  { %v6074_v37 = vpop.f32.mrb[130].mxu0 }
0x494a   :  { %v12404_v11 = vadd.f32 %v6121_v54, %v6074_v37  ;;  %v10277_v16 = vpop.f32.mrb[131].mxu0  ;;  %v6449_v37 = vpop.permute.xlu1 %6448 }
0x494f   :  { %v6169_v46 = vpop.f32.mrb[132].mxu0 }
0x4950   :  { %v6225_v34 = vmul.f32 0.35355338, %v6169_v46  ;;  %v10288_v18 = vpop.f32.mrb[133].mxu0 }
0x4951   :  { %v6172_v56 = vpop.f32.mrb[134].mxu0 }
0x4952   :  { %v10289_v20 = vpop.f32.mrb[135].mxu0  ;;  %v6227_v23 = vsel %vm2232_vm11, %v6225_v34, -inf }
0x4953   :  { %6228 = vmax.xlane.f32.xlu0 %v6227_v23 }
0x4957   :  { %6243 = vadd.xlane.f32.xlu0 %v6242_v25 }
0x49e0   :  { %v6229_v26 = vpop.xlane.xlu0 %6228 }
0x49e1   :  { %v6233_v63 = vsub.f32 %v6225_v34, %v6229_v26 }
0x49e3   :  { %v6235_v31 = vmul.f32 1.442695, %v6233_v63 }
0x49e4   :  { %v6244_v22 = vpop.xlane.xlu0 %6243 }
0x49e5   :  { %10984 = vpow2.f32 %v6235_v31 }
0x49e6   :  { %10986 = vrcp.f32 %v6244_v22 }
0x49ef   :  { %v10985_v33 = vpop.eup %10984 }
0x49f0   :  { %v6239_v28 = vsel %vm2232_vm11, %v10985_v33, 0.0  ;;  %v10987_v29 = vpop.eup %10986 }
0x49f1   :  { %6240 = vadd.xlane.f32.xlu0 %v6239_v28  ;;  %v6248_v30 = vmul.f32 %v10987_v29, %v10983_v24 }
0x49f3   :  { %v6250_v62 = vpack.c.bf16 %v6248_v30, %v6248_v30 }
0x4a07   :  { %6299 = vrot.lane.b32.xlu0 %v12280_v39, %s11080_s3 }
0x4a0b   :  { %6398 = vrot.lane.b32.xlu0 %v12278_v12, %s11082_s7 }
0x4a7e   :  { %v6241_v45 = vpop.xlane.xlu0 %6240 }
0x4a7f   :  { %10988 = vrcp.f32 %v6241_v45 }
0x4a82   :  { %v6300_v35 = vpop.permute.xlu0 %6299 }
0x4a83   :  { %v6305_v40 = vsel %vm1136_vm7, %v6300_v35, 0 }
0x4a84   :  { %10303 = vmatpush3.bf16.msra.mxu1 %v6305_v40 }
0x4a85   :  { %10314 = vmatprep.subr.bf16.mxu1 %v11069_v1 }
0x4a86   :  { %v6399_v48 = vpop.permute.xlu0 %6398 }
0x4a87   :  { %10305 = vmatmul.mubr.msk.bf16.vlgmr.msra.gmra.mrb[136].mxu1 %vm2232_vm11, %v6250_v62 }
0x4a88   :  { %10316 = vmatprep.mubr.msk.bf16.mxu1 %vm11070_vm0, %v11069_v1 }
0x4a89   :  { %v10989_v44 = vpop.eup %10988 }
0x4a8a   :  { %v6247_v36 = vmul.f32 %v10989_v44, %v10985_v33 }
0x4a8c   :  { %v6249_v0 = vpack.c.bf16 %v6247_v36, %v6247_v36 }
0x4a8d   :  { %10315 = vmatpush3.bf16.xpose.msra.mxu1 %v6406_v38 }
0x4a8e   :  { %10299 = vmatmul.mubr.msk.bf16.vlgmr.msra.gmra.mrb[136].mxu0 %vm2232_vm11, %v6249_v0  ;;  %10326 = vmatprep.subr.bf16.mxu1 %v11069_v1  ;;  %v5582_v0 = vld [vmem:[%s12787_s16 + $0x18] sm:$0xff] }
0x4a8f   :  { %10310 = vmatprep.mubr.msk.bf16.mxu0 %vm11070_vm0, %v11069_v1  ;;  %10309 = vmatpush3.bf16.msra.mxu0 %v6353_v2 }
0x4a90   :  { %10320 = vmatprep.subr.bf16.mxu0 %v11069_v1 }
0x4a94   :  { %10317 = vmatmul.mubr.msk.bf16.vlgmr.msra.gmra.mrb[140].mxu1 %vm2232_vm11, %v6399_v48  ;;  %v6621_v48 = vpack.c.bf16 %v5582_v0, %v5582_v0  ;;  %v6763_v0 = vld [vmem:[%s12791_s26 + $0x48] sm:$0xff] }
0x4a95   :  { %10328 = vmatprep.mubr.msk.bf16.mxu1 %vm11070_vm0, %v11069_v1 }
0x4a96   :  { %v6626_v51 = vsel %vm1136_vm7, %v6621_v48, 0  ;;  %v6770_v48 = vld [vmem:[%s12791_s26 + $0x80] sm:$0xff] }
0x4b5a   :  { %v6341_v47 = vpop.f32.mrb[136].mxu1 }
0x4b5b   :  { %v10306_v52 = vpop.f32.mrb[137].mxu1 }
0x4b5c   :  { %v6344_v54 = vpop.f32.mrb[138].mxu1 }
0x4b5d   :  { %v10307_v55 = vpop.f32.mrb[139].mxu1 }
0x4b61   :  { %v6293_v15 = vpop.f32.mrb[136].mxu0 }
0x4b62   :  { %v6347_v42 = vpack.c.bf16 %v6341_v47, %v6293_v15  ;;  %v10300_v58 = vpop.f32.mrb[137].mxu0 }
0x4b63   :  { %v6296_v43 = vpop.f32.mrb[138].mxu0 }
0x4b64   :  { %v10301_v61 = vpop.f32.mrb[139].mxu0  ;;  %10311 = vmatmul.mubr.msk.bf16.vlgmr.msra.gmra.mrb[140].mxu0 %vm2232_vm11, %v6347_v42 }
0x4b65   :  { %10321 = vmatpush3.bf16.xpose.msra.mxu0 %v6456_v60  ;;  %10322 = vmatprep.mubr.msk.bf16.mxu0 %vm11070_vm0, %v11069_v1 }
0x4b66   :  { %10332 = vmatprep.subr.bf16.mxu0 %v11069_v1 }
0x4b67   :  { %v6442_v17 = vpop.f32.mrb[140].mxu1 }
0x4b68   :  { %v6498_v9 = vmul.f32 0.35355338, %v6442_v17  ;;  %v10318_v57 = vpop.f32.mrb[141].mxu1 }
0x4b69   :  { %v6445_v21 = vpop.f32.mrb[142].mxu1  ;;  %v9273_v57 = vld [vmem:[%s12788_s18] ss:$0 sm:$0xff] }
0x4b6a   :  { %v10319_v10 = vpop.f32.mrb[143].mxu1  ;;  %v6500_v59 = vsel %vm2232_vm11, %v6498_v9, -inf }
0x4b6b   :  { %6501 = vmax.xlane.f32.xlu0 %v6500_v59 }
0x4b6c   :  { %10323 = vmatmul.mubr.msk.bf16.vlgmr.msra.gmra.mrb[144].mxu0 %vm2232_vm11, %v6449_v37 }
0x4b6d   :  { %10334 = vmatprep.mubr.msk.bf16.mxu0 %vm11070_vm0, %v11069_v1 }
0x4bf8   :  { %v6502_v16 = vpop.xlane.xlu0 %6501 }
0x4bf9   :  { %v6506_v46 = vsub.f32 %v6498_v9, %v6502_v16 }
0x4bfb   :  { %v6508_v34 = vmul.f32 1.442695, %v6506_v46 }
0x4bfd   :  { %10990 = vpow2.f32 %v6508_v34 }
0x4c07   :  { %v10991_v18 = vpop.eup %10990 }
0x4c08   :  { %v6512_v56 = vsel %vm2232_vm11, %v10991_v18, 0.0 }
0x4c09   :  { %6513 = vadd.xlane.f32.xlu0 %v6512_v56 }
0x4c37   :  { %v6389_v20 = vpop.f32.mrb[140].mxu0 }
0x4c38   :  { %v6396_v23 = vadd.f32 %v6389_v20, %v12402_v5  ;;  %v10312_v24 = vpop.f32.mrb[141].mxu0 }
0x4c39   :  { %v6392_v25 = vpop.f32.mrb[142].mxu0 }
0x4c3a   :  { %v6397_v26 = vadd.f32 %v6392_v25, %v12404_v11  ;;  %v10313_v63 = vpop.f32.mrb[143].mxu0 }
0x4c3f   :  { %v6492_v31 = vpop.f32.mrb[144].mxu0 }
0x4c40   :  { %v6499_v33 = vmul.f32 0.35355338, %v6492_v31  ;;  %v10324_v28 = vpop.f32.mrb[145].mxu0 }
0x4c41   :  { %v6495_v22 = vpop.f32.mrb[146].mxu0 }
0x4c42   :  { %v10325_v29 = vpop.f32.mrb[147].mxu0  ;;  %v6503_v45 = vsel %vm2232_vm11, %v6499_v33, -inf }
0x4c43   :  { %6504 = vmax.xlane.f32.xlu1 %v6503_v45 }
0x4c54   :  { %6524 = vrot.lane.b32.xlu1 %v12278_v12, %s11083_s10 }
0x4c96   :  { %v6514_v30 = vpop.xlane.xlu0 %6513 }
0x4c97   :  { %10992 = vrcp.f32 %v6514_v30 }
0x4ca1   :  { %v10993_v35 = vpop.eup %10992 }
0x4ca2   :  { %v6520_v62 = vmul.f32 %v10993_v35, %v10991_v18 }
0x4ca4   :  { %v6522_v36 = vpack.c.bf16 %v6520_v62, %v6520_v62  ;;  %v9275_v62 = vld [vmem:[%s12789_s22] ss:$0 sm:$0xff] }
0x4cd0   :  { %v6505_v5 = vpop.xlane.xlu1 %6504 }
0x4cd1   :  { %v6507_v40 = vsub.f32 %v6499_v33, %v6505_v5 }
0x4cd3   :  { %v6510_v11 = vmul.f32 1.442695, %v6507_v40 }
0x4cd4   :  { %v6525_v44 = vpop.permute.xlu1 %6524 }
0x4cd5   :  { %10994 = vpow2.f32 %v6510_v11  ;;  %v6530_v49 = vsel %vm1136_vm7, %v6525_v44, 0  ;;  %v9274_v11 = vld [vmem:[%s12790_s23] ss:$0 sm:$0xff] }
0x4cd6   :  { %10327 = vmatpush3.bf16.msra.mxu1 %v6530_v49  ;;  %v6754_v44 = vld [vmem:[%s12791_s26] sm:$0xff] }
0x4cd7   :  { %10338 = vmatprep.subr.bf16.mxu1 %v11069_v1  ;;  %v6762_v49 = vld [vmem:[%s12791_s26 + $0x40] sm:$0xff] }
0x4cd9   :  { %10329 = vmatmul.mubr.msk.bf16.vlgmr.msra.gmra.mrb[144].mxu1 %vm2232_vm11, %v6522_v36  ;;  %v6755_v36 = vld [vmem:[%s12791_s26 + $0x8] sm:$0xff] }
0x4cda   :  { %10340 = vmatprep.mubr.msk.bf16.mxu1 %vm11070_vm0, %v11069_v1  ;;  %10339 = vmatpush3.bf16.msra.mxu1 %v6626_v51  ;;  %v6778_v51 = vld [vmem:[%s12791_s26 + $0xc0] sm:$0xff] }
0x4cdf   :  { %v10995_v12 = vpop.eup %10994 }
0x4ce0   :  { %v6515_v38 = vsel %vm2232_vm11, %v10995_v12, 0.0 }
0x4ce1   :  { %6516 = vadd.xlane.f32.xlu0 %v6515_v38  ;;  %v9277_v38 = vcombine.high %v6754_v44, %v6762_v49 }
0x4cf7   :  { %6572 = vrot.lane.b32.xlu0 %v12280_v39, %s11083_s10 }
0x4d6e   :  { %v6517_v50 = vpop.xlane.xlu0 %6516 }
0x4d6f   :  { %10996 = vrcp.f32 %v6517_v50  ;;  %v9278_v50 = vcombine.low %v6755_v36, %v6763_v0 }
0x4d72   :  { %v6573_v2 = vpop.permute.xlu0 %6572 }
0x4d73   :  { %v6578_v47 = vsel %vm1136_vm7, %v6573_v2, 0  ;;  %v9279_v2 = vcombine.high %v6755_v36, %v6763_v0  ;;  %v6774_v36 = vld [vmem:[%s12791_s26 + $0xa0] sm:$0xff]  ;;  %v6783_v0 = vld [vmem:[%s12791_s26 + $0xe8] sm:$0xff] }
0x4d74   :  { %10333 = vmatpush3.bf16.msra.mxu0 %v6578_v47  ;;  %v9293_v47 = vcombine.high %v6770_v48, %v6778_v51 }
0x4d75   :  { %7037 = vmatprep.subr.bf16.mxu0 %v9277_v38  ;;  %7080 = vmatprep.subr.bf16.mxu1 %v9279_v2  ;;  %v6775_v38 = vld [vmem:[%s12791_s26 + $0xa8] sm:$0xff] }
0x4d76   :  { %v9303_v2 = vcombine.high %v6775_v38, %v6783_v0 }
0x4d79   :  { %v10997_v52 = vpop.eup %10996 }
0x4d7a   :  { %v6521_v54 = vmul.f32 %v10997_v52, %v10995_v12  ;;  %v9276_v12 = vcombine.low %v6754_v44, %v6762_v49  ;;  %v6771_v52 = vld [vmem:[%s12791_s26 + $0x88] sm:$0xff] }
0x4d7c   :  { %v6523_v55 = vpack.c.bf16 %v6521_v54, %v6521_v54  ;;  %v6779_v54 = vld [vmem:[%s12791_s26 + $0xc8] sm:$0xff] }
0x4d7e   :  { %10335 = vmatmul.mubr.msk.bf16.vlgmr.msra.gmra.mrb[148].mxu0 %vm2232_vm11, %v6523_v55  ;;  %v9295_v55 = vcombine.high %v6771_v52, %v6779_v54 }
0x4d7f   :  { %7069 = vmatprep.mubr.bf16.mxu0 %v11071_v7  ;;  %7038 = vmatpush1.bf16.msra.mxu0 %v9276_v12  ;;  %v6782_v12 = vld [vmem:[%s12791_s26 + $0xe0] sm:$0xff] }
0x4d80   :  { %7039 = vmatprep.subr.bf16.mxu0 %v9293_v47  ;;  %v6760_v47 = vld [vmem:[%s12791_s26 + $0x30] sm:$0xff] }
0x4dac   :  { %v6566_v39 = vpop.f32.mrb[144].mxu1 }
0x4dad   :  { %v10330_v53 = vpop.f32.mrb[145].mxu1 }
0x4dae   :  { %v6569_v15 = vpop.f32.mrb[146].mxu1  ;;  %v9294_v53 = vcombine.low %v6771_v52, %v6779_v54  ;;  %v6768_v52 = vld [vmem:[%s12791_s26 + $0x70] sm:$0xff]  ;;  %v6761_v54 = vld [vmem:[%s12791_s26 + $0x38] sm:$0xff] }
0x4daf   :  { %v10331_v42 = vpop.f32.mrb[147].mxu1 }
0x4e51   :  { %v6614_v58 = vpop.f32.mrb[148].mxu0 }
0x4e52   :  { %v6620_v43 = vpack.c.bf16 %v6614_v58, %v6566_v39  ;;  %v10336_v60 = vpop.f32.mrb[149].mxu0  ;;  %v9292_v39 = vcombine.low %v6770_v48, %v6778_v51 }
0x4e53   :  { %v6617_v61 = vpop.f32.mrb[150].mxu0 }
0x4e54   :  { %v10337_v17 = vpop.f32.mrb[151].mxu0  ;;  %10341 = vmatmul.mubr.msk.bf16.vlgmr.msra.gmra.mrb[148].mxu1 %vm2232_vm11, %v6620_v43  ;;  %7040 = vmatpush1.bf16.msra.mxu0 %v9292_v39  ;;  %v9300_v39 = vcombine.low %v6774_v36, %v6782_v12 }
0x4e55   :  { %7112 = vmatprep.mubr.bf16.mxu1 %v11071_v7  ;;  %7081 = vmatpush1.bf16.msra.mxu1 %v9278_v50  ;;  %v6756_v17 = vld [vmem:[%s12791_s26 + $0x10] sm:$0xff]  ;;  %v9301_v50 = vcombine.high %v6774_v36, %v6782_v12  ;;  %v10568_v12 = vld [vmem:[%s12792_s28 + $0x78] sm:$0xff]  }
0x4e56   :  { %7082 = vmatprep.subr.bf16.mxu1 %v9295_v55  ;;  %v6769_v55 = vld [vmem:[%s12791_s26 + $0x78] sm:$0xff]  ;;  %v10567_v36 = vld [vmem:[%s12792_s28 + $0xb0] sm:$0xff]  }
0x4e59   :  { %7083 = vmatpush1.bf16.msra.mxu1 %v9294_v53  ;;  %v9302_v53 = vcombine.low %v6775_v38, %v6783_v0  ;;  %v10569_v38 = vld [vmem:[%s12792_s28 + $0xf8] sm:$0xff]  }
0x4e5a   :  { %v10570_v0 = vld [vmem:[%s12792_s28 + $0x38] sm:$0xff]  }
0x4f27   :  { %v6662_v9 = vpop.f32.mrb[148].mxu1 }
0x4f28   :  { %v6669_v21 = vadd.f32 %v6662_v9, %v6396_v23  ;;  %v10342_v10 = vpop.f32.mrb[149].mxu1  ;;  %v6764_v9 = vld [vmem:[%s12791_s26 + $0x50] sm:$0xff] }
0x4f29   :  { %v6665_v59 = vpop.f32.mrb[150].mxu1  ;;  %v9280_v10 = vcombine.low %v6756_v17, %v6764_v9 }
0x4f2a   :  { %v6678_v37 = vadd.f32 %v9273_v57, %v6669_v21  ;;  %v6670_v16 = vadd.f32 %v6665_v59, %v6397_v26  ;;  %v10343_v46 = vpop.f32.mrb[151].mxu1  ;;  %v9281_v59 = vcombine.high %v6756_v17, %v6764_v9  ;;  %v9288_v17 = vcombine.low %v6760_v47, %v6768_v52 }
0x4f2b   :  { %v9290_v9 = vcombine.low %v6761_v54, %v6769_v55 }
0x4f2c   :  { %6682 = vrot.lane.b32.xlu1 %v6678_v37, %s11074_s9  ;;  %v6679_v34 = vadd.f32 %v9273_v57, %v6670_v16  ;;  %v6757_v57 = vld [vmem:[%s12791_s26 + $0x18] sm:$0xff]  ;;  %7123 = vmatprep.subr.bf16.mxu0 %v9281_v59 }
0x4f2d   :  { %v6765_v37 = vld [vmem:[%s12791_s26 + $0x58] sm:$0xff] }
0x4f2e   :  { %v9282_v46 = vcombine.low %v6757_v57, %v6765_v37 }
0x4f30   :  { %6684 = vrot.lane.b32.xlu1 %v6679_v34, %s11074_s9  ;;  %v9283_v34 = vcombine.high %v6757_v57, %v6765_v37  ;;  %v10540_v37 = vld [vmem:[%s12792_s28 + $0x40] sm:$0xff]  }
0x4f32   :  { %7166 = vmatprep.subr.bf16.mxu1 %v9283_v34  ;;  %v10543_v34 = vld [vmem:[%s12792_s28 + $0x80] sm:$0xff]  }
0x4f9e   :  { %v6683_v18 = vpop.permute.xlu1 %6682 }
0x4f9f   :  { %v6688_v56 = vadd.f32 %v6683_v18, %v12267_v41 }
0x4fa1   :  { %6694 = vrot.lane.b32.xlu0 %v6688_v56, %s11073_s5 }
0x4fa2   :  { %v6685_v20 = vpop.permute.xlu1 %6684 }
0x4fa3   :  { %v6689_v24 = vadd.f32 %v6685_v20, %v12269_v27 }
0x4fa5   :  { %6696 = vrot.lane.b32.xlu1 %v6689_v24, %s11073_s5 }
0x5013   :  { %v6695_v23 = vpop.permute.xlu0 %6694 }
0x5014   :  { %v6700_v25 = vsel %vm219_vm3, %v6695_v23, 0.0 }
0x5015   :  { %6701 = vadd.xlane.f32.xlu0 %v6700_v25 }
0x5017   :  { %v6697_v26 = vpop.permute.xlu1 %6696 }
0x5018   :  { %v6703_v63 = vsel %vm219_vm3, %v6697_v26, 0.0 }
0x5019   :  { %6704 = vadd.xlane.f32.xlu1 %v6703_v63 }
0x50a2   :  { %v6702_v31 = vpop.xlane.xlu0 %6701 }
0x50a3   :  { %v6706_v33 = vmul.f32 0.03125, %v6702_v31 }
0x50a5   :  { %v6708_v41 = vsub.f32 %v6688_v56, %v6706_v33  ;;  %v6772_v33 = vld [vmem:[%s12791_s26 + $0x90] sm:$0xff] }
0x50a6   :  { %v6705_v28 = vpop.xlane.xlu1 %6704 }
0x50a7   :  { %v6710_v22 = vmul.f32 %v6708_v41, %v6708_v41  ;;  %v6707_v29 = vmul.f32 0.03125, %v6705_v28  ;;  %v6773_v28 = vld [vmem:[%s12791_s26 + $0x98] sm:$0xff] }
0x50a9   :  { %v6709_v27 = vsub.f32 %v6689_v24, %v6707_v29  ;;  %6714 = vrot.lane.b32.xlu0 %v6710_v22, %s11073_s5  ;;  %v6781_v22 = vld [vmem:[%s12791_s26 + $0xd8] sm:$0xff] }
0x50ab   :  { %v6711_v45 = vmul.f32 %v6709_v27, %v6709_v27 }
0x50ad   :  { %6716 = vrot.lane.b32.xlu1 %v6711_v45, %s11073_s5  ;;  %v6758_v45 = vld [vmem:[%s12791_s26 + $0x20] sm:$0xff] }
0x511b   :  { %v6715_v30 = vpop.permute.xlu0 %6714 }
0x511c   :  { %v6720_v35 = vsel %vm219_vm3, %v6715_v30, 0.0 }
0x511d   :  { %6721 = vadd.xlane.f32.xlu0 %v6720_v35  ;;  %v6766_v35 = vld [vmem:[%s12791_s26 + $0x60] sm:$0xff] }
0x511e   :  { %v9285_v44 = vcombine.high %v6758_v45, %v6766_v35  ;;  %v9284_v48 = vcombine.low %v6758_v45, %v6766_v35  ;;  %v10558_v45 = vld [vmem:[%s12792_s28 + $0x20] sm:$0xff]   ;;  %v10560_v35 = vld [vmem:[%s12792_s28 + $0x68] sm:$0xff]  }
0x511f   :  { %v6717_v5 = vpop.permute.xlu1 %6716 }
0x5120   :  { %v6723_v40 = vsel %vm219_vm3, %v6717_v5, 0.0  ;;  %v6759_v5 = vld [vmem:[%s12791_s26 + $0x28] sm:$0xff] }
0x5121   :  { %6724 = vadd.xlane.f32.xlu1 %v6723_v40  ;;  %v6767_v40 = vld [vmem:[%s12791_s26 + $0x68] sm:$0xff] }
0x5122   :  { %v9287_v49 = vcombine.high %v6759_v5, %v6767_v40  ;;  %v9286_v51 = vcombine.low %v6759_v5, %v6767_v40  ;;  %v10561_v5 = vld [vmem:[%s12792_s28 + $0xe8] sm:$0xff]  }
0x5123   :  { %v10562_v40 = vld [vmem:[%s12792_s28 + $0x28] sm:$0xff]  }
0x5132   :  { %6749 = vrot.lane.b32.xlu1 %v9275_v62, %s11074_s9 }
0x5133   :  { %6739 = vrot.lane.b32.xlu0 %v9274_v11, %s11074_s9  ;;  %v9298_v11 = vcombine.low %v6773_v28, %v6781_v22 }
0x51aa   :  { %v6722_v15 = vpop.xlane.xlu0 %6721 }
0x51ab   :  { %v6726_v42 = vmul.f32 0.03125, %v6722_v15  ;;  %v9289_v15 = vcombine.high %v6760_v47, %v6768_v52 }
0x51ad   :  { %v6728_v58 = vadd.f32 1e-05, %v6726_v42  ;;  %v9291_v42 = vcombine.high %v6761_v54, %v6769_v55 }
0x51ae   :  { %v6725_v43 = vpop.xlane.xlu1 %6724  ;;  %v6740_v18 = vpop.permute.xlu0 %6739 }
0x51af   :  { %10998 = vrsqrt.f32 %v6728_v58  ;;  %v6727_v60 = vmul.f32 0.03125, %v6725_v43  ;;  %v6776_v58 = vld [vmem:[%s12791_s26 + $0xb0] sm:$0xff] }
0x51b0   :  { %v6784_v43 = vld [vmem:[%s12791_s26 + $0xf0] sm:$0xff] }
0x51b1   :  { %v6729_v61 = vadd.f32 1e-05, %v6727_v60  ;;  %v6777_v60 = vld [vmem:[%s12791_s26 + $0xb8] sm:$0xff]  ;;  %v9305_v57 = vcombine.high %v6776_v58, %v6784_v43 }
0x51b2   :  { %v6750_v23 = vpop.permute.xlu1 %6749 }
0x51b3   :  { %11000 = vrsqrt.f32 %v6729_v61  ;;  %v6785_v61 = vld [vmem:[%s12791_s26 + $0xf8] sm:$0xff] }
0x51b4   :  { %v9306_v59 = vcombine.low %v6777_v60, %v6785_v61 }
0x51b9   :  { %v10999_v21 = vpop.eup %10998 }
0x51ba   :  { %v6732_v16 = vmul.f32 %v10999_v21, %v6708_v41  ;;  %v6780_v41 = vld [vmem:[%s12791_s26 + $0xd0] sm:$0xff]  ;;  %v9307_v21 = vcombine.high %v6777_v60, %v6785_v61 }
0x51bb   :  { %v9297_v29 = vcombine.high %v6772_v33, %v6780_v41  ;;  %v9296_v62 = vcombine.low %v6772_v33, %v6780_v41  ;;  %v10552_v33 = vld [vmem:[%s12792_s28 + $0x58] sm:$0xff]  }
0x51bc   :  { %v6742_v24 = vmul.f32 %v6740_v18, %v6732_v16  ;;  %v10541_v16 = vld [vmem:[%s12792_s28 + $0xc0] sm:$0xff]   ;;  %v10553_v41 = vld [vmem:[%s12792_s28 + $0xd8] sm:$0xff]  }
0x51bd   :  { %v11001_v56 = vpop.eup %11000 }
0x51be   :  { %v6733_v20 = vmul.f32 %v11001_v56, %v6709_v27  ;;  %v12488_v26 = vadd.f32 %v6750_v23, %v6742_v24  ;;  %v9299_v27 = vcombine.high %v6773_v28, %v6781_v22  ;;  %v10545_v56 = vld [vmem:[%s12792_s28 + $0xc8] sm:$0xff]   ;;  %v10548_v24 = vld [vmem:[%s12792_s28 + $0x50] sm:$0xff]   ;;  %v10554_v28 = vld [vmem:[%s12792_s28 + $0x18] sm:$0xff]  }
0x51bf   :  { %v10555_v22 = vld [vmem:[%s12792_s28 + $0x98] sm:$0xff]  }
0x51c0   :  { %v6743_v25 = vmul.f32 %v6740_v18, %v6733_v20  ;;  %v10544_v18 = vld [vmem:[%s12792_s28 + $0x48] sm:$0xff]  }
0x51c1   :  { %v10547_v20 = vld [vmem:[%s12792_s28 + $0x88] sm:$0xff]  }
0x51c2   :  { %v12490_v63 = vadd.f32 %v6750_v23, %v6743_v25  ;;  %v10549_v23 = vld [vmem:[%s12792_s28 + $0xd0] sm:$0xff]  }
0x51c3   :  { %v10550_v25 = vld [vmem:[%s12792_s28 + $0x10] sm:$0xff]  }
0x51c4   :  { %v6786_v31 = vpack.c.bf16 %v12490_v63, %v12488_v26 }
0x51c6   :  { %6872 = vrot.lane.b32.xlu0 %v6786_v31, %s11073_s5  ;;  %v10551_v31 = vld [vmem:[%s12792_s28 + $0x90] sm:$0xff]  }
0x5238   :  { %v12500_v30 = vpop.permute.xlu0 %6872 }
0x5239   :  { %9308 = vmatmul.mubr.msk.bf16.vlgmr.msra.gmra.mrb[152].mxu0 %vm219_vm3, %v12500_v30  ;;  %9309 = vmatmul.mubr.msk.bf16.vlgmr.msra.gmra.mrb[152].mxu1 %vm219_vm3, %v12500_v30 }
0x523a   :  { %7124 = vmatpush1.bf16.msra.mxu0 %v9280_v10  ;;  %7167 = vmatpush1.bf16.msra.mxu1 %v9282_v46  ;;  %v9304_v10 = vcombine.low %v6776_v58, %v6784_v43  ;;  %v10542_v46 = vld [vmem:[%s12792_s28] sm:$0xff]  }
0x523b   :  { %7125 = vmatprep.subr.bf16.mxu0 %v9297_v29  ;;  %7168 = vmatprep.subr.bf16.mxu1 %v9299_v27  ;;  %v10556_v29 = vld [vmem:[%s12792_s28 + $0x60] sm:$0xff]  }
0x523c   :  { %7155 = vmatprep.mubr.bf16.mxu0 %v11071_v7  ;;  %7198 = vmatprep.mubr.bf16.mxu1 %v11071_v7  ;;  %v10557_v27 = vld [vmem:[%s12792_s28 + $0xe0] sm:$0xff]  }
0x523e   :  { %7126 = vmatpush1.bf16.msra.mxu0 %v9296_v62  ;;  %7169 = vmatpush1.bf16.msra.mxu1 %v9298_v11  ;;  %v10563_v62 = vld [vmem:[%s12792_s28 + $0xa8] sm:$0xff]   ;;  %v10564_v11 = vld [vmem:[%s12792_s28 + $0x70] sm:$0xff]  }
0x523f   :  { %7209 = vmatprep.subr.bf16.mxu0 %v9285_v44  ;;  %7252 = vmatprep.subr.bf16.mxu1 %v9287_v49  ;;  %v10565_v44 = vld [vmem:[%s12792_s28 + $0xf0] sm:$0xff]  }
0x5240   :  { %v10566_v49 = vld [vmem:[%s12792_s28 + $0x30] sm:$0xff]  }
0x5241   :  { %9310 = vmatmul.mubr.msk.bf16.vlgmr.msra.gmra.mrb[156].mxu0 %vm219_vm3, %v12500_v30  ;;  %9311 = vmatmul.mubr.msk.bf16.vlgmr.msra.gmra.mrb[156].mxu1 %vm219_vm3, %v12500_v30 }
0x5242   :  { %7210 = vmatpush1.bf16.msra.mxu0 %v9284_v48  ;;  %7253 = vmatpush1.bf16.msra.mxu1 %v9286_v51  ;;  %v10571_v48 = vld [vmem:[%s12792_s28 + $0xb8] sm:$0xff]   ;;  %v10572_v51 = vld [vmem:[%s12792_s28 + $0x140] sm:$0xff]  }
0x5243   :  { %7211 = vmatprep.subr.bf16.mxu0 %v9301_v50  ;;  %7254 = vmatprep.subr.bf16.mxu1 %v9303_v2  ;;  %v10573_v50 = vld [vmem:[%s12792_s28 + $0x1c0] sm:$0xff]  }
0x5244   :  { %7241 = vmatprep.mubr.bf16.mxu0 %v11071_v7  ;;  %7284 = vmatprep.mubr.bf16.mxu1 %v11071_v7  ;;  %v6787_v2 = vld [vmem:[%s12793_s1] sm:$0xff] }
0x5245   :  { %v6794_v47 = vrot.slane %v6787_v2, %v12072_v3  ;;  %v6802_v52 = vrot.slane %v6787_v2, %v12074_v4  ;;  %v6798_v54 = vrot.slane %v6787_v2, %v12077_v6  ;;  %v6806_v55 = vrot.slane %v6787_v2, %v12079_v8 }
0x5246   :  { %7212 = vmatpush1.bf16.msra.mxu0 %v9300_v39  ;;  %7255 = vmatpush1.bf16.msra.mxu1 %v9302_v53 }
0x5247   :  { %7295 = vmatprep.subr.bf16.mxu0 %v9289_v15  ;;  %7338 = vmatprep.subr.bf16.mxu1 %v9291_v42 }
0x5249   :  { %9312 = vmatmul.mubr.msk.bf16.vlgmr.msra.gmra.mrb[160].mxu0 %vm219_vm3, %v12500_v30  ;;  %9313 = vmatmul.mubr.msk.bf16.vlgmr.msra.gmra.mrb[160].mxu1 %vm219_vm3, %v12500_v30 }
0x524a   :  { %7296 = vmatpush1.bf16.msra.mxu0 %v9288_v17  ;;  %7339 = vmatpush1.bf16.msra.mxu1 %v9290_v9 }
0x524b   :  { %7297 = vmatprep.subr.bf16.mxu0 %v9305_v57  ;;  %7340 = vmatprep.subr.bf16.mxu1 %v9307_v21 }
0x524c   :  { %7327 = vmatprep.mubr.bf16.mxu0 %v11071_v7  ;;  %7370 = vmatprep.mubr.bf16.mxu1 %v11071_v7  ;;  %v10546_v7 = vld [vmem:[%s12792_s28 + $0x8] sm:$0xff]  }
0x524e   :  { %7298 = vmatpush1.bf16.msra.mxu0 %v9304_v10  ;;  %7341 = vmatpush1.bf16.msra.mxu1 %v9306_v59 }
0x524f   :  { %9767 = vmatprep.subr.bf16.mxu0 %v10540_v37  ;;  %9789 = vmatprep.subr.bf16.mxu1 %v10541_v16  ;;  %v6810_v37 = vrot.slane %v6787_v2, %v12085_v13  ;;  %v6818_v16 = vrot.slane %v6787_v2, %v12087_v14 }
0x5251   :  { %9314 = vmatmul.mubr.msk.bf16.vlgmr.msra.gmra.mrb[164].mxu0 %vm219_vm3, %v12500_v30  ;;  %9315 = vmatmul.mubr.msk.bf16.vlgmr.msra.gmra.mrb[164].mxu1 %vm219_vm3, %v12500_v30  ;;  %v10559_v30 = vld [vmem:[%s12792_s28 + $0xa0] sm:$0xff]  }
0x5252   :  { %9768 = vmatpush3.bf16.msra.mxu0 %v10542_v46  ;;  %9790 = vmatpush3.bf16.msra.mxu1 %v10543_v34 }
0x5253   :  { %9769 = vmatprep.subr.bf16.mxu0 %v10544_v18  ;;  %9791 = vmatprep.subr.bf16.mxu1 %v10545_v56  ;;  %v6814_v18 = vrot.slane %v6787_v2, %v12089_v19  ;;  %v6822_v56 = vrot.slane %v6787_v2, %v12091_v32 }
0x5256   :  { %9770 = vmatpush3.bf16.msra.mxu0 %v10546_v7  ;;  %9792 = vmatpush3.bf16.msra.mxu1 %v10547_v20 }
0x5257   :  { %9771 = vmatprep.subr.bf16.mxu0 %v10548_v24  ;;  %9793 = vmatprep.subr.bf16.mxu1 %v10549_v23 }
0x525a   :  { %9772 = vmatpush3.bf16.msra.mxu0 %v10550_v25  ;;  %9794 = vmatpush3.bf16.msra.mxu1 %v10551_v31 }
0x525b   :  { %9773 = vmatprep.subr.bf16.mxu0 %v10552_v33  ;;  %9795 = vmatprep.subr.bf16.mxu1 %v10553_v41 }
0x525e   :  { %9774 = vmatpush3.bf16.msra.mxu0 %v10554_v28  ;;  %9796 = vmatpush3.bf16.msra.mxu1 %v10555_v22  ;;  %v12583_v28 = vld [vmem:[%s12793_s1 + $0x8] sm:$0xff] }
0x525f   :  { %9775 = vmatprep.subr.bf16.mxu0 %v10556_v29  ;;  %9797 = vmatprep.subr.bf16.mxu1 %v10557_v27  ;;  %v6834_v2 = vrot.slane %v12583_v28, %v12074_v4  ;;  %v6838_v4 = vrot.slane %v12583_v28, %v12079_v8 }
0x5262   :  { %9776 = vmatpush3.bf16.msra.mxu0 %v10558_v45  ;;  %9798 = vmatpush3.bf16.msra.mxu1 %v10559_v30 }
0x5263   :  { %9777 = vmatprep.subr.bf16.mxu0 %v10560_v35  ;;  %9799 = vmatprep.subr.bf16.mxu1 %v10561_v5  ;;  %v10574_v5 = vld [vmem:[%s12792_s28 + $0x100] sm:$0xff]  }
0x5266   :  { %9778 = vmatpush3.bf16.msra.mxu0 %v10562_v40  ;;  %9800 = vmatpush3.bf16.msra.mxu1 %v10563_v62  ;;  %v10575_v40 = vld [vmem:[%s12792_s28 + $0x180] sm:$0xff]  }
0x5267   :  { %9779 = vmatprep.subr.bf16.mxu0 %v10564_v11  ;;  %9801 = vmatprep.subr.bf16.mxu1 %v10565_v44 }
0x526a   :  { %9780 = vmatpush3.bf16.msra.mxu0 %v10566_v49  ;;  %9802 = vmatpush3.bf16.msra.mxu1 %v10567_v36  ;;  %v10576_v36 = vld [vmem:[%s12792_s28 + $0x148] sm:$0xff]  }
0x526b   :  { %9781 = vmatprep.subr.bf16.mxu0 %v10568_v12  ;;  %9803 = vmatprep.subr.bf16.mxu1 %v10569_v38  ;;  %v10577_v12 = vld [vmem:[%s12792_s28 + $0x1c8] sm:$0xff]   ;;  %v6826_v38 = vrot.slane %v12583_v28, %v12072_v3  ;;  %v6830_v3 = vrot.slane %v12583_v28, %v12077_v6 }
0x526e   :  { %9782 = vmatpush3.bf16.msra.mxu0 %v10570_v0  ;;  %9804 = vmatpush3.bf16.msra.mxu1 %v10571_v48 }
0x526f   :  { %9811 = vmatprep.subr.bf16.mxu0 %v10572_v51  ;;  %9833 = vmatprep.subr.bf16.mxu1 %v10573_v50 }
0x530c   :  { %v7071_v39 = vpop.f32.mrb[152].mxu0  ;;  %v7114_v53 = vpop.f32.mrb[152].mxu1 }
0x530d   :  { %v7072_v15 = vadd.f32 %v7071_v39, %v6794_v47  ;;  %v7115_v42 = vadd.f32 %v7114_v53, %v6802_v52  ;;  %v7073_v58 = vpop.f32.mrb[153].mxu0  ;;  %v7116_v43 = vpop.f32.mrb[153].mxu1 }
0x530e   :  { %v7074_v60 = vadd.f32 %v7073_v58, %v6798_v54  ;;  %v7117_v61 = vadd.f32 %v7116_v43, %v6806_v55  ;;  %v7075_v17 = vpop.f32.mrb[154].mxu0  ;;  %v7118_v9 = vpop.f32.mrb[154].mxu1 }
0x530f   :  { %v7076_v57 = vadd.f32 %v7075_v17, %v6794_v47  ;;  %v7119_v21 = vadd.f32 %v7118_v9, %v6802_v52  ;;  %v7077_v10 = vpop.f32.mrb[155].mxu0  ;;  %v7120_v59 = vpop.f32.mrb[155].mxu1  ;;  %v7381_v7 = vmax.f32 %v7072_v15, 0.0  ;;  %v7383_v20 = vmax.f32 %v7115_v42, 0.0  ;;  %v10578_v15 = vld [vmem:[%s12792_s28 + $0x108] sm:$0xff]   ;;  %v10580_v17 = vld [vmem:[%s12792_s28 + $0x150] sm:$0xff]  }
0x5310   :  { %v7078_v46 = vadd.f32 %v7077_v10, %v6798_v54  ;;  %v7121_v34 = vadd.f32 %v7120_v59, %v6806_v55  ;;  %v7382_v25 = vmax.f32 %v7074_v60, 0.0  ;;  %v7384_v31 = vmax.f32 %v7117_v61, 0.0  ;;  %v10579_v42 = vld [vmem:[%s12792_s28 + $0x188] sm:$0xff]   ;;  %v10581_v9 = vld [vmem:[%s12792_s28 + $0x1d0] sm:$0xff]  }
0x5311   :  { %v7397_v24 = vmax.f32 %v7076_v57, 0.0  ;;  %v7399_v23 = vmax.f32 %v7119_v21, 0.0 }
0x5312   :  { %v7398_v33 = vmax.f32 %v7078_v46, 0.0  ;;  %v7400_v41 = vmax.f32 %v7121_v34, 0.0 }
0x5313   :  { %v7669_v22 = vpack.c.bf16 %v7397_v24, %v7381_v7  ;;  %v7671_v29 = vpack.c.bf16 %v7399_v23, %v7383_v20 }
0x5314   :  { %v7670_v27 = vpack.c.bf16 %v7398_v33, %v7382_v25  ;;  %v7672_v45 = vpack.c.bf16 %v7400_v41, %v7384_v31  ;;  %v7157_v30 = vpop.f32.mrb[156].mxu0  ;;  %v7200_v35 = vpop.f32.mrb[156].mxu1  ;;  %v10584_v25 = vld [vmem:[%s12792_s28 + $0x158] sm:$0xff]  }
0x5315   :  { %v7158_v62 = vadd.f32 %v7157_v30, %v6810_v37  ;;  %v7201_v11 = vadd.f32 %v7200_v35, %v6818_v16  ;;  %v7159_v44 = vpop.f32.mrb[157].mxu0  ;;  %v7202_v49 = vpop.f32.mrb[157].mxu1  ;;  %v10585_v31 = vld [vmem:[%s12792_s28 + $0x1d8] sm:$0xff]  }
0x5316   :  { %v7160_v0 = vadd.f32 %v7159_v44, %v6814_v18  ;;  %v7203_v48 = vadd.f32 %v7202_v49, %v6822_v56  ;;  %v7161_v51 = vpop.f32.mrb[158].mxu0  ;;  %v7204_v50 = vpop.f32.mrb[158].mxu1  ;;  %8492 = vmatprep.mubr.bf16.mxu0 %v7670_v27  ;;  %8533 = vmatprep.mubr.bf16.mxu1 %v7672_v45  ;;  %v6842_v27 = vrot.slane %v12583_v28, %v12085_v13  ;;  %v10586_v49 = vld [vmem:[%s12792_s28 + $0x118] sm:$0xff]  }
0x5317   :  { %v7162_v47 = vadd.f32 %v7161_v51, %v6810_v37  ;;  %v7205_v52 = vadd.f32 %v7204_v50, %v6818_v16  ;;  %v7163_v54 = vpop.f32.mrb[159].mxu0  ;;  %v7206_v55 = vpop.f32.mrb[159].mxu1  ;;  %8493 = vmatmul.mubr.bf16.vlgmr.msra.gmra.mrb[168].mxu0 %v7669_v22  ;;  %8534 = vmatmul.mubr.bf16.vlgmr.msra.gmra.mrb[168].mxu1 %v7671_v29  ;;  %v7385_v58 = vmax.f32 %v7158_v62, 0.0  ;;  %v7387_v43 = vmax.f32 %v7201_v11, 0.0  ;;  %v10589_v51 = vld [vmem:[%s12792_s28 + $0x1e0] sm:$0xff]  }
0x5318   :  { %v7164_v39 = vadd.f32 %v7163_v54, %v6814_v18  ;;  %v7207_v53 = vadd.f32 %v7206_v55, %v6822_v56  ;;  %9812 = vmatpush3.bf16.msra.mxu0 %v10574_v5  ;;  %9834 = vmatpush3.bf16.msra.mxu1 %v10575_v40  ;;  %v7386_v6 = vmax.f32 %v7160_v0, 0.0  ;;  %v7388_v57 = vmax.f32 %v7203_v48, 0.0  ;;  %v10582_v18 = vld [vmem:[%s12792_s28 + $0x110] sm:$0xff]  }
0x5319   :  { %v7401_v60 = vmax.f32 %v7162_v47, 0.0  ;;  %v7403_v61 = vmax.f32 %v7205_v52, 0.0  ;;  %9813 = vmatprep.subr.bf16.mxu0 %v10576_v36  ;;  %9835 = vmatprep.subr.bf16.mxu1 %v10577_v12  ;;  %v10583_v56 = vld [vmem:[%s12792_s28 + $0x190] sm:$0xff]   ;;  %v6850_v40 = vrot.slane %v12583_v28, %v12087_v14  ;;  %v6846_v62 = vrot.slane %v12583_v28, %v12089_v19  ;;  %v10587_v36 = vld [vmem:[%s12792_s28 + $0x198] sm:$0xff]   ;;  %v10588_v14 = vld [vmem:[%s12792_s28 + $0x160] sm:$0xff]  }
0x531a   :  { %v7402_v21 = vmax.f32 %v7164_v39, 0.0  ;;  %v7404_v10 = vmax.f32 %v7207_v53, 0.0  ;;  %v6854_v13 = vrot.slane %v12583_v28, %v12091_v32  ;;  %v10590_v39 = vld [vmem:[%s12792_s28 + $0x120] sm:$0xff]  }
0x531b   :  { %v12601_v59 = vpack.c.bf16 %v7401_v60, %v7385_v58  ;;  %v12603_v37 = vpack.c.bf16 %v7403_v61, %v7387_v43  ;;  %v10591_v53 = vld [vmem:[%s12792_s28 + $0x1a0] sm:$0xff]   ;;  %v10592_v43 = vld [vmem:[%s12792_s28 + $0x168] sm:$0xff]  }
0x531c   :  { %v7674_v8 = vpack.c.bf16 %v7402_v21, %v7386_v6  ;;  %v7676_v16 = vpack.c.bf16 %v7404_v10, %v7388_v57  ;;  %9814 = vmatpush3.bf16.msra.mxu0 %v10578_v15  ;;  %9836 = vmatpush3.bf16.msra.mxu1 %v10579_v42  ;;  %v7243_v46 = vpop.f32.mrb[160].mxu0  ;;  %v7286_v34 = vpop.f32.mrb[160].mxu1  ;;  %v10593_v60 = vld [vmem:[%s12792_s28 + $0x1e8] sm:$0xff]  }
0x531d   :  { %v7244_v7 = vadd.f32 %v7243_v46, %v6826_v38  ;;  %v7287_v20 = vadd.f32 %v7286_v34, %v6834_v2  ;;  %v7245_v24 = vpop.f32.mrb[161].mxu0  ;;  %v7288_v23 = vpop.f32.mrb[161].mxu1  ;;  %9815 = vmatprep.subr.bf16.mxu0 %v10580_v17  ;;  %9837 = vmatprep.subr.bf16.mxu1 %v10581_v9  ;;  %v10594_v34 = vld [vmem:[%s12792_s28 + $0x128] sm:$0xff]  }
0x531e   :  { %v7246_v33 = vadd.f32 %v7245_v24, %v6830_v3  ;;  %v7289_v41 = vadd.f32 %v7288_v23, %v6838_v4  ;;  %v7247_v22 = vpop.f32.mrb[162].mxu0  ;;  %v7290_v29 = vpop.f32.mrb[162].mxu1  ;;  %8574 = vmatprep.mubr.bf16.mxu0 %v7674_v8  ;;  %8615 = vmatprep.mubr.bf16.mxu1 %v7676_v16  ;;  %v10596_v23 = vld [vmem:[%s12792_s28 + $0x170] sm:$0xff]  }
0x531f   :  { %v7248_v45 = vadd.f32 %v7247_v22, %v6826_v38  ;;  %v7291_v30 = vadd.f32 %v7290_v29, %v6834_v2  ;;  %v7249_v35 = vpop.f32.mrb[163].mxu0  ;;  %v7292_v5 = vpop.f32.mrb[163].mxu1  ;;  %v7389_v12 = vmax.f32 %v7244_v7, 0.0  ;;  %v7391_v38 = vmax.f32 %v7287_v20, 0.0 }
0x5320   :  { %v7250_v11 = vadd.f32 %v7249_v35, %v6830_v3  ;;  %v7293_v44 = vadd.f32 %v7292_v5, %v6838_v4  ;;  %9816 = vmatpush3.bf16.msra.mxu0 %v10582_v18  ;;  %9838 = vmatpush3.bf16.msra.mxu1 %v10583_v56  ;;  %v7390_v19 = vmax.f32 %v7246_v33, 0.0  ;;  %v7392_v50 = vmax.f32 %v7289_v41, 0.0  ;;  %v10595_v18 = vld [vmem:[%s12792_s28 + $0x1a8] sm:$0xff]   ;;  %v10598_v35 = vld [vmem:[%s12792_s28 + $0x130] sm:$0xff]  }
0x5321   :  { %v7405_v0 = vmax.f32 %v7248_v45, 0.0  ;;  %v7407_v48 = vmax.f32 %v7291_v30, 0.0  ;;  %9817 = vmatprep.subr.bf16.mxu0 %v10584_v25  ;;  %9839 = vmatprep.subr.bf16.mxu1 %v10585_v31  ;;  %v10597_v25 = vld [vmem:[%s12792_s28 + $0x1f0] sm:$0xff]  }
0x5322   :  { %v7406_v2 = vmax.f32 %v7250_v11, 0.0  ;;  %v7408_v47 = vmax.f32 %v7293_v44, 0.0  ;;  %v10599_v5 = vld [vmem:[%s12792_s28 + $0x1b0] sm:$0xff]   ;;  %v10602_v11 = vld [vmem:[%s12792_s28 + $0x138] sm:$0xff]  }
0x5323   :  { %v12621_v52 = vpack.c.bf16 %v7405_v0, %v7389_v12  ;;  %v12623_v54 = vpack.c.bf16 %v7407_v48, %v7391_v38  ;;  %v10603_v44 = vld [vmem:[%s12792_s28 + $0x1b8] sm:$0xff]   ;;  %v10607_v12 = vld [vmem:[%s12792_s28 + $0x280] sm:$0xff]   ;;  %v10608_v38 = vld [vmem:[%s12792_s28 + $0x248] sm:$0xff]  }
0x5324   :  { %v12625_v32 = vpack.c.bf16 %v7406_v2, %v7390_v19  ;;  %v12627_v28 = vpack.c.bf16 %v7408_v47, %v7392_v50  ;;  %9818 = vmatpush3.bf16.msra.mxu0 %v10586_v49  ;;  %9840 = vmatpush3.bf16.msra.mxu1 %v10587_v36  ;;  %v7329_v55 = vpop.f32.mrb[164].mxu0  ;;  %v7372_v3 = vpop.f32.mrb[164].mxu1  ;;  %v10604_v49 = vld [vmem:[%s12792_s28 + $0x240] sm:$0xff]   ;;  %v10609_v0 = vld [vmem:[%s12792_s28 + $0x2c8] sm:$0xff]   ;;  %v10615_v19 = vld [vmem:[%s12792_s28 + $0x290] sm:$0xff]  }
0x5325   :  { %v7330_v15 = vadd.f32 %v7329_v55, %v6842_v27  ;;  %v7373_v42 = vadd.f32 %v7372_v3, %v6850_v40  ;;  %v7331_v4 = vpop.f32.mrb[165].mxu0  ;;  %v7374_v58 = vpop.f32.mrb[165].mxu1  ;;  %9819 = vmatprep.subr.bf16.mxu0 %v10588_v14  ;;  %9841 = vmatprep.subr.bf16.mxu1 %v10589_v51  ;;  %v10605_v36 = vld [vmem:[%s12792_s28 + $0x2c0] sm:$0xff]   ;;  %v10610_v48 = vld [vmem:[%s12792_s28 + $0x208] sm:$0xff]   ;;  %v10612_v51 = vld [vmem:[%s12792_s28 + $0x250] sm:$0xff]  }
0x5326   :  { %v7332_v61 = vadd.f32 %v7331_v4, %v6846_v62  ;;  %v7375_v17 = vadd.f32 %v7374_v58, %v6854_v13  ;;  %v7333_v9 = vpop.f32.mrb[166].mxu0  ;;  %v7376_v6 = vpop.f32.mrb[166].mxu1  ;;  %v10611_v14 = vld [vmem:[%s12792_s28 + $0x288] sm:$0xff]   ;;  %v10616_v50 = vld [vmem:[%s12792_s28 + $0x258] sm:$0xff]   ;;  %v10621_v55 = vld [vmem:[%s12792_s28 + $0x2e0] sm:$0xff]  }
0x5327   :  { %v7334_v57 = vadd.f32 %v7333_v9, %v6842_v27  ;;  %v7377_v21 = vadd.f32 %v7376_v6, %v6850_v40  ;;  %v7335_v10 = vpop.f32.mrb[167].mxu0  ;;  %v7378_v8 = vpop.f32.mrb[167].mxu1  ;;  %v7393_v56 = vmax.f32 %v7330_v15, 0.0  ;;  %v7395_v7 = vmax.f32 %v7373_v42, 0.0  ;;  %v10600_v40 = vld [vmem:[%s12792_s28 + $0x178] sm:$0xff]   ;;  %v10622_v3 = vld [vmem:[%s12792_s28 + $0x220] sm:$0xff]  }
0x5328   :  { %v7336_v16 = vadd.f32 %v7335_v10, %v6846_v62  ;;  %v7379_v46 = vadd.f32 %v7378_v8, %v6854_v13  ;;  %9820 = vmatpush3.bf16.msra.mxu0 %v10590_v39  ;;  %9842 = vmatpush3.bf16.msra.mxu1 %v10591_v53  ;;  %v7394_v31 = vmax.f32 %v7332_v61, 0.0  ;;  %v7396_v33 = vmax.f32 %v7375_v17, 0.0  ;;  %v10601_v62 = vld [vmem:[%s12792_s28 + $0x1f8] sm:$0xff]   ;;  %v10606_v13 = vld [vmem:[%s12792_s28 + $0x200] sm:$0xff]   ;;  %v10624_v53 = vld [vmem:[%s12792_s28 + $0x268] sm:$0xff]  }
0x5329   :  { %v7409_v20 = vmax.f32 %v7334_v57, 0.0  ;;  %v7411_v24 = vmax.f32 %v7377_v21, 0.0  ;;  %9821 = vmatprep.subr.bf16.mxu0 %v10592_v43  ;;  %9843 = vmatprep.subr.bf16.mxu1 %v10593_v60  ;;  %v10617_v2 = vld [vmem:[%s12792_s28 + $0x2d8] sm:$0xff]   ;;  %v10623_v39 = vld [vmem:[%s12792_s28 + $0x2a0] sm:$0xff]   ;;  %v10625_v15 = vld [vmem:[%s12792_s28 + $0x2e8] sm:$0xff]  }
0x532a   :  { %v7410_v41 = vmax.f32 %v7336_v16, 0.0  ;;  %v7412_v22 = vmax.f32 %v7379_v46, 0.0  ;;  %v10618_v47 = vld [vmem:[%s12792_s28 + $0x218] sm:$0xff]   ;;  %v10626_v42 = vld [vmem:[%s12792_s28 + $0x228] sm:$0xff]   ;;  %v10628_v58 = vld [vmem:[%s12792_s28 + $0x270] sm:$0xff]  }
0x532b   :  { %v12637_v29 = vpack.c.bf16 %v7409_v20, %v7393_v56  ;;  %v12639_v27 = vpack.c.bf16 %v7411_v24, %v7395_v7  ;;  %v10627_v4 = vld [vmem:[%s12792_s28 + $0x2a8] sm:$0xff]   ;;  %v10629_v43 = vld [vmem:[%s12792_s28 + $0x2f0] sm:$0xff]   ;;  %v10632_v17 = vld [vmem:[%s12792_s28 + $0x278] sm:$0xff]  }
0x532c   :  { %v12641_v45 = vpack.c.bf16 %v7410_v41, %v7394_v31  ;;  %v12643_v30 = vpack.c.bf16 %v7412_v22, %v7396_v33  ;;  %9822 = vmatpush3.bf16.msra.mxu0 %v10594_v34  ;;  %9844 = vmatpush3.bf16.msra.mxu1 %v10595_v18  ;;  %v10630_v60 = vld [vmem:[%s12792_s28 + $0x230] sm:$0xff]   ;;  %v10633_v9 = vld [vmem:[%s12792_s28 + $0x2f8] sm:$0xff]   ;;  %v10636_v21 = vld [vmem:[%s12792_s28 + $0x340] sm:$0xff]  }
0x532d   :  { %9823 = vmatprep.subr.bf16.mxu0 %v10596_v23  ;;  %9845 = vmatprep.subr.bf16.mxu1 %v10597_v25  ;;  %v10631_v61 = vld [vmem:[%s12792_s28 + $0x2b0] sm:$0xff]   ;;  %v10634_v6 = vld [vmem:[%s12792_s28 + $0x238] sm:$0xff]   ;;  %v10637_v10 = vld [vmem:[%s12792_s28 + $0x3c0] sm:$0xff]  }
0x532e   :  { %v10635_v57 = vld [vmem:[%s12792_s28 + $0x2b8] sm:$0xff]   ;;  %v10638_v8 = vld [vmem:[%s12792_s28 + $0x300] sm:$0xff]   ;;  %v10640_v46 = vld [vmem:[%s12792_s28 + $0x348] sm:$0xff]  }
0x532f   :  { %v10639_v16 = vld [vmem:[%s12792_s28 + $0x380] sm:$0xff]   ;;  %v10641_v34 = vld [vmem:[%s12792_s28 + $0x3c8] sm:$0xff]   ;;  %v10644_v7 = vld [vmem:[%s12792_s28 + $0x350] sm:$0xff]  }
0x5330   :  { %9824 = vmatpush3.bf16.msra.mxu0 %v10598_v35  ;;  %9846 = vmatpush3.bf16.msra.mxu1 %v10599_v5  ;;  %v10642_v18 = vld [vmem:[%s12792_s28 + $0x308] sm:$0xff]   ;;  %v10647_v20 = vld [vmem:[%s12792_s28 + $0x390] sm:$0xff]   ;;  %v10648_v24 = vld [vmem:[%s12792_s28 + $0x358] sm:$0xff]  }
0x5331   :  { %9825 = vmatprep.subr.bf16.mxu0 %v10600_v40  ;;  %9847 = vmatprep.subr.bf16.mxu1 %v10601_v62  ;;  %v10643_v56 = vld [vmem:[%s12792_s28 + $0x388] sm:$0xff]   ;;  %v10649_v23 = vld [vmem:[%s12792_s28 + $0x3d8] sm:$0xff]   ;;  %v10652_v33 = vld [vmem:[%s12792_s28 + $0x360] sm:$0xff]  }
0x5332   :  { %v10650_v25 = vld [vmem:[%s12792_s28 + $0x318] sm:$0xff]   ;;  %v10653_v41 = vld [vmem:[%s12792_s28 + $0x3e0] sm:$0xff]   ;;  %v10657_v35 = vld [vmem:[%s12792_s28 + $0x3e8] sm:$0xff]  }
0x5333   :  { %v10651_v31 = vld [vmem:[%s12792_s28 + $0x398] sm:$0xff]   ;;  %v10654_v22 = vld [vmem:[%s12792_s28 + $0x320] sm:$0xff]   ;;  %v10658_v5 = vld [vmem:[%s12792_s28 + $0x328] sm:$0xff]  }
0x5334   :  { %9826 = vmatpush3.bf16.msra.mxu0 %v10602_v11  ;;  %9848 = vmatpush3.bf16.msra.mxu1 %v10603_v44  ;;  %v10659_v40 = vld [vmem:[%s12792_s28 + $0x3a8] sm:$0xff]   ;;  %v10660_v62 = vld [vmem:[%s12792_s28 + $0x370] sm:$0xff]  }
0x5335   :  { %9855 = vmatprep.subr.bf16.mxu0 %v10604_v49  ;;  %9877 = vmatprep.subr.bf16.mxu1 %v10605_v36  ;;  %v10661_v11 = vld [vmem:[%s12792_s28 + $0x3f0] sm:$0xff]   ;;  %v10664_v36 = vld [vmem:[%s12792_s28 + $0x378] sm:$0xff]  }
0x5336   :  { %v10662_v44 = vld [vmem:[%s12792_s28 + $0x330] sm:$0xff]  }
0x5337   :  { %8575 = vmatmul.mubr.bf16.vlgmr.msra.gmra.mrb[172].mxu0 %v12601_v59  ;;  %8616 = vmatmul.mubr.bf16.vlgmr.msra.gmra.mrb[172].mxu1 %v12603_v37  ;;  %v10613_v59 = vld [vmem:[%s12792_s28 + $0x2d0] sm:$0xff]  }
0x5338   :  { %9856 = vmatpush3.bf16.msra.mxu0 %v10606_v13  ;;  %8656 = vmatprep.mubr.bf16.mxu0 %v12625_v32  ;;  %v10614_v37 = vld [vmem:[%s12792_s28 + $0x210] sm:$0xff]   ;;  %v10619_v32 = vld [vmem:[%s12792_s28 + $0x298] sm:$0xff]  }
0x5339   :  { %9878 = vmatpush3.bf16.msra.mxu1 %v10607_v12  ;;  %8697 = vmatprep.mubr.bf16.mxu1 %v12627_v28  ;;  %v10620_v28 = vld [vmem:[%s12792_s28 + $0x260] sm:$0xff]   ;;  %v10663_v49 = vld [vmem:[%s12792_s28 + $0x3b0] sm:$0xff]   ;;  %v10665_v13 = vld [vmem:[%s12792_s28 + $0x3f8] sm:$0xff]  }
0x533a   :  { %9857 = vmatprep.subr.bf16.mxu0 %v10608_v38  ;;  %9879 = vmatprep.subr.bf16.mxu1 %v10609_v0  ;;  %v10666_v12 = vld [vmem:[%s12792_s28 + $0x338] sm:$0xff]  }
0x533b   :  { %v10667_v38 = vld [vmem:[%s12792_s28 + $0x3b8] sm:$0xff]  }
0x533c   :  { %9858 = vmatpush3.bf16.msra.mxu0 %v10610_v48 }
0x533d   :  { %9880 = vmatpush3.bf16.msra.mxu1 %v10611_v14  ;;  %9859 = vmatprep.subr.bf16.mxu0 %v10612_v51  ;;  %v9316_v14 = vld [vmem:[%s12794_s2] ss:$0 sm:$0xff] }
0x533e   :  { %9881 = vmatprep.subr.bf16.mxu1 %v10613_v59 }
0x5340   :  { %9860 = vmatpush3.bf16.msra.mxu0 %v10614_v37 }
0x5341   :  { %9882 = vmatpush3.bf16.msra.mxu1 %v10615_v19  ;;  %9861 = vmatprep.subr.bf16.mxu0 %v10616_v50 }
0x5342   :  { %9883 = vmatprep.subr.bf16.mxu1 %v10617_v2 }
0x5344   :  { %9862 = vmatpush3.bf16.msra.mxu0 %v10618_v47 }
0x5345   :  { %9884 = vmatpush3.bf16.msra.mxu1 %v10619_v32  ;;  %9863 = vmatprep.subr.bf16.mxu0 %v10620_v28 }
0x5346   :  { %9885 = vmatprep.subr.bf16.mxu1 %v10621_v55 }
0x5348   :  { %9864 = vmatpush3.bf16.msra.mxu0 %v10622_v3 }
0x5349   :  { %9886 = vmatpush3.bf16.msra.mxu1 %v10623_v39  ;;  %9865 = vmatprep.subr.bf16.mxu0 %v10624_v53 }
0x534a   :  { %9887 = vmatprep.subr.bf16.mxu1 %v10625_v15 }
0x534c   :  { %9866 = vmatpush3.bf16.msra.mxu0 %v10626_v42 }
0x534d   :  { %9888 = vmatpush3.bf16.msra.mxu1 %v10627_v4  ;;  %9867 = vmatprep.subr.bf16.mxu0 %v10628_v58 }
0x534e   :  { %9889 = vmatprep.subr.bf16.mxu1 %v10629_v43 }
0x5350   :  { %9868 = vmatpush3.bf16.msra.mxu0 %v10630_v60 }
0x5351   :  { %9890 = vmatpush3.bf16.msra.mxu1 %v10631_v61  ;;  %9869 = vmatprep.subr.bf16.mxu0 %v10632_v17 }
0x5352   :  { %9891 = vmatprep.subr.bf16.mxu1 %v10633_v9 }
0x5354   :  { %9870 = vmatpush3.bf16.msra.mxu0 %v10634_v6 }
0x5355   :  { %9892 = vmatpush3.bf16.msra.mxu1 %v10635_v57  ;;  %9899 = vmatprep.subr.bf16.mxu0 %v10636_v21 }
0x5356   :  { %9921 = vmatprep.subr.bf16.mxu1 %v10637_v10 }
0x5357   :  { %8657 = vmatmul.mubr.bf16.vlgmr.msra.gmra.mrb[176].mxu0 %v12621_v52  ;;  %v10645_v52 = vld [vmem:[%s12792_s28 + $0x3d0] sm:$0xff]  }
0x5358   :  { %8698 = vmatmul.mubr.bf16.vlgmr.msra.gmra.mrb[176].mxu1 %v12623_v54  ;;  %9900 = vmatpush3.bf16.msra.mxu0 %v10638_v8  ;;  %v10646_v54 = vld [vmem:[%s12792_s28 + $0x310] sm:$0xff]  }
0x5359   :  { %8738 = vmatprep.mubr.bf16.mxu0 %v12641_v45  ;;  %9922 = vmatpush3.bf16.msra.mxu1 %v10639_v16  ;;  %v10655_v45 = vld [vmem:[%s12792_s28 + $0x3a0] sm:$0xff]  }
0x535a   :  { %8779 = vmatprep.mubr.bf16.mxu1 %v12643_v30  ;;  %9901 = vmatprep.subr.bf16.mxu0 %v10640_v46  ;;  %v10656_v30 = vld [vmem:[%s12792_s28 + $0x368] sm:$0xff]  }
0x535b   :  { %9923 = vmatprep.subr.bf16.mxu1 %v10641_v34 }
0x535c   :  { %9902 = vmatpush3.bf16.msra.mxu0 %v10642_v18 }
0x535d   :  { %9924 = vmatpush3.bf16.msra.mxu1 %v10643_v56  ;;  %9903 = vmatprep.subr.bf16.mxu0 %v10644_v7 }
0x535e   :  { %9925 = vmatprep.subr.bf16.mxu1 %v10645_v52 }
0x5360   :  { %9904 = vmatpush3.bf16.msra.mxu0 %v10646_v54 }
0x5361   :  { %9926 = vmatpush3.bf16.msra.mxu1 %v10647_v20  ;;  %9905 = vmatprep.subr.bf16.mxu0 %v10648_v24 }
0x5362   :  { %9927 = vmatprep.subr.bf16.mxu1 %v10649_v23 }
0x5364   :  { %9906 = vmatpush3.bf16.msra.mxu0 %v10650_v25 }
0x5365   :  { %9928 = vmatpush3.bf16.msra.mxu1 %v10651_v31  ;;  %9907 = vmatprep.subr.bf16.mxu0 %v10652_v33 }
0x5366   :  { %9929 = vmatprep.subr.bf16.mxu1 %v10653_v41 }
0x5368   :  { %9908 = vmatpush3.bf16.msra.mxu0 %v10654_v22 }
0x5369   :  { %9930 = vmatpush3.bf16.msra.mxu1 %v10655_v45  ;;  %9909 = vmatprep.subr.bf16.mxu0 %v10656_v30 }
0x536a   :  { %9931 = vmatprep.subr.bf16.mxu1 %v10657_v35 }
0x536c   :  { %9910 = vmatpush3.bf16.msra.mxu0 %v10658_v5 }
0x536d   :  { %9932 = vmatpush3.bf16.msra.mxu1 %v10659_v40  ;;  %9911 = vmatprep.subr.bf16.mxu0 %v10660_v62 }
0x536e   :  { %9933 = vmatprep.subr.bf16.mxu1 %v10661_v11 }
0x5370   :  { %9912 = vmatpush3.bf16.msra.mxu0 %v10662_v44 }
0x5371   :  { %9934 = vmatpush3.bf16.msra.mxu1 %v10663_v49  ;;  %9913 = vmatprep.subr.bf16.mxu0 %v10664_v36 }
0x5372   :  { %9935 = vmatprep.subr.bf16.mxu1 %v10665_v13 }
0x5374   :  { %9914 = vmatpush3.bf16.msra.mxu0 %v10666_v12 }
0x5375   :  { %9936 = vmatpush3.bf16.msra.mxu1 %v10667_v38  ;;  %10344 = vmatprep.subr.bf16.mxu0 %v11069_v1 }
0x5377   :  { %8739 = vmatmul.mubr.bf16.vlgmr.msra.gmra.mrb[180].mxu0 %v12637_v29 }
0x5378   :  { %8780 = vmatmul.mubr.bf16.vlgmr.msra.gmra.mrb[180].mxu1 %v12639_v27  ;;  %10348 = vmatprep.mubr.msk.bf16.mxu0 %vm11070_vm0, %v11069_v1 }
0x53ea   :  { %v9783_v0 = vpop.f32.mrb[168].mxu0  ;;  %v9805_v48 = vpop.f32.mrb[168].mxu1 }
0x53eb   :  { %v9784_v51 = vpop.f32.mrb[169].mxu0  ;;  %v9806_v59 = vpop.f32.mrb[169].mxu1 }
0x53ec   :  { %v9785_v37 = vadd.f32 %v9784_v51, %v9783_v0  ;;  %v9807_v19 = vadd.f32 %v9806_v59, %v9805_v48  ;;  %v9786_v50 = vpop.f32.mrb[170].mxu0  ;;  %v9808_v2 = vpop.f32.mrb[170].mxu1 }
0x53ed   :  { %v9787_v47 = vpop.f32.mrb[171].mxu0  ;;  %v9809_v32 = vpop.f32.mrb[171].mxu1 }
0x53ee   :  { %v8495_v28 = vadd.f32 %v9785_v37, %v9316_v14  ;;  %v9788_v55 = vadd.f32 %v9787_v47, %v9786_v50  ;;  %v9810_v3 = vadd.f32 %v9809_v32, %v9808_v2 }
0x53f0   :  { %v8536_v29 = vadd.f32 %v9807_v19, %v8495_v28  ;;  %v8498_v39 = vadd.f32 %v9788_v55, %v9316_v14 }
0x53f2   :  { %v8539_v27 = vadd.f32 %v9810_v3, %v8498_v39 }
0x540a   :  { %v9827_v53 = vpop.f32.mrb[172].mxu0  ;;  %v9849_v15 = vpop.f32.mrb[172].mxu1 }
0x540b   :  { %v9828_v42 = vpop.f32.mrb[173].mxu0  ;;  %v9850_v4 = vpop.f32.mrb[173].mxu1 }
0x540c   :  { %v9829_v58 = vadd.f32 %v9828_v42, %v9827_v53  ;;  %v9851_v43 = vadd.f32 %v9850_v4, %v9849_v15  ;;  %v9830_v60 = vpop.f32.mrb[174].mxu0  ;;  %v9852_v61 = vpop.f32.mrb[174].mxu1 }
0x540d   :  { %v9831_v17 = vpop.f32.mrb[175].mxu0  ;;  %v9853_v9 = vpop.f32.mrb[175].mxu1 }
0x540e   :  { %v8577_v6 = vadd.f32 %v9829_v58, %v8536_v29  ;;  %v9832_v57 = vadd.f32 %v9831_v17, %v9830_v60  ;;  %v9854_v21 = vadd.f32 %v9853_v9, %v9852_v61  ;;  %v9445_v60 = vld [vmem:[%s12795_s0] ss:$0 sm:$0xff]  ;;  %v10669_v17 = vld [vmem:[%s11248_s20 + $0x8] sm:$0xff]  }
0x540f   :  { %v10668_v61 = vld [vmem:[%s11248_s20] sm:$0xff]  }
0x5410   :  { %v8618_v10 = vadd.f32 %v9851_v43, %v8577_v6  ;;  %v8580_v8 = vadd.f32 %v9832_v57, %v8539_v27  ;;  %v9446_v43 = vld [vmem:[%s11243_s12] ss:$0 sm:$0xff]  ;;  %10345 = vmatpush3.bf16.msra.mxu0 %v10668_v61  ;;  %s11084_s12 = smov [#allocation2]  }
0x5411   :  { %10346 = vmatprep.subr.bf16.mxu0 %v11069_v1  ;;  %s8953_s20 = sshll.u32 %s11084_s12, 4  ;;  %s8954_s20 = int_to_ptr.vmem [resolvable:$true] %s8953_s20 }
0x5412   :  { %v8621_v16 = vadd.f32 %v9854_v21, %v8580_v8  ;;  %p11017_p1 = scmp.lt.s32.totalorder %s8954_s20, %s8954_s20 }
0x5414   :  { %10347 = vmatpush3.bf16.msra.mxu0 %v10669_v17 }
0x542a   :  { %v9871_v46 = vpop.f32.mrb[176].mxu0 }
0x542b   :  { %v9893_v34 = vpop.f32.mrb[176].mxu1  ;;  %v9872_v18 = vpop.f32.mrb[177].mxu0 }
0x542c   :  { %v9873_v56 = vadd.f32 %v9872_v18, %v9871_v46  ;;  %v9894_v7 = vpop.f32.mrb[177].mxu1  ;;  %v9874_v52 = vpop.f32.mrb[178].mxu0 }
0x542d   :  { %v9895_v54 = vadd.f32 %v9894_v7, %v9893_v34  ;;  %v9896_v20 = vpop.f32.mrb[178].mxu1  ;;  %v9875_v24 = vpop.f32.mrb[179].mxu0 }
0x542e   :  { %v8659_v23 = vadd.f32 %v9873_v56, %v8618_v10  ;;  %v9876_v25 = vadd.f32 %v9875_v24, %v9874_v52  ;;  %v9897_v31 = vpop.f32.mrb[179].mxu1 }
0x542f   :  { %v9898_v33 = vadd.f32 %v9897_v31, %v9896_v20 }
0x5430   :  { %v8700_v41 = vadd.f32 %v9895_v54, %v8659_v23  ;;  %v8662_v22 = vadd.f32 %v9876_v25, %v8621_v16 }
0x5432   :  { %v8703_v45 = vadd.f32 %v9898_v33, %v8662_v22 }
0x544a   :  { %v9915_v30 = vpop.f32.mrb[180].mxu0 }
0x544b   :  { %v9937_v35 = vpop.f32.mrb[180].mxu1  ;;  %v9916_v5 = vpop.f32.mrb[181].mxu0 }
0x544c   :  { %v9917_v40 = vadd.f32 %v9916_v5, %v9915_v30  ;;  %v9938_v62 = vpop.f32.mrb[181].mxu1  ;;  %v9918_v11 = vpop.f32.mrb[182].mxu0 }
0x544d   :  { %v9939_v44 = vadd.f32 %v9938_v62, %v9937_v35  ;;  %v9940_v49 = vpop.f32.mrb[182].mxu1  ;;  %v9919_v36 = vpop.f32.mrb[183].mxu0  ;;  %v9447_v35 = vld [vmem:[%s11253_s27] ss:$0 sm:$0xff] }
0x544e   :  { %v8741_v13 = vadd.f32 %v9917_v40, %v8700_v41  ;;  %v9920_v12 = vadd.f32 %v9919_v36, %v9918_v11  ;;  %v9941_v38 = vpop.f32.mrb[183].mxu1 }
0x544f   :  { %v9942_v0 = vadd.f32 %v9941_v38, %v9940_v49 }
0x5450   :  { %v8782_v48 = vadd.f32 %v9939_v44, %v8741_v13  ;;  %v8744_v14 = vadd.f32 %v9920_v12, %v8703_v45 }
0x5452   :  { %v8785_v51 = vadd.f32 %v9942_v0, %v8744_v14  ;;  %8790 = vrot.lane.b32.xlu1 %v8782_v48, %s11074_s9 }
0x5454   :  { %8792 = vrot.lane.b32.xlu0 %v8785_v51, %s11074_s9 }
0x54c4   :  { %v8791_v59 = vpop.permute.xlu1 %8790 }
0x54c5   :  { %v8796_v37 = vadd.f32 %v8791_v59, %v12488_v26 }
0x54c6   :  { %v8793_v19 = vpop.permute.xlu0 %8792 }
0x54c7   :  { %v8797_v50 = vadd.f32 %v8793_v19, %v12490_v63  ;;  %8802 = vrot.lane.b32.xlu1 %v8796_v37, %s11073_s5 }
0x54c9   :  { %8804 = vrot.lane.b32.xlu0 %v8797_v50, %s11073_s5 }
0x5539   :  { %v8803_v2 = vpop.permute.xlu1 %8802 }
0x553a   :  { %v8808_v47 = vsel %vm219_vm3, %v8803_v2, 0.0 }
0x553b   :  { %v8805_v32 = vpop.permute.xlu0 %8804  ;;  %8809 = vadd.xlane.f32.xlu1 %v8808_v47 }
0x553c   :  { %v8811_v28 = vsel %vm219_vm3, %v8805_v32, 0.0 }
0x553d   :  { %8812 = vadd.xlane.f32.xlu0 %v8811_v28 }
0x55c8   :  { %v8810_v55 = vpop.xlane.xlu1 %8809 }
0x55c9   :  { %v8814_v3 = vmul.f32 0.03125, %v8810_v55 }
0x55ca   :  { %v8813_v29 = vpop.xlane.xlu0 %8812 }
0x55cb   :  { %v8816_v26 = vsub.f32 %v8796_v37, %v8814_v3  ;;  %v8815_v39 = vmul.f32 0.03125, %v8813_v29 }
0x55cd   :  { %v8818_v63 = vmul.f32 %v8816_v26, %v8816_v26  ;;  %v8817_v27 = vsub.f32 %v8797_v50, %v8815_v39 }
0x55cf   :  { %v8819_v53 = vmul.f32 %v8817_v27, %v8817_v27  ;;  %8822 = vrot.lane.b32.xlu0 %v8818_v63, %s11073_s5 }
0x55d1   :  { %8824 = vrot.lane.b32.xlu1 %v8819_v53, %s11073_s5 }
0x5641   :  { %v8823_v15 = vpop.permute.xlu0 %8822 }
0x5642   :  { %v8828_v42 = vsel %vm219_vm3, %v8823_v15, 0.0 }
0x5643   :  { %8829 = vadd.xlane.f32.xlu1 %v8828_v42  ;;  %v8825_v4 = vpop.permute.xlu1 %8824 }
0x5644   :  { %v8831_v58 = vsel %vm219_vm3, %v8825_v4, 0.0 }
0x5645   :  { %8832 = vadd.xlane.f32.xlu0 %v8831_v58 }
0x5654   :  { %8857 = vrot.lane.b32.xlu1 %v9446_v43, %s11074_s9 }
0x565b   :  { %8847 = vrot.lane.b32.xlu0 %v9445_v60, %s11074_s9 }
0x56d0   :  { %v8830_v9 = vpop.xlane.xlu1 %8829 }
0x56d1   :  { %v8834_v6 = vmul.f32 0.03125, %v8830_v9 }
0x56d2   :  { %v8833_v57 = vpop.xlane.xlu0 %8832 }
0x56d3   :  { %v8836_v21 = vadd.f32 1e-05, %v8834_v6  ;;  %v8835_v10 = vmul.f32 0.03125, %v8833_v57 }
0x56d4   :  { %v8858_v56 = vpop.permute.xlu1 %8857 }
0x56d5   :  { %11002 = vrsqrt.f32 %v8836_v21  ;;  %v8837_v8 = vadd.f32 1e-05, %v8835_v10 }
0x56d6   :  { %v8848_v46 = vpop.permute.xlu0 %8847 }
0x56d7   :  { %11004 = vrsqrt.f32 %v8837_v8 }
0x56df   :  { %v11003_v16 = vpop.eup %11002 }
0x56e0   :  { %v8840_v34 = vmul.f32 %v11003_v16, %v8816_v26 }
0x56e1   :  { %v11005_v18 = vpop.eup %11004 }
0x56e2   :  { %v8841_v7 = vmul.f32 %v11005_v18, %v8817_v27  ;;  %v8850_v52 = vmul.f32 %v8848_v46, %v8840_v34 }
0x56e4   :  { %v8851_v54 = vmul.f32 %v8848_v46, %v8841_v7  ;;  %v8860_v20 = vadd.f32 %v8858_v56, %v8850_v52 }
0x56e6   :  { %v8861_v1 = vadd.f32 %v8858_v56, %v8851_v54  ;;  %v8866_v24 = vpack.c.bf16 %v8860_v20, %v8860_v20 }
0x56e8   :  { %v8867_v23 = vpack.c.bf16 %v8861_v1, %v8861_v1  ;;  %v8877_v25 = vunpack.c.l.b16 %v8866_v24 }
0x56ea   :  { %v8878_v31 = vunpack.c.l.b16 %v8867_v23  ;;  %v8879_v33 = vrot.slane %v8877_v25, 7 }
0x56ec   :  { %v8880_v41 = vrot.slane %v8878_v31, 6 }
0x56ee   :  { %v8881_v22 = vsel %vm324_vm2, %v8880_v41, %v8879_v33 }
0x56ef   :  { %v8882_v45 = vpack.c.b16 %v8881_v22, %v8881_v22 }
0x56f1   :  { %8883 = vrot.lane.b32.xlu1 %v8882_v45, %s11073_s5  ;;  %s11012_s5 = scalar_lea.vmem %s8954_s20, 32 }
0x56f2   :  { %p11013_p0 = scmp.ne.s32.totalorder %s8954_s20, %s11012_s5  ;;  %p11018_p2 = scmp.lt.s32.totalorder %s11012_s5, %s11012_s5 }
0x56f4   :  { %p11019_p3 = por %p11018_p2, %p11017_p1 }
0x56f6   :  { %p11020_p4 = pnand %p11019_p3, %p11013_p0 }
0x5763   :  { %v8884_v30 = vpop.permute.xlu1 %8883 }
0x5764   :  { %10349 = vmatmul.mubr.msk.bf16.vlgmr.msra.gmra.mrb[184].mxu0 %vm219_vm3, %v8884_v30 }
0x5837   :  { %v8934_v5 = vpop.f32.mrb[184].mxu0 }
0x5838   :  { %v8935_v40 = vadd.f32 %v9447_v35, %v8934_v5  ;;  %v10350_v62 = vpop.f32.mrb[185].mxu0 }
0x5839   :  { %v8937_v11 = vpop.f32.mrb[186].mxu0 }
0x583a   :  { %v9451_v44 = vmul.f32 -1.442695, %v8935_v40  ;;  %v10351_v49 = vpop.f32.mrb[187].mxu0 }
0x583c   :  { %11006 = vpow2.f32 %v9451_v44 }
0x5846   :  { %v11007_v36 = vpop.eup %11006 }
0x5847   :  { %v8943_v13 = vadd.f32 1.0, %v11007_v36 }
0x5849   :  { %11008 = vrcp.f32 %v8943_v13 }
0x5853   :  { %v11009_v12 = vpop.eup %11008 }
0x5854   :  { %8946 = vst [vmem:[#allocation2] sm:$0x3] %v11009_v12 }
0x5855   :  { %11023 = shalt.err (!%p11020_p4)
}
0x5856   :  { %s11024_s27 = scalar_lea.hbm %s11258_s4, 32 }
0x5857   :  { %p11025_p5 = scmp.ne.s32.totalorder %s11258_s4, %s11024_s27  ;;  %p11028_p6 = scmp.lt.u32.totalorder %s11024_s27, %s11258_s4 }
0x5859   :  { %p11030_p7 = pnand %p11028_p6, %p11025_p5 }
0x585b   :  { %11033 = shalt.err (!%p11030_p7)
}
0x585c   :  { %8956 = dma.vmem_to_hbm [thread:$0]  %s8954_s20, 32, %s11258_s4, [#allocation3]  }
0x585d   :  { %11034 = dma.done.wait [#allocation3], 32  }
0x585e   :  { %11035 = vsyncadd [#allocation3], 4294967264 }
0x585f   :  { %8960 = vsyncpa [#allocation3], 1 }

</bundles_post_ra>
